<compile_context>
chip_gen: v7x
topology: tpu7x:2x2x1
jax: 0.10.0
libtpu: 0.0.40
codegen_flags: <defaults>
</compile_context>

<pallas_src>
import jax
import jax.numpy as jnp
from jax.experimental import pallas as pl
from jax.experimental.pallas import tpu as pltpu


DEC_TN = 512          # decoder vocab tile (lane-dense); vocab padded to this
DEC_TM = 256          # decoder row tile
MAX_TIME_CHUNK = 8    # timesteps per hoisted input-projection chunk


def _round_up(x, m):
    return ((x + m - 1) // m) * m


def _pick_tile(dim, max_tile, align):
    """Largest multiple of `align` <= min(dim, max_tile) that divides dim."""
    assert dim >= align and dim % align == 0, (dim, align)
    t = min(dim, max_tile)
    t = max((t // align) * align, align)
    while dim % t != 0:
        t -= align
    return t


# ----------------------------------------------------------------------------
# Tiled linear kernel: o = x @ w + b   (used for the decoder).
# bf16 operands, f32 accumulate, f32 lane-dense output tiles.
# ----------------------------------------------------------------------------
def _linear_kernel(x_ref, w_ref, b_ref, o_ref):
    o_ref[...] = (jnp.dot(x_ref[...].astype(jnp.bfloat16), w_ref[...],
                          preferred_element_type=jnp.float32)
                  + b_ref[...])


def linear(x, w, b, *, max_tm=DEC_TM, max_tn=DEC_TN):
    m, k = x.shape
    k2, n = w.shape
    assert k == k2 and b.shape == (1, n)
    tm = min(max_tm, _round_up(m, 8))
    m_p = _round_up(m, tm)                    # pad M up -> never degenerate tm
    if m_p != m:
        x = jnp.pad(x, ((0, m_p - m), (0, 0)))
    tn = _pick_tile(n, max_tn, 128)
    vmem_limit = 2 * (tm * k * x.dtype.itemsize + k * tn * w.dtype.itemsize
                      + tn * 4 + tm * tn * 4) + (4 << 20)
    out = pl.pallas_call(
        _linear_kernel,
        out_shape=jax.ShapeDtypeStruct((m_p, n), jnp.float32),
        grid=(m_p // tm, n // tn),
        in_specs=[
            pl.BlockSpec((tm, k), lambda i, j: (i, 0)),
            pl.BlockSpec((k, tn), lambda i, j: (0, j)),
            pl.BlockSpec((1, tn), lambda i, j: (0, j)),
        ],
        out_specs=pl.BlockSpec((tm, tn), lambda i, j: (i, j)),
        compiler_params=pltpu.CompilerParams(
            dimension_semantics=("parallel", "parallel"),
            vmem_limit_bytes=int(max(vmem_limit, 32 << 20))),
    )(x, w, b)
    return out[:m] if m_p != m else out


# ----------------------------------------------------------------------------
# Fused multi-layer LSTM kernel (single pallas_call owns the whole time loop).
#   x_ref      : (seq, bt, ninp_p)  bf16 embedded inputs (batch block)
#   w_ih0_ref  : (ninp_p, 4*nhid_p) bf16
#   b0_ref     : (1, 4*nhid_p)      f32 combined b_ih+b_hh, layer 0
#   w_hh_ref   : (nlayers, nhid_p, 4*nhid_p)            bf16
#   w_ih_r_ref : (max(nlayers-1,1), nhid_p, 4*nhid_p)   bf16, layers >= 1
#   b_r_ref    : (max(nlayers-1,1), 1, 4*nhid_p)        f32,  layers >= 1
#   h0/c0      : (nlayers, bt, nhid_p) f32
# Outputs: y (seq, bt, nhid_p) last-layer h, hT/cT (nlayers, bt, nhid_p).
# xpbuf scratch: (chunk, bt, 4*nhid_p) f32 per-chunk hoisted input projection.
# Gate order: i, f, g, o (PyTorch).
# ----------------------------------------------------------------------------
def _lstm_stack_kernel(x_ref, w_ih0_ref, b0_ref, w_hh_ref, w_ih_r_ref, b_r_ref,
                       h0_ref, c0_ref, y_ref, hT_ref, cT_ref, xpbuf):
    nlayers = w_hh_ref.shape[0]
    seq, bt, _ = x_ref.shape
    nhid = y_ref.shape[2]
    chunk, _, gdim = xpbuf.shape
    num_chunks = seq // chunk

    for layer in range(nlayers):                      # static unroll (small)

        def chunk_body(ci, carry, layer=layer):
            h, c = carry
            t0 = pl.multiple_of(ci * chunk, chunk)

            # Hoisted input projection for this chunk of timesteps: ONE matmul
            # over `chunk` steps (bias added here, outside the recurrence).
            if layer == 0:
                src = x_ref[pl.ds(t0, chunk), :, :]            # already bf16
                w_in = w_ih0_ref[...]
                bias = b0_ref[...]
            else:
                # previous layer's output lives in y_ref (read before the
                # step loop below overwrites these rows)
                src = y_ref[pl.ds(t0, chunk), :, :].astype(jnp.bfloat16)
                w_in = w_ih_r_ref[layer - 1]
                bias = b_r_ref[layer - 1]
            xp = (jnp.dot(src.reshape(chunk * bt, -1), w_in,
                          preferred_element_type=jnp.float32) + bias)
            xpbuf[...] = xp.reshape(chunk, bt, gdim)

            def step(t, carry2, layer=layer):
                h, c = carry2
                hb = h.astype(jnp.bfloat16)

                # Per-gate matmuls straight off the stacked-weight ref: keeps
                # live vreg width to one gate and avoids materializing a full
                # W_hh[layer] VMEM copy.
                def gate(g):
                    lo = g * nhid
                    return (xpbuf[t, :, lo:lo + nhid]
                            + jnp.dot(hb, w_hh_ref[layer, :, lo:lo + nhid],
                                      preferred_element_type=jnp.float32))

                f_g = jax.nn.sigmoid(gate(1))
                c_new = f_g * c
                i_g = jax.nn.sigmoid(gate(0))
                c_new = c_new + i_g * jnp.tanh(gate(2))
                o_g = jax.nn.sigmoid(gate(3))
                h_new = o_g * jnp.tanh(c_new)
                y_ref[t0 + t] = h_new
                return h_new, c_new

            # fully unroll the short per-chunk time loop (LLO visibility)
            return jax.lax.fori_loop(0, chunk, step, (h, c), unroll=True)

        h_fin, c_fin = jax.lax.fori_loop(
            0, num_chunks, chunk_body, (h0_ref[layer], c0_ref[layer]))
        hT_ref[layer] = h_fin
        cT_ref[layer] = c_fin


def lstm_stack(x, w_ih0, b0, w_hh_all, w_ih_rest, b_rest, h0, c0,
               *, batch_block=None, max_chunk=MAX_TIME_CHUNK):
    seq, batch_p, ninp_p = x.shape
    nlayers, _, nhid_p = h0.shape
    gdim = w_hh_all.shape[2]

    # TODO(synk): on v7x pass batch_block=batch_p//2 so the "parallel" grid
    # axis splits the recurrence across both TensorCores.
    bt = batch_p if batch_block is None else batch_block
    assert batch_p % bt == 0 and bt % 8 == 0
    nb = batch_p // bt
    chunk = _pick_tile(seq, max_chunk, 1)             # divisor of seq

    def nbytes(a):
        return a.size * a.dtype.itemsize

    resident = (nbytes(x) + nbytes(w_ih0) + nbytes(b0) + nbytes(w_hh_all)
                + nbytes(w_ih_rest) + nbytes(b_rest) + nbytes(h0) + nbytes(c0)
                + seq * batch_p * nhid_p * 4            # y
                + 2 * nlayers * batch_p * nhid_p * 4)   # hT, cT
    scratch_bytes = chunk * bt * gdim * 4
    vmem_limit = int(max(min(2 * resident + scratch_bytes + (4 << 20),
                             127 << 20), 32 << 20))

    total = seq * batch_p
    cost = pl.CostEstimate(
        flops=2 * total * gdim * (ninp_p + (nlayers - 1) * nhid_p
                                  + nlayers * nhid_p),
        transcendentals=nlayers * total * 5 * nhid_p,
        bytes_accessed=resident)

    return pl.pallas_call(
        _lstm_stack_kernel,
        out_shape=(
            jax.ShapeDtypeStruct((seq, batch_p, nhid_p), jnp.float32),
            jax.ShapeDtypeStruct((nlayers, batch_p, nhid_p), jnp.float32),
            jax.ShapeDtypeStruct((nlayers, batch_p, nhid_p), jnp.float32),
        ),
        grid=(nb,),
        in_specs=[
            pl.BlockSpec((seq, bt, ninp_p), lambda b: (0, b, 0)),
            pl.BlockSpec(w_ih0.shape, lambda b: (0, 0)),
            pl.BlockSpec(b0.shape, lambda b: (0, 0)),
            pl.BlockSpec(w_hh_all.shape, lambda b: (0, 0, 0)),
            pl.BlockSpec(w_ih_rest.shape, lambda b: (0, 0, 0)),
            pl.BlockSpec(b_rest.shape, lambda b: (0, 0, 0)),
            pl.BlockSpec((nlayers, bt, nhid_p), lambda b: (0, b, 0)),
            pl.BlockSpec((nlayers, bt, nhid_p), lambda b: (0, b, 0)),
        ],
        out_specs=(
            pl.BlockSpec((seq, bt, nhid_p), lambda b: (0, b, 0)),
            pl.BlockSpec((nlayers, bt, nhid_p), lambda b: (0, b, 0)),
            pl.BlockSpec((nlayers, bt, nhid_p), lambda b: (0, b, 0)),
        ),
        scratch_shapes=[pltpu.VMEM((chunk, bt, gdim), jnp.float32)],
        compiler_params=pltpu.CompilerParams(
            dimension_semantics=("parallel",),
            vmem_limit_bytes=vmem_limit),
        cost_estimate=cost,
    )(x, w_ih0, b0, w_hh_all, w_ih_rest, b_rest, h0, c0)


# ----------------------------------------------------------------------------
# Parameter init (deterministic, mirrors PyTorch __init__ shapes/ranges)
# ----------------------------------------------------------------------------
def init_params(key, ntoken, ninp, nhid, nlayers):
    initrange = 0.1
    k_enc, k_dec, key = jax.random.split(key, 3)
    params = {
        "emb": jax.random.uniform(k_enc, (ntoken, ninp), jnp.float32,
                                  -initrange, initrange),
        "dec_w": jax.random.uniform(k_dec, (ntoken, nhid), jnp.float32,
                                    -initrange, initrange),
        "dec_b": jnp.zeros((ntoken,), jnp.float32),
        "lstm": [],
    }
    stdv = 1.0 / jnp.sqrt(nhid)
    for layer in range(nlayers):
        in_dim = ninp if layer == 0 else nhid
        k1, k2, k3, k4, key = jax.random.split(key, 5)
        params["lstm"].append({
            "w_ih": jax.random.uniform(k1, (4 * nhid, in_dim), jnp.float32,
                                       -stdv, stdv),
            "w_hh": jax.random.uniform(k2, (4 * nhid, nhid), jnp.float32,
                                       -stdv, stdv),
            "b_ih": jax.random.uniform(k3, (4 * nhid,), jnp.float32,
                                       -stdv, stdv),
            "b_hh": jax.random.uniform(k4, (4 * nhid,), jnp.float32,
                                       -stdv, stdv),
        })
    return params


# ----------------------------------------------------------------------------
# One-time parameter prep: transpose, pad each gate block to 128 lanes,
# combine biases, stack per-layer weights, cast matmul weights to bf16.
# ----------------------------------------------------------------------------
def prepare_params(params, ntoken, ninp, nhid, nlayers):
    ninp_p = _round_up(ninp, 128)
    nhid_p = _round_up(nhid, 128)
    ntoken_p = _round_up(ntoken, DEC_TN)    # pad vocab to the decoder tile
    gdim = 4 * nhid_p

    def pad_gate_w(w, in_dim, in_dim_p):
        # (4*nhid, in_dim) -> (in_dim_p, 4*nhid_p), gate blocks padded apart
        w4 = w.reshape(4, nhid, in_dim)
        w4 = jnp.pad(w4, ((0, 0), (0, nhid_p - nhid), (0, in_dim_p - in_dim)))
        return (jnp.transpose(w4, (2, 0, 1))
                .reshape(in_dim_p, gdim).astype(jnp.bfloat16))

    def pad_gate_b(b):
        b4 = b.reshape(4, nhid)
        b4 = jnp.pad(b4, ((0, 0), (0, nhid_p - nhid)))
        return b4.reshape(1, gdim)                              # f32

    l0 = params["lstm"][0]
    w_ih0_t = pad_gate_w(l0["w_ih"], ninp, ninp_p)
    b0 = pad_gate_b(l0["b_ih"] + l0["b_hh"])

    w_hh_all = jnp.stack([pad_gate_w(lp["w_hh"], nhid, nhid_p)
                          for lp in params["lstm"]], axis=0)
    if nlayers > 1:
        w_ih_rest = jnp.stack([pad_gate_w(lp["w_ih"], nhid, nhid_p)
                               for lp in params["lstm"][1:]], axis=0)
        b_rest = jnp.stack([pad_gate_b(lp["b_ih"] + lp["b_hh"])
                            for lp in params["lstm"][1:]], axis=0)
    else:  # dummies so the kernel signature stays fixed
        w_ih_rest = jnp.zeros((1, nhid_p, gdim), jnp.bfloat16)
        b_rest = jnp.zeros((1, 1, gdim), jnp.float32)

    return {
        "emb": jnp.pad(params["emb"], ((0, 0), (0, ninp_p - ninp))),
        "w_ih0_t": w_ih0_t,
        "b0": b0,
        "w_hh_all": w_hh_all,
        "w_ih_rest": w_ih_rest,
        "b_rest": b_rest,
        "dec_w_t": jnp.pad(params["dec_w"].T,
                           ((0, nhid_p - nhid), (0, ntoken_p - ntoken))
                           ).astype(jnp.bfloat16),
        "dec_b": jnp.pad(params["dec_b"],
                         (0, ntoken_p - ntoken)).reshape(1, ntoken_p),
    }


# ----------------------------------------------------------------------------
# Forward: embedding gather (glue) -> fused LSTM (Pallas) -> decoder (Pallas)
# ----------------------------------------------------------------------------
@jax.jit
def rnn_model_forward(prep, tokens, hidden):
    h0, c0 = hidden                              # (nlayers, batch, nhid) each
    seq, batch = tokens.shape
    nlayers, _, nhid = h0.shape
    ntoken = prep["emb"].shape[0]
    nhid_p = prep["w_hh_all"].shape[1]
    batch_p = _round_up(batch, 8)

    # Embedding lookup (gather) — glue in plain JAX. drop(emb): identity.
    x = prep["emb"][tokens]                      # (seq, batch, ninp_p) f32
    x = jnp.pad(x, ((0, 0), (0, batch_p - batch), (0, 0)))
    x = x.astype(jnp.bfloat16)                   # bf16 MXU operand

    h0_p = jnp.pad(h0, ((0, 0), (0, batch_p - batch), (0, nhid_p - nhid)))
    c0_p = jnp.pad(c0, ((0, 0), (0, batch_p - batch), (0, nhid_p - nhid)))

    # Fused nlayers-deep LSTM: per-chunk hoisted input projections + full
    # time loop inside a single kernel.
    y, hT_p, cT_p = lstm_stack(x, prep["w_ih0_t"], prep["b0"],
                               prep["w_hh_all"], prep["w_ih_rest"],
                               prep["b_rest"], h0_p, c0_p)

    # drop(output): identity. Decoder: tiled, lane-dense vocab tiles.
    y_flat = y.reshape(seq * batch_p, nhid_p)
    dec = linear(y_flat, prep["dec_w_t"], prep["dec_b"])
    decoded = dec.reshape(seq, batch_p, -1)[:, :batch, :ntoken]

    hidden_out = (hT_p[:, :batch, :nhid], cT_p[:, :batch, :nhid])
    return decoded, hidden_out


if __name__ == "__main__":
    ntoken, ninp, nhid, nlayers = 32, 32, 32, 2
    seq, batch = 8, 2

    key = jax.random.PRNGKey(0)
    k_params, k_tok = jax.random.split(key)
    raw_params = init_params(k_params, ntoken, ninp, nhid, nlayers)
    prep = prepare_params(raw_params, ntoken, ninp, nhid, nlayers)

    tokens = jax.random.randint(k_tok, (seq, batch), 0, ntoken, jnp.int32)
    hidden = (jnp.zeros((nlayers, batch, nhid), jnp.float32),
              jnp.zeros((nlayers, batch, nhid), jnp.float32))

    decoded, (h_out, c_out) = rnn_model_forward(prep, tokens, hidden)
    jax.block_until_ready((decoded, h_out, c_out))

    assert decoded.shape == (seq, batch, ntoken)
    assert h_out.shape == (nlayers, batch, nhid)
    assert c_out.shape == (nlayers, batch, nhid)
    assert bool(jnp.all(jnp.isfinite(decoded)))
    print("KERNEL_OK")
</pallas_src>

<mosaic_0001>
module attributes {stable_mosaic.version = 11 : i64} {
  func.func @_linear_kernel(%arg0: i32, %arg1: i32, %arg2: memref<64x128xf32, #tpu.memory_space<vmem>>, %arg3: memref<128x512xbf16, #tpu.memory_space<vmem>>, %arg4: memref<1x512xf32, #tpu.memory_space<vmem>>, %arg5: memref<64x512xf32, #tpu.memory_space<vmem>>) attributes {dimension_semantics = [#tpu.dimension_semantics<parallel>, #tpu.dimension_semantics<parallel>], iteration_bounds = array<i64: 1, 1>, scalar_prefetch = 0 : i64, scratch_operands = 0 : i64, tpu.core_type = #tpu.core_type<tc>, window_params = [{transform_indices = @transform_0, window_bounds = array<i64: 64, 128>}, {transform_indices = @transform_1, window_bounds = array<i64: 128, 512>}, {transform_indices = @transform_2, window_bounds = array<i64: 1, 512>}, {transform_indices = @transform_3, window_bounds = array<i64: 64, 512>}]} {
    %c0 = arith.constant 0 : index
    %c0_0 = arith.constant 0 : index
    %0 = vector.load %arg2[%c0, %c0_0] : memref<64x128xf32, #tpu.memory_space<vmem>>, vector<64x128xf32>
    %1 = arith.truncf %0 : vector<64x128xf32> to vector<64x128xbf16>
    %c0_1 = arith.constant 0 : index
    %c0_2 = arith.constant 0 : index
    %2 = vector.load %arg3[%c0_1, %c0_2] : memref<128x512xbf16, #tpu.memory_space<vmem>>, vector<128x512xbf16>
    %cst = arith.constant dense<0.000000e+00> : vector<64x512xf32>
    %3 = tpu.matmul %1, %2, %cst {dimension_numbers = #tpu.dot_dimension_numbers<[1], [0], [0], [1], [0, 0, 1, 1], [], []>} : vector<64x128xbf16>, vector<128x512xbf16>, vector<64x512xf32> -> vector<64x512xf32>
    %c0_3 = arith.constant 0 : index
    %c0_4 = arith.constant 0 : index
    %4 = vector.load %arg4[%c0_3, %c0_4] : memref<1x512xf32, #tpu.memory_space<vmem>>, vector<1x512xf32>
    %5 = vector.broadcast %4 : vector<1x512xf32> to vector<64x512xf32>
    %6 = arith.addf %3, %5 : vector<64x512xf32>
    %c0_5 = arith.constant 0 : index
    %c0_6 = arith.constant 0 : index
    %7 = vector.load %arg5[%c0_5, %c0_6] : memref<64x512xf32, #tpu.memory_space<vmem>>, vector<64x512xf32>
    tpu.vector_store %arg5[%c0_5, %c0_6], %6 {strides = array<i32>} : memref<64x512xf32, #tpu.memory_space<vmem>>, vector<64x512xf32>,
    return
  }
  func.func @transform_0(%arg0: i32, %arg1: i32) -> (i32, i32) {
    %c0_i32 = arith.constant 0 : i32
    %c0_i32_0 = arith.constant 0 : i32
    return %arg0, %c0_i32 : i32, i32
  }
  func.func @transform_1(%arg0: i32, %arg1: i32) -> (i32, i32) {
    %c0_i32 = arith.constant 0 : i32
    %c0_i32_0 = arith.constant 0 : i32
    return %c0_i32, %arg1 : i32, i32
  }
  func.func @transform_2(%arg0: i32, %arg1: i32) -> (i32, i32) {
    %c0_i32 = arith.constant 0 : i32
    %c0_i32_0 = arith.constant 0 : i32
    return %c0_i32, %arg1 : i32, i32
  }
  func.func @transform_3(%arg0: i32, %arg1: i32) -> (i32, i32) {
    %c0_i32 = arith.constant 0 : i32
    return %arg0, %arg1 : i32, i32
  }
}

module attributes {stable_mosaic.version = 11 : i64} {
  func.func @_lstm_stack_kernel(%arg0: i32, %arg1: memref<8x8x128xbf16, #tpu.memory_space<vmem>>, %arg2: memref<128x512xbf16, #tpu.memory_space<vmem>>, %arg3: memref<1x512xf32, #tpu.memory_space<vmem>>, %arg4: memref<2x128x512xbf16, #tpu.memory_space<vmem>>, %arg5: memref<1x128x512xbf16, #tpu.memory_space<vmem>>, %arg6: memref<1x1x512xf32, #tpu.memory_space<vmem>>, %arg7: memref<2x8x128xf32, #tpu.memory_space<vmem>>, %arg8: memref<2x8x128xf32, #tpu.memory_space<vmem>>, %arg9: memref<8x8x128xf32, #tpu.memory_space<vmem>>, %arg10: memref<2x8x128xf32, #tpu.memory_space<vmem>>, %arg11: memref<2x8x128xf32, #tpu.memory_space<vmem>>, %arg12: memref<8x8x512xf32, #tpu.memory_space<vmem>>) attributes {dimension_semantics = [#tpu.dimension_semantics<parallel>], iteration_bounds = array<i64: 1>, scalar_prefetch = 0 : i64, scratch_operands = 1 : i64, tpu.core_type = #tpu.core_type<tc>, window_params = [{transform_indices = @transform_0, window_bounds = array<i64: 8, 8, 128>}, {pipeline_mode = #tpu.pipeline_mode<synchronous>, transform_indices = @transform_1, window_bounds = array<i64: 128, 512>}, {pipeline_mode = #tpu.pipeline_mode<synchronous>, transform_indices = @transform_2, window_bounds = array<i64: 1, 512>}, {pipeline_mode = #tpu.pipeline_mode<synchronous>, transform_indices = @transform_3, window_bounds = array<i64: 2, 128, 512>}, {pipeline_mode = #tpu.pipeline_mode<synchronous>, transform_indices = @transform_4, window_bounds = array<i64: 1, 128, 512>}, {pipeline_mode = #tpu.pipeline_mode<synchronous>, transform_indices = @transform_5, window_bounds = array<i64: 1, 1, 512>}, {transform_indices = @transform_6, window_bounds = array<i64: 2, 8, 128>}, {transform_indices = @transform_7, window_bounds = array<i64: 2, 8, 128>}, {transform_indices = @transform_8, window_bounds = array<i64: 8, 8, 128>}, {transform_indices = @transform_9, window_bounds = array<i64: 2, 8, 128>}, {transform_indices = @transform_10, window_bounds = array<i64: 2, 8, 128>}]} {
    %c0 = arith.constant 0 : index
    %c0_0 = arith.constant 0 : index
    %c0_1 = arith.constant 0 : index
    %0 = vector.load %arg7[%c0, %c0_0, %c0_1] : memref<2x8x128xf32, #tpu.memory_space<vmem>>, vector<1x8x128xf32>
    %1 = vector.shape_cast %0 : vector<1x8x128xf32> to vector<8x128xf32>
    %c0_2 = arith.constant 0 : index
    %c0_3 = arith.constant 0 : index
    %c0_4 = arith.constant 0 : index
    %2 = vector.load %arg8[%c0_2, %c0_3, %c0_4] : memref<2x8x128xf32, #tpu.memory_space<vmem>>, vector<1x8x128xf32>
    %3 = vector.shape_cast %2 : vector<1x8x128xf32> to vector<8x128xf32>
    %c0_i32 = arith.constant 0 : i32
    %c8_i32 = arith.constant 8 : i32
    %4 = arith.muli %c0_i32, %c8_i32 : i32
    %5 = tpu.assume_multiple %4, 8 : i32
    %6 = arith.index_cast %5 : i32 to index
    %c0_5 = arith.constant 0 : index
    %c0_6 = arith.constant 0 : index
    %7 = vector.load %arg1[%6, %c0_5, %c0_6] : memref<8x8x128xbf16, #tpu.memory_space<vmem>>, vector<8x8x128xbf16>
    %c0_7 = arith.constant 0 : index
    %c0_8 = arith.constant 0 : index
    %8 = vector.load %arg2[%c0_7, %c0_8] : memref<128x512xbf16, #tpu.memory_space<vmem>>, vector<128x512xbf16>
    %c0_9 = arith.constant 0 : index
    %c0_10 = arith.constant 0 : index
    %9 = vector.load %arg3[%c0_9, %c0_10] : memref<1x512xf32, #tpu.memory_space<vmem>>, vector<1x512xf32>
    %10 = vector.shape_cast %7 : vector<8x8x128xbf16> to vector<64x128xbf16>
    %cst = arith.constant dense<0.000000e+00> : vector<64x512xf32>
    %11 = tpu.matmul %10, %8, %cst {dimension_numbers = #tpu.dot_dimension_numbers<[1], [0], [0], [1], [0, 0, 1, 1], [], []>} : vector<64x128xbf16>, vector<128x512xbf16>, vector<64x512xf32> -> vector<64x512xf32>
    %12 = vector.broadcast %9 : vector<1x512xf32> to vector<64x512xf32>
    %13 = arith.addf %11, %12 : vector<64x512xf32>
    %14 = vector.shape_cast %13 : vector<64x512xf32> to vector<8x8x512xf32>
    %c0_11 = arith.constant 0 : index
    %c0_12 = arith.constant 0 : index
    %c0_13 = arith.constant 0 : index
    %15 = vector.load %arg12[%c0_11, %c0_12, %c0_13] : memref<8x8x512xf32, #tpu.memory_space<vmem>>, vector<8x8x512xf32>
    tpu.vector_store %arg12[%c0_11, %c0_12, %c0_13], %14 {strides = array<i32>} : memref<8x8x512xf32, #tpu.memory_space<vmem>>, vector<8x8x512xf32>,
    %c0_i32_14 = arith.constant 0 : i32
    %16 = arith.truncf %1 : vector<8x128xf32> to vector<8x128xbf16>
    %17 = arith.index_cast %c0_i32_14 : i32 to index
    %c0_15 = arith.constant 0 : index
    %c128 = arith.constant 128 : index
    %18 = vector.load %arg12[%17, %c0_15, %c128] : memref<8x8x512xf32, #tpu.memory_space<vmem>>, vector<1x8x128xf32>
    %19 = vector.shape_cast %18 : vector<1x8x128xf32> to vector<8x128xf32>
    %c0_16 = arith.constant 0 : index
    %c0_17 = arith.constant 0 : index
    %c128_18 = arith.constant 128 : index
    %20 = vector.load %arg4[%c0_16, %c0_17, %c128_18] : memref<2x128x512xbf16, #tpu.memory_space<vmem>>, vector<1x128x128xbf16>
    %21 = vector.shape_cast %20 : vector<1x128x128xbf16> to vector<128x128xbf16>
    %cst_19 = arith.constant dense<0.000000e+00> : vector<8x128xf32>
    %22 = tpu.matmul %16, %21, %cst_19 {dimension_numbers = #tpu.dot_dimension_numbers<[1], [0], [0], [1], [0, 0, 1, 1], [], []>} : vector<8x128xbf16>, vector<128x128xbf16>, vector<8x128xf32> -> vector<8x128xf32>
    %23 = arith.addf %19, %22 : vector<8x128xf32>
    %24 = arith.negf %23 : vector<8x128xf32>
    %25 = math.exp %24 : vector<8x128xf32>
    %cst_20 = arith.constant 1.000000e+00 : f32
    %26 = vector.broadcast %cst_20 : f32 to vector<8x128xf32>
    %27 = arith.addf %26, %25 : vector<8x128xf32>
    %28 = arith.divf %26, %27 : vector<8x128xf32>
    %29 = arith.mulf %28, %3 : vector<8x128xf32>
    %30 = arith.index_cast %c0_i32_14 : i32 to index
    %c0_21 = arith.constant 0 : index
    %c0_22 = arith.constant 0 : index
    %31 = vector.load %arg12[%30, %c0_21, %c0_22] : memref<8x8x512xf32, #tpu.memory_space<vmem>>, vector<1x8x128xf32>
    %32 = vector.shape_cast %31 : vector<1x8x128xf32> to vector<8x128xf32>
    %c0_23 = arith.constant 0 : index
    %c0_24 = arith.constant 0 : index
    %c0_25 = arith.constant 0 : index
    %33 = vector.load %arg4[%c0_23, %c0_24, %c0_25] : memref<2x128x512xbf16, #tpu.memory_space<vmem>>, vector<1x128x128xbf16>
    %34 = vector.shape_cast %33 : vector<1x128x128xbf16> to vector<128x128xbf16>
    %cst_26 = arith.constant dense<0.000000e+00> : vector<8x128xf32>
    %35 = tpu.matmul %16, %34, %cst_26 {dimension_numbers = #tpu.dot_dimension_numbers<[1], [0], [0], [1], [0, 0, 1, 1], [], []>} : vector<8x128xbf16>, vector<128x128xbf16>, vector<8x128xf32> -> vector<8x128xf32>
    %36 = arith.addf %32, %35 : vector<8x128xf32>
    %37 = arith.negf %36 : vector<8x128xf32>
    %38 = math.exp %37 : vector<8x128xf32>
    %cst_27 = arith.constant 1.000000e+00 : f32
    %39 = vector.broadcast %cst_27 : f32 to vector<8x128xf32>
    %40 = arith.addf %39, %38 : vector<8x128xf32>
    %41 = arith.divf %39, %40 : vector<8x128xf32>
    %42 = arith.index_cast %c0_i32_14 : i32 to index
    %c0_28 = arith.constant 0 : index
    %c256 = arith.constant 256 : index
    %43 = vector.load %arg12[%42, %c0_28, %c256] : memref<8x8x512xf32, #tpu.memory_space<vmem>>, vector<1x8x128xf32>
    %44 = vector.shape_cast %43 : vector<1x8x128xf32> to vector<8x128xf32>
    %c0_29 = arith.constant 0 : index
    %c0_30 = arith.constant 0 : index
    %c256_31 = arith.constant 256 : index
    %45 = vector.load %arg4[%c0_29, %c0_30, %c256_31] : memref<2x128x512xbf16, #tpu.memory_space<vmem>>, vector<1x128x128xbf16>
    %46 = vector.shape_cast %45 : vector<1x128x128xbf16> to vector<128x128xbf16>
    %cst_32 = arith.constant dense<0.000000e+00> : vector<8x128xf32>
    %47 = tpu.matmul %16, %46, %cst_32 {dimension_numbers = #tpu.dot_dimension_numbers<[1], [0], [0], [1], [0, 0, 1, 1], [], []>} : vector<8x128xbf16>, vector<128x128xbf16>, vector<8x128xf32> -> vector<8x128xf32>
    %48 = arith.addf %44, %47 : vector<8x128xf32>
    %49 = math.tanh %48 : vector<8x128xf32>
    %50 = arith.mulf %41, %49 : vector<8x128xf32>
    %51 = arith.addf %29, %50 : vector<8x128xf32>
    %52 = arith.index_cast %c0_i32_14 : i32 to index
    %c0_33 = arith.constant 0 : index
    %c384 = arith.constant 384 : index
    %53 = vector.load %arg12[%52, %c0_33, %c384] : memref<8x8x512xf32, #tpu.memory_space<vmem>>, vector<1x8x128xf32>
    %54 = vector.shape_cast %53 : vector<1x8x128xf32> to vector<8x128xf32>
    %c0_34 = arith.constant 0 : index
    %c0_35 = arith.constant 0 : index
    %c384_36 = arith.constant 384 : index
    %55 = vector.load %arg4[%c0_34, %c0_35, %c384_36] : memref<2x128x512xbf16, #tpu.memory_space<vmem>>, vector<1x128x128xbf16>
    %56 = vector.shape_cast %55 : vector<1x128x128xbf16> to vector<128x128xbf16>
    %cst_37 = arith.constant dense<0.000000e+00> : vector<8x128xf32>
    %57 = tpu.matmul %16, %56, %cst_37 {dimension_numbers = #tpu.dot_dimension_numbers<[1], [0], [0], [1], [0, 0, 1, 1], [], []>} : vector<8x128xbf16>, vector<128x128xbf16>, vector<8x128xf32> -> vector<8x128xf32>
    %58 = arith.addf %54, %57 : vector<8x128xf32>
    %59 = arith.negf %58 : vector<8x128xf32>
    %60 = math.exp %59 : vector<8x128xf32>
    %cst_38 = arith.constant 1.000000e+00 : f32
    %61 = vector.broadcast %cst_38 : f32 to vector<8x128xf32>
    %62 = arith.addf %61, %60 : vector<8x128xf32>
    %63 = arith.divf %61, %62 : vector<8x128xf32>
    %64 = math.tanh %51 : vector<8x128xf32>
    %65 = arith.mulf %63, %64 : vector<8x128xf32>
    %66 = arith.addi %5, %c0_i32_14 : i32
    %67 = arith.index_cast %66 : i32 to index
    %c0_39 = arith.constant 0 : index
    %c0_40 = arith.constant 0 : index
    %68 = vector.load %arg9[%67, %c0_39, %c0_40] : memref<8x8x128xf32, #tpu.memory_space<vmem>>, vector<1x8x128xf32>
    %69 = vector.shape_cast %68 : vector<1x8x128xf32> to vector<8x128xf32>
    %70 = vector.shape_cast %65 : vector<8x128xf32> to vector<1x8x128xf32>
    tpu.vector_store %arg9[%67, %c0_39, %c0_40], %70 {strides = array<i32>} : memref<8x8x128xf32, #tpu.memory_space<vmem>>, vector<1x8x128xf32>,
    %c1_i32 = arith.constant 1 : i32
    %71 = arith.truncf %65 : vector<8x128xf32> to vector<8x128xbf16>
    %72 = arith.index_cast %c1_i32 : i32 to index
    %c0_41 = arith.constant 0 : index
    %c128_42 = arith.constant 128 : index
    %73 = vector.load %arg12[%72, %c0_41, %c128_42] : memref<8x8x512xf32, #tpu.memory_space<vmem>>, vector<1x8x128xf32>
    %74 = vector.shape_cast %73 : vector<1x8x128xf32> to vector<8x128xf32>
    %c0_43 = arith.constant 0 : index
    %c0_44 = arith.constant 0 : index
    %c128_45 = arith.constant 128 : index
    %75 = vector.load %arg4[%c0_43, %c0_44, %c128_45] : memref<2x128x512xbf16, #tpu.memory_space<vmem>>, vector<1x128x128xbf16>
    %76 = vector.shape_cast %75 : vector<1x128x128xbf16> to vector<128x128xbf16>
    %cst_46 = arith.constant dense<0.000000e+00> : vector<8x128xf32>
    %77 = tpu.matmul %71, %76, %cst_46 {dimension_numbers = #tpu.dot_dimension_numbers<[1], [0], [0], [1], [0, 0, 1, 1], [], []>} : vector<8x128xbf16>, vector<128x128xbf16>, vector<8x128xf32> -> vector<8x128xf32>
    %78 = arith.addf %74, %77 : vector<8x128xf32>
    %79 = arith.negf %78 : vector<8x128xf32>
    %80 = math.exp %79 : vector<8x128xf32>
    %cst_47 = arith.constant 1.000000e+00 : f32
    %81 = vector.broadcast %cst_47 : f32 to vector<8x128xf32>
    %82 = arith.addf %81, %80 : vector<8x128xf32>
    %83 = arith.divf %81, %82 : vector<8x128xf32>
    %84 = arith.mulf %83, %51 : vector<8x128xf32>
    %85 = arith.index_cast %c1_i32 : i32 to index
    %c0_48 = arith.constant 0 : index
    %c0_49 = arith.constant 0 : index
    %86 = vector.load %arg12[%85, %c0_48, %c0_49] : memref<8x8x512xf32, #tpu.memory_space<vmem>>, vector<1x8x128xf32>
    %87 = vector.shape_cast %86 : vector<1x8x128xf32> to vector<8x128xf32>
    %c0_50 = arith.constant 0 : index
    %c0_51 = arith.constant 0 : index
    %c0_52 = arith.constant 0 : index
    %88 = vector.load %arg4[%c0_50, %c0_51, %c0_52] : memref<2x128x512xbf16, #tpu.memory_space<vmem>>, vector<1x128x128xbf16>
    %89 = vector.shape_cast %88 : vector<1x128x128xbf16> to vector<128x128xbf16>
    %cst_53 = arith.constant dense<0.000000e+00> : vector<8x128xf32>
    %90 = tpu.matmul %71, %89, %cst_53 {dimension_numbers = #tpu.dot_dimension_numbers<[1], [0], [0], [1], [0, 0, 1, 1], [], []>} : vector<8x128xbf16>, vector<128x128xbf16>, vector<8x128xf32> -> vector<8x128xf32>
    %91 = arith.addf %87, %90 : vector<8x128xf32>
    %92 = arith.negf %91 : vector<8x128xf32>
    %93 = math.exp %92 : vector<8x128xf32>
    %cst_54 = arith.constant 1.000000e+00 : f32
    %94 = vector.broadcast %cst_54 : f32 to vector<8x128xf32>
    %95 = arith.addf %94, %93 : vector<8x128xf32>
    %96 = arith.divf %94, %95 : vector<8x128xf32>
    %97 = arith.index_cast %c1_i32 : i32 to index
    %c0_55 = arith.constant 0 : index
    %c256_56 = arith.constant 256 : index
    %98 = vector.load %arg12[%97, %c0_55, %c256_56] : memref<8x8x512xf32, #tpu.memory_space<vmem>>, vector<1x8x128xf32>
    %99 = vector.shape_cast %98 : vector<1x8x128xf32> to vector<8x128xf32>
    %c0_57 = arith.constant 0 : index
    %c0_58 = arith.constant 0 : index
    %c256_59 = arith.constant 256 : index
    %100 = vector.load %arg4[%c0_57, %c0_58, %c256_59] : memref<2x128x512xbf16, #tpu.memory_space<vmem>>, vector<1x128x128xbf16>
    %101 = vector.shape_cast %100 : vector<1x128x128xbf16> to vector<128x128xbf16>
    %cst_60 = arith.constant dense<0.000000e+00> : vector<8x128xf32>
    %102 = tpu.matmul %71, %101, %cst_60 {dimension_numbers = #tpu.dot_dimension_numbers<[1], [0], [0], [1], [0, 0, 1, 1], [], []>} : vector<8x128xbf16>, vector<128x128xbf16>, vector<8x128xf32> -> vector<8x128xf32>
    %103 = arith.addf %99, %102 : vector<8x128xf32>
    %104 = math.tanh %103 : vector<8x128xf32>
    %105 = arith.mulf %96, %104 : vector<8x128xf32>
    %106 = arith.addf %84, %105 : vector<8x128xf32>
    %107 = arith.index_cast %c1_i32 : i32 to index
    %c0_61 = arith.constant 0 : index
    %c384_62 = arith.constant 384 : index
    %108 = vector.load %arg12[%107, %c0_61, %c384_62] : memref<8x8x512xf32, #tpu.memory_space<vmem>>, vector<1x8x128xf32>
    %109 = vector.shape_cast %108 : vector<1x8x128xf32> to vector<8x128xf32>
    %c0_63 = arith.constant 0 : index
    %c0_64 = arith.constant 0 : index
    %c384_65 = arith.constant 384 : index
    %110 = vector.load %arg4[%c0_63, %c0_64, %c384_65] : memref<2x128x512xbf16, #tpu.memory_space<vmem>>, vector<1x128x128xbf16>
    %111 = vector.shape_cast %110 : vector<1x128x128xbf16> to vector<128x128xbf16>
    %cst_66 = arith.constant dense<0.000000e+00> : vector<8x128xf32>
    %112 = tpu.matmul %71, %111, %cst_66 {dimension_numbers = #tpu.dot_dimension_numbers<[1], [0], [0], [1], [0, 0, 1, 1], [], []>} : vector<8x128xbf16>, vector<128x128xbf16>, vector<8x128xf32> -> vector<8x128xf32>
    %113 = arith.addf %109, %112 : vector<8x128xf32>
    %114 = arith.negf %113 : vector<8x128xf32>
    %115 = math.exp %114 : vector<8x128xf32>
    %cst_67 = arith.constant 1.000000e+00 : f32
    %116 = vector.broadcast %cst_67 : f32 to vector<8x128xf32>
    %117 = arith.addf %116, %115 : vector<8x128xf32>
    %118 = arith.divf %116, %117 : vector<8x128xf32>
    %119 = math.tanh %106 : vector<8x128xf32>
    %120 = arith.mulf %118, %119 : vector<8x128xf32>
    %121 = arith.addi %5, %c1_i32 : i32
    %122 = arith.index_cast %121 : i32 to index
    %c0_68 = arith.constant 0 : index
    %c0_69 = arith.constant 0 : index
    %123 = vector.load %arg9[%122, %c0_68, %c0_69] : memref<8x8x128xf32, #tpu.memory_space<vmem>>, vector<1x8x128xf32>
    %124 = vector.shape_cast %123 : vector<1x8x128xf32> to vector<8x128xf32>
    %125 = vector.shape_cast %120 : vector<8x128xf32> to vector<1x8x128xf32>
    tpu.vector_store %arg9[%122, %c0_68, %c0_69], %125 {strides = array<i32>} : memref<8x8x128xf32, #tpu.memory_space<vmem>>, vector<1x8x128xf32>,
    %c2_i32 = arith.constant 2 : i32
    %126 = arith.truncf %120 : vector<8x128xf32> to vector<8x128xbf16>
    %127 = arith.index_cast %c2_i32 : i32 to index
    %c0_70 = arith.constant 0 : index
    %c128_71 = arith.constant 128 : index
    %128 = vector.load %arg12[%127, %c0_70, %c128_71] : memref<8x8x512xf32, #tpu.memory_space<vmem>>, vector<1x8x128xf32>
    %129 = vector.shape_cast %128 : vector<1x8x128xf32> to vector<8x128xf32>
    %c0_72 = arith.constant 0 : index
    %c0_73 = arith.constant 0 : index
    %c128_74 = arith.constant 128 : index
    %130 = vector.load %arg4[%c0_72, %c0_73, %c128_74] : memref<2x128x512xbf16, #tpu.memory_space<vmem>>, vector<1x128x128xbf16>
    %131 = vector.shape_cast %130 : vector<1x128x128xbf16> to vector<128x128xbf16>
    %cst_75 = arith.constant dense<0.000000e+00> : vector<8x128xf32>
    %132 = tpu.matmul %126, %131, %cst_75 {dimension_numbers = #tpu.dot_dimension_numbers<[1], [0], [0], [1], [0, 0, 1, 1], [], []>} : vector<8x128xbf16>, vector<128x128xbf16>, vector<8x128xf32> -> vector<8x128xf32>
    %133 = arith.addf %129, %132 : vector<8x128xf32>
    %134 = arith.negf %133 : vector<8x128xf32>
    %135 = math.exp %134 : vector<8x128xf32>
    %cst_76 = arith.constant 1.000000e+00 : f32
    %136 = vector.broadcast %cst_76 : f32 to vector<8x128xf32>
    %137 = arith.addf %136, %135 : vector<8x128xf32>
    %138 = arith.divf %136, %137 : vector<8x128xf32>
    %139 = arith.mulf %138, %106 : vector<8x128xf32>
    %140 = arith.index_cast %c2_i32 : i32 to index
    %c0_77 = arith.constant 0 : index
    %c0_78 = arith.constant 0 : index
    %141 = vector.load %arg12[%140, %c0_77, %c0_78] : memref<8x8x512xf32, #tpu.memory_space<vmem>>, vector<1x8x128xf32>
    %142 = vector.shape_cast %141 : vector<1x8x128xf32> to vector<8x128xf32>
    %c0_79 = arith.constant 0 : index
    %c0_80 = arith.constant 0 : index
    %c0_81 = arith.constant 0 : index
    %143 = vector.load %arg4[%c0_79, %c0_80, %c0_81] : memref<2x128x512xbf16, #tpu.memory_space<vmem>>, vector<1x128x128xbf16>
    %144 = vector.shape_cast %143 : vector<1x128x128xbf16> to vector<128x128xbf16>
    %cst_82 = arith.constant dense<0.000000e+00> : vector<8x128xf32>
    %145 = tpu.matmul %126, %144, %cst_82 {dimension_numbers = #tpu.dot_dimension_numbers<[1], [0], [0], [1], [0, 0, 1, 1], [], []>} : vector<8x128xbf16>, vector<128x128xbf16>, vector<8x128xf32> -> vector<8x128xf32>
    %146 = arith.addf %142, %145 : vector<8x128xf32>
    %147 = arith.negf %146 : vector<8x128xf32>
    %148 = math.exp %147 : vector<8x128xf32>
    %cst_83 = arith.constant 1.000000e+00 : f32
    %149 = vector.broadcast %cst_83 : f32 to vector<8x128xf32>
    %150 = arith.addf %149, %148 : vector<8x128xf32>
    %151 = arith.divf %149, %150 : vector<8x128xf32>
    %152 = arith.index_cast %c2_i32 : i32 to index
    %c0_84 = arith.constant 0 : index
    %c256_85 = arith.constant 256 : index
    %153 = vector.load %arg12[%152, %c0_84, %c256_85] : memref<8x8x512xf32, #tpu.memory_space<vmem>>, vector<1x8x128xf32>
    %154 = vector.shape_cast %153 : vector<1x8x128xf32> to vector<8x128xf32>
    %c0_86 = arith.constant 0 : index
    %c0_87 = arith.constant 0 : index
    %c256_88 = arith.constant 256 : index
    %155 = vector.load %arg4[%c0_86, %c0_87, %c256_88] : memref<2x128x512xbf16, #tpu.memory_space<vmem>>, vector<1x128x128xbf16>
    %156 = vector.shape_cast %155 : vector<1x128x128xbf16> to vector<128x128xbf16>
    %cst_89 = arith.constant dense<0.000000e+00> : vector<8x128xf32>
    %157 = tpu.matmul %126, %156, %cst_89 {dimension_numbers = #tpu.dot_dimension_numbers<[1], [0], [0], [1], [0, 0, 1, 1], [], []>} : vector<8x128xbf16>, vector<128x128xbf16>, vector<8x128xf32> -> vector<8x128xf32>
    %158 = arith.addf %154, %157 : vector<8x128xf32>
    %159 = math.tanh %158 : vector<8x128xf32>
    %160 = arith.mulf %151, %159 : vector<8x128xf32>
    %161 = arith.addf %139, %160 : vector<8x128xf32>
    %162 = arith.index_cast %c2_i32 : i32 to index
    %c0_90 = arith.constant 0 : index
    %c384_91 = arith.constant 384 : index
    %163 = vector.load %arg12[%162, %c0_90, %c384_91] : memref<8x8x512xf32, #tpu.memory_space<vmem>>, vector<1x8x128xf32>
    %164 = vector.shape_cast %163 : vector<1x8x128xf32> to vector<8x128xf32>
    %c0_92 = arith.constant 0 : index
    %c0_93 = arith.constant 0 : index
    %c384_94 = arith.constant 384 : index
    %165 = vector.load %arg4[%c0_92, %c0_93, %c384_94] : memref<2x128x512xbf16, #tpu.memory_space<vmem>>, vector<1x128x128xbf16>
    %166 = vector.shape_cast %165 : vector<1x128x128xbf16> to vector<128x128xbf16>
    %cst_95 = arith.constant dense<0.000000e+00> : vector<8x128xf32>
    %167 = tpu.matmul %126, %166, %cst_95 {dimension_numbers = #tpu.dot_dimension_numbers<[1], [0], [0], [1], [0, 0, 1, 1], [], []>} : vector<8x128xbf16>, vector<128x128xbf16>, vector<8x128xf32> -> vector<8x128xf32>
    %168 = arith.addf %164, %167 : vector<8x128xf32>
    %169 = arith.negf %168 : vector<8x128xf32>
    %170 = math.exp %169 : vector<8x128xf32>
    %cst_96 = arith.constant 1.000000e+00 : f32
    %171 = vector.broadcast %cst_96 : f32 to vector<8x128xf32>
    %172 = arith.addf %171, %170 : vector<8x128xf32>
    %173 = arith.divf %171, %172 : vector<8x128xf32>
    %174 = math.tanh %161 : vector<8x128xf32>
    %175 = arith.mulf %173, %174 : vector<8x128xf32>
    %176 = arith.addi %5, %c2_i32 : i32
    %177 = arith.index_cast %176 : i32 to index
    %c0_97 = arith.constant 0 : index
    %c0_98 = arith.constant 0 : index
    %178 = vector.load %arg9[%177, %c0_97, %c0_98] : memref<8x8x128xf32, #tpu.memory_space<vmem>>, vector<1x8x128xf32>
    %179 = vector.shape_cast %178 : vector<1x8x128xf32> to vector<8x128xf32>
    %180 = vector.shape_cast %175 : vector<8x128xf32> to vector<1x8x128xf32>
    tpu.vector_store %arg9[%177, %c0_97, %c0_98], %180 {strides = array<i32>} : memref<8x8x128xf32, #tpu.memory_space<vmem>>, vector<1x8x128xf32>,
    %c3_i32 = arith.constant 3 : i32
    %181 = arith.truncf %175 : vector<8x128xf32> to vector<8x128xbf16>
    %182 = arith.index_cast %c3_i32 : i32 to index
    %c0_99 = arith.constant 0 : index
    %c128_100 = arith.constant 128 : index
    %183 = vector.load %arg12[%182, %c0_99, %c128_100] : memref<8x8x512xf32, #tpu.memory_space<vmem>>, vector<1x8x128xf32>
    %184 = vector.shape_cast %183 : vector<1x8x128xf32> to vector<8x128xf32>
    %c0_101 = arith.constant 0 : index
    %c0_102 = arith.constant 0 : index
    %c128_103 = arith.constant 128 : index
    %185 = vector.load %arg4[%c0_101, %c0_102, %c128_103] : memref<2x128x512xbf16, #tpu.memory_space<vmem>>, vector<1x128x128xbf16>
    %186 = vector.shape_cast %185 : vector<1x128x128xbf16> to vector<128x128xbf16>
    %cst_104 = arith.constant dense<0.000000e+00> : vector<8x128xf32>
    %187 = tpu.matmul %181, %186, %cst_104 {dimension_numbers = #tpu.dot_dimension_numbers<[1], [0], [0], [1], [0, 0, 1, 1], [], []>} : vector<8x128xbf16>, vector<128x128xbf16>, vector<8x128xf32> -> vector<8x128xf32>
    %188 = arith.addf %184, %187 : vector<8x128xf32>
    %189 = arith.negf %188 : vector<8x128xf32>
    %190 = math.exp %189 : vector<8x128xf32>
    %cst_105 = arith.constant 1.000000e+00 : f32
    %191 = vector.broadcast %cst_105 : f32 to vector<8x128xf32>
    %192 = arith.addf %191, %190 : vector<8x128xf32>
    %193 = arith.divf %191, %192 : vector<8x128xf32>
    %194 = arith.mulf %193, %161 : vector<8x128xf32>
    %195 = arith.index_cast %c3_i32 : i32 to index
    %c0_106 = arith.constant 0 : index
    %c0_107 = arith.constant 0 : index
    %196 = vector.load %arg12[%195, %c0_106, %c0_107] : memref<8x8x512xf32, #tpu.memory_space<vmem>>, vector<1x8x128xf32>
    %197 = vector.shape_cast %196 : vector<1x8x128xf32> to vector<8x128xf32>
    %c0_108 = arith.constant 0 : index
    %c0_109 = arith.constant 0 : index
    %c0_110 = arith.constant 0 : index
    %198 = vector.load %arg4[%c0_108, %c0_109, %c0_110] : memref<2x128x512xbf16, #tpu.memory_space<vmem>>, vector<1x128x128xbf16>
    %199 = vector.shape_cast %198 : vector<1x128x128xbf16> to vector<128x128xbf16>
    %cst_111 = arith.constant dense<0.000000e+00> : vector<8x128xf32>
    %200 = tpu.matmul %181, %199, %cst_111 {dimension_numbers = #tpu.dot_dimension_numbers<[1], [0], [0], [1], [0, 0, 1, 1], [], []>} : vector<8x128xbf16>, vector<128x128xbf16>, vector<8x128xf32> -> vector<8x128xf32>
    %201 = arith.addf %197, %200 : vector<8x128xf32>
    %202 = arith.negf %201 : vector<8x128xf32>
    %203 = math.exp %202 : vector<8x128xf32>
    %cst_112 = arith.constant 1.000000e+00 : f32
    %204 = vector.broadcast %cst_112 : f32 to vector<8x128xf32>
    %205 = arith.addf %204, %203 : vector<8x128xf32>
    %206 = arith.divf %204, %205 : vector<8x128xf32>
    %207 = arith.index_cast %c3_i32 : i32 to index
    %c0_113 = arith.constant 0 : index
    %c256_114 = arith.constant 256 : index
    %208 = vector.load %arg12[%207, %c0_113, %c256_114] : memref<8x8x512xf32, #tpu.memory_space<vmem>>, vector<1x8x128xf32>
    %209 = vector.shape_cast %208 : vector<1x8x128xf32> to vector<8x128xf32>
    %c0_115 = arith.constant 0 : index
    %c0_116 = arith.constant 0 : index
    %c256_117 = arith.constant 256 : index
    %210 = vector.load %arg4[%c0_115, %c0_116, %c256_117] : memref<2x128x512xbf16, #tpu.memory_space<vmem>>, vector<1x128x128xbf16>
    %211 = vector.shape_cast %210 : vector<1x128x128xbf16> to vector<128x128xbf16>
    %cst_118 = arith.constant dense<0.000000e+00> : vector<8x128xf32>
    %212 = tpu.matmul %181, %211, %cst_118 {dimension_numbers = #tpu.dot_dimension_numbers<[1], [0], [0], [1], [0, 0, 1, 1], [], []>} : vector<8x128xbf16>, vector<128x128xbf16>, vector<8x128xf32> -> vector<8x128xf32>
    %213 = arith.addf %209, %212 : vector<8x128xf32>
    %214 = math.tanh %213 : vector<8x128xf32>
    %215 = arith.mulf %206, %214 : vector<8x128xf32>
    %216 = arith.addf %194, %215 : vector<8x128xf32>
    %217 = arith.index_cast %c3_i32 : i32 to index
    %c0_119 = arith.constant 0 : index
    %c384_120 = arith.constant 384 : index
    %218 = vector.load %arg12[%217, %c0_119, %c384_120] : memref<8x8x512xf32, #tpu.memory_space<vmem>>, vector<1x8x128xf32>
    %219 = vector.shape_cast %218 : vector<1x8x128xf32> to vector<8x128xf32>
    %c0_121 = arith.constant 0 : index
    %c0_122 = arith.constant 0 : index
    %c384_123 = arith.constant 384 : index
    %220 = vector.load %arg4[%c0_121, %c0_122, %c384_123] : memref<2x128x512xbf16, #tpu.memory_space<vmem>>, vector<1x128x128xbf16>
    %221 = vector.shape_cast %220 : vector<1x128x128xbf16> to vector<128x128xbf16>
    %cst_124 = arith.constant dense<0.000000e+00> : vector<8x128xf32>
    %222 = tpu.matmul %181, %221, %cst_124 {dimension_numbers = #tpu.dot_dimension_numbers<[1], [0], [0], [1], [0, 0, 1, 1], [], []>} : vector<8x128xbf16>, vector<128x128xbf16>, vector<8x128xf32> -> vector<8x128xf32>
    %223 = arith.addf %219, %222 : vector<8x128xf32>
    %224 = arith.negf %223 : vector<8x128xf32>
    %225 = math.exp %224 : vector<8x128xf32>
    %cst_125 = arith.constant 1.000000e+00 : f32
    %226 = vector.broadcast %cst_125 : f32 to vector<8x128xf32>
    %227 = arith.addf %226, %225 : vector<8x128xf32>
    %228 = arith.divf %226, %227 : vector<8x128xf32>
    %229 = math.tanh %216 : vector<8x128xf32>
    %230 = arith.mulf %228, %229 : vector<8x128xf32>
    %231 = arith.addi %5, %c3_i32 : i32
    %232 = arith.index_cast %231 : i32 to index
    %c0_126 = arith.constant 0 : index
    %c0_127 = arith.constant 0 : index
    %233 = vector.load %arg9[%232, %c0_126, %c0_127] : memref<8x8x128xf32, #tpu.memory_space<vmem>>, vector<1x8x128xf32>
    %234 = vector.shape_cast %233 : vector<1x8x128xf32> to vector<8x128xf32>
    %235 = vector.shape_cast %230 : vector<8x128xf32> to vector<1x8x128xf32>
    tpu.vector_store %arg9[%232, %c0_126, %c0_127], %235 {strides = array<i32>} : memref<8x8x128xf32, #tpu.memory_space<vmem>>, vector<1x8x128xf32>,
    %c4_i32 = arith.constant 4 : i32
    %236 = arith.truncf %230 : vector<8x128xf32> to vector<8x128xbf16>
    %237 = arith.index_cast %c4_i32 : i32 to index
    %c0_128 = arith.constant 0 : index
    %c128_129 = arith.constant 128 : index
    %238 = vector.load %arg12[%237, %c0_128, %c128_129] : memref<8x8x512xf32, #tpu.memory_space<vmem>>, vector<1x8x128xf32>
    %239 = vector.shape_cast %238 : vector<1x8x128xf32> to vector<8x128xf32>
    %c0_130 = arith.constant 0 : index
    %c0_131 = arith.constant 0 : index
    %c128_132 = arith.constant 128 : index
    %240 = vector.load %arg4[%c0_130, %c0_131, %c128_132] : memref<2x128x512xbf16, #tpu.memory_space<vmem>>, vector<1x128x128xbf16>
    %241 = vector.shape_cast %240 : vector<1x128x128xbf16> to vector<128x128xbf16>
    %cst_133 = arith.constant dense<0.000000e+00> : vector<8x128xf32>
    %242 = tpu.matmul %236, %241, %cst_133 {dimension_numbers = #tpu.dot_dimension_numbers<[1], [0], [0], [1], [0, 0, 1, 1], [], []>} : vector<8x128xbf16>, vector<128x128xbf16>, vector<8x128xf32> -> vector<8x128xf32>
    %243 = arith.addf %239, %242 : vector<8x128xf32>
    %244 = arith.negf %243 : vector<8x128xf32>
    %245 = math.exp %244 : vector<8x128xf32>
    %cst_134 = arith.constant 1.000000e+00 : f32
    %246 = vector.broadcast %cst_134 : f32 to vector<8x128xf32>
    %247 = arith.addf %246, %245 : vector<8x128xf32>
    %248 = arith.divf %246, %247 : vector<8x128xf32>
    %249 = arith.mulf %248, %216 : vector<8x128xf32>
    %250 = arith.index_cast %c4_i32 : i32 to index
    %c0_135 = arith.constant 0 : index
    %c0_136 = arith.constant 0 : index
    %251 = vector.load %arg12[%250, %c0_135, %c0_136] : memref<8x8x512xf32, #tpu.memory_space<vmem>>, vector<1x8x128xf32>
    %252 = vector.shape_cast %251 : vector<1x8x128xf32> to vector<8x128xf32>
    %c0_137 = arith.constant 0 : index
    %c0_138 = arith.constant 0 : index
    %c0_139 = arith.constant 0 : index
    %253 = vector.load %arg4[%c0_137, %c0_138, %c0_139] : memref<2x128x512xbf16, #tpu.memory_space<vmem>>, vector<1x128x128xbf16>
    %254 = vector.shape_cast %253 : vector<1x128x128xbf16> to vector<128x128xbf16>
    %cst_140 = arith.constant dense<0.000000e+00> : vector<8x128xf32>
    %255 = tpu.matmul %236, %254, %cst_140 {dimension_numbers = #tpu.dot_dimension_numbers<[1], [0], [0], [1], [0, 0, 1, 1], [], []>} : vector<8x128xbf16>, vector<128x128xbf16>, vector<8x128xf32> -> vector<8x128xf32>
    %256 = arith.addf %252, %255 : vector<8x128xf32>
    %257 = arith.negf %256 : vector<8x128xf32>
    %258 = math.exp %257 : vector<8x128xf32>
    %cst_141 = arith.constant 1.000000e+00 : f32
    %259 = vector.broadcast %cst_141 : f32 to vector<8x128xf32>
    %260 = arith.addf %259, %258 : vector<8x128xf32>
    %261 = arith.divf %259, %260 : vector<8x128xf32>
    %262 = arith.index_cast %c4_i32 : i32 to index
    %c0_142 = arith.constant 0 : index
    %c256_143 = arith.constant 256 : index
    %263 = vector.load %arg12[%262, %c0_142, %c256_143] : memref<8x8x512xf32, #tpu.memory_space<vmem>>, vector<1x8x128xf32>
    %264 = vector.shape_cast %263 : vector<1x8x128xf32> to vector<8x128xf32>
    %c0_144 = arith.constant 0 : index
    %c0_145 = arith.constant 0 : index
    %c256_146 = arith.constant 256 : index
    %265 = vector.load %arg4[%c0_144, %c0_145, %c256_146] : memref<2x128x512xbf16, #tpu.memory_space<vmem>>, vector<1x128x128xbf16>
    %266 = vector.shape_cast %265 : vector<1x128x128xbf16> to vector<128x128xbf16>
    %cst_147 = arith.constant dense<0.000000e+00> : vector<8x128xf32>
    %267 = tpu.matmul %236, %266, %cst_147 {dimension_numbers = #tpu.dot_dimension_numbers<[1], [0], [0], [1], [0, 0, 1, 1], [], []>} : vector<8x128xbf16>, vector<128x128xbf16>, vector<8x128xf32> -> vector<8x128xf32>
    %268 = arith.addf %264, %267 : vector<8x128xf32>
    %269 = math.tanh %268 : vector<8x128xf32>
    %270 = arith.mulf %261, %269 : vector<8x128xf32>
    %271 = arith.addf %249, %270 : vector<8x128xf32>
    %272 = arith.index_cast %c4_i32 : i32 to index
    %c0_148 = arith.constant 0 : index
    %c384_149 = arith.constant 384 : index
    %273 = vector.load %arg12[%272, %c0_148, %c384_149] : memref<8x8x512xf32, #tpu.memory_space<vmem>>, vector<1x8x128xf32>
    %274 = vector.shape_cast %273 : vector<1x8x128xf32> to vector<8x128xf32>
    %c0_150 = arith.constant 0 : index
    %c0_151 = arith.constant 0 : index
    %c384_152 = arith.constant 384 : index
    %275 = vector.load %arg4[%c0_150, %c0_151, %c384_152] : memref<2x128x512xbf16, #tpu.memory_space<vmem>>, vector<1x128x128xbf16>
    %276 = vector.shape_cast %275 : vector<1x128x128xbf16> to vector<128x128xbf16>
    %cst_153 = arith.constant dense<0.000000e+00> : vector<8x128xf32>
    %277 = tpu.matmul %236, %276, %cst_153 {dimension_numbers = #tpu.dot_dimension_numbers<[1], [0], [0], [1], [0, 0, 1, 1], [], []>} : vector<8x128xbf16>, vector<128x128xbf16>, vector<8x128xf32> -> vector<8x128xf32>
    %278 = arith.addf %274, %277 : vector<8x128xf32>
    %279 = arith.negf %278 : vector<8x128xf32>
    %280 = math.exp %279 : vector<8x128xf32>
    %cst_154 = arith.constant 1.000000e+00 : f32
    %281 = vector.broadcast %cst_154 : f32 to vector<8x128xf32>
    %282 = arith.addf %281, %280 : vector<8x128xf32>
    %283 = arith.divf %281, %282 : vector<8x128xf32>
    %284 = math.tanh %271 : vector<8x128xf32>
    %285 = arith.mulf %283, %284 : vector<8x128xf32>
    %286 = arith.addi %5, %c4_i32 : i32
    %287 = arith.index_cast %286 : i32 to index
    %c0_155 = arith.constant 0 : index
    %c0_156 = arith.constant 0 : index
    %288 = vector.load %arg9[%287, %c0_155, %c0_156] : memref<8x8x128xf32, #tpu.memory_space<vmem>>, vector<1x8x128xf32>
    %289 = vector.shape_cast %288 : vector<1x8x128xf32> to vector<8x128xf32>
    %290 = vector.shape_cast %285 : vector<8x128xf32> to vector<1x8x128xf32>
    tpu.vector_store %arg9[%287, %c0_155, %c0_156], %290 {strides = array<i32>} : memref<8x8x128xf32, #tpu.memory_space<vmem>>, vector<1x8x128xf32>,
    %c5_i32 = arith.constant 5 : i32
    %291 = arith.truncf %285 : vector<8x128xf32> to vector<8x128xbf16>
    %292 = arith.index_cast %c5_i32 : i32 to index
    %c0_157 = arith.constant 0 : index
    %c128_158 = arith.constant 128 : index
    %293 = vector.load %arg12[%292, %c0_157, %c128_158] : memref<8x8x512xf32, #tpu.memory_space<vmem>>, vector<1x8x128xf32>
    %294 = vector.shape_cast %293 : vector<1x8x128xf32> to vector<8x128xf32>
    %c0_159 = arith.constant 0 : index
    %c0_160 = arith.constant 0 : index
    %c128_161 = arith.constant 128 : index
    %295 = vector.load %arg4[%c0_159, %c0_160, %c128_161] : memref<2x128x512xbf16, #tpu.memory_space<vmem>>, vector<1x128x128xbf16>
    %296 = vector.shape_cast %295 : vector<1x128x128xbf16> to vector<128x128xbf16>
    %cst_162 = arith.constant dense<0.000000e+00> : vector<8x128xf32>
    %297 = tpu.matmul %291, %296, %cst_162 {dimension_numbers = #tpu.dot_dimension_numbers<[1], [0], [0], [1], [0, 0, 1, 1], [], []>} : vector<8x128xbf16>, vector<128x128xbf16>, vector<8x128xf32> -> vector<8x128xf32>
    %298 = arith.addf %294, %297 : vector<8x128xf32>
    %299 = arith.negf %298 : vector<8x128xf32>
    %300 = math.exp %299 : vector<8x128xf32>
    %cst_163 = arith.constant 1.000000e+00 : f32
    %301 = vector.broadcast %cst_163 : f32 to vector<8x128xf32>
    %302 = arith.addf %301, %300 : vector<8x128xf32>
    %303 = arith.divf %301, %302 : vector<8x128xf32>
    %304 = arith.mulf %303, %271 : vector<8x128xf32>
    %305 = arith.index_cast %c5_i32 : i32 to index
    %c0_164 = arith.constant 0 : index
    %c0_165 = arith.constant 0 : index
    %306 = vector.load %arg12[%305, %c0_164, %c0_165] : memref<8x8x512xf32, #tpu.memory_space<vmem>>, vector<1x8x128xf32>
    %307 = vector.shape_cast %306 : vector<1x8x128xf32> to vector<8x128xf32>
    %c0_166 = arith.constant 0 : index
    %c0_167 = arith.constant 0 : index
    %c0_168 = arith.constant 0 : index
    %308 = vector.load %arg4[%c0_166, %c0_167, %c0_168] : memref<2x128x512xbf16, #tpu.memory_space<vmem>>, vector<1x128x128xbf16>
    %309 = vector.shape_cast %308 : vector<1x128x128xbf16> to vector<128x128xbf16>
    %cst_169 = arith.constant dense<0.000000e+00> : vector<8x128xf32>
    %310 = tpu.matmul %291, %309, %cst_169 {dimension_numbers = #tpu.dot_dimension_numbers<[1], [0], [0], [1], [0, 0, 1, 1], [], []>} : vector<8x128xbf16>, vector<128x128xbf16>, vector<8x128xf32> -> vector<8x128xf32>
    %311 = arith.addf %307, %310 : vector<8x128xf32>
    %312 = arith.negf %311 : vector<8x128xf32>
    %313 = math.exp %312 : vector<8x128xf32>
    %cst_170 = arith.constant 1.000000e+00 : f32
    %314 = vector.broadcast %cst_170 : f32 to vector<8x128xf32>
    %315 = arith.addf %314, %313 : vector<8x128xf32>
    %316 = arith.divf %314, %315 : vector<8x128xf32>
    %317 = arith.index_cast %c5_i32 : i32 to index
    %c0_171 = arith.constant 0 : index
    %c256_172 = arith.constant 256 : index
    %318 = vector.load %arg12[%317, %c0_171, %c256_172] : memref<8x8x512xf32, #tpu.memory_space<vmem>>, vector<1x8x128xf32>
    %319 = vector.shape_cast %318 : vector<1x8x128xf32> to vector<8x128xf32>
    %c0_173 = arith.constant 0 : index
    %c0_174 = arith.constant 0 : index
    %c256_175 = arith.constant 256 : index
    %320 = vector.load %arg4[%c0_173, %c0_174, %c256_175] : memref<2x128x512xbf16, #tpu.memory_space<vmem>>, vector<1x128x128xbf16>
    %321 = vector.shape_cast %320 : vector<1x128x128xbf16> to vector<128x128xbf16>
    %cst_176 = arith.constant dense<0.000000e+00> : vector<8x128xf32>
    %322 = tpu.matmul %291, %321, %cst_176 {dimension_numbers = #tpu.dot_dimension_numbers<[1], [0], [0], [1], [0, 0, 1, 1], [], []>} : vector<8x128xbf16>, vector<128x128xbf16>, vector<8x128xf32> -> vector<8x128xf32>
    %323 = arith.addf %319, %322 : vector<8x128xf32>
    %324 = math.tanh %323 : vector<8x128xf32>
    %325 = arith.mulf %316, %324 : vector<8x128xf32>
    %326 = arith.addf %304, %325 : vector<8x128xf32>
    %327 = arith.index_cast %c5_i32 : i32 to index
    %c0_177 = arith.constant 0 : index
    %c384_178 = arith.constant 384 : index
    %328 = vector.load %arg12[%327, %c0_177, %c384_178] : memref<8x8x512xf32, #tpu.memory_space<vmem>>, vector<1x8x128xf32>
    %329 = vector.shape_cast %328 : vector<1x8x128xf32> to vector<8x128xf32>
    %c0_179 = arith.constant 0 : index
    %c0_180 = arith.constant 0 : index
    %c384_181 = arith.constant 384 : index
    %330 = vector.load %arg4[%c0_179, %c0_180, %c384_181] : memref<2x128x512xbf16, #tpu.memory_space<vmem>>, vector<1x128x128xbf16>
    %331 = vector.shape_cast %330 : vector<1x128x128xbf16> to vector<128x128xbf16>
    %cst_182 = arith.constant dense<0.000000e+00> : vector<8x128xf32>
    %332 = tpu.matmul %291, %331, %cst_182 {dimension_numbers = #tpu.dot_dimension_numbers<[1], [0], [0], [1], [0, 0, 1, 1], [], []>} : vector<8x128xbf16>, vector<128x128xbf16>, vector<8x128xf32> -> vector<8x128xf32>
    %333 = arith.addf %329, %332 : vector<8x128xf32>
    %334 = arith.negf %333 : vector<8x128xf32>
    %335 = math.exp %334 : vector<8x128xf32>
    %cst_183 = arith.constant 1.000000e+00 : f32
    %336 = vector.broadcast %cst_183 : f32 to vector<8x128xf32>
    %337 = arith.addf %336, %335 : vector<8x128xf32>
    %338 = arith.divf %336, %337 : vector<8x128xf32>
    %339 = math.tanh %326 : vector<8x128xf32>
    %340 = arith.mulf %338, %339 : vector<8x128xf32>
    %341 = arith.addi %5, %c5_i32 : i32
    %342 = arith.index_cast %341 : i32 to index
    %c0_184 = arith.constant 0 : index
    %c0_185 = arith.constant 0 : index
    %343 = vector.load %arg9[%342, %c0_184, %c0_185] : memref<8x8x128xf32, #tpu.memory_space<vmem>>, vector<1x8x128xf32>
    %344 = vector.shape_cast %343 : vector<1x8x128xf32> to vector<8x128xf32>
    %345 = vector.shape_cast %340 : vector<8x128xf32> to vector<1x8x128xf32>
    tpu.vector_store %arg9[%342, %c0_184, %c0_185], %345 {strides = array<i32>} : memref<8x8x128xf32, #tpu.memory_space<vmem>>, vector<1x8x128xf32>,
    %c6_i32 = arith.constant 6 : i32
    %346 = arith.truncf %340 : vector<8x128xf32> to vector<8x128xbf16>
    %347 = arith.index_cast %c6_i32 : i32 to index
    %c0_186 = arith.constant 0 : index
    %c128_187 = arith.constant 128 : index
    %348 = vector.load %arg12[%347, %c0_186, %c128_187] : memref<8x8x512xf32, #tpu.memory_space<vmem>>, vector<1x8x128xf32>
    %349 = vector.shape_cast %348 : vector<1x8x128xf32> to vector<8x128xf32>
    %c0_188 = arith.constant 0 : index
    %c0_189 = arith.constant 0 : index
    %c128_190 = arith.constant 128 : index
    %350 = vector.load %arg4[%c0_188, %c0_189, %c128_190] : memref<2x128x512xbf16, #tpu.memory_space<vmem>>, vector<1x128x128xbf16>
    %351 = vector.shape_cast %350 : vector<1x128x128xbf16> to vector<128x128xbf16>
    %cst_191 = arith.constant dense<0.000000e+00> : vector<8x128xf32>
    %352 = tpu.matmul %346, %351, %cst_191 {dimension_numbers = #tpu.dot_dimension_numbers<[1], [0], [0], [1], [0, 0, 1, 1], [], []>} : vector<8x128xbf16>, vector<128x128xbf16>, vector<8x128xf32> -> vector<8x128xf32>
    %353 = arith.addf %349, %352 : vector<8x128xf32>
    %354 = arith.negf %353 : vector<8x128xf32>
    %355 = math.exp %354 : vector<8x128xf32>
    %cst_192 = arith.constant 1.000000e+00 : f32
    %356 = vector.broadcast %cst_192 : f32 to vector<8x128xf32>
    %357 = arith.addf %356, %355 : vector<8x128xf32>
    %358 = arith.divf %356, %357 : vector<8x128xf32>
    %359 = arith.mulf %358, %326 : vector<8x128xf32>
    %360 = arith.index_cast %c6_i32 : i32 to index
    %c0_193 = arith.constant 0 : index
    %c0_194 = arith.constant 0 : index
    %361 = vector.load %arg12[%360, %c0_193, %c0_194] : memref<8x8x512xf32, #tpu.memory_space<vmem>>, vector<1x8x128xf32>
    %362 = vector.shape_cast %361 : vector<1x8x128xf32> to vector<8x128xf32>
    %c0_195 = arith.constant 0 : index
    %c0_196 = arith.constant 0 : index
    %c0_197 = arith.constant 0 : index
    %363 = vector.load %arg4[%c0_195, %c0_196, %c0_197] : memref<2x128x512xbf16, #tpu.memory_space<vmem>>, vector<1x128x128xbf16>
    %364 = vector.shape_cast %363 : vector<1x128x128xbf16> to vector<128x128xbf16>
    %cst_198 = arith.constant dense<0.000000e+00> : vector<8x128xf32>
    %365 = tpu.matmul %346, %364, %cst_198 {dimension_numbers = #tpu.dot_dimension_numbers<[1], [0], [0], [1], [0, 0, 1, 1], [], []>} : vector<8x128xbf16>, vector<128x128xbf16>, vector<8x128xf32> -> vector<8x128xf32>
    %366 = arith.addf %362, %365 : vector<8x128xf32>
    %367 = arith.negf %366 : vector<8x128xf32>
    %368 = math.exp %367 : vector<8x128xf32>
    %cst_199 = arith.constant 1.000000e+00 : f32
    %369 = vector.broadcast %cst_199 : f32 to vector<8x128xf32>
    %370 = arith.addf %369, %368 : vector<8x128xf32>
    %371 = arith.divf %369, %370 : vector<8x128xf32>
    %372 = arith.index_cast %c6_i32 : i32 to index
    %c0_200 = arith.constant 0 : index
    %c256_201 = arith.constant 256 : index
    %373 = vector.load %arg12[%372, %c0_200, %c256_201] : memref<8x8x512xf32, #tpu.memory_space<vmem>>, vector<1x8x128xf32>
    %374 = vector.shape_cast %373 : vector<1x8x128xf32> to vector<8x128xf32>
    %c0_202 = arith.constant 0 : index
    %c0_203 = arith.constant 0 : index
    %c256_204 = arith.constant 256 : index
    %375 = vector.load %arg4[%c0_202, %c0_203, %c256_204] : memref<2x128x512xbf16, #tpu.memory_space<vmem>>, vector<1x128x128xbf16>
    %376 = vector.shape_cast %375 : vector<1x128x128xbf16> to vector<128x128xbf16>
    %cst_205 = arith.constant dense<0.000000e+00> : vector<8x128xf32>
    %377 = tpu.matmul %346, %376, %cst_205 {dimension_numbers = #tpu.dot_dimension_numbers<[1], [0], [0], [1], [0, 0, 1, 1], [], []>} : vector<8x128xbf16>, vector<128x128xbf16>, vector<8x128xf32> -> vector<8x128xf32>
    %378 = arith.addf %374, %377 : vector<8x128xf32>
    %379 = math.tanh %378 : vector<8x128xf32>
    %380 = arith.mulf %371, %379 : vector<8x128xf32>
    %381 = arith.addf %359, %380 : vector<8x128xf32>
    %382 = arith.index_cast %c6_i32 : i32 to index
    %c0_206 = arith.constant 0 : index
    %c384_207 = arith.constant 384 : index
    %383 = vector.load %arg12[%382, %c0_206, %c384_207] : memref<8x8x512xf32, #tpu.memory_space<vmem>>, vector<1x8x128xf32>
    %384 = vector.shape_cast %383 : vector<1x8x128xf32> to vector<8x128xf32>
    %c0_208 = arith.constant 0 : index
    %c0_209 = arith.constant 0 : index
    %c384_210 = arith.constant 384 : index
    %385 = vector.load %arg4[%c0_208, %c0_209, %c384_210] : memref<2x128x512xbf16, #tpu.memory_space<vmem>>, vector<1x128x128xbf16>
    %386 = vector.shape_cast %385 : vector<1x128x128xbf16> to vector<128x128xbf16>
    %cst_211 = arith.constant dense<0.000000e+00> : vector<8x128xf32>
    %387 = tpu.matmul %346, %386, %cst_211 {dimension_numbers = #tpu.dot_dimension_numbers<[1], [0], [0], [1], [0, 0, 1, 1], [], []>} : vector<8x128xbf16>, vector<128x128xbf16>, vector<8x128xf32> -> vector<8x128xf32>
    %388 = arith.addf %384, %387 : vector<8x128xf32>
    %389 = arith.negf %388 : vector<8x128xf32>
    %390 = math.exp %389 : vector<8x128xf32>
    %cst_212 = arith.constant 1.000000e+00 : f32
    %391 = vector.broadcast %cst_212 : f32 to vector<8x128xf32>
    %392 = arith.addf %391, %390 : vector<8x128xf32>
    %393 = arith.divf %391, %392 : vector<8x128xf32>
    %394 = math.tanh %381 : vector<8x128xf32>
    %395 = arith.mulf %393, %394 : vector<8x128xf32>
    %396 = arith.addi %5, %c6_i32 : i32
    %397 = arith.index_cast %396 : i32 to index
    %c0_213 = arith.constant 0 : index
    %c0_214 = arith.constant 0 : index
    %398 = vector.load %arg9[%397, %c0_213, %c0_214] : memref<8x8x128xf32, #tpu.memory_space<vmem>>, vector<1x8x128xf32>
    %399 = vector.shape_cast %398 : vector<1x8x128xf32> to vector<8x128xf32>
    %400 = vector.shape_cast %395 : vector<8x128xf32> to vector<1x8x128xf32>
    tpu.vector_store %arg9[%397, %c0_213, %c0_214], %400 {strides = array<i32>} : memref<8x8x128xf32, #tpu.memory_space<vmem>>, vector<1x8x128xf32>,
    %c7_i32 = arith.constant 7 : i32
    %401 = arith.truncf %395 : vector<8x128xf32> to vector<8x128xbf16>
    %402 = arith.index_cast %c7_i32 : i32 to index
    %c0_215 = arith.constant 0 : index
    %c128_216 = arith.constant 128 : index
    %403 = vector.load %arg12[%402, %c0_215, %c128_216] : memref<8x8x512xf32, #tpu.memory_space<vmem>>, vector<1x8x128xf32>
    %404 = vector.shape_cast %403 : vector<1x8x128xf32> to vector<8x128xf32>
    %c0_217 = arith.constant 0 : index
    %c0_218 = arith.constant 0 : index
    %c128_219 = arith.constant 128 : index
    %405 = vector.load %arg4[%c0_217, %c0_218, %c128_219] : memref<2x128x512xbf16, #tpu.memory_space<vmem>>, vector<1x128x128xbf16>
    %406 = vector.shape_cast %405 : vector<1x128x128xbf16> to vector<128x128xbf16>
    %cst_220 = arith.constant dense<0.000000e+00> : vector<8x128xf32>
    %407 = tpu.matmul %401, %406, %cst_220 {dimension_numbers = #tpu.dot_dimension_numbers<[1], [0], [0], [1], [0, 0, 1, 1], [], []>} : vector<8x128xbf16>, vector<128x128xbf16>, vector<8x128xf32> -> vector<8x128xf32>
    %408 = arith.addf %404, %407 : vector<8x128xf32>
    %409 = arith.negf %408 : vector<8x128xf32>
    %410 = math.exp %409 : vector<8x128xf32>
    %cst_221 = arith.constant 1.000000e+00 : f32
    %411 = vector.broadcast %cst_221 : f32 to vector<8x128xf32>
    %412 = arith.addf %411, %410 : vector<8x128xf32>
    %413 = arith.divf %411, %412 : vector<8x128xf32>
    %414 = arith.mulf %413, %381 : vector<8x128xf32>
    %415 = arith.index_cast %c7_i32 : i32 to index
    %c0_222 = arith.constant 0 : index
    %c0_223 = arith.constant 0 : index
    %416 = vector.load %arg12[%415, %c0_222, %c0_223] : memref<8x8x512xf32, #tpu.memory_space<vmem>>, vector<1x8x128xf32>
    %417 = vector.shape_cast %416 : vector<1x8x128xf32> to vector<8x128xf32>
    %c0_224 = arith.constant 0 : index
    %c0_225 = arith.constant 0 : index
    %c0_226 = arith.constant 0 : index
    %418 = vector.load %arg4[%c0_224, %c0_225, %c0_226] : memref<2x128x512xbf16, #tpu.memory_space<vmem>>, vector<1x128x128xbf16>
    %419 = vector.shape_cast %418 : vector<1x128x128xbf16> to vector<128x128xbf16>
    %cst_227 = arith.constant dense<0.000000e+00> : vector<8x128xf32>
    %420 = tpu.matmul %401, %419, %cst_227 {dimension_numbers = #tpu.dot_dimension_numbers<[1], [0], [0], [1], [0, 0, 1, 1], [], []>} : vector<8x128xbf16>, vector<128x128xbf16>, vector<8x128xf32> -> vector<8x128xf32>
    %421 = arith.addf %417, %420 : vector<8x128xf32>
    %422 = arith.negf %421 : vector<8x128xf32>
    %423 = math.exp %422 : vector<8x128xf32>
    %cst_228 = arith.constant 1.000000e+00 : f32
    %424 = vector.broadcast %cst_228 : f32 to vector<8x128xf32>
    %425 = arith.addf %424, %423 : vector<8x128xf32>
    %426 = arith.divf %424, %425 : vector<8x128xf32>
    %427 = arith.index_cast %c7_i32 : i32 to index
    %c0_229 = arith.constant 0 : index
    %c256_230 = arith.constant 256 : index
    %428 = vector.load %arg12[%427, %c0_229, %c256_230] : memref<8x8x512xf32, #tpu.memory_space<vmem>>, vector<1x8x128xf32>
    %429 = vector.shape_cast %428 : vector<1x8x128xf32> to vector<8x128xf32>
    %c0_231 = arith.constant 0 : index
    %c0_232 = arith.constant 0 : index
    %c256_233 = arith.constant 256 : index
    %430 = vector.load %arg4[%c0_231, %c0_232, %c256_233] : memref<2x128x512xbf16, #tpu.memory_space<vmem>>, vector<1x128x128xbf16>
    %431 = vector.shape_cast %430 : vector<1x128x128xbf16> to vector<128x128xbf16>
    %cst_234 = arith.constant dense<0.000000e+00> : vector<8x128xf32>
    %432 = tpu.matmul %401, %431, %cst_234 {dimension_numbers = #tpu.dot_dimension_numbers<[1], [0], [0], [1], [0, 0, 1, 1], [], []>} : vector<8x128xbf16>, vector<128x128xbf16>, vector<8x128xf32> -> vector<8x128xf32>
    %433 = arith.addf %429, %432 : vector<8x128xf32>
    %434 = math.tanh %433 : vector<8x128xf32>
    %435 = arith.mulf %426, %434 : vector<8x128xf32>
    %436 = arith.addf %414, %435 : vector<8x128xf32>
    %437 = arith.index_cast %c7_i32 : i32 to index
    %c0_235 = arith.constant 0 : index
    %c384_236 = arith.constant 384 : index
    %438 = vector.load %arg12[%437, %c0_235, %c384_236] : memref<8x8x512xf32, #tpu.memory_space<vmem>>, vector<1x8x128xf32>
    %439 = vector.shape_cast %438 : vector<1x8x128xf32> to vector<8x128xf32>
    %c0_237 = arith.constant 0 : index
    %c0_238 = arith.constant 0 : index
    %c384_239 = arith.constant 384 : index
    %440 = vector.load %arg4[%c0_237, %c0_238, %c384_239] : memref<2x128x512xbf16, #tpu.memory_space<vmem>>, vector<1x128x128xbf16>
    %441 = vector.shape_cast %440 : vector<1x128x128xbf16> to vector<128x128xbf16>
    %cst_240 = arith.constant dense<0.000000e+00> : vector<8x128xf32>
    %442 = tpu.matmul %401, %441, %cst_240 {dimension_numbers = #tpu.dot_dimension_numbers<[1], [0], [0], [1], [0, 0, 1, 1], [], []>} : vector<8x128xbf16>, vector<128x128xbf16>, vector<8x128xf32> -> vector<8x128xf32>
    %443 = arith.addf %439, %442 : vector<8x128xf32>
    %444 = arith.negf %443 : vector<8x128xf32>
    %445 = math.exp %444 : vector<8x128xf32>
    %cst_241 = arith.constant 1.000000e+00 : f32
    %446 = vector.broadcast %cst_241 : f32 to vector<8x128xf32>
    %447 = arith.addf %446, %445 : vector<8x128xf32>
    %448 = arith.divf %446, %447 : vector<8x128xf32>
    %449 = math.tanh %436 : vector<8x128xf32>
    %450 = arith.mulf %448, %449 : vector<8x128xf32>
    %451 = arith.addi %5, %c7_i32 : i32
    %452 = arith.index_cast %451 : i32 to index
    %c0_242 = arith.constant 0 : index
    %c0_243 = arith.constant 0 : index
    %453 = vector.load %arg9[%452, %c0_242, %c0_243] : memref<8x8x128xf32, #tpu.memory_space<vmem>>, vector<1x8x128xf32>
    %454 = vector.shape_cast %453 : vector<1x8x128xf32> to vector<8x128xf32>
    %455 = vector.shape_cast %450 : vector<8x128xf32> to vector<1x8x128xf32>
    tpu.vector_store %arg9[%452, %c0_242, %c0_243], %455 {strides = array<i32>} : memref<8x8x128xf32, #tpu.memory_space<vmem>>, vector<1x8x128xf32>,
    %c8_i32_244 = arith.constant 8 : i32
    %c1_i32_245 = arith.constant 1 : i32
    %c0_246 = arith.constant 0 : index
    %c0_247 = arith.constant 0 : index
    %c0_248 = arith.constant 0 : index
    %456 = vector.load %arg10[%c0_246, %c0_247, %c0_248] : memref<2x8x128xf32, #tpu.memory_space<vmem>>, vector<1x8x128xf32>
    %457 = vector.shape_cast %456 : vector<1x8x128xf32> to vector<8x128xf32>
    %458 = vector.shape_cast %450 : vector<8x128xf32> to vector<1x8x128xf32>
    tpu.vector_store %arg10[%c0_246, %c0_247, %c0_248], %458 {strides = array<i32>} : memref<2x8x128xf32, #tpu.memory_space<vmem>>, vector<1x8x128xf32>,
    %c0_249 = arith.constant 0 : index
    %c0_250 = arith.constant 0 : index
    %c0_251 = arith.constant 0 : index
    %459 = vector.load %arg11[%c0_249, %c0_250, %c0_251] : memref<2x8x128xf32, #tpu.memory_space<vmem>>, vector<1x8x128xf32>
    %460 = vector.shape_cast %459 : vector<1x8x128xf32> to vector<8x128xf32>
    %461 = vector.shape_cast %436 : vector<8x128xf32> to vector<1x8x128xf32>
    tpu.vector_store %arg11[%c0_249, %c0_250, %c0_251], %461 {strides = array<i32>} : memref<2x8x128xf32, #tpu.memory_space<vmem>>, vector<1x8x128xf32>,
    %c1 = arith.constant 1 : index
    %c0_252 = arith.constant 0 : index
    %c0_253 = arith.constant 0 : index
    %462 = vector.load %arg7[%c1, %c0_252, %c0_253] : memref<2x8x128xf32, #tpu.memory_space<vmem>>, vector<1x8x128xf32>
    %463 = vector.shape_cast %462 : vector<1x8x128xf32> to vector<8x128xf32>
    %c1_254 = arith.constant 1 : index
    %c0_255 = arith.constant 0 : index
    %c0_256 = arith.constant 0 : index
    %464 = vector.load %arg8[%c1_254, %c0_255, %c0_256] : memref<2x8x128xf32, #tpu.memory_space<vmem>>, vector<1x8x128xf32>
    %465 = vector.shape_cast %464 : vector<1x8x128xf32> to vector<8x128xf32>
    %c0_i32_257 = arith.constant 0 : i32
    %c8_i32_258 = arith.constant 8 : i32
    %466 = arith.muli %c0_i32_257, %c8_i32_258 : i32
    %467 = tpu.assume_multiple %466, 8 : i32
    %468 = arith.index_cast %467 : i32 to index
    %c0_259 = arith.constant 0 : index
    %c0_260 = arith.constant 0 : index
    %469 = vector.load %arg9[%468, %c0_259, %c0_260] : memref<8x8x128xf32, #tpu.memory_space<vmem>>, vector<8x8x128xf32>
    %470 = arith.truncf %469 : vector<8x8x128xf32> to vector<8x8x128xbf16>
    %c0_261 = arith.constant 0 : index
    %c0_262 = arith.constant 0 : index
    %c0_263 = arith.constant 0 : index
    %471 = vector.load %arg5[%c0_261, %c0_262, %c0_263] : memref<1x128x512xbf16, #tpu.memory_space<vmem>>, vector<1x128x512xbf16>
    %472 = vector.shape_cast %471 : vector<1x128x512xbf16> to vector<128x512xbf16>
    %c0_264 = arith.constant 0 : index
    %c0_265 = arith.constant 0 : index
    %c0_266 = arith.constant 0 : index
    %473 = vector.load %arg6[%c0_264, %c0_265, %c0_266] : memref<1x1x512xf32, #tpu.memory_space<vmem>>, vector<1x1x512xf32>
    %474 = vector.shape_cast %473 : vector<1x1x512xf32> to vector<1x512xf32>
    %475 = vector.shape_cast %470 : vector<8x8x128xbf16> to vector<64x128xbf16>
    %cst_267 = arith.constant dense<0.000000e+00> : vector<64x512xf32>
    %476 = tpu.matmul %475, %472, %cst_267 {dimension_numbers = #tpu.dot_dimension_numbers<[1], [0], [0], [1], [0, 0, 1, 1], [], []>} : vector<64x128xbf16>, vector<128x512xbf16>, vector<64x512xf32> -> vector<64x512xf32>
    %477 = vector.broadcast %474 : vector<1x512xf32> to vector<64x512xf32>
    %478 = arith.addf %476, %477 : vector<64x512xf32>
    %479 = vector.shape_cast %478 : vector<64x512xf32> to vector<8x8x512xf32>
    %c0_268 = arith.constant 0 : index
    %c0_269 = arith.constant 0 : index
    %c0_270 = arith.constant 0 : index
    %480 = vector.load %arg12[%c0_268, %c0_269, %c0_270] : memref<8x8x512xf32, #tpu.memory_space<vmem>>, vector<8x8x512xf32>
    tpu.vector_store %arg12[%c0_268, %c0_269, %c0_270], %479 {strides = array<i32>} : memref<8x8x512xf32, #tpu.memory_space<vmem>>, vector<8x8x512xf32>,
    %c0_i32_271 = arith.constant 0 : i32
    %481 = arith.truncf %463 : vector<8x128xf32> to vector<8x128xbf16>
    %482 = arith.index_cast %c0_i32_271 : i32 to index
    %c0_272 = arith.constant 0 : index
    %c128_273 = arith.constant 128 : index
    %483 = vector.load %arg12[%482, %c0_272, %c128_273] : memref<8x8x512xf32, #tpu.memory_space<vmem>>, vector<1x8x128xf32>
    %484 = vector.shape_cast %483 : vector<1x8x128xf32> to vector<8x128xf32>
    %c1_274 = arith.constant 1 : index
    %c0_275 = arith.constant 0 : index
    %c128_276 = arith.constant 128 : index
    %485 = vector.load %arg4[%c1_274, %c0_275, %c128_276] : memref<2x128x512xbf16, #tpu.memory_space<vmem>>, vector<1x128x128xbf16>
    %486 = vector.shape_cast %485 : vector<1x128x128xbf16> to vector<128x128xbf16>
    %cst_277 = arith.constant dense<0.000000e+00> : vector<8x128xf32>
    %487 = tpu.matmul %481, %486, %cst_277 {dimension_numbers = #tpu.dot_dimension_numbers<[1], [0], [0], [1], [0, 0, 1, 1], [], []>} : vector<8x128xbf16>, vector<128x128xbf16>, vector<8x128xf32> -> vector<8x128xf32>
    %488 = arith.addf %484, %487 : vector<8x128xf32>
    %489 = arith.negf %488 : vector<8x128xf32>
    %490 = math.exp %489 : vector<8x128xf32>
    %cst_278 = arith.constant 1.000000e+00 : f32
    %491 = vector.broadcast %cst_278 : f32 to vector<8x128xf32>
    %492 = arith.addf %491, %490 : vector<8x128xf32>
    %493 = arith.divf %491, %492 : vector<8x128xf32>
    %494 = arith.mulf %493, %465 : vector<8x128xf32>
    %495 = arith.index_cast %c0_i32_271 : i32 to index
    %c0_279 = arith.constant 0 : index
    %c0_280 = arith.constant 0 : index
    %496 = vector.load %arg12[%495, %c0_279, %c0_280] : memref<8x8x512xf32, #tpu.memory_space<vmem>>, vector<1x8x128xf32>
    %497 = vector.shape_cast %496 : vector<1x8x128xf32> to vector<8x128xf32>
    %c1_281 = arith.constant 1 : index
    %c0_282 = arith.constant 0 : index
    %c0_283 = arith.constant 0 : index
    %498 = vector.load %arg4[%c1_281, %c0_282, %c0_283] : memref<2x128x512xbf16, #tpu.memory_space<vmem>>, vector<1x128x128xbf16>
    %499 = vector.shape_cast %498 : vector<1x128x128xbf16> to vector<128x128xbf16>
    %cst_284 = arith.constant dense<0.000000e+00> : vector<8x128xf32>
    %500 = tpu.matmul %481, %499, %cst_284 {dimension_numbers = #tpu.dot_dimension_numbers<[1], [0], [0], [1], [0, 0, 1, 1], [], []>} : vector<8x128xbf16>, vector<128x128xbf16>, vector<8x128xf32> -> vector<8x128xf32>
    %501 = arith.addf %497, %500 : vector<8x128xf32>
    %502 = arith.negf %501 : vector<8x128xf32>
    %503 = math.exp %502 : vector<8x128xf32>
    %cst_285 = arith.constant 1.000000e+00 : f32
    %504 = vector.broadcast %cst_285 : f32 to vector<8x128xf32>
    %505 = arith.addf %504, %503 : vector<8x128xf32>
    %506 = arith.divf %504, %505 : vector<8x128xf32>
    %507 = arith.index_cast %c0_i32_271 : i32 to index
    %c0_286 = arith.constant 0 : index
    %c256_287 = arith.constant 256 : index
    %508 = vector.load %arg12[%507, %c0_286, %c256_287] : memref<8x8x512xf32, #tpu.memory_space<vmem>>, vector<1x8x128xf32>
    %509 = vector.shape_cast %508 : vector<1x8x128xf32> to vector<8x128xf32>
    %c1_288 = arith.constant 1 : index
    %c0_289 = arith.constant 0 : index
    %c256_290 = arith.constant 256 : index
    %510 = vector.load %arg4[%c1_288, %c0_289, %c256_290] : memref<2x128x512xbf16, #tpu.memory_space<vmem>>, vector<1x128x128xbf16>
    %511 = vector.shape_cast %510 : vector<1x128x128xbf16> to vector<128x128xbf16>
    %cst_291 = arith.constant dense<0.000000e+00> : vector<8x128xf32>
    %512 = tpu.matmul %481, %511, %cst_291 {dimension_numbers = #tpu.dot_dimension_numbers<[1], [0], [0], [1], [0, 0, 1, 1], [], []>} : vector<8x128xbf16>, vector<128x128xbf16>, vector<8x128xf32> -> vector<8x128xf32>
    %513 = arith.addf %509, %512 : vector<8x128xf32>
    %514 = math.tanh %513 : vector<8x128xf32>
    %515 = arith.mulf %506, %514 : vector<8x128xf32>
    %516 = arith.addf %494, %515 : vector<8x128xf32>
    %517 = arith.index_cast %c0_i32_271 : i32 to index
    %c0_292 = arith.constant 0 : index
    %c384_293 = arith.constant 384 : index
    %518 = vector.load %arg12[%517, %c0_292, %c384_293] : memref<8x8x512xf32, #tpu.memory_space<vmem>>, vector<1x8x128xf32>
    %519 = vector.shape_cast %518 : vector<1x8x128xf32> to vector<8x128xf32>
    %c1_294 = arith.constant 1 : index
    %c0_295 = arith.constant 0 : index
    %c384_296 = arith.constant 384 : index
    %520 = vector.load %arg4[%c1_294, %c0_295, %c384_296] : memref<2x128x512xbf16, #tpu.memory_space<vmem>>, vector<1x128x128xbf16>
    %521 = vector.shape_cast %520 : vector<1x128x128xbf16> to vector<128x128xbf16>
    %cst_297 = arith.constant dense<0.000000e+00> : vector<8x128xf32>
    %522 = tpu.matmul %481, %521, %cst_297 {dimension_numbers = #tpu.dot_dimension_numbers<[1], [0], [0], [1], [0, 0, 1, 1], [], []>} : vector<8x128xbf16>, vector<128x128xbf16>, vector<8x128xf32> -> vector<8x128xf32>
    %523 = arith.addf %519, %522 : vector<8x128xf32>
    %524 = arith.negf %523 : vector<8x128xf32>
    %525 = math.exp %524 : vector<8x128xf32>
    %cst_298 = arith.constant 1.000000e+00 : f32
    %526 = vector.broadcast %cst_298 : f32 to vector<8x128xf32>
    %527 = arith.addf %526, %525 : vector<8x128xf32>
    %528 = arith.divf %526, %527 : vector<8x128xf32>
    %529 = math.tanh %516 : vector<8x128xf32>
    %530 = arith.mulf %528, %529 : vector<8x128xf32>
    %531 = arith.addi %467, %c0_i32_271 : i32
    %532 = arith.index_cast %531 : i32 to index
    %c0_299 = arith.constant 0 : index
    %c0_300 = arith.constant 0 : index
    %533 = vector.load %arg9[%532, %c0_299, %c0_300] : memref<8x8x128xf32, #tpu.memory_space<vmem>>, vector<1x8x128xf32>
    %534 = vector.shape_cast %533 : vector<1x8x128xf32> to vector<8x128xf32>
    %535 = vector.shape_cast %530 : vector<8x128xf32> to vector<1x8x128xf32>
    tpu.vector_store %arg9[%532, %c0_299, %c0_300], %535 {strides = array<i32>} : memref<8x8x128xf32, #tpu.memory_space<vmem>>, vector<1x8x128xf32>,
    %c1_i32_301 = arith.constant 1 : i32
    %536 = arith.truncf %530 : vector<8x128xf32> to vector<8x128xbf16>
    %537 = arith.index_cast %c1_i32_301 : i32 to index
    %c0_302 = arith.constant 0 : index
    %c128_303 = arith.constant 128 : index
    %538 = vector.load %arg12[%537, %c0_302, %c128_303] : memref<8x8x512xf32, #tpu.memory_space<vmem>>, vector<1x8x128xf32>
    %539 = vector.shape_cast %538 : vector<1x8x128xf32> to vector<8x128xf32>
    %c1_304 = arith.constant 1 : index
    %c0_305 = arith.constant 0 : index
    %c128_306 = arith.constant 128 : index
    %540 = vector.load %arg4[%c1_304, %c0_305, %c128_306] : memref<2x128x512xbf16, #tpu.memory_space<vmem>>, vector<1x128x128xbf16>
    %541 = vector.shape_cast %540 : vector<1x128x128xbf16> to vector<128x128xbf16>
    %cst_307 = arith.constant dense<0.000000e+00> : vector<8x128xf32>
    %542 = tpu.matmul %536, %541, %cst_307 {dimension_numbers = #tpu.dot_dimension_numbers<[1], [0], [0], [1], [0, 0, 1, 1], [], []>} : vector<8x128xbf16>, vector<128x128xbf16>, vector<8x128xf32> -> vector<8x128xf32>
    %543 = arith.addf %539, %542 : vector<8x128xf32>
    %544 = arith.negf %543 : vector<8x128xf32>
    %545 = math.exp %544 : vector<8x128xf32>
    %cst_308 = arith.constant 1.000000e+00 : f32
    %546 = vector.broadcast %cst_308 : f32 to vector<8x128xf32>
    %547 = arith.addf %546, %545 : vector<8x128xf32>
    %548 = arith.divf %546, %547 : vector<8x128xf32>
    %549 = arith.mulf %548, %516 : vector<8x128xf32>
    %550 = arith.index_cast %c1_i32_301 : i32 to index
    %c0_309 = arith.constant 0 : index
    %c0_310 = arith.constant 0 : index
    %551 = vector.load %arg12[%550, %c0_309, %c0_310] : memref<8x8x512xf32, #tpu.memory_space<vmem>>, vector<1x8x128xf32>
    %552 = vector.shape_cast %551 : vector<1x8x128xf32> to vector<8x128xf32>
    %c1_311 = arith.constant 1 : index
    %c0_312 = arith.constant 0 : index
    %c0_313 = arith.constant 0 : index
    %553 = vector.load %arg4[%c1_311, %c0_312, %c0_313] : memref<2x128x512xbf16, #tpu.memory_space<vmem>>, vector<1x128x128xbf16>
    %554 = vector.shape_cast %553 : vector<1x128x128xbf16> to vector<128x128xbf16>
    %cst_314 = arith.constant dense<0.000000e+00> : vector<8x128xf32>
    %555 = tpu.matmul %536, %554, %cst_314 {dimension_numbers = #tpu.dot_dimension_numbers<[1], [0], [0], [1], [0, 0, 1, 1], [], []>} : vector<8x128xbf16>, vector<128x128xbf16>, vector<8x128xf32> -> vector<8x128xf32>
    %556 = arith.addf %552, %555 : vector<8x128xf32>
    %557 = arith.negf %556 : vector<8x128xf32>
    %558 = math.exp %557 : vector<8x128xf32>
    %cst_315 = arith.constant 1.000000e+00 : f32
    %559 = vector.broadcast %cst_315 : f32 to vector<8x128xf32>
    %560 = arith.addf %559, %558 : vector<8x128xf32>
    %561 = arith.divf %559, %560 : vector<8x128xf32>
    %562 = arith.index_cast %c1_i32_301 : i32 to index
    %c0_316 = arith.constant 0 : index
    %c256_317 = arith.constant 256 : index
    %563 = vector.load %arg12[%562, %c0_316, %c256_317] : memref<8x8x512xf32, #tpu.memory_space<vmem>>, vector<1x8x128xf32>
    %564 = vector.shape_cast %563 : vector<1x8x128xf32> to vector<8x128xf32>
    %c1_318 = arith.constant 1 : index
    %c0_319 = arith.constant 0 : index
    %c256_320 = arith.constant 256 : index
    %565 = vector.load %arg4[%c1_318, %c0_319, %c256_320] : memref<2x128x512xbf16, #tpu.memory_space<vmem>>, vector<1x128x128xbf16>
    %566 = vector.shape_cast %565 : vector<1x128x128xbf16> to vector<128x128xbf16>
    %cst_321 = arith.constant dense<0.000000e+00> : vector<8x128xf32>
    %567 = tpu.matmul %536, %566, %cst_321 {dimension_numbers = #tpu.dot_dimension_numbers<[1], [0], [0], [1], [0, 0, 1, 1], [], []>} : vector<8x128xbf16>, vector<128x128xbf16>, vector<8x128xf32> -> vector<8x128xf32>
    %568 = arith.addf %564, %567 : vector<8x128xf32>
    %569 = math.tanh %568 : vector<8x128xf32>
    %570 = arith.mulf %561, %569 : vector<8x128xf32>
    %571 = arith.addf %549, %570 : vector<8x128xf32>
    %572 = arith.index_cast %c1_i32_301 : i32 to index
    %c0_322 = arith.constant 0 : index
    %c384_323 = arith.constant 384 : index
    %573 = vector.load %arg12[%572, %c0_322, %c384_323] : memref<8x8x512xf32, #tpu.memory_space<vmem>>, vector<1x8x128xf32>
    %574 = vector.shape_cast %573 : vector<1x8x128xf32> to vector<8x128xf32>
    %c1_324 = arith.constant 1 : index
    %c0_325 = arith.constant 0 : index
    %c384_326 = arith.constant 384 : index
    %575 = vector.load %arg4[%c1_324, %c0_325, %c384_326] : memref<2x128x512xbf16, #tpu.memory_space<vmem>>, vector<1x128x128xbf16>
    %576 = vector.shape_cast %575 : vector<1x128x128xbf16> to vector<128x128xbf16>
    %cst_327 = arith.constant dense<0.000000e+00> : vector<8x128xf32>
    %577 = tpu.matmul %536, %576, %cst_327 {dimension_numbers = #tpu.dot_dimension_numbers<[1], [0], [0], [1], [0, 0, 1, 1], [], []>} : vector<8x128xbf16>, vector<128x128xbf16>, vector<8x128xf32> -> vector<8x128xf32>
    %578 = arith.addf %574, %577 : vector<8x128xf32>
    %579 = arith.negf %578 : vector<8x128xf32>
    %580 = math.exp %579 : vector<8x128xf32>
    %cst_328 = arith.constant 1.000000e+00 : f32
    %581 = vector.broadcast %cst_328 : f32 to vector<8x128xf32>
    %582 = arith.addf %581, %580 : vector<8x128xf32>
    %583 = arith.divf %581, %582 : vector<8x128xf32>
    %584 = math.tanh %571 : vector<8x128xf32>
    %585 = arith.mulf %583, %584 : vector<8x128xf32>
    %586 = arith.addi %467, %c1_i32_301 : i32
    %587 = arith.index_cast %586 : i32 to index
    %c0_329 = arith.constant 0 : index
    %c0_330 = arith.constant 0 : index
    %588 = vector.load %arg9[%587, %c0_329, %c0_330] : memref<8x8x128xf32, #tpu.memory_space<vmem>>, vector<1x8x128xf32>
    %589 = vector.shape_cast %588 : vector<1x8x128xf32> to vector<8x128xf32>
    %590 = vector.shape_cast %585 : vector<8x128xf32> to vector<1x8x128xf32>
    tpu.vector_store %arg9[%587, %c0_329, %c0_330], %590 {strides = array<i32>} : memref<8x8x128xf32, #tpu.memory_space<vmem>>, vector<1x8x128xf32>,
    %c2_i32_331 = arith.constant 2 : i32
    %591 = arith.truncf %585 : vector<8x128xf32> to vector<8x128xbf16>
    %592 = arith.index_cast %c2_i32_331 : i32 to index
    %c0_332 = arith.constant 0 : index
    %c128_333 = arith.constant 128 : index
    %593 = vector.load %arg12[%592, %c0_332, %c128_333] : memref<8x8x512xf32, #tpu.memory_space<vmem>>, vector<1x8x128xf32>
    %594 = vector.shape_cast %593 : vector<1x8x128xf32> to vector<8x128xf32>
    %c1_334 = arith.constant 1 : index
    %c0_335 = arith.constant 0 : index
    %c128_336 = arith.constant 128 : index
    %595 = vector.load %arg4[%c1_334, %c0_335, %c128_336] : memref<2x128x512xbf16, #tpu.memory_space<vmem>>, vector<1x128x128xbf16>
    %596 = vector.shape_cast %595 : vector<1x128x128xbf16> to vector<128x128xbf16>
    %cst_337 = arith.constant dense<0.000000e+00> : vector<8x128xf32>
    %597 = tpu.matmul %591, %596, %cst_337 {dimension_numbers = #tpu.dot_dimension_numbers<[1], [0], [0], [1], [0, 0, 1, 1], [], []>} : vector<8x128xbf16>, vector<128x128xbf16>, vector<8x128xf32> -> vector<8x128xf32>
    %598 = arith.addf %594, %597 : vector<8x128xf32>
    %599 = arith.negf %598 : vector<8x128xf32>
    %600 = math.exp %599 : vector<8x128xf32>
    %cst_338 = arith.constant 1.000000e+00 : f32
    %601 = vector.broadcast %cst_338 : f32 to vector<8x128xf32>
    %602 = arith.addf %601, %600 : vector<8x128xf32>
    %603 = arith.divf %601, %602 : vector<8x128xf32>
    %604 = arith.mulf %603, %571 : vector<8x128xf32>
    %605 = arith.index_cast %c2_i32_331 : i32 to index
    %c0_339 = arith.constant 0 : index
    %c0_340 = arith.constant 0 : index
    %606 = vector.load %arg12[%605, %c0_339, %c0_340] : memref<8x8x512xf32, #tpu.memory_space<vmem>>, vector<1x8x128xf32>
    %607 = vector.shape_cast %606 : vector<1x8x128xf32> to vector<8x128xf32>
    %c1_341 = arith.constant 1 : index
    %c0_342 = arith.constant 0 : index
    %c0_343 = arith.constant 0 : index
    %608 = vector.load %arg4[%c1_341, %c0_342, %c0_343] : memref<2x128x512xbf16, #tpu.memory_space<vmem>>, vector<1x128x128xbf16>
    %609 = vector.shape_cast %608 : vector<1x128x128xbf16> to vector<128x128xbf16>
    %cst_344 = arith.constant dense<0.000000e+00> : vector<8x128xf32>
    %610 = tpu.matmul %591, %609, %cst_344 {dimension_numbers = #tpu.dot_dimension_numbers<[1], [0], [0], [1], [0, 0, 1, 1], [], []>} : vector<8x128xbf16>, vector<128x128xbf16>, vector<8x128xf32> -> vector<8x128xf32>
    %611 = arith.addf %607, %610 : vector<8x128xf32>
    %612 = arith.negf %611 : vector<8x128xf32>
    %613 = math.exp %612 : vector<8x128xf32>
    %cst_345 = arith.constant 1.000000e+00 : f32
    %614 = vector.broadcast %cst_345 : f32 to vector<8x128xf32>
    %615 = arith.addf %614, %613 : vector<8x128xf32>
    %616 = arith.divf %614, %615 : vector<8x128xf32>
    %617 = arith.index_cast %c2_i32_331 : i32 to index
    %c0_346 = arith.constant 0 : index
    %c256_347 = arith.constant 256 : index
    %618 = vector.load %arg12[%617, %c0_346, %c256_347] : memref<8x8x512xf32, #tpu.memory_space<vmem>>, vector<1x8x128xf32>
    %619 = vector.shape_cast %618 : vector<1x8x128xf32> to vector<8x128xf32>
    %c1_348 = arith.constant 1 : index
    %c0_349 = arith.constant 0 : index
    %c256_350 = arith.constant 256 : index
    %620 = vector.load %arg4[%c1_348, %c0_349, %c256_350] : memref<2x128x512xbf16, #tpu.memory_space<vmem>>, vector<1x128x128xbf16>
    %621 = vector.shape_cast %620 : vector<1x128x128xbf16> to vector<128x128xbf16>
    %cst_351 = arith.constant dense<0.000000e+00> : vector<8x128xf32>
    %622 = tpu.matmul %591, %621, %cst_351 {dimension_numbers = #tpu.dot_dimension_numbers<[1], [0], [0], [1], [0, 0, 1, 1], [], []>} : vector<8x128xbf16>, vector<128x128xbf16>, vector<8x128xf32> -> vector<8x128xf32>
    %623 = arith.addf %619, %622 : vector<8x128xf32>
    %624 = math.tanh %623 : vector<8x128xf32>
    %625 = arith.mulf %616, %624 : vector<8x128xf32>
    %626 = arith.addf %604, %625 : vector<8x128xf32>
    %627 = arith.index_cast %c2_i32_331 : i32 to index
    %c0_352 = arith.constant 0 : index
    %c384_353 = arith.constant 384 : index
    %628 = vector.load %arg12[%627, %c0_352, %c384_353] : memref<8x8x512xf32, #tpu.memory_space<vmem>>, vector<1x8x128xf32>
    %629 = vector.shape_cast %628 : vector<1x8x128xf32> to vector<8x128xf32>
    %c1_354 = arith.constant 1 : index
    %c0_355 = arith.constant 0 : index
    %c384_356 = arith.constant 384 : index
    %630 = vector.load %arg4[%c1_354, %c0_355, %c384_356] : memref<2x128x512xbf16, #tpu.memory_space<vmem>>, vector<1x128x128xbf16>
    %631 = vector.shape_cast %630 : vector<1x128x128xbf16> to vector<128x128xbf16>
    %cst_357 = arith.constant dense<0.000000e+00> : vector<8x128xf32>
    %632 = tpu.matmul %591, %631, %cst_357 {dimension_numbers = #tpu.dot_dimension_numbers<[1], [0], [0], [1], [0, 0, 1, 1], [], []>} : vector<8x128xbf16>, vector<128x128xbf16>, vector<8x128xf32> -> vector<8x128xf32>
    %633 = arith.addf %629, %632 : vector<8x128xf32>
    %634 = arith.negf %633 : vector<8x128xf32>
    %635 = math.exp %634 : vector<8x128xf32>
    %cst_358 = arith.constant 1.000000e+00 : f32
    %636 = vector.broadcast %cst_358 : f32 to vector<8x128xf32>
    %637 = arith.addf %636, %635 : vector<8x128xf32>
    %638 = arith.divf %636, %637 : vector<8x128xf32>
    %639 = math.tanh %626 : vector<8x128xf32>
    %640 = arith.mulf %638, %639 : vector<8x128xf32>
    %641 = arith.addi %467, %c2_i32_331 : i32
    %642 = arith.index_cast %641 : i32 to index
    %c0_359 = arith.constant 0 : index
    %c0_360 = arith.constant 0 : index
    %643 = vector.load %arg9[%642, %c0_359, %c0_360] : memref<8x8x128xf32, #tpu.memory_space<vmem>>, vector<1x8x128xf32>
    %644 = vector.shape_cast %643 : vector<1x8x128xf32> to vector<8x128xf32>
    %645 = vector.shape_cast %640 : vector<8x128xf32> to vector<1x8x128xf32>
    tpu.vector_store %arg9[%642, %c0_359, %c0_360], %645 {strides = array<i32>} : memref<8x8x128xf32, #tpu.memory_space<vmem>>, vector<1x8x128xf32>,
    %c3_i32_361 = arith.constant 3 : i32
    %646 = arith.truncf %640 : vector<8x128xf32> to vector<8x128xbf16>
    %647 = arith.index_cast %c3_i32_361 : i32 to index
    %c0_362 = arith.constant 0 : index
    %c128_363 = arith.constant 128 : index
    %648 = vector.load %arg12[%647, %c0_362, %c128_363] : memref<8x8x512xf32, #tpu.memory_space<vmem>>, vector<1x8x128xf32>
    %649 = vector.shape_cast %648 : vector<1x8x128xf32> to vector<8x128xf32>
    %c1_364 = arith.constant 1 : index
    %c0_365 = arith.constant 0 : index
    %c128_366 = arith.constant 128 : index
    %650 = vector.load %arg4[%c1_364, %c0_365, %c128_366] : memref<2x128x512xbf16, #tpu.memory_space<vmem>>, vector<1x128x128xbf16>
    %651 = vector.shape_cast %650 : vector<1x128x128xbf16> to vector<128x128xbf16>
    %cst_367 = arith.constant dense<0.000000e+00> : vector<8x128xf32>
    %652 = tpu.matmul %646, %651, %cst_367 {dimension_numbers = #tpu.dot_dimension_numbers<[1], [0], [0], [1], [0, 0, 1, 1], [], []>} : vector<8x128xbf16>, vector<128x128xbf16>, vector<8x128xf32> -> vector<8x128xf32>
    %653 = arith.addf %649, %652 : vector<8x128xf32>
    %654 = arith.negf %653 : vector<8x128xf32>
    %655 = math.exp %654 : vector<8x128xf32>
    %cst_368 = arith.constant 1.000000e+00 : f32
    %656 = vector.broadcast %cst_368 : f32 to vector<8x128xf32>
    %657 = arith.addf %656, %655 : vector<8x128xf32>
    %658 = arith.divf %656, %657 : vector<8x128xf32>
    %659 = arith.mulf %658, %626 : vector<8x128xf32>
    %660 = arith.index_cast %c3_i32_361 : i32 to index
    %c0_369 = arith.constant 0 : index
    %c0_370 = arith.constant 0 : index
    %661 = vector.load %arg12[%660, %c0_369, %c0_370] : memref<8x8x512xf32, #tpu.memory_space<vmem>>, vector<1x8x128xf32>
    %662 = vector.shape_cast %661 : vector<1x8x128xf32> to vector<8x128xf32>
    %c1_371 = arith.constant 1 : index
    %c0_372 = arith.constant 0 : index
    %c0_373 = arith.constant 0 : index
    %663 = vector.load %arg4[%c1_371, %c0_372, %c0_373] : memref<2x128x512xbf16, #tpu.memory_space<vmem>>, vector<1x128x128xbf16>
    %664 = vector.shape_cast %663 : vector<1x128x128xbf16> to vector<128x128xbf16>
    %cst_374 = arith.constant dense<0.000000e+00> : vector<8x128xf32>
    %665 = tpu.matmul %646, %664, %cst_374 {dimension_numbers = #tpu.dot_dimension_numbers<[1], [0], [0], [1], [0, 0, 1, 1], [], []>} : vector<8x128xbf16>, vector<128x128xbf16>, vector<8x128xf32> -> vector<8x128xf32>
    %666 = arith.addf %662, %665 : vector<8x128xf32>
    %667 = arith.negf %666 : vector<8x128xf32>
    %668 = math.exp %667 : vector<8x128xf32>
    %cst_375 = arith.constant 1.000000e+00 : f32
    %669 = vector.broadcast %cst_375 : f32 to vector<8x128xf32>
    %670 = arith.addf %669, %668 : vector<8x128xf32>
    %671 = arith.divf %669, %670 : vector<8x128xf32>
    %672 = arith.index_cast %c3_i32_361 : i32 to index
    %c0_376 = arith.constant 0 : index
    %c256_377 = arith.constant 256 : index
    %673 = vector.load %arg12[%672, %c0_376, %c256_377] : memref<8x8x512xf32, #tpu.memory_space<vmem>>, vector<1x8x128xf32>
    %674 = vector.shape_cast %673 : vector<1x8x128xf32> to vector<8x128xf32>
    %c1_378 = arith.constant 1 : index
    %c0_379 = arith.constant 0 : index
    %c256_380 = arith.constant 256 : index
    %675 = vector.load %arg4[%c1_378, %c0_379, %c256_380] : memref<2x128x512xbf16, #tpu.memory_space<vmem>>, vector<1x128x128xbf16>
    %676 = vector.shape_cast %675 : vector<1x128x128xbf16> to vector<128x128xbf16>
    %cst_381 = arith.constant dense<0.000000e+00> : vector<8x128xf32>
    %677 = tpu.matmul %646, %676, %cst_381 {dimension_numbers = #tpu.dot_dimension_numbers<[1], [0], [0], [1], [0, 0, 1, 1], [], []>} : vector<8x128xbf16>, vector<128x128xbf16>, vector<8x128xf32> -> vector<8x128xf32>
    %678 = arith.addf %674, %677 : vector<8x128xf32>
    %679 = math.tanh %678 : vector<8x128xf32>
    %680 = arith.mulf %671, %679 : vector<8x128xf32>
    %681 = arith.addf %659, %680 : vector<8x128xf32>
    %682 = arith.index_cast %c3_i32_361 : i32 to index
    %c0_382 = arith.constant 0 : index
    %c384_383 = arith.constant 384 : index
    %683 = vector.load %arg12[%682, %c0_382, %c384_383] : memref<8x8x512xf32, #tpu.memory_space<vmem>>, vector<1x8x128xf32>
    %684 = vector.shape_cast %683 : vector<1x8x128xf32> to vector<8x128xf32>
    %c1_384 = arith.constant 1 : index
    %c0_385 = arith.constant 0 : index
    %c384_386 = arith.constant 384 : index
    %685 = vector.load %arg4[%c1_384, %c0_385, %c384_386] : memref<2x128x512xbf16, #tpu.memory_space<vmem>>, vector<1x128x128xbf16>
    %686 = vector.shape_cast %685 : vector<1x128x128xbf16> to vector<128x128xbf16>
    %cst_387 = arith.constant dense<0.000000e+00> : vector<8x128xf32>
    %687 = tpu.matmul %646, %686, %cst_387 {dimension_numbers = #tpu.dot_dimension_numbers<[1], [0], [0], [1], [0, 0, 1, 1], [], []>} : vector<8x128xbf16>, vector<128x128xbf16>, vector<8x128xf32> -> vector<8x128xf32>
    %688 = arith.addf %684, %687 : vector<8x128xf32>
    %689 = arith.negf %688 : vector<8x128xf32>
    %690 = math.exp %689 : vector<8x128xf32>
    %cst_388 = arith.constant 1.000000e+00 : f32
    %691 = vector.broadcast %cst_388 : f32 to vector<8x128xf32>
    %692 = arith.addf %691, %690 : vector<8x128xf32>
    %693 = arith.divf %691, %692 : vector<8x128xf32>
    %694 = math.tanh %681 : vector<8x128xf32>
    %695 = arith.mulf %693, %694 : vector<8x128xf32>
    %696 = arith.addi %467, %c3_i32_361 : i32
    %697 = arith.index_cast %696 : i32 to index
    %c0_389 = arith.constant 0 : index
    %c0_390 = arith.constant 0 : index
    %698 = vector.load %arg9[%697, %c0_389, %c0_390] : memref<8x8x128xf32, #tpu.memory_space<vmem>>, vector<1x8x128xf32>
    %699 = vector.shape_cast %698 : vector<1x8x128xf32> to vector<8x128xf32>
    %700 = vector.shape_cast %695 : vector<8x128xf32> to vector<1x8x128xf32>
    tpu.vector_store %arg9[%697, %c0_389, %c0_390], %700 {strides = array<i32>} : memref<8x8x128xf32, #tpu.memory_space<vmem>>, vector<1x8x128xf32>,
    %c4_i32_391 = arith.constant 4 : i32
    %701 = arith.truncf %695 : vector<8x128xf32> to vector<8x128xbf16>
    %702 = arith.index_cast %c4_i32_391 : i32 to index
    %c0_392 = arith.constant 0 : index
    %c128_393 = arith.constant 128 : index
    %703 = vector.load %arg12[%702, %c0_392, %c128_393] : memref<8x8x512xf32, #tpu.memory_space<vmem>>, vector<1x8x128xf32>
    %704 = vector.shape_cast %703 : vector<1x8x128xf32> to vector<8x128xf32>
    %c1_394 = arith.constant 1 : index
    %c0_395 = arith.constant 0 : index
    %c128_396 = arith.constant 128 : index
    %705 = vector.load %arg4[%c1_394, %c0_395, %c128_396] : memref<2x128x512xbf16, #tpu.memory_space<vmem>>, vector<1x128x128xbf16>
    %706 = vector.shape_cast %705 : vector<1x128x128xbf16> to vector<128x128xbf16>
    %cst_397 = arith.constant dense<0.000000e+00> : vector<8x128xf32>
    %707 = tpu.matmul %701, %706, %cst_397 {dimension_numbers = #tpu.dot_dimension_numbers<[1], [0], [0], [1], [0, 0, 1, 1], [], []>} : vector<8x128xbf16>, vector<128x128xbf16>, vector<8x128xf32> -> vector<8x128xf32>
    %708 = arith.addf %704, %707 : vector<8x128xf32>
    %709 = arith.negf %708 : vector<8x128xf32>
    %710 = math.exp %709 : vector<8x128xf32>
    %cst_398 = arith.constant 1.000000e+00 : f32
    %711 = vector.broadcast %cst_398 : f32 to vector<8x128xf32>
    %712 = arith.addf %711, %710 : vector<8x128xf32>
    %713 = arith.divf %711, %712 : vector<8x128xf32>
    %714 = arith.mulf %713, %681 : vector<8x128xf32>
    %715 = arith.index_cast %c4_i32_391 : i32 to index
    %c0_399 = arith.constant 0 : index
    %c0_400 = arith.constant 0 : index
    %716 = vector.load %arg12[%715, %c0_399, %c0_400] : memref<8x8x512xf32, #tpu.memory_space<vmem>>, vector<1x8x128xf32>
    %717 = vector.shape_cast %716 : vector<1x8x128xf32> to vector<8x128xf32>
    %c1_401 = arith.constant 1 : index
    %c0_402 = arith.constant 0 : index
    %c0_403 = arith.constant 0 : index
    %718 = vector.load %arg4[%c1_401, %c0_402, %c0_403] : memref<2x128x512xbf16, #tpu.memory_space<vmem>>, vector<1x128x128xbf16>
    %719 = vector.shape_cast %718 : vector<1x128x128xbf16> to vector<128x128xbf16>
    %cst_404 = arith.constant dense<0.000000e+00> : vector<8x128xf32>
    %720 = tpu.matmul %701, %719, %cst_404 {dimension_numbers = #tpu.dot_dimension_numbers<[1], [0], [0], [1], [0, 0, 1, 1], [], []>} : vector<8x128xbf16>, vector<128x128xbf16>, vector<8x128xf32> -> vector<8x128xf32>
    %721 = arith.addf %717, %720 : vector<8x128xf32>
    %722 = arith.negf %721 : vector<8x128xf32>
    %723 = math.exp %722 : vector<8x128xf32>
    %cst_405 = arith.constant 1.000000e+00 : f32
    %724 = vector.broadcast %cst_405 : f32 to vector<8x128xf32>
    %725 = arith.addf %724, %723 : vector<8x128xf32>
    %726 = arith.divf %724, %725 : vector<8x128xf32>
    %727 = arith.index_cast %c4_i32_391 : i32 to index
    %c0_406 = arith.constant 0 : index
    %c256_407 = arith.constant 256 : index
    %728 = vector.load %arg12[%727, %c0_406, %c256_407] : memref<8x8x512xf32, #tpu.memory_space<vmem>>, vector<1x8x128xf32>
    %729 = vector.shape_cast %728 : vector<1x8x128xf32> to vector<8x128xf32>
    %c1_408 = arith.constant 1 : index
    %c0_409 = arith.constant 0 : index
    %c256_410 = arith.constant 256 : index
    %730 = vector.load %arg4[%c1_408, %c0_409, %c256_410] : memref<2x128x512xbf16, #tpu.memory_space<vmem>>, vector<1x128x128xbf16>
    %731 = vector.shape_cast %730 : vector<1x128x128xbf16> to vector<128x128xbf16>
    %cst_411 = arith.constant dense<0.000000e+00> : vector<8x128xf32>
    %732 = tpu.matmul %701, %731, %cst_411 {dimension_numbers = #tpu.dot_dimension_numbers<[1], [0], [0], [1], [0, 0, 1, 1], [], []>} : vector<8x128xbf16>, vector<128x128xbf16>, vector<8x128xf32> -> vector<8x128xf32>
    %733 = arith.addf %729, %732 : vector<8x128xf32>
    %734 = math.tanh %733 : vector<8x128xf32>
    %735 = arith.mulf %726, %734 : vector<8x128xf32>
    %736 = arith.addf %714, %735 : vector<8x128xf32>
    %737 = arith.index_cast %c4_i32_391 : i32 to index
    %c0_412 = arith.constant 0 : index
    %c384_413 = arith.constant 384 : index
    %738 = vector.load %arg12[%737, %c0_412, %c384_413] : memref<8x8x512xf32, #tpu.memory_space<vmem>>, vector<1x8x128xf32>
    %739 = vector.shape_cast %738 : vector<1x8x128xf32> to vector<8x128xf32>
    %c1_414 = arith.constant 1 : index
    %c0_415 = arith.constant 0 : index
    %c384_416 = arith.constant 384 : index
    %740 = vector.load %arg4[%c1_414, %c0_415, %c384_416] : memref<2x128x512xbf16, #tpu.memory_space<vmem>>, vector<1x128x128xbf16>
    %741 = vector.shape_cast %740 : vector<1x128x128xbf16> to vector<128x128xbf16>
    %cst_417 = arith.constant dense<0.000000e+00> : vector<8x128xf32>
    %742 = tpu.matmul %701, %741, %cst_417 {dimension_numbers = #tpu.dot_dimension_numbers<[1], [0], [0], [1], [0, 0, 1, 1], [], []>} : vector<8x128xbf16>, vector<128x128xbf16>, vector<8x128xf32> -> vector<8x128xf32>
    %743 = arith.addf %739, %742 : vector<8x128xf32>
    %744 = arith.negf %743 : vector<8x128xf32>
    %745 = math.exp %744 : vector<8x128xf32>
    %cst_418 = arith.constant 1.000000e+00 : f32
    %746 = vector.broadcast %cst_418 : f32 to vector<8x128xf32>
    %747 = arith.addf %746, %745 : vector<8x128xf32>
    %748 = arith.divf %746, %747 : vector<8x128xf32>
    %749 = math.tanh %736 : vector<8x128xf32>
    %750 = arith.mulf %748, %749 : vector<8x128xf32>
    %751 = arith.addi %467, %c4_i32_391 : i32
    %752 = arith.index_cast %751 : i32 to index
    %c0_419 = arith.constant 0 : index
    %c0_420 = arith.constant 0 : index
    %753 = vector.load %arg9[%752, %c0_419, %c0_420] : memref<8x8x128xf32, #tpu.memory_space<vmem>>, vector<1x8x128xf32>
    %754 = vector.shape_cast %753 : vector<1x8x128xf32> to vector<8x128xf32>
    %755 = vector.shape_cast %750 : vector<8x128xf32> to vector<1x8x128xf32>
    tpu.vector_store %arg9[%752, %c0_419, %c0_420], %755 {strides = array<i32>} : memref<8x8x128xf32, #tpu.memory_space<vmem>>, vector<1x8x128xf32>,
    %c5_i32_421 = arith.constant 5 : i32
    %756 = arith.truncf %750 : vector<8x128xf32> to vector<8x128xbf16>
    %757 = arith.index_cast %c5_i32_421 : i32 to index
    %c0_422 = arith.constant 0 : index
    %c128_423 = arith.constant 128 : index
    %758 = vector.load %arg12[%757, %c0_422, %c128_423] : memref<8x8x512xf32, #tpu.memory_space<vmem>>, vector<1x8x128xf32>
    %759 = vector.shape_cast %758 : vector<1x8x128xf32> to vector<8x128xf32>
    %c1_424 = arith.constant 1 : index
    %c0_425 = arith.constant 0 : index
    %c128_426 = arith.constant 128 : index
    %760 = vector.load %arg4[%c1_424, %c0_425, %c128_426] : memref<2x128x512xbf16, #tpu.memory_space<vmem>>, vector<1x128x128xbf16>
    %761 = vector.shape_cast %760 : vector<1x128x128xbf16> to vector<128x128xbf16>
    %cst_427 = arith.constant dense<0.000000e+00> : vector<8x128xf32>
    %762 = tpu.matmul %756, %761, %cst_427 {dimension_numbers = #tpu.dot_dimension_numbers<[1], [0], [0], [1], [0, 0, 1, 1], [], []>} : vector<8x128xbf16>, vector<128x128xbf16>, vector<8x128xf32> -> vector<8x128xf32>
    %763 = arith.addf %759, %762 : vector<8x128xf32>
    %764 = arith.negf %763 : vector<8x128xf32>
    %765 = math.exp %764 : vector<8x128xf32>
    %cst_428 = arith.constant 1.000000e+00 : f32
    %766 = vector.broadcast %cst_428 : f32 to vector<8x128xf32>
    %767 = arith.addf %766, %765 : vector<8x128xf32>
    %768 = arith.divf %766, %767 : vector<8x128xf32>
    %769 = arith.mulf %768, %736 : vector<8x128xf32>
    %770 = arith.index_cast %c5_i32_421 : i32 to index
    %c0_429 = arith.constant 0 : index
    %c0_430 = arith.constant 0 : index
    %771 = vector.load %arg12[%770, %c0_429, %c0_430] : memref<8x8x512xf32, #tpu.memory_space<vmem>>, vector<1x8x128xf32>
    %772 = vector.shape_cast %771 : vector<1x8x128xf32> to vector<8x128xf32>
    %c1_431 = arith.constant 1 : index
    %c0_432 = arith.constant 0 : index
    %c0_433 = arith.constant 0 : index
    %773 = vector.load %arg4[%c1_431, %c0_432, %c0_433] : memref<2x128x512xbf16, #tpu.memory_space<vmem>>, vector<1x128x128xbf16>
    %774 = vector.shape_cast %773 : vector<1x128x128xbf16> to vector<128x128xbf16>
    %cst_434 = arith.constant dense<0.000000e+00> : vector<8x128xf32>
    %775 = tpu.matmul %756, %774, %cst_434 {dimension_numbers = #tpu.dot_dimension_numbers<[1], [0], [0], [1], [0, 0, 1, 1], [], []>} : vector<8x128xbf16>, vector<128x128xbf16>, vector<8x128xf32> -> vector<8x128xf32>
    %776 = arith.addf %772, %775 : vector<8x128xf32>
    %777 = arith.negf %776 : vector<8x128xf32>
    %778 = math.exp %777 : vector<8x128xf32>
    %cst_435 = arith.constant 1.000000e+00 : f32
    %779 = vector.broadcast %cst_435 : f32 to vector<8x128xf32>
    %780 = arith.addf %779, %778 : vector<8x128xf32>
    %781 = arith.divf %779, %780 : vector<8x128xf32>
    %782 = arith.index_cast %c5_i32_421 : i32 to index
    %c0_436 = arith.constant 0 : index
    %c256_437 = arith.constant 256 : index
    %783 = vector.load %arg12[%782, %c0_436, %c256_437] : memref<8x8x512xf32, #tpu.memory_space<vmem>>, vector<1x8x128xf32>
    %784 = vector.shape_cast %783 : vector<1x8x128xf32> to vector<8x128xf32>
    %c1_438 = arith.constant 1 : index
    %c0_439 = arith.constant 0 : index
    %c256_440 = arith.constant 256 : index
    %785 = vector.load %arg4[%c1_438, %c0_439, %c256_440] : memref<2x128x512xbf16, #tpu.memory_space<vmem>>, vector<1x128x128xbf16>
    %786 = vector.shape_cast %785 : vector<1x128x128xbf16> to vector<128x128xbf16>
    %cst_441 = arith.constant dense<0.000000e+00> : vector<8x128xf32>
    %787 = tpu.matmul %756, %786, %cst_441 {dimension_numbers = #tpu.dot_dimension_numbers<[1], [0], [0], [1], [0, 0, 1, 1], [], []>} : vector<8x128xbf16>, vector<128x128xbf16>, vector<8x128xf32> -> vector<8x128xf32>
    %788 = arith.addf %784, %787 : vector<8x128xf32>
    %789 = math.tanh %788 : vector<8x128xf32>
    %790 = arith.mulf %781, %789 : vector<8x128xf32>
    %791 = arith.addf %769, %790 : vector<8x128xf32>
    %792 = arith.index_cast %c5_i32_421 : i32 to index
    %c0_442 = arith.constant 0 : index
    %c384_443 = arith.constant 384 : index
    %793 = vector.load %arg12[%792, %c0_442, %c384_443] : memref<8x8x512xf32, #tpu.memory_space<vmem>>, vector<1x8x128xf32>
    %794 = vector.shape_cast %793 : vector<1x8x128xf32> to vector<8x128xf32>
    %c1_444 = arith.constant 1 : index
    %c0_445 = arith.constant 0 : index
    %c384_446 = arith.constant 384 : index
    %795 = vector.load %arg4[%c1_444, %c0_445, %c384_446] : memref<2x128x512xbf16, #tpu.memory_space<vmem>>, vector<1x128x128xbf16>
    %796 = vector.shape_cast %795 : vector<1x128x128xbf16> to vector<128x128xbf16>
    %cst_447 = arith.constant dense<0.000000e+00> : vector<8x128xf32>
    %797 = tpu.matmul %756, %796, %cst_447 {dimension_numbers = #tpu.dot_dimension_numbers<[1], [0], [0], [1], [0, 0, 1, 1], [], []>} : vector<8x128xbf16>, vector<128x128xbf16>, vector<8x128xf32> -> vector<8x128xf32>
    %798 = arith.addf %794, %797 : vector<8x128xf32>
    %799 = arith.negf %798 : vector<8x128xf32>
    %800 = math.exp %799 : vector<8x128xf32>
    %cst_448 = arith.constant 1.000000e+00 : f32
    %801 = vector.broadcast %cst_448 : f32 to vector<8x128xf32>
    %802 = arith.addf %801, %800 : vector<8x128xf32>
    %803 = arith.divf %801, %802 : vector<8x128xf32>
    %804 = math.tanh %791 : vector<8x128xf32>
    %805 = arith.mulf %803, %804 : vector<8x128xf32>
    %806 = arith.addi %467, %c5_i32_421 : i32
    %807 = arith.index_cast %806 : i32 to index
    %c0_449 = arith.constant 0 : index
    %c0_450 = arith.constant 0 : index
    %808 = vector.load %arg9[%807, %c0_449, %c0_450] : memref<8x8x128xf32, #tpu.memory_space<vmem>>, vector<1x8x128xf32>
    %809 = vector.shape_cast %808 : vector<1x8x128xf32> to vector<8x128xf32>
    %810 = vector.shape_cast %805 : vector<8x128xf32> to vector<1x8x128xf32>
    tpu.vector_store %arg9[%807, %c0_449, %c0_450], %810 {strides = array<i32>} : memref<8x8x128xf32, #tpu.memory_space<vmem>>, vector<1x8x128xf32>,
    %c6_i32_451 = arith.constant 6 : i32
    %811 = arith.truncf %805 : vector<8x128xf32> to vector<8x128xbf16>
    %812 = arith.index_cast %c6_i32_451 : i32 to index
    %c0_452 = arith.constant 0 : index
    %c128_453 = arith.constant 128 : index
    %813 = vector.load %arg12[%812, %c0_452, %c128_453] : memref<8x8x512xf32, #tpu.memory_space<vmem>>, vector<1x8x128xf32>
    %814 = vector.shape_cast %813 : vector<1x8x128xf32> to vector<8x128xf32>
    %c1_454 = arith.constant 1 : index
    %c0_455 = arith.constant 0 : index
    %c128_456 = arith.constant 128 : index
    %815 = vector.load %arg4[%c1_454, %c0_455, %c128_456] : memref<2x128x512xbf16, #tpu.memory_space<vmem>>, vector<1x128x128xbf16>
    %816 = vector.shape_cast %815 : vector<1x128x128xbf16> to vector<128x128xbf16>
    %cst_457 = arith.constant dense<0.000000e+00> : vector<8x128xf32>
    %817 = tpu.matmul %811, %816, %cst_457 {dimension_numbers = #tpu.dot_dimension_numbers<[1], [0], [0], [1], [0, 0, 1, 1], [], []>} : vector<8x128xbf16>, vector<128x128xbf16>, vector<8x128xf32> -> vector<8x128xf32>
    %818 = arith.addf %814, %817 : vector<8x128xf32>
    %819 = arith.negf %818 : vector<8x128xf32>
    %820 = math.exp %819 : vector<8x128xf32>
    %cst_458 = arith.constant 1.000000e+00 : f32
    %821 = vector.broadcast %cst_458 : f32 to vector<8x128xf32>
    %822 = arith.addf %821, %820 : vector<8x128xf32>
    %823 = arith.divf %821, %822 : vector<8x128xf32>
    %824 = arith.mulf %823, %791 : vector<8x128xf32>
    %825 = arith.index_cast %c6_i32_451 : i32 to index
    %c0_459 = arith.constant 0 : index
    %c0_460 = arith.constant 0 : index
    %826 = vector.load %arg12[%825, %c0_459, %c0_460] : memref<8x8x512xf32, #tpu.memory_space<vmem>>, vector<1x8x128xf32>
    %827 = vector.shape_cast %826 : vector<1x8x128xf32> to vector<8x128xf32>
    %c1_461 = arith.constant 1 : index
    %c0_462 = arith.constant 0 : index
    %c0_463 = arith.constant 0 : index
    %828 = vector.load %arg4[%c1_461, %c0_462, %c0_463] : memref<2x128x512xbf16, #tpu.memory_space<vmem>>, vector<1x128x128xbf16>
    %829 = vector.shape_cast %828 : vector<1x128x128xbf16> to vector<128x128xbf16>
    %cst_464 = arith.constant dense<0.000000e+00> : vector<8x128xf32>
    %830 = tpu.matmul %811, %829, %cst_464 {dimension_numbers = #tpu.dot_dimension_numbers<[1], [0], [0], [1], [0, 0, 1, 1], [], []>} : vector<8x128xbf16>, vector<128x128xbf16>, vector<8x128xf32> -> vector<8x128xf32>
    %831 = arith.addf %827, %830 : vector<8x128xf32>
    %832 = arith.negf %831 : vector<8x128xf32>
    %833 = math.exp %832 : vector<8x128xf32>
    %cst_465 = arith.constant 1.000000e+00 : f32
    %834 = vector.broadcast %cst_465 : f32 to vector<8x128xf32>
    %835 = arith.addf %834, %833 : vector<8x128xf32>
    %836 = arith.divf %834, %835 : vector<8x128xf32>
    %837 = arith.index_cast %c6_i32_451 : i32 to index
    %c0_466 = arith.constant 0 : index
    %c256_467 = arith.constant 256 : index
    %838 = vector.load %arg12[%837, %c0_466, %c256_467] : memref<8x8x512xf32, #tpu.memory_space<vmem>>, vector<1x8x128xf32>
    %839 = vector.shape_cast %838 : vector<1x8x128xf32> to vector<8x128xf32>
    %c1_468 = arith.constant 1 : index
    %c0_469 = arith.constant 0 : index
    %c256_470 = arith.constant 256 : index
    %840 = vector.load %arg4[%c1_468, %c0_469, %c256_470] : memref<2x128x512xbf16, #tpu.memory_space<vmem>>, vector<1x128x128xbf16>
    %841 = vector.shape_cast %840 : vector<1x128x128xbf16> to vector<128x128xbf16>
    %cst_471 = arith.constant dense<0.000000e+00> : vector<8x128xf32>
    %842 = tpu.matmul %811, %841, %cst_471 {dimension_numbers = #tpu.dot_dimension_numbers<[1], [0], [0], [1], [0, 0, 1, 1], [], []>} : vector<8x128xbf16>, vector<128x128xbf16>, vector<8x128xf32> -> vector<8x128xf32>
    %843 = arith.addf %839, %842 : vector<8x128xf32>
    %844 = math.tanh %843 : vector<8x128xf32>
    %845 = arith.mulf %836, %844 : vector<8x128xf32>
    %846 = arith.addf %824, %845 : vector<8x128xf32>
    %847 = arith.index_cast %c6_i32_451 : i32 to index
    %c0_472 = arith.constant 0 : index
    %c384_473 = arith.constant 384 : index
    %848 = vector.load %arg12[%847, %c0_472, %c384_473] : memref<8x8x512xf32, #tpu.memory_space<vmem>>, vector<1x8x128xf32>
    %849 = vector.shape_cast %848 : vector<1x8x128xf32> to vector<8x128xf32>
    %c1_474 = arith.constant 1 : index
    %c0_475 = arith.constant 0 : index
    %c384_476 = arith.constant 384 : index
    %850 = vector.load %arg4[%c1_474, %c0_475, %c384_476] : memref<2x128x512xbf16, #tpu.memory_space<vmem>>, vector<1x128x128xbf16>
    %851 = vector.shape_cast %850 : vector<1x128x128xbf16> to vector<128x128xbf16>
    %cst_477 = arith.constant dense<0.000000e+00> : vector<8x128xf32>
    %852 = tpu.matmul %811, %851, %cst_477 {dimension_numbers = #tpu.dot_dimension_numbers<[1], [0], [0], [1], [0, 0, 1, 1], [], []>} : vector<8x128xbf16>, vector<128x128xbf16>, vector<8x128xf32> -> vector<8x128xf32>
    %853 = arith.addf %849, %852 : vector<8x128xf32>
    %854 = arith.negf %853 : vector<8x128xf32>
    %855 = math.exp %854 : vector<8x128xf32>
    %cst_478 = arith.constant 1.000000e+00 : f32
    %856 = vector.broadcast %cst_478 : f32 to vector<8x128xf32>
    %857 = arith.addf %856, %855 : vector<8x128xf32>
    %858 = arith.divf %856, %857 : vector<8x128xf32>
    %859 = math.tanh %846 : vector<8x128xf32>
    %860 = arith.mulf %858, %859 : vector<8x128xf32>
    %861 = arith.addi %467, %c6_i32_451 : i32
    %862 = arith.index_cast %861 : i32 to index
    %c0_479 = arith.constant 0 : index
    %c0_480 = arith.constant 0 : index
    %863 = vector.load %arg9[%862, %c0_479, %c0_480] : memref<8x8x128xf32, #tpu.memory_space<vmem>>, vector<1x8x128xf32>
    %864 = vector.shape_cast %863 : vector<1x8x128xf32> to vector<8x128xf32>
    %865 = vector.shape_cast %860 : vector<8x128xf32> to vector<1x8x128xf32>
    tpu.vector_store %arg9[%862, %c0_479, %c0_480], %865 {strides = array<i32>} : memref<8x8x128xf32, #tpu.memory_space<vmem>>, vector<1x8x128xf32>,
    %c7_i32_481 = arith.constant 7 : i32
    %866 = arith.truncf %860 : vector<8x128xf32> to vector<8x128xbf16>
    %867 = arith.index_cast %c7_i32_481 : i32 to index
    %c0_482 = arith.constant 0 : index
    %c128_483 = arith.constant 128 : index
    %868 = vector.load %arg12[%867, %c0_482, %c128_483] : memref<8x8x512xf32, #tpu.memory_space<vmem>>, vector<1x8x128xf32>
    %869 = vector.shape_cast %868 : vector<1x8x128xf32> to vector<8x128xf32>
    %c1_484 = arith.constant 1 : index
    %c0_485 = arith.constant 0 : index
    %c128_486 = arith.constant 128 : index
    %870 = vector.load %arg4[%c1_484, %c0_485, %c128_486] : memref<2x128x512xbf16, #tpu.memory_space<vmem>>, vector<1x128x128xbf16>
    %871 = vector.shape_cast %870 : vector<1x128x128xbf16> to vector<128x128xbf16>
    %cst_487 = arith.constant dense<0.000000e+00> : vector<8x128xf32>
    %872 = tpu.matmul %866, %871, %cst_487 {dimension_numbers = #tpu.dot_dimension_numbers<[1], [0], [0], [1], [0, 0, 1, 1], [], []>} : vector<8x128xbf16>, vector<128x128xbf16>, vector<8x128xf32> -> vector<8x128xf32>
    %873 = arith.addf %869, %872 : vector<8x128xf32>
    %874 = arith.negf %873 : vector<8x128xf32>
    %875 = math.exp %874 : vector<8x128xf32>
    %cst_488 = arith.constant 1.000000e+00 : f32
    %876 = vector.broadcast %cst_488 : f32 to vector<8x128xf32>
    %877 = arith.addf %876, %875 : vector<8x128xf32>
    %878 = arith.divf %876, %877 : vector<8x128xf32>
    %879 = arith.mulf %878, %846 : vector<8x128xf32>
    %880 = arith.index_cast %c7_i32_481 : i32 to index
    %c0_489 = arith.constant 0 : index
    %c0_490 = arith.constant 0 : index
    %881 = vector.load %arg12[%880, %c0_489, %c0_490] : memref<8x8x512xf32, #tpu.memory_space<vmem>>, vector<1x8x128xf32>
    %882 = vector.shape_cast %881 : vector<1x8x128xf32> to vector<8x128xf32>
    %c1_491 = arith.constant 1 : index
    %c0_492 = arith.constant 0 : index
    %c0_493 = arith.constant 0 : index
    %883 = vector.load %arg4[%c1_491, %c0_492, %c0_493] : memref<2x128x512xbf16, #tpu.memory_space<vmem>>, vector<1x128x128xbf16>
    %884 = vector.shape_cast %883 : vector<1x128x128xbf16> to vector<128x128xbf16>
    %cst_494 = arith.constant dense<0.000000e+00> : vector<8x128xf32>
    %885 = tpu.matmul %866, %884, %cst_494 {dimension_numbers = #tpu.dot_dimension_numbers<[1], [0], [0], [1], [0, 0, 1, 1], [], []>} : vector<8x128xbf16>, vector<128x128xbf16>, vector<8x128xf32> -> vector<8x128xf32>
    %886 = arith.addf %882, %885 : vector<8x128xf32>
    %887 = arith.negf %886 : vector<8x128xf32>
    %888 = math.exp %887 : vector<8x128xf32>
    %cst_495 = arith.constant 1.000000e+00 : f32
    %889 = vector.broadcast %cst_495 : f32 to vector<8x128xf32>
    %890 = arith.addf %889, %888 : vector<8x128xf32>
    %891 = arith.divf %889, %890 : vector<8x128xf32>
    %892 = arith.index_cast %c7_i32_481 : i32 to index
    %c0_496 = arith.constant 0 : index
    %c256_497 = arith.constant 256 : index
    %893 = vector.load %arg12[%892, %c0_496, %c256_497] : memref<8x8x512xf32, #tpu.memory_space<vmem>>, vector<1x8x128xf32>
    %894 = vector.shape_cast %893 : vector<1x8x128xf32> to vector<8x128xf32>
    %c1_498 = arith.constant 1 : index
    %c0_499 = arith.constant 0 : index
    %c256_500 = arith.constant 256 : index
    %895 = vector.load %arg4[%c1_498, %c0_499, %c256_500] : memref<2x128x512xbf16, #tpu.memory_space<vmem>>, vector<1x128x128xbf16>
    %896 = vector.shape_cast %895 : vector<1x128x128xbf16> to vector<128x128xbf16>
    %cst_501 = arith.constant dense<0.000000e+00> : vector<8x128xf32>
    %897 = tpu.matmul %866, %896, %cst_501 {dimension_numbers = #tpu.dot_dimension_numbers<[1], [0], [0], [1], [0, 0, 1, 1], [], []>} : vector<8x128xbf16>, vector<128x128xbf16>, vector<8x128xf32> -> vector<8x128xf32>
    %898 = arith.addf %894, %897 : vector<8x128xf32>
    %899 = math.tanh %898 : vector<8x128xf32>
    %900 = arith.mulf %891, %899 : vector<8x128xf32>
    %901 = arith.addf %879, %900 : vector<8x128xf32>
    %902 = arith.index_cast %c7_i32_481 : i32 to index
    %c0_502 = arith.constant 0 : index
    %c384_503 = arith.constant 384 : index
    %903 = vector.load %arg12[%902, %c0_502, %c384_503] : memref<8x8x512xf32, #tpu.memory_space<vmem>>, vector<1x8x128xf32>
    %904 = vector.shape_cast %903 : vector<1x8x128xf32> to vector<8x128xf32>
    %c1_504 = arith.constant 1 : index
    %c0_505 = arith.constant 0 : index
    %c384_506 = arith.constant 384 : index
    %905 = vector.load %arg4[%c1_504, %c0_505, %c384_506] : memref<2x128x512xbf16, #tpu.memory_space<vmem>>, vector<1x128x128xbf16>
    %906 = vector.shape_cast %905 : vector<1x128x128xbf16> to vector<128x128xbf16>
    %cst_507 = arith.constant dense<0.000000e+00> : vector<8x128xf32>
    %907 = tpu.matmul %866, %906, %cst_507 {dimension_numbers = #tpu.dot_dimension_numbers<[1], [0], [0], [1], [0, 0, 1, 1], [], []>} : vector<8x128xbf16>, vector<128x128xbf16>, vector<8x128xf32> -> vector<8x128xf32>
    %908 = arith.addf %904, %907 : vector<8x128xf32>
    %909 = arith.negf %908 : vector<8x128xf32>
    %910 = math.exp %909 : vector<8x128xf32>
    %cst_508 = arith.constant 1.000000e+00 : f32
    %911 = vector.broadcast %cst_508 : f32 to vector<8x128xf32>
    %912 = arith.addf %911, %910 : vector<8x128xf32>
    %913 = arith.divf %911, %912 : vector<8x128xf32>
    %914 = math.tanh %901 : vector<8x128xf32>
    %915 = arith.mulf %913, %914 : vector<8x128xf32>
    %916 = arith.addi %467, %c7_i32_481 : i32
    %917 = arith.index_cast %916 : i32 to index
    %c0_509 = arith.constant 0 : index
    %c0_510 = arith.constant 0 : index
    %918 = vector.load %arg9[%917, %c0_509, %c0_510] : memref<8x8x128xf32, #tpu.memory_space<vmem>>, vector<1x8x128xf32>
    %919 = vector.shape_cast %918 : vector<1x8x128xf32> to vector<8x128xf32>
    %920 = vector.shape_cast %915 : vector<8x128xf32> to vector<1x8x128xf32>
    tpu.vector_store %arg9[%917, %c0_509, %c0_510], %920 {strides = array<i32>} : memref<8x8x128xf32, #tpu.memory_space<vmem>>, vector<1x8x128xf32>,
    %c8_i32_511 = arith.constant 8 : i32
    %c1_i32_512 = arith.constant 1 : i32
    %c1_513 = arith.constant 1 : index
    %c0_514 = arith.constant 0 : index
    %c0_515 = arith.constant 0 : index
    %921 = vector.load %arg10[%c1_513, %c0_514, %c0_515] : memref<2x8x128xf32, #tpu.memory_space<vmem>>, vector<1x8x128xf32>
    %922 = vector.shape_cast %921 : vector<1x8x128xf32> to vector<8x128xf32>
    %923 = vector.shape_cast %915 : vector<8x128xf32> to vector<1x8x128xf32>
    tpu.vector_store %arg10[%c1_513, %c0_514, %c0_515], %923 {strides = array<i32>} : memref<2x8x128xf32, #tpu.memory_space<vmem>>, vector<1x8x128xf32>,
    %c1_516 = arith.constant 1 : index
    %c0_517 = arith.constant 0 : index
    %c0_518 = arith.constant 0 : index
    %924 = vector.load %arg11[%c1_516, %c0_517, %c0_518] : memref<2x8x128xf32, #tpu.memory_space<vmem>>, vector<1x8x128xf32>
    %925 = vector.shape_cast %924 : vector<1x8x128xf32> to vector<8x128xf32>
    %926 = vector.shape_cast %901 : vector<8x128xf32> to vector<1x8x128xf32>
    tpu.vector_store %arg11[%c1_516, %c0_517, %c0_518], %926 {strides = array<i32>} : memref<2x8x128xf32, #tpu.memory_space<vmem>>, vector<1x8x128xf32>,
    return
  }
  func.func @transform_0(%arg0: i32) -> (i32, i32, i32) {
    %c0_i32 = arith.constant 0 : i32
    %c0_i32_0 = arith.constant 0 : i32
    %c0_i32_1 = arith.constant 0 : i32
    return %c0_i32, %arg0, %c0_i32_0 : i32, i32, i32
  }
  func.func @transform_1(%arg0: i32) -> (i32, i32) {
    %c0_i32 = arith.constant 0 : i32
    %c0_i32_0 = arith.constant 0 : i32
    %c0_i32_1 = arith.constant 0 : i32
    return %c0_i32, %c0_i32_0 : i32, i32
  }
  func.func @transform_2(%arg0: i32) -> (i32, i32) {
    %c0_i32 = arith.constant 0 : i32
    %c0_i32_0 = arith.constant 0 : i32
    %c0_i32_1 = arith.constant 0 : i32
    return %c0_i32, %c0_i32_0 : i32, i32
  }
  func.func @transform_3(%arg0: i32) -> (i32, i32, i32) {
    %c0_i32 = arith.constant 0 : i32
    %c0_i32_0 = arith.constant 0 : i32
    %c0_i32_1 = arith.constant 0 : i32
    %c0_i32_2 = arith.constant 0 : i32
    return %c0_i32, %c0_i32_0, %c0_i32_1 : i32, i32, i32
  }
  func.func @transform_4(%arg0: i32) -> (i32, i32, i32) {
    %c0_i32 = arith.constant 0 : i32
    %c0_i32_0 = arith.constant 0 : i32
    %c0_i32_1 = arith.constant 0 : i32
    %c0_i32_2 = arith.constant 0 : i32
    return %c0_i32, %c0_i32_0, %c0_i32_1 : i32, i32, i32
  }
  func.func @transform_5(%arg0: i32) -> (i32, i32, i32) {
    %c0_i32 = arith.constant 0 : i32
    %c0_i32_0 = arith.constant 0 : i32
    %c0_i32_1 = arith.constant 0 : i32
    %c0_i32_2 = arith.constant 0 : i32
    return %c0_i32, %c0_i32_0, %c0_i32_1 : i32, i32, i32
  }
  func.func @transform_6(%arg0: i32) -> (i32, i32, i32) {
    %c0_i32 = arith.constant 0 : i32
    %c0_i32_0 = arith.constant 0 : i32
    %c0_i32_1 = arith.constant 0 : i32
    return %c0_i32, %arg0, %c0_i32_0 : i32, i32, i32
  }
  func.func @transform_7(%arg0: i32) -> (i32, i32, i32) {
    %c0_i32 = arith.constant 0 : i32
    %c0_i32_0 = arith.constant 0 : i32
    %c0_i32_1 = arith.constant 0 : i32
    return %c0_i32, %arg0, %c0_i32_0 : i32, i32, i32
  }
  func.func @transform_8(%arg0: i32) -> (i32, i32, i32) {
    %c0_i32 = arith.constant 0 : i32
    %c0_i32_0 = arith.constant 0 : i32
    %c0_i32_1 = arith.constant 0 : i32
    return %c0_i32, %arg0, %c0_i32_0 : i32, i32, i32
  }
  func.func @transform_9(%arg0: i32) -> (i32, i32, i32) {
    %c0_i32 = arith.constant 0 : i32
    %c0_i32_0 = arith.constant 0 : i32
    %c0_i32_1 = arith.constant 0 : i32
    return %c0_i32, %arg0, %c0_i32_0 : i32, i32, i32
  }
  func.func @transform_10(%arg0: i32) -> (i32, i32, i32) {
    %c0_i32 = arith.constant 0 : i32
    %c0_i32_0 = arith.constant 0 : i32
    %c0_i32_1 = arith.constant 0 : i32
    return %c0_i32, %arg0, %c0_i32_0 : i32, i32, i32
  }
}

</mosaic_0001>

<bundles_post_ra>
// kernel: rnn_model_forward.3
= control target key start
LH: loop header
LB: loop body
LE: loop exit
PB: predicated region body
PF: predicated region fallthrough
CT: control target
= control target key end

     0   :  { %v504_v1 = vmov 0   ;;  %v61_v45 = vlaneseq  ;;  %s792_s1 = inlined_call_operand.vmem [shape: bf16[128,512], index: 1, kind: input, shape index: {}]   ;;  %s793_s0 = inlined_call_operand.vmem [shape: f32[64,128], index: 0, kind: input, shape index: {}]   ;;  %s794_s2 = inlined_call_operand.vmem [shape: f32[1,512], index: 2, kind: input, shape index: {}]   ;;  %s795_s3 = inlined_call_operand.vmem [shape: f32[64,512], index: 3, kind: output, shape index: {}]  }
   0x1   :  { %v456_v0 = vld [vmem:[%s792_s1 + $0x4] ss:$16 sps:$4 sm:$0xff]   ;;  %273 = vmatprep.mubr.bf16.mxu0 %v504_v1  ;;  %346 = vmatprep.mubr.bf16.mxu1 %v504_v1  ;;  %v458_v2 = vld [vmem:[%s792_s1 + $0xc] ss:$16 sps:$4 sm:$0xff]   ;;  %v460_v3 = vld [vmem:[%s792_s1] ss:$16 sps:$4 sm:$0xff]  }
   0x2   :  { %241 = vmatprep.subr.bf16.mxu0 %v456_v0  ;;  %v461_v4 = vld [vmem:[%s792_s1 + $0x8] ss:$16 sps:$4 sm:$0xff]   ;;  %314 = vmatprep.subr.bf16.mxu1 %v458_v2  ;;  %v462_v5 = vld [vmem:[%s792_s1 + $0x24] ss:$16 sps:$4 sm:$0xff]   ;;  %v464_v6 = vld [vmem:[%s792_s1 + $0x2c] ss:$16 sps:$4 sm:$0xff]  }
   0x3   :  { %242 = vmatpush1.bf16.msra.mxu0 %v460_v3  ;;  %315 = vmatpush1.bf16.msra.mxu1 %v461_v4  ;;  %v466_v7 = vld [vmem:[%s792_s1 + $0x20] ss:$16 sps:$4 sm:$0xff]   ;;  %v467_v8 = vld [vmem:[%s792_s1 + $0x28] ss:$16 sps:$4 sm:$0xff]   ;;  %v468_v9 = vld [vmem:[%s792_s1 + $0x44] ss:$16 sps:$4 sm:$0xff]  }
   0x4   :  { %243 = vmatprep.subr.bf16.mxu0 %v462_v5  ;;  %316 = vmatprep.subr.bf16.mxu1 %v464_v6  ;;  %v470_v10 = vld [vmem:[%s792_s1 + $0x4c] ss:$16 sps:$4 sm:$0xff]   ;;  %v472_v11 = vld [vmem:[%s792_s1 + $0x40] ss:$16 sps:$4 sm:$0xff]   ;;  %v473_v12 = vld [vmem:[%s792_s1 + $0x48] ss:$16 sps:$4 sm:$0xff]  }
   0x5   :  { %v474_v13 = vld [vmem:[%s792_s1 + $0x64] ss:$16 sps:$4 sm:$0xff]   ;;  %v476_v14 = vld [vmem:[%s792_s1 + $0x6c] ss:$16 sps:$4 sm:$0xff]   ;;  %v478_v15 = vld [vmem:[%s792_s1 + $0x60] ss:$16 sps:$4 sm:$0xff]  }
   0x6   :  { %v479_v16 = vld [vmem:[%s792_s1 + $0x68] ss:$16 sps:$4 sm:$0xff]   ;;  %v480_v17 = vld [vmem:[%s792_s1 + $0x84] ss:$16 sps:$4 sm:$0xff]   ;;  %v482_v18 = vld [vmem:[%s792_s1 + $0x8c] ss:$16 sps:$4 sm:$0xff]  }
   0x7   :  { %244 = vmatpush1.bf16.msra.mxu0 %v466_v7  ;;  %317 = vmatpush1.bf16.msra.mxu1 %v467_v8  ;;  %v484_v19 = vld [vmem:[%s792_s1 + $0x80] ss:$16 sps:$4 sm:$0xff]   ;;  %v485_v20 = vld [vmem:[%s792_s1 + $0x88] ss:$16 sps:$4 sm:$0xff]   ;;  %v486_v21 = vld [vmem:[%s792_s1 + $0xa4] ss:$16 sps:$4 sm:$0xff]  }
   0x8   :  { %245 = vmatprep.subr.bf16.mxu0 %v468_v9  ;;  %318 = vmatprep.subr.bf16.mxu1 %v470_v10  ;;  %v488_v22 = vld [vmem:[%s792_s1 + $0xac] ss:$16 sps:$4 sm:$0xff]   ;;  %v490_v23 = vld [vmem:[%s792_s1 + $0xa0] ss:$16 sps:$4 sm:$0xff]   ;;  %v491_v24 = vld [vmem:[%s792_s1 + $0xa8] ss:$16 sps:$4 sm:$0xff]  }
   0x9   :  { %v492_v25 = vld [vmem:[%s792_s1 + $0xc4] ss:$16 sps:$4 sm:$0xff]   ;;  %v494_v26 = vld [vmem:[%s792_s1 + $0xcc] ss:$16 sps:$4 sm:$0xff]   ;;  %v496_v27 = vld [vmem:[%s792_s1 + $0xc0] ss:$16 sps:$4 sm:$0xff]  }
   0xa   :  { %v497_v28 = vld [vmem:[%s792_s1 + $0xc8] ss:$16 sps:$4 sm:$0xff]   ;;  %v498_v29 = vld [vmem:[%s792_s1 + $0xe4] ss:$16 sps:$4 sm:$0xff]   ;;  %v500_v30 = vld [vmem:[%s792_s1 + $0xec] ss:$16 sps:$4 sm:$0xff]  }
   0xb   :  { %246 = vmatpush1.bf16.msra.mxu0 %v472_v11  ;;  %319 = vmatpush1.bf16.msra.mxu1 %v473_v12  ;;  %v502_v31 = vld [vmem:[%s792_s1 + $0xe0] ss:$16 sps:$4 sm:$0xff]   ;;  %v503_v32 = vld [vmem:[%s792_s1 + $0xe8] ss:$16 sps:$4 sm:$0xff]   ;;  %v62_v46 = vshrl.u32 %v61_v45, 7 }
   0xc   :  { %247 = vmatprep.subr.bf16.mxu0 %v474_v13  ;;  %320 = vmatprep.subr.bf16.mxu1 %v476_v14  ;;  %v15_v33 = vld [vmem:[%s793_s0] sm:$0xff]  ;;  %v16_v34 = vld [vmem:[%s793_s0 + $0x8] sm:$0xff]  ;;  %v17_v36 = vld [vmem:[%s793_s0 + $0x10] sm:$0xff] }
   0xd   :  { %v23_v35 = vpack.c.bf16 %v16_v34, %v15_v33  ;;  %v18_v37 = vld [vmem:[%s793_s0 + $0x18] sm:$0xff]  ;;  %v19_v39 = vld [vmem:[%s793_s0 + $0x20] sm:$0xff]  ;;  %v20_v40 = vld [vmem:[%s793_s0 + $0x28] sm:$0xff]  ;;  %v63_v47 = vsub.s32 0, %v62_v46  ;;  %v71_v48 = vsub.s32 2, %v62_v46  ;;  %v67_v50 = vsub.s32 1, %v62_v46 }
   0xe   :  { %v24_v38 = vpack.c.bf16 %v18_v37, %v17_v36  ;;  %v25_v41 = vpack.c.bf16 %v20_v40, %v19_v39  ;;  %v21_v42 = vld [vmem:[%s793_s0 + $0x30] sm:$0xff]  ;;  %v22_v43 = vld [vmem:[%s793_s0 + $0x38] sm:$0xff]  ;;  %v59_v49 = vld [vmem:[%s794_s2] sm:$0xf]  ;;  %v75_v51 = vsub.s32 3, %v62_v46 }
   0xf   :  { %248 = vmatpush1.bf16.msra.mxu0 %v478_v15  ;;  %321 = vmatpush1.bf16.msra.mxu1 %v479_v16  ;;  %v26_v44 = vpack.c.bf16 %v22_v43, %v21_v42  ;;  %v656_v52 = vrot.slane %v59_v49, %v63_v47  ;;  %v658_v53 = vrot.slane %v59_v49, %v71_v48 }
  0x10   :  { %249 = vmatprep.subr.bf16.mxu0 %v480_v17  ;;  %322 = vmatprep.subr.bf16.mxu1 %v482_v18  ;;  %v660_v54 = vrot.slane %v59_v49, %v67_v50  ;;  %v662_v55 = vrot.slane %v59_v49, %v75_v51 }
  0x13   :  { %250 = vmatpush1.bf16.msra.mxu0 %v484_v19  ;;  %323 = vmatpush1.bf16.msra.mxu1 %v485_v20 }
  0x14   :  { %251 = vmatprep.subr.bf16.mxu0 %v486_v21  ;;  %324 = vmatprep.subr.bf16.mxu1 %v488_v22 }
  0x17   :  { %252 = vmatpush1.bf16.msra.mxu0 %v490_v23  ;;  %325 = vmatpush1.bf16.msra.mxu1 %v491_v24 }
  0x18   :  { %253 = vmatprep.subr.bf16.mxu0 %v492_v25  ;;  %326 = vmatprep.subr.bf16.mxu1 %v494_v26 }
  0x1b   :  { %254 = vmatpush1.bf16.msra.mxu0 %v496_v27  ;;  %327 = vmatpush1.bf16.msra.mxu1 %v497_v28 }
  0x1c   :  { %255 = vmatprep.subr.bf16.mxu0 %v498_v29  ;;  %328 = vmatprep.subr.bf16.mxu1 %v500_v30 }
  0x1f   :  { %256 = vmatpush1.bf16.msra.mxu0 %v502_v31  ;;  %329 = vmatpush1.bf16.msra.mxu1 %v503_v32 }
  0x22   :  { %274 = vmatmul.mubr.bf16.vlgmr.msra.gmra.mrb[0].mxu0 %v23_v35  ;;  %347 = vmatmul.mubr.bf16.vlgmr.msra.gmra.mrb[0].mxu1 %v23_v35 }
  0x23   :  { %283 = vmatprep.mubr.bf16.mxu0 %v504_v1  ;;  %356 = vmatprep.mubr.bf16.mxu1 %v504_v1 }
  0x2a   :  { %284 = vmatmul.mubr.bf16.gmra.mrb[4].mxu0 %v24_v38  ;;  %357 = vmatmul.mubr.bf16.gmra.mrb[4].mxu1 %v24_v38 }
  0x2b   :  { %293 = vmatprep.mubr.bf16.mxu0 %v504_v1  ;;  %366 = vmatprep.mubr.bf16.mxu1 %v504_v1 }
  0x32   :  { %294 = vmatmul.mubr.bf16.gmra.mrb[8].mxu0 %v25_v41  ;;  %367 = vmatmul.mubr.bf16.gmra.mrb[8].mxu1 %v25_v41 }
  0x33   :  { %303 = vmatprep.mubr.bf16.mxu0 %v504_v1  ;;  %376 = vmatprep.mubr.bf16.mxu1 %v504_v1 }
  0x3a   :  { %304 = vmatmul.mubr.bf16.gmra.mrb[12].mxu0 %v26_v44  ;;  %377 = vmatmul.mubr.bf16.gmra.mrb[12].mxu1 %v26_v44 }
  0xf5   :  { %v275_v56 = vpop.f32.mrb[0].mxu0  ;;  %v348_v57 = vpop.f32.mrb[0].mxu1 }
  0xf6   :  { %v276_v58 = vadd.f32 %v275_v56, %v656_v52  ;;  %v349_v59 = vadd.f32 %v348_v57, %v658_v53  ;;  %v277_v60 = vpop.f32.mrb[1].mxu0  ;;  %v350_v61 = vpop.f32.mrb[1].mxu1 }
  0xf7   :  { %v278_v62 = vadd.f32 %v277_v60, %v660_v54  ;;  %v351_v63 = vadd.f32 %v350_v61, %v662_v55  ;;  %v279_v0 = vpop.f32.mrb[2].mxu0  ;;  %v352_v1 = vpop.f32.mrb[2].mxu1 }
  0xf8   :  { %387 = vst [vmem:[%s795_s3] sm:$0xff] %v276_v58  ;;  %389 = vst [vmem:[%s795_s3 + $0x10] sm:$0xff] %v349_v59  ;;  %v280_v2 = vadd.f32 %v279_v0, %v656_v52  ;;  %v353_v3 = vadd.f32 %v352_v1, %v658_v53  ;;  %v281_v4 = vpop.f32.mrb[3].mxu0  ;;  %v354_v5 = vpop.f32.mrb[3].mxu1 }
  0xf9   :  { %388 = vst [vmem:[%s795_s3 + $0x8] sm:$0xff] %v278_v62  ;;  %390 = vst [vmem:[%s795_s3 + $0x18] sm:$0xff] %v351_v63  ;;  %v282_v6 = vadd.f32 %v281_v4, %v660_v54  ;;  %v355_v7 = vadd.f32 %v354_v5, %v662_v55 }
  0xfa   :  { %391 = vst [vmem:[%s795_s3 + $0x20] sm:$0xff] %v280_v2  ;;  %393 = vst [vmem:[%s795_s3 + $0x30] sm:$0xff] %v353_v3 }
  0xfb   :  { %392 = vst [vmem:[%s795_s3 + $0x28] sm:$0xff] %v282_v6  ;;  %394 = vst [vmem:[%s795_s3 + $0x38] sm:$0xff] %v355_v7 }
  0xfd   :  { %v285_v8 = vpop.f32.mrb[4].mxu0  ;;  %v358_v9 = vpop.f32.mrb[4].mxu1 }
  0xfe   :  { %v286_v10 = vadd.f32 %v285_v8, %v656_v52  ;;  %v359_v11 = vadd.f32 %v358_v9, %v658_v53  ;;  %v287_v12 = vpop.f32.mrb[5].mxu0  ;;  %v360_v13 = vpop.f32.mrb[5].mxu1 }
  0xff   :  { %v288_v14 = vadd.f32 %v287_v12, %v660_v54  ;;  %v361_v15 = vadd.f32 %v360_v13, %v662_v55  ;;  %v289_v16 = vpop.f32.mrb[6].mxu0  ;;  %v362_v17 = vpop.f32.mrb[6].mxu1 }
 0x100   :  { %395 = vst [vmem:[%s795_s3 + $0x40] sm:$0xff] %v286_v10  ;;  %397 = vst [vmem:[%s795_s3 + $0x50] sm:$0xff] %v359_v11  ;;  %v290_v18 = vadd.f32 %v289_v16, %v656_v52  ;;  %v363_v19 = vadd.f32 %v362_v17, %v658_v53  ;;  %v291_v20 = vpop.f32.mrb[7].mxu0  ;;  %v364_v21 = vpop.f32.mrb[7].mxu1 }
 0x101   :  { %396 = vst [vmem:[%s795_s3 + $0x48] sm:$0xff] %v288_v14  ;;  %398 = vst [vmem:[%s795_s3 + $0x58] sm:$0xff] %v361_v15  ;;  %v292_v22 = vadd.f32 %v291_v20, %v660_v54  ;;  %v365_v23 = vadd.f32 %v364_v21, %v662_v55 }
 0x102   :  { %399 = vst [vmem:[%s795_s3 + $0x60] sm:$0xff] %v290_v18  ;;  %401 = vst [vmem:[%s795_s3 + $0x70] sm:$0xff] %v363_v19 }
 0x103   :  { %400 = vst [vmem:[%s795_s3 + $0x68] sm:$0xff] %v292_v22  ;;  %402 = vst [vmem:[%s795_s3 + $0x78] sm:$0xff] %v365_v23 }
 0x105   :  { %v295_v24 = vpop.f32.mrb[8].mxu0  ;;  %v368_v25 = vpop.f32.mrb[8].mxu1 }
 0x106   :  { %v296_v26 = vadd.f32 %v295_v24, %v656_v52  ;;  %v369_v27 = vadd.f32 %v368_v25, %v658_v53  ;;  %v297_v28 = vpop.f32.mrb[9].mxu0  ;;  %v370_v29 = vpop.f32.mrb[9].mxu1 }
 0x107   :  { %v298_v30 = vadd.f32 %v297_v28, %v660_v54  ;;  %v371_v31 = vadd.f32 %v370_v29, %v662_v55  ;;  %v299_v32 = vpop.f32.mrb[10].mxu0  ;;  %v372_v33 = vpop.f32.mrb[10].mxu1 }
 0x108   :  { %403 = vst [vmem:[%s795_s3 + $0x80] sm:$0xff] %v296_v26  ;;  %405 = vst [vmem:[%s795_s3 + $0x90] sm:$0xff] %v369_v27  ;;  %v300_v34 = vadd.f32 %v299_v32, %v656_v52  ;;  %v373_v35 = vadd.f32 %v372_v33, %v658_v53  ;;  %v301_v36 = vpop.f32.mrb[11].mxu0  ;;  %v374_v37 = vpop.f32.mrb[11].mxu1 }
 0x109   :  { %404 = vst [vmem:[%s795_s3 + $0x88] sm:$0xff] %v298_v30  ;;  %406 = vst [vmem:[%s795_s3 + $0x98] sm:$0xff] %v371_v31  ;;  %v302_v38 = vadd.f32 %v301_v36, %v660_v54  ;;  %v375_v39 = vadd.f32 %v374_v37, %v662_v55 }
 0x10a   :  { %407 = vst [vmem:[%s795_s3 + $0xa0] sm:$0xff] %v300_v34  ;;  %409 = vst [vmem:[%s795_s3 + $0xb0] sm:$0xff] %v373_v35 }
 0x10b   :  { %408 = vst [vmem:[%s795_s3 + $0xa8] sm:$0xff] %v302_v38  ;;  %410 = vst [vmem:[%s795_s3 + $0xb8] sm:$0xff] %v375_v39 }
 0x10d   :  { %v305_v40 = vpop.f32.mrb[12].mxu0  ;;  %v378_v41 = vpop.f32.mrb[12].mxu1 }
 0x10e   :  { %v306_v42 = vadd.f32 %v305_v40, %v656_v52  ;;  %v379_v43 = vadd.f32 %v378_v41, %v658_v53  ;;  %v307_v44 = vpop.f32.mrb[13].mxu0  ;;  %v380_v45 = vpop.f32.mrb[13].mxu1 }
 0x10f   :  { %v308_v46 = vadd.f32 %v307_v44, %v660_v54  ;;  %v381_v47 = vadd.f32 %v380_v45, %v662_v55  ;;  %v309_v48 = vpop.f32.mrb[14].mxu0  ;;  %v382_v49 = vpop.f32.mrb[14].mxu1 }
 0x110   :  { %411 = vst [vmem:[%s795_s3 + $0xc0] sm:$0xff] %v306_v42  ;;  %413 = vst [vmem:[%s795_s3 + $0xd0] sm:$0xff] %v379_v43  ;;  %v310_v50 = vadd.f32 %v309_v48, %v656_v52  ;;  %v383_v51 = vadd.f32 %v382_v49, %v658_v53  ;;  %v311_v56 = vpop.f32.mrb[15].mxu0  ;;  %v384_v57 = vpop.f32.mrb[15].mxu1 }
 0x111   :  { %412 = vst [vmem:[%s795_s3 + $0xc8] sm:$0xff] %v308_v46  ;;  %414 = vst [vmem:[%s795_s3 + $0xd8] sm:$0xff] %v381_v47  ;;  %v312_v58 = vadd.f32 %v311_v56, %v660_v54  ;;  %v385_v59 = vadd.f32 %v384_v57, %v662_v55 }
 0x112   :  { %415 = vst [vmem:[%s795_s3 + $0xe0] sm:$0xff] %v310_v50  ;;  %417 = vst [vmem:[%s795_s3 + $0xf0] sm:$0xff] %v383_v51 }
 0x113   :  { %416 = vst [vmem:[%s795_s3 + $0xe8] sm:$0xff] %v312_v58  ;;  %418 = vst [vmem:[%s795_s3 + $0xf8] sm:$0xff] %v385_v59 }

// kernel: rnn_model_forward.2
= control target key start
LH: loop header
LB: loop body
LE: loop exit
PB: predicated region body
PF: predicated region fallthrough
CT: control target
= control target key end

     0   :  { %16 = vsyncpa [#allocation4], 0  ;;  %s12867_s0 = inlined_call_operand.vmem [shape: bf16[8,8,128], index: 0, kind: input, shape index: {}]   ;;  %s12868_s1 = inlined_call_operand.hbm [shape: bf16[128,512], index: 1, kind: input, shape index: {}]   ;;  %s12869_s2 = inlined_call_operand.vmem [shape: f32[1,512], index: 2, kind: input, shape index: {}]   ;;  %s12870_s3 = inlined_call_operand.hbm [shape: bf16[2,128,512], index: 3, kind: input, shape index: {}]   ;;  %s12871_s4 = inlined_call_operand.hbm [shape: bf16[1,128,512], index: 4, kind: input, shape index: {}]   ;;  %s12872_s5 = inlined_call_operand.vmem [shape: f32[1,1,512], index: 5, kind: input, shape index: {}]   ;;  %s12873_s6 = inlined_call_operand.vmem [shape: f32[2,8,128], index: 6, kind: input, shape index: {}]   ;;  %s12874_s7 = inlined_call_operand.vmem [shape: f32[2,8,128], index: 7, kind: input, shape index: {}]   ;;  %s12875_s8 = inlined_call_operand.vmem [shape: f32[8,8,128], index: 8, kind: output, shape index: {0}]   ;;  %s12876_s9 = inlined_call_operand.vmem [shape: f32[2,8,128], index: 9, kind: output, shape index: {1}]   ;;  %s12877_s10 = inlined_call_operand.vmem [shape: f32[2,8,128], index: 10, kind: output, shape index: {2}]  }
   0x1   :  { %17 = vsyncpa [#allocation6], 0  ;;  %s11650_s13 = smov [#allocation5]   ;;  %s11651_s15 = smov [#allocation3]  }
   0x2   :  { %s39_s14 = sshll.u32 %s11650_s13, 4  ;;  %s25_s16 = sshll.u32 %s11651_s15, 4  ;;  %s40_s14 = int_to_ptr.vmem [resolvable:$true] %s39_s14  ;;  %s11713_s16 = int_to_ptr.vmem [resolvable:$true] %s25_s16 }
   0x3   :  { %s11580_s19 = scalar_lea.hbm %s12870_s3, 8192 }
   0x4   :  { %p11581_p0 = scmp.ne.s32.totalorder %s12870_s3, %s11580_s19  ;;  %p11584_p1 = scmp.lt.u32.totalorder %s11580_s19, %s12870_s3 }
   0x6   :  { %p11586_p2 = pnand %p11584_p1, %p11581_p0 }
   0x8   :  { %11589 = shalt.err (!%p11586_p2)
}
   0x9   :  { %s11590_s24 = scalar_lea.vmem %s40_s14, 8192  ;;  %p11595_p4 = scmp.lt.s32.totalorder %s40_s14, %s40_s14 }
   0xa   :  { %p11591_p3 = scmp.ne.s32.totalorder %s40_s14, %s11590_s24  ;;  %p11596_p5 = scmp.lt.s32.totalorder %s11590_s24, %s11590_s24 }
   0xc   :  { %p11597_p6 = por %p11596_p5, %p11595_p4 }
   0xe   :  { %p11598_p7 = pnand %p11597_p6, %p11591_p3 }
  0x10   :  { %11601 = shalt.err (!%p11598_p7)
}
  0x11   :  { %s11652_s25 = smov 256   ;;  %s11653_s26 = smov 16  }
  0x12   :  { %45 = dma.hbm_to_vmem [thread:$0]  %s12870_s3, 8192, %s40_s14, [#allocation6], %s11652_s25, %s11652_s25, %s11653_s26  }
  0x13   :  { %s11602_s11 = scalar_lea.hbm %s12868_s1, 4096 }
  0x14   :  { %p11603_p8 = scmp.ne.s32.totalorder %s12868_s1, %s11602_s11  ;;  %p11606_p9 = scmp.lt.u32.totalorder %s11602_s11, %s12868_s1 }
  0x16   :  { %p11608_p10 = pnand %p11606_p9, %p11603_p8 }
  0x18   :  { %11611 = shalt.err (!%p11608_p10)
}
  0x19   :  { %s11612_s18 = scalar_lea.vmem %s11713_s16, 4096  ;;  %p11617_p12 = scmp.lt.s32.totalorder %s11713_s16, %s11713_s16 }
  0x1a   :  { %p11613_p11 = scmp.ne.s32.totalorder %s11713_s16, %s11612_s18  ;;  %p11618_p13 = scmp.lt.s32.totalorder %s11612_s18, %s11612_s18 }
  0x1c   :  { %p11619_p0 = por %p11618_p13, %p11617_p12 }
  0x1e   :  { %p11620_p1 = pnand %p11619_p0, %p11613_p11 }
  0x20   :  { %11623 = shalt.err (!%p11620_p1)
}
  0x21   :  { %31 = dma.hbm_to_vmem [thread:$0]  %s12868_s1, 4096, %s11713_s16, [#allocation4], %s11652_s25, %s11652_s25, %s11653_s26  }
  0x22   :  { %s11654_s19 = smov [#allocation7]   ;;  %s11624_s23 = scalar_lea.hbm %s12871_s4, 4096 }
  0x23   :  { %s51_s20 = sshll.u32 %s11654_s19, 4  ;;  %p11625_p2 = scmp.ne.s32.totalorder %s12871_s4, %s11624_s23  ;;  %s52_s20 = int_to_ptr.vmem [resolvable:$true] %s51_s20 }
  0x24   :  { %p11628_p3 = scmp.lt.u32.totalorder %s11624_s23, %s12871_s4 }
  0x26   :  { %p11630_p4 = pnand %p11628_p3, %p11625_p2 }
  0x28   :  { %11633 = shalt.err (!%p11630_p4)
}
  0x29   :  { %s11634_s30 = scalar_lea.vmem %s52_s20, 4096  ;;  %p11639_p6 = scmp.lt.s32.totalorder %s52_s20, %s52_s20 }
  0x2a   :  { %p11635_p5 = scmp.ne.s32.totalorder %s52_s20, %s11634_s30  ;;  %p11640_p7 = scmp.lt.s32.totalorder %s11634_s30, %s11634_s30 }
  0x2c   :  { %p11641_p8 = por %p11640_p7, %p11639_p6 }
  0x2e   :  { %p11642_p9 = pnand %p11641_p8, %p11635_p5 }
  0x30   :  { %11645 = shalt.err (!%p11642_p9)
}
  0x31   :  { %57 = dma.hbm_to_vmem [thread:$0]  %s12871_s4, 4096, %s52_s20, [#allocation6], %s11652_s25, %s11652_s25, %s11653_s26  }
  0x32   :  { %11646 = dma.done.wait [#allocation4], 4096  }
  0x33   :  { %11647 = vsyncadd [#allocation4], 4294963200 }
  0x34   :  { %11648 = dma.done.wait [#allocation6], 12288  }
  0x35   :  { %11649 = vsyncadd [#allocation6], 4294955008  ;;  %v11655_v0 = vmov 0   ;;  %v10712_v1 = vld [vmem:[#allocation3 + $0x4] ss:$16 sps:$4 sm:$0xff]   ;;  %v11656_v36 = vmov 0.0  }
  0x36   :  { %354 = vmatprep.mubr.bf16.mxu0 %v11655_v0  ;;  %427 = vmatprep.mubr.bf16.mxu1 %v11655_v0  ;;  %v10714_v2 = vld [vmem:[#allocation3 + $0xc] ss:$16 sps:$4 sm:$0xff]   ;;  %v10716_v3 = vld [vmem:[#allocation3] ss:$16 sps:$4 sm:$0xff]   ;;  %v10717_v4 = vld [vmem:[#allocation3 + $0x8] ss:$16 sps:$4 sm:$0xff]  }
  0x37   :  { %322 = vmatprep.subr.bf16.mxu0 %v10712_v1  ;;  %395 = vmatprep.subr.bf16.mxu1 %v10714_v2  ;;  %v10718_v5 = vld [vmem:[#allocation3 + $0x24] ss:$16 sps:$4 sm:$0xff]   ;;  %v10720_v6 = vld [vmem:[#allocation3 + $0x2c] ss:$16 sps:$4 sm:$0xff]   ;;  %v10722_v7 = vld [vmem:[#allocation3 + $0x20] ss:$16 sps:$4 sm:$0xff]  }
  0x38   :  { %323 = vmatpush1.bf16.msra.mxu0 %v10716_v3  ;;  %396 = vmatpush1.bf16.msra.mxu1 %v10717_v4  ;;  %v10723_v8 = vld [vmem:[#allocation3 + $0x28] ss:$16 sps:$4 sm:$0xff]   ;;  %v10724_v9 = vld [vmem:[#allocation3 + $0x44] ss:$16 sps:$4 sm:$0xff]   ;;  %v10726_v10 = vld [vmem:[#allocation3 + $0x4c] ss:$16 sps:$4 sm:$0xff]  }
  0x39   :  { %324 = vmatprep.subr.bf16.mxu0 %v10718_v5  ;;  %397 = vmatprep.subr.bf16.mxu1 %v10720_v6  ;;  %v10728_v11 = vld [vmem:[#allocation3 + $0x40] ss:$16 sps:$4 sm:$0xff]   ;;  %v10729_v12 = vld [vmem:[#allocation3 + $0x48] ss:$16 sps:$4 sm:$0xff]   ;;  %v10730_v13 = vld [vmem:[#allocation3 + $0x64] ss:$16 sps:$4 sm:$0xff]  }
  0x3a   :  { %v10732_v14 = vld [vmem:[#allocation3 + $0x6c] ss:$16 sps:$4 sm:$0xff]   ;;  %v10734_v15 = vld [vmem:[#allocation3 + $0x60] ss:$16 sps:$4 sm:$0xff]   ;;  %v10735_v16 = vld [vmem:[#allocation3 + $0x68] ss:$16 sps:$4 sm:$0xff]  }
  0x3b   :  { %v10736_v17 = vld [vmem:[#allocation3 + $0x84] ss:$16 sps:$4 sm:$0xff]   ;;  %v10738_v18 = vld [vmem:[#allocation3 + $0x8c] ss:$16 sps:$4 sm:$0xff]   ;;  %v10740_v19 = vld [vmem:[#allocation3 + $0x80] ss:$16 sps:$4 sm:$0xff]  }
  0x3c   :  { %325 = vmatpush1.bf16.msra.mxu0 %v10722_v7  ;;  %398 = vmatpush1.bf16.msra.mxu1 %v10723_v8  ;;  %v10741_v20 = vld [vmem:[#allocation3 + $0x88] ss:$16 sps:$4 sm:$0xff]   ;;  %v10742_v21 = vld [vmem:[#allocation3 + $0xa4] ss:$16 sps:$4 sm:$0xff]   ;;  %v10744_v22 = vld [vmem:[#allocation3 + $0xac] ss:$16 sps:$4 sm:$0xff]  }
  0x3d   :  { %326 = vmatprep.subr.bf16.mxu0 %v10724_v9  ;;  %399 = vmatprep.subr.bf16.mxu1 %v10726_v10  ;;  %v10746_v23 = vld [vmem:[#allocation3 + $0xa0] ss:$16 sps:$4 sm:$0xff]   ;;  %v10747_v24 = vld [vmem:[#allocation3 + $0xa8] ss:$16 sps:$4 sm:$0xff]   ;;  %v10748_v25 = vld [vmem:[#allocation3 + $0xc4] ss:$16 sps:$4 sm:$0xff]  }
  0x3e   :  { %v10750_v26 = vld [vmem:[#allocation3 + $0xcc] ss:$16 sps:$4 sm:$0xff]   ;;  %v10752_v27 = vld [vmem:[#allocation3 + $0xc0] ss:$16 sps:$4 sm:$0xff]   ;;  %v10753_v28 = vld [vmem:[#allocation3 + $0xc8] ss:$16 sps:$4 sm:$0xff]  }
  0x3f   :  { %v10754_v29 = vld [vmem:[#allocation3 + $0xe4] ss:$16 sps:$4 sm:$0xff]   ;;  %v10756_v30 = vld [vmem:[#allocation3 + $0xec] ss:$16 sps:$4 sm:$0xff]   ;;  %v10758_v31 = vld [vmem:[#allocation3 + $0xe0] ss:$16 sps:$4 sm:$0xff]  }
  0x40   :  { %327 = vmatpush1.bf16.msra.mxu0 %v10728_v11  ;;  %400 = vmatpush1.bf16.msra.mxu1 %v10729_v12  ;;  %v10759_v32 = vld [vmem:[#allocation3 + $0xe8] ss:$16 sps:$4 sm:$0xff]   ;;  %v10760_v33 = vld [vmem:[%s12867_s0] sm:$0xff]   ;;  %v10770_v44 = vld [vmem:[%s12867_s0 + $0x10] sm:$0xff]   ;;  %vm11657_vm0 = vmmov 0  }
  0x41   :  { %328 = vmatprep.subr.bf16.mxu0 %v10730_v13  ;;  %401 = vmatprep.subr.bf16.mxu1 %v10732_v14  ;;  %v10761_v34 = vld [vmem:[#allocation5 + $0x4] ss:$16 sps:$4 sm:$0xff]   ;;  %v10762_v35 = vld [vmem:[#allocation5] ss:$16 sps:$4 sm:$0xff]   ;;  %v10765_v39 = vld [vmem:[%s12867_s0 + $0x8] sm:$0xff]  }
  0x42   :  { %v10763_v37 = vld [vmem:[#allocation5 + $0x24] ss:$16 sps:$4 sm:$0xff]   ;;  %v10764_v38 = vld [vmem:[#allocation5 + $0x20] ss:$16 sps:$4 sm:$0xff]   ;;  %v10775_v49 = vld [vmem:[%s12867_s0 + $0x18] sm:$0xff]  }
  0x43   :  { %v10766_v40 = vld [vmem:[#allocation5 + $0x44] ss:$16 sps:$4 sm:$0xff]   ;;  %v10767_v41 = vld [vmem:[#allocation5 + $0x40] ss:$16 sps:$4 sm:$0xff]   ;;  %v10780_v55 = vld [vmem:[#allocation5 + $0x8] ss:$16 sps:$4 sm:$0xff]  }
  0x44   :  { %329 = vmatpush1.bf16.msra.mxu0 %v10734_v15  ;;  %402 = vmatpush1.bf16.msra.mxu1 %v10735_v16  ;;  %v10768_v42 = vld [vmem:[#allocation5 + $0x64] ss:$16 sps:$4 sm:$0xff]   ;;  %v10769_v43 = vld [vmem:[#allocation5 + $0x60] ss:$16 sps:$4 sm:$0xff]   ;;  %v10781_v56 = vld [vmem:[#allocation5 + $0xc] ss:$16 sps:$4 sm:$0xff]  }
  0x45   :  { %330 = vmatprep.subr.bf16.mxu0 %v10736_v17  ;;  %403 = vmatprep.subr.bf16.mxu1 %v10738_v18  ;;  %v10771_v45 = vld [vmem:[#allocation5 + $0x84] ss:$16 sps:$4 sm:$0xff]   ;;  %v10772_v46 = vld [vmem:[#allocation5 + $0x80] ss:$16 sps:$4 sm:$0xff]   ;;  %v10782_v58 = vld [vmem:[#allocation5 + $0x28] ss:$16 sps:$4 sm:$0xff]  }
  0x46   :  { %v10773_v47 = vld [vmem:[#allocation5 + $0xa4] ss:$16 sps:$4 sm:$0xff]   ;;  %v10774_v48 = vld [vmem:[#allocation5 + $0xa0] ss:$16 sps:$4 sm:$0xff]   ;;  %v10783_v59 = vld [vmem:[#allocation5 + $0x2c] ss:$16 sps:$4 sm:$0xff]  }
  0x47   :  { %v10776_v50 = vld [vmem:[#allocation5 + $0xc4] ss:$16 sps:$4 sm:$0xff]   ;;  %v10777_v51 = vld [vmem:[#allocation5 + $0xc0] ss:$16 sps:$4 sm:$0xff]   ;;  %v10784_v60 = vld [vmem:[#allocation5 + $0x48] ss:$16 sps:$4 sm:$0xff]  }
  0x48   :  { %331 = vmatpush1.bf16.msra.mxu0 %v10740_v19  ;;  %404 = vmatpush1.bf16.msra.mxu1 %v10741_v20  ;;  %v10778_v52 = vld [vmem:[#allocation5 + $0xe4] ss:$16 sps:$4 sm:$0xff]   ;;  %v10779_v53 = vld [vmem:[#allocation5 + $0xe0] ss:$16 sps:$4 sm:$0xff]   ;;  %v10785_v61 = vld [vmem:[#allocation5 + $0x4c] ss:$16 sps:$4 sm:$0xff]  }
  0x49   :  { %332 = vmatprep.subr.bf16.mxu0 %v10742_v21  ;;  %405 = vmatprep.subr.bf16.mxu1 %v10744_v22  ;;  %v74_v54 = vld [vmem:[%s12873_s6] sm:$0xff]  ;;  %v10786_v62 = vld [vmem:[#allocation5 + $0x68] ss:$16 sps:$4 sm:$0xff]   ;;  %v10787_v63 = vld [vmem:[#allocation5 + $0x6c] ss:$16 sps:$4 sm:$0xff]  }
  0x4a   :  { %v500_v57 = vpack.c.bf16 %v74_v54, %v74_v54  ;;  %v10788_v1 = vld [vmem:[#allocation5 + $0x88] ss:$16 sps:$4 sm:$0xff]   ;;  %v10789_v2 = vld [vmem:[#allocation5 + $0x8c] ss:$16 sps:$4 sm:$0xff]   ;;  %v10796_v9 = vld [vmem:[#allocation5 + $0x4] ss:$16 sps:$4 sm:$0xff]  }
  0x4b   :  { %v10790_v3 = vld [vmem:[#allocation5 + $0xa8] ss:$16 sps:$4 sm:$0xff]   ;;  %v10791_v4 = vld [vmem:[#allocation5 + $0xac] ss:$16 sps:$4 sm:$0xff]   ;;  %v10797_v10 = vld [vmem:[#allocation5] ss:$16 sps:$4 sm:$0xff]  }
  0x4c   :  { %333 = vmatpush1.bf16.msra.mxu0 %v10746_v23  ;;  %406 = vmatpush1.bf16.msra.mxu1 %v10747_v24  ;;  %v10792_v5 = vld [vmem:[#allocation5 + $0xc8] ss:$16 sps:$4 sm:$0xff]   ;;  %v10793_v6 = vld [vmem:[#allocation5 + $0xcc] ss:$16 sps:$4 sm:$0xff]   ;;  %v10798_v11 = vld [vmem:[#allocation5 + $0x24] ss:$16 sps:$4 sm:$0xff]  }
  0x4d   :  { %334 = vmatprep.subr.bf16.mxu0 %v10748_v25  ;;  %407 = vmatprep.subr.bf16.mxu1 %v10750_v26  ;;  %v10794_v7 = vld [vmem:[#allocation5 + $0xe8] ss:$16 sps:$4 sm:$0xff]   ;;  %v10795_v8 = vld [vmem:[#allocation5 + $0xec] ss:$16 sps:$4 sm:$0xff]   ;;  %v10799_v12 = vld [vmem:[#allocation5 + $0x20] ss:$16 sps:$4 sm:$0xff]   ;;  %v118_v25 = vlaneseq }
  0x4e   :  { %v10800_v13 = vld [vmem:[#allocation5 + $0x44] ss:$16 sps:$4 sm:$0xff]   ;;  %v10801_v14 = vld [vmem:[#allocation5 + $0x40] ss:$16 sps:$4 sm:$0xff]  }
  0x4f   :  { %v10802_v15 = vld [vmem:[#allocation5 + $0x64] ss:$16 sps:$4 sm:$0xff]   ;;  %v10803_v16 = vld [vmem:[#allocation5 + $0x60] ss:$16 sps:$4 sm:$0xff]   ;;  %v11850_v26 = vshrl.u32 %v118_v25, 7 }
  0x50   :  { %335 = vmatpush1.bf16.msra.mxu0 %v10752_v27  ;;  %408 = vmatpush1.bf16.msra.mxu1 %v10753_v28  ;;  %v10804_v17 = vld [vmem:[#allocation5 + $0x84] ss:$16 sps:$4 sm:$0xff]   ;;  %v10805_v18 = vld [vmem:[#allocation5 + $0x80] ss:$16 sps:$4 sm:$0xff]  }
  0x51   :  { %336 = vmatprep.subr.bf16.mxu0 %v10754_v29  ;;  %409 = vmatprep.subr.bf16.mxu1 %v10756_v30  ;;  %v10806_v19 = vld [vmem:[#allocation5 + $0xa4] ss:$16 sps:$4 sm:$0xff]   ;;  %v10807_v20 = vld [vmem:[#allocation5 + $0xa0] ss:$16 sps:$4 sm:$0xff]   ;;  %v120_v27 = vsub.s32 0, %v11850_v26  ;;  %v128_v28 = vsub.s32 2, %v11850_v26 }
  0x52   :  { %v10808_v21 = vld [vmem:[#allocation5 + $0xc4] ss:$16 sps:$4 sm:$0xff]   ;;  %v10809_v22 = vld [vmem:[#allocation5 + $0xc0] ss:$16 sps:$4 sm:$0xff]   ;;  %v124_v30 = vsub.s32 1, %v11850_v26 }
  0x53   :  { %v10810_v23 = vld [vmem:[#allocation5 + $0xe4] ss:$16 sps:$4 sm:$0xff]   ;;  %v10811_v24 = vld [vmem:[#allocation5 + $0xe0] ss:$16 sps:$4 sm:$0xff]  }
  0x54   :  { %337 = vmatpush1.bf16.msra.mxu0 %v10758_v31  ;;  %410 = vmatpush1.bf16.msra.mxu1 %v10759_v32  ;;  %v116_v29 = vld [vmem:[%s12869_s2] sm:$0xf]  ;;  %v132_v31 = vsub.s32 3, %v11850_v26 }
  0x55   :  { %9424 = vmatprep.subr.bf16.mxu0 %v11656_v36  ;;  %9444 = vmatprep.subr.bf16.mxu1 %v11656_v36  ;;  %v11861_v32 = vrot.slane %v116_v29, %v120_v27 }
  0x57   :  { %355 = vmatmul.mubr.bf16.vlgmr.msra.gmra.mrb[0].mxu0 %v10760_v33  ;;  %428 = vmatmul.mubr.bf16.vlgmr.msra.gmra.mrb[0].mxu1 %v10760_v33  ;;  %v11865_v33 = vrot.slane %v116_v29, %v128_v28 }
  0x58   :  { %9425 = vmatpush3.bf16.msra.mxu0 %v10761_v34  ;;  %9445 = vmatpush3.bf16.msra.mxu1 %v10762_v35 }
  0x59   :  { %9426 = vmatprep.subr.bf16.mxu0 %v11656_v36  ;;  %9446 = vmatprep.subr.bf16.mxu1 %v11656_v36 }
  0x5a   :  { %364 = vmatprep.mubr.bf16.mxu0 %v11655_v0  ;;  %437 = vmatprep.mubr.bf16.mxu1 %v11655_v0 }
  0x5c   :  { %9427 = vmatpush3.bf16.msra.mxu0 %v10763_v37  ;;  %9447 = vmatpush3.bf16.msra.mxu1 %v10764_v38 }
  0x5d   :  { %9428 = vmatprep.subr.bf16.mxu0 %v11656_v36  ;;  %9448 = vmatprep.subr.bf16.mxu1 %v11656_v36 }
  0x5f   :  { %365 = vmatmul.mubr.bf16.gmra.mrb[4].mxu0 %v10765_v39  ;;  %438 = vmatmul.mubr.bf16.gmra.mrb[4].mxu1 %v10765_v39  ;;  %v125_v39 = vrot.slane %v116_v29, %v124_v30 }
  0x60   :  { %9429 = vmatpush3.bf16.msra.mxu0 %v10766_v40  ;;  %9449 = vmatpush3.bf16.msra.mxu1 %v10767_v41  ;;  %v11875_v40 = vrot.slane %v116_v29, %v132_v31 }
  0x61   :  { %9430 = vmatprep.subr.bf16.mxu0 %v11656_v36  ;;  %9450 = vmatprep.subr.bf16.mxu1 %v11656_v36 }
  0x62   :  { %374 = vmatprep.mubr.bf16.mxu0 %v11655_v0  ;;  %447 = vmatprep.mubr.bf16.mxu1 %v11655_v0 }
  0x64   :  { %9431 = vmatpush3.bf16.msra.mxu0 %v10768_v42  ;;  %9451 = vmatpush3.bf16.msra.mxu1 %v10769_v43 }
  0x65   :  { %9432 = vmatprep.subr.bf16.mxu0 %v11656_v36  ;;  %9452 = vmatprep.subr.bf16.mxu1 %v11656_v36 }
  0x67   :  { %375 = vmatmul.mubr.bf16.gmra.mrb[8].mxu0 %v10770_v44  ;;  %448 = vmatmul.mubr.bf16.gmra.mrb[8].mxu1 %v10770_v44 }
  0x68   :  { %9433 = vmatpush3.bf16.msra.mxu0 %v10771_v45  ;;  %9453 = vmatpush3.bf16.msra.mxu1 %v10772_v46 }
  0x69   :  { %9434 = vmatprep.subr.bf16.mxu0 %v11656_v36  ;;  %9454 = vmatprep.subr.bf16.mxu1 %v11656_v36 }
  0x6a   :  { %384 = vmatprep.mubr.bf16.mxu0 %v11655_v0  ;;  %457 = vmatprep.mubr.bf16.mxu1 %v11655_v0 }
  0x6c   :  { %9435 = vmatpush3.bf16.msra.mxu0 %v10773_v47  ;;  %9455 = vmatpush3.bf16.msra.mxu1 %v10774_v48 }
  0x6d   :  { %9436 = vmatprep.subr.bf16.mxu0 %v11656_v36  ;;  %9456 = vmatprep.subr.bf16.mxu1 %v11656_v36 }
  0x6f   :  { %385 = vmatmul.mubr.bf16.gmra.mrb[12].mxu0 %v10775_v49  ;;  %458 = vmatmul.mubr.bf16.gmra.mrb[12].mxu1 %v10775_v49 }
  0x70   :  { %9437 = vmatpush3.bf16.msra.mxu0 %v10776_v50  ;;  %9457 = vmatpush3.bf16.msra.mxu1 %v10777_v51 }
  0x71   :  { %9438 = vmatprep.subr.bf16.mxu0 %v11656_v36  ;;  %9458 = vmatprep.subr.bf16.mxu1 %v11656_v36 }
  0x72   :  { %9440 = vmatprep.mubr.msk.bf16.mxu0 %vm11657_vm0, %v11656_v36  ;;  %9460 = vmatprep.mubr.msk.bf16.mxu1 %vm11657_vm0, %v11656_v36 }
  0x74   :  { %9439 = vmatpush3.bf16.msra.mxu0 %v10778_v52  ;;  %9459 = vmatpush3.bf16.msra.mxu1 %v10779_v53 }
  0x75   :  { %9464 = vmatprep.subr.bf16.mxu0 %v11656_v36  ;;  %9484 = vmatprep.subr.bf16.mxu1 %v11656_v36 }
  0x77   :  { %9441 = vmatmul.mubr.bf16.vlgmr.msra.gmra.mrb[16].mxu0 %v500_v57  ;;  %9461 = vmatmul.mubr.bf16.vlgmr.msra.gmra.mrb[16].mxu1 %v500_v57 }
  0x78   :  { %9465 = vmatpush3.bf16.msra.mxu0 %v10780_v55  ;;  %9485 = vmatpush3.bf16.msra.mxu1 %v10781_v56 }
  0x79   :  { %9466 = vmatprep.subr.bf16.mxu0 %v11656_v36  ;;  %9486 = vmatprep.subr.bf16.mxu1 %v11656_v36 }
  0x7a   :  { %9480 = vmatprep.mubr.msk.bf16.mxu0 %vm11657_vm0, %v11656_v36  ;;  %9500 = vmatprep.mubr.msk.bf16.mxu1 %vm11657_vm0, %v11656_v36 }
  0x7c   :  { %9467 = vmatpush3.bf16.msra.mxu0 %v10782_v58  ;;  %9487 = vmatpush3.bf16.msra.mxu1 %v10783_v59 }
  0x7d   :  { %9468 = vmatprep.subr.bf16.mxu0 %v11656_v36  ;;  %9488 = vmatprep.subr.bf16.mxu1 %v11656_v36 }
  0x80   :  { %9469 = vmatpush3.bf16.msra.mxu0 %v10784_v60  ;;  %9489 = vmatpush3.bf16.msra.mxu1 %v10785_v61 }
  0x81   :  { %9470 = vmatprep.subr.bf16.mxu0 %v11656_v36  ;;  %9490 = vmatprep.subr.bf16.mxu1 %v11656_v36 }
  0x84   :  { %9471 = vmatpush3.bf16.msra.mxu0 %v10786_v62  ;;  %9491 = vmatpush3.bf16.msra.mxu1 %v10787_v63 }
  0x85   :  { %9472 = vmatprep.subr.bf16.mxu0 %v11656_v36  ;;  %9492 = vmatprep.subr.bf16.mxu1 %v11656_v36 }
  0x88   :  { %9473 = vmatpush3.bf16.msra.mxu0 %v10788_v1  ;;  %9493 = vmatpush3.bf16.msra.mxu1 %v10789_v2 }
  0x89   :  { %9474 = vmatprep.subr.bf16.mxu0 %v11656_v36  ;;  %9494 = vmatprep.subr.bf16.mxu1 %v11656_v36 }
  0x8c   :  { %9475 = vmatpush3.bf16.msra.mxu0 %v10790_v3  ;;  %9495 = vmatpush3.bf16.msra.mxu1 %v10791_v4 }
  0x8d   :  { %9476 = vmatprep.subr.bf16.mxu0 %v11656_v36  ;;  %9496 = vmatprep.subr.bf16.mxu1 %v11656_v36 }
  0x90   :  { %9477 = vmatpush3.bf16.msra.mxu0 %v10792_v5  ;;  %9497 = vmatpush3.bf16.msra.mxu1 %v10793_v6 }
  0x91   :  { %9478 = vmatprep.subr.bf16.mxu0 %v11656_v36  ;;  %9498 = vmatprep.subr.bf16.mxu1 %v11656_v36 }
  0x94   :  { %9479 = vmatpush3.bf16.msra.mxu0 %v10794_v7  ;;  %9499 = vmatpush3.bf16.msra.mxu1 %v10795_v8 }
  0x95   :  { %9504 = vmatprep.subr.bf16.mxu0 %v11656_v36  ;;  %9524 = vmatprep.subr.bf16.mxu1 %v11656_v36 }
  0x97   :  { %9481 = vmatmul.mubr.bf16.vlgmr.msra.gmra.mrb[20].mxu0 %v500_v57  ;;  %9501 = vmatmul.mubr.bf16.vlgmr.msra.gmra.mrb[20].mxu1 %v500_v57 }
  0x98   :  { %9520 = vmatprep.mubr.msk.bf16.mxu0 %vm11657_vm0, %v11656_v36  ;;  %9540 = vmatprep.mubr.msk.bf16.mxu1 %vm11657_vm0, %v11656_v36 }
  0x99   :  { %9505 = vmatpush3.bf16.msra.mxu0 %v10796_v9  ;;  %9525 = vmatpush3.bf16.msra.mxu1 %v10797_v10 }
  0x9a   :  { %9506 = vmatprep.subr.bf16.mxu0 %v11656_v36  ;;  %9526 = vmatprep.subr.bf16.mxu1 %v11656_v36 }
  0x9d   :  { %9507 = vmatpush3.bf16.msra.mxu0 %v10798_v11  ;;  %9527 = vmatpush3.bf16.msra.mxu1 %v10799_v12 }
  0x9e   :  { %9508 = vmatprep.subr.bf16.mxu0 %v11656_v36  ;;  %9528 = vmatprep.subr.bf16.mxu1 %v11656_v36 }
  0xa1   :  { %9509 = vmatpush3.bf16.msra.mxu0 %v10800_v13  ;;  %9529 = vmatpush3.bf16.msra.mxu1 %v10801_v14 }
  0xa2   :  { %9510 = vmatprep.subr.bf16.mxu0 %v11656_v36  ;;  %9530 = vmatprep.subr.bf16.mxu1 %v11656_v36 }
  0xa5   :  { %9511 = vmatpush3.bf16.msra.mxu0 %v10802_v15  ;;  %9531 = vmatpush3.bf16.msra.mxu1 %v10803_v16 }
  0xa6   :  { %9512 = vmatprep.subr.bf16.mxu0 %v11656_v36  ;;  %9532 = vmatprep.subr.bf16.mxu1 %v11656_v36 }
  0xa9   :  { %9513 = vmatpush3.bf16.msra.mxu0 %v10804_v17  ;;  %9533 = vmatpush3.bf16.msra.mxu1 %v10805_v18 }
  0xaa   :  { %9514 = vmatprep.subr.bf16.mxu0 %v11656_v36  ;;  %9534 = vmatprep.subr.bf16.mxu1 %v11656_v36 }
  0xad   :  { %9515 = vmatpush3.bf16.msra.mxu0 %v10806_v19  ;;  %9535 = vmatpush3.bf16.msra.mxu1 %v10807_v20 }
  0xae   :  { %9516 = vmatprep.subr.bf16.mxu0 %v11656_v36  ;;  %9536 = vmatprep.subr.bf16.mxu1 %v11656_v36 }
  0xb1   :  { %9517 = vmatpush3.bf16.msra.mxu0 %v10808_v21  ;;  %9537 = vmatpush3.bf16.msra.mxu1 %v10809_v22 }
  0xb2   :  { %9518 = vmatprep.subr.bf16.mxu0 %v11656_v36  ;;  %9538 = vmatprep.subr.bf16.mxu1 %v11656_v36 }
  0xb5   :  { %9519 = vmatpush3.bf16.msra.mxu0 %v10810_v23  ;;  %9539 = vmatpush3.bf16.msra.mxu1 %v10811_v24 }
  0xb6   :  { %9544 = vmatprep.subr.bf16.mxu0 %v11656_v36  ;;  %9564 = vmatprep.subr.bf16.mxu1 %v11656_v36 }
 0x12a   :  { %v356_v34 = vpop.f32.mrb[0].mxu0  ;;  %v11867_v35 = vpop.f32.mrb[0].mxu1 }
 0x12b   :  { %v358_v37 = vpop.f32.mrb[1].mxu0  ;;  %v11869_v38 = vpop.f32.mrb[1].mxu1 }
 0x12c   :  { %v360_v41 = vpop.f32.mrb[2].mxu0  ;;  %v433_v42 = vpop.f32.mrb[2].mxu1 }
 0x12d   :  { %v11878_v43 = vadd.f32 %v360_v41, %v11861_v32  ;;  %v11881_v44 = vadd.f32 %v433_v42, %v11865_v33  ;;  %v362_v45 = vpop.f32.mrb[3].mxu0  ;;  %v435_v46 = vpop.f32.mrb[3].mxu1 }
 0x12e   :  { %v11883_v47 = vadd.f32 %v362_v45, %v125_v39  ;;  %v11886_v48 = vadd.f32 %v435_v46, %v11875_v40 }
 0x132   :  { %v366_v49 = vpop.f32.mrb[4].mxu0  ;;  %v439_v50 = vpop.f32.mrb[4].mxu1 }
 0x133   :  { %v11889_v51 = vadd.f32 %v366_v49, %v11861_v32  ;;  %v11892_v52 = vadd.f32 %v439_v50, %v11865_v33  ;;  %v368_v53 = vpop.f32.mrb[5].mxu0  ;;  %v441_v54 = vpop.f32.mrb[5].mxu1 }
 0x134   :  { %v11894_v55 = vadd.f32 %v368_v53, %v125_v39  ;;  %v11897_v56 = vadd.f32 %v441_v54, %v11875_v40  ;;  %v370_v57 = vpop.f32.mrb[6].mxu0  ;;  %v443_v58 = vpop.f32.mrb[6].mxu1  ;;  %v357_v54 = vadd.f32 %v356_v34, %v11861_v32  ;;  %v432_v34 = vadd.f32 %v11869_v38, %v11875_v40 }
 0x135   :  { %v11900_v59 = vadd.f32 %v370_v57, %v11861_v32  ;;  %v11903_v60 = vadd.f32 %v443_v58, %v11865_v33  ;;  %v372_v61 = vpop.f32.mrb[7].mxu0  ;;  %v445_v62 = vpop.f32.mrb[7].mxu1  ;;  %v359_v57 = vadd.f32 %v358_v37, %v125_v39 }
 0x136   :  { %v11905_v63 = vadd.f32 %v372_v61, %v125_v39  ;;  %v11908_v1 = vadd.f32 %v445_v62, %v11875_v40 }
 0x13a   :  { %v376_v2 = vpop.f32.mrb[8].mxu0  ;;  %v449_v3 = vpop.f32.mrb[8].mxu1 }
 0x13b   :  { %v11911_v4 = vadd.f32 %v376_v2, %v11861_v32  ;;  %v11914_v5 = vadd.f32 %v449_v3, %v11865_v33  ;;  %v378_v6 = vpop.f32.mrb[9].mxu0  ;;  %v451_v7 = vpop.f32.mrb[9].mxu1 }
 0x13c   :  { %v11916_v8 = vadd.f32 %v378_v6, %v125_v39  ;;  %v11919_v9 = vadd.f32 %v451_v7, %v11875_v40  ;;  %v380_v10 = vpop.f32.mrb[10].mxu0  ;;  %v453_v11 = vpop.f32.mrb[10].mxu1 }
 0x13d   :  { %v11922_v12 = vadd.f32 %v380_v10, %v11861_v32  ;;  %v11925_v13 = vadd.f32 %v453_v11, %v11865_v33  ;;  %v382_v14 = vpop.f32.mrb[11].mxu0  ;;  %v455_v15 = vpop.f32.mrb[11].mxu1 }
 0x13e   :  { %v11927_v16 = vadd.f32 %v382_v14, %v125_v39  ;;  %v11930_v17 = vadd.f32 %v455_v15, %v11875_v40 }
 0x142   :  { %v386_v18 = vpop.f32.mrb[12].mxu0  ;;  %v459_v19 = vpop.f32.mrb[12].mxu1 }
 0x143   :  { %v11933_v20 = vadd.f32 %v386_v18, %v11861_v32  ;;  %v11936_v21 = vadd.f32 %v459_v19, %v11865_v33  ;;  %v388_v22 = vpop.f32.mrb[13].mxu0  ;;  %v461_v23 = vpop.f32.mrb[13].mxu1 }
 0x144   :  { %v11938_v24 = vadd.f32 %v388_v22, %v125_v39  ;;  %v11941_v25 = vadd.f32 %v461_v23, %v11875_v40  ;;  %v390_v29 = vpop.f32.mrb[14].mxu0  ;;  %v463_v41 = vpop.f32.mrb[14].mxu1 }
 0x145   :  { %v11944_v42 = vadd.f32 %v390_v29, %v11861_v32  ;;  %v11947_v45 = vadd.f32 %v463_v41, %v11865_v33  ;;  %v392_v46 = vpop.f32.mrb[15].mxu0  ;;  %v465_v49 = vpop.f32.mrb[15].mxu1  ;;  %v430_v32 = vadd.f32 %v11867_v35, %v11865_v33  ;;  %v75_v33 = vld [vmem:[%s12874_s7] sm:$0xff] }
 0x146   :  { %v11949_v50 = vadd.f32 %v392_v46, %v125_v39  ;;  %v11952_v53 = vadd.f32 %v465_v49, %v11875_v40 }
 0x14a   :  { %v600_v58 = vpop.f32.mrb[16].mxu0  ;;  %v713_v61 = vpop.f32.mrb[16].mxu1 }
 0x14b   :  { %v606_v62 = vadd.f32 %v600_v58, %v359_v57  ;;  %v719_v2 = vadd.f32 %v713_v61, %v357_v54  ;;  %v9442_v3 = vpop.f32.mrb[17].mxu0  ;;  %v9462_v6 = vpop.f32.mrb[17].mxu1 }
 0x14c   :  { %v603_v7 = vpop.f32.mrb[18].mxu0  ;;  %v716_v10 = vpop.f32.mrb[18].mxu1 }
 0x14d   :  { %v8238_v11 = vmul.f32 -1.442695, %v606_v62  ;;  %v8247_v14 = vmul.f32 -1.442695, %v719_v2  ;;  %v9443_v15 = vpop.f32.mrb[19].mxu0  ;;  %v9463_v18 = vpop.f32.mrb[19].mxu1 }
 0x14e   :  { %v10812_v18 = vld [vmem:[#allocation5 + $0x8] ss:$16 sps:$4 sm:$0xff]  }
 0x14f   :  { %11324 = vpow2.f32 %v8238_v11 }
 0x150   :  { %11326 = vpow2.f32 %v8247_v14 }
 0x159   :  { %v11325_v19 = vpop.eup %11324 }
 0x15a   :  { %v11327_v22 = vpop.eup %11326  ;;  %v610_v23 = vadd.f32 1.0, %v11325_v19  ;;  %v10813_v19 = vld [vmem:[#allocation5 + $0xc] ss:$16 sps:$4 sm:$0xff]  }
 0x15b   :  { %v723_v29 = vadd.f32 1.0, %v11327_v22 }
 0x15c   :  { %11328 = vrcp.f32 %v610_v23 }
 0x15d   :  { %11330 = vrcp.f32 %v723_v29  ;;  %v10814_v29 = vld [vmem:[#allocation5 + $0x28] ss:$16 sps:$4 sm:$0xff]  }
 0x166   :  { %v11329_v35 = vpop.eup %11328 }
 0x167   :  { %v11331_v38 = vpop.eup %11330  ;;  %v613_v3 = vmul.f32 %v11329_v35, %v75_v33  ;;  %v10828_v33 = vld [vmem:[#allocation5 + $0x4] ss:$16 sps:$4 sm:$0xff]   ;;  %v10829_v35 = vld [vmem:[#allocation5] ss:$16 sps:$4 sm:$0xff]  }
 0x16a   :  { %v825_v37 = vpop.f32.mrb[20].mxu0  ;;  %v934_v39 = vpop.f32.mrb[20].mxu1 }
 0x16b   :  { %v831_v41 = vadd.f32 %v825_v37, %v430_v32  ;;  %v940_v46 = vadd.f32 %v934_v39, %v432_v34  ;;  %v9482_v49 = vpop.f32.mrb[21].mxu0  ;;  %v9502_v54 = vpop.f32.mrb[21].mxu1  ;;  %v10815_v32 = vld [vmem:[#allocation5 + $0x2c] ss:$16 sps:$4 sm:$0xff]   ;;  %v10816_v34 = vld [vmem:[#allocation5 + $0x48] ss:$16 sps:$4 sm:$0xff]  }
 0x16c   :  { %v828_v57 = vpop.f32.mrb[22].mxu0  ;;  %v937_v58 = vpop.f32.mrb[22].mxu1  ;;  %v10817_v37 = vld [vmem:[#allocation5 + $0x4c] ss:$16 sps:$4 sm:$0xff]   ;;  %v10818_v39 = vld [vmem:[#allocation5 + $0x68] ss:$16 sps:$4 sm:$0xff]  }
 0x16d   :  { %11332 = vtanh.f32 %v831_v41  ;;  %v8264_v61 = vmul.f32 -1.442695, %v940_v46  ;;  %v9483_v62 = vpop.f32.mrb[23].mxu0  ;;  %v9503_v2 = vpop.f32.mrb[23].mxu1  ;;  %v10819_v41 = vld [vmem:[#allocation5 + $0x6c] ss:$16 sps:$4 sm:$0xff]  }
 0x16e   :  { %v10820_v46 = vld [vmem:[#allocation5 + $0x88] ss:$16 sps:$4 sm:$0xff]   ;;  %v10821_v49 = vld [vmem:[#allocation5 + $0x8c] ss:$16 sps:$4 sm:$0xff]  }
 0x16f   :  { %11334 = vpow2.f32 %v8264_v61  ;;  %v10822_v54 = vld [vmem:[#allocation5 + $0xa8] ss:$16 sps:$4 sm:$0xff]   ;;  %v10823_v57 = vld [vmem:[#allocation5 + $0xac] ss:$16 sps:$4 sm:$0xff]  }
 0x170   :  { %v10824_v58 = vld [vmem:[#allocation5 + $0xc8] ss:$16 sps:$4 sm:$0xff]   ;;  %v10825_v61 = vld [vmem:[#allocation5 + $0xcc] ss:$16 sps:$4 sm:$0xff]  }
 0x171   :  { %v10826_v62 = vld [vmem:[#allocation5 + $0xe8] ss:$16 sps:$4 sm:$0xff]   ;;  %v10827_v2 = vld [vmem:[#allocation5 + $0xec] ss:$16 sps:$4 sm:$0xff]  }
 0x177   :  { %v11333_v40 = vpop.eup %11332 }
 0x178   :  { %v833_v6 = vmul.f32 %v11333_v40, %v11331_v38  ;;  %v10830_v38 = vld [vmem:[#allocation5 + $0x24] ss:$16 sps:$4 sm:$0xff]   ;;  %v10831_v40 = vld [vmem:[#allocation5 + $0x20] ss:$16 sps:$4 sm:$0xff]  }
 0x179   :  { %v11335_v7 = vpop.eup %11334 }
 0x17a   :  { %v11962_v10 = vadd.f32 %v833_v6, %v613_v3  ;;  %v944_v11 = vadd.f32 1.0, %v11335_v7  ;;  %v10832_v3 = vld [vmem:[#allocation5 + $0x44] ss:$16 sps:$4 sm:$0xff]   ;;  %v10833_v6 = vld [vmem:[#allocation5 + $0x40] ss:$16 sps:$4 sm:$0xff]  }
 0x17b   :  { %v10834_v7 = vld [vmem:[#allocation5 + $0x64] ss:$16 sps:$4 sm:$0xff]  }
 0x17c   :  { %11336 = vtanh.f32 %v11962_v10 }
 0x17d   :  { %11338 = vrcp.f32 %v944_v11  ;;  %v10835_v11 = vld [vmem:[#allocation5 + $0x60] ss:$16 sps:$4 sm:$0xff]  }
 0x186   :  { %v11337_v14 = vpop.eup %11336 }
 0x187   :  { %v11339_v15 = vpop.eup %11338 }
 0x188   :  { %v948_v22 = vmul.f32 %v11339_v15, %v11337_v14  ;;  %v10836_v14 = vld [vmem:[#allocation5 + $0x84] ss:$16 sps:$4 sm:$0xff]   ;;  %v10837_v15 = vld [vmem:[#allocation5 + $0x80] ss:$16 sps:$4 sm:$0xff]  }
 0x18a   :  { %951 = vst [vmem:[%s12875_s8] sm:$0xff] %v948_v22  ;;  %v952_v23 = vpack.c.bf16 %v948_v22, %v948_v22  ;;  %v10840_v22 = vld [vmem:[#allocation5 + $0xc4] ss:$16 sps:$4 sm:$0xff]  }
 0x18c   :  { %9521 = vmatmul.mubr.bf16.vlgmr.msra.gmra.mrb[24].mxu0 %v952_v23  ;;  %9541 = vmatmul.mubr.bf16.vlgmr.msra.gmra.mrb[24].mxu1 %v952_v23 }
 0x18d   :  { %9545 = vmatpush3.bf16.msra.mxu0 %v10812_v18  ;;  %9565 = vmatpush3.bf16.msra.mxu1 %v10813_v19  ;;  %v10838_v18 = vld [vmem:[#allocation5 + $0xa4] ss:$16 sps:$4 sm:$0xff]   ;;  %v10839_v19 = vld [vmem:[#allocation5 + $0xa0] ss:$16 sps:$4 sm:$0xff]  }
 0x18e   :  { %9546 = vmatprep.subr.bf16.mxu0 %v11656_v36  ;;  %9566 = vmatprep.subr.bf16.mxu1 %v11656_v36 }
 0x18f   :  { %9560 = vmatprep.mubr.msk.bf16.mxu0 %vm11657_vm0, %v11656_v36  ;;  %9580 = vmatprep.mubr.msk.bf16.mxu1 %vm11657_vm0, %v11656_v36 }
 0x191   :  { %9547 = vmatpush3.bf16.msra.mxu0 %v10814_v29  ;;  %9567 = vmatpush3.bf16.msra.mxu1 %v10815_v32  ;;  %v10842_v29 = vld [vmem:[#allocation5 + $0xe4] ss:$16 sps:$4 sm:$0xff]   ;;  %v10843_v32 = vld [vmem:[#allocation5 + $0xe0] ss:$16 sps:$4 sm:$0xff]  }
 0x192   :  { %9548 = vmatprep.subr.bf16.mxu0 %v11656_v36  ;;  %9568 = vmatprep.subr.bf16.mxu1 %v11656_v36 }
 0x195   :  { %9549 = vmatpush3.bf16.msra.mxu0 %v10816_v34  ;;  %9569 = vmatpush3.bf16.msra.mxu1 %v10817_v37 }
 0x196   :  { %9550 = vmatprep.subr.bf16.mxu0 %v11656_v36  ;;  %9570 = vmatprep.subr.bf16.mxu1 %v11656_v36 }
 0x199   :  { %9551 = vmatpush3.bf16.msra.mxu0 %v10818_v39  ;;  %9571 = vmatpush3.bf16.msra.mxu1 %v10819_v41 }
 0x19a   :  { %9552 = vmatprep.subr.bf16.mxu0 %v11656_v36  ;;  %9572 = vmatprep.subr.bf16.mxu1 %v11656_v36 }
 0x19d   :  { %9553 = vmatpush3.bf16.msra.mxu0 %v10820_v46  ;;  %9573 = vmatpush3.bf16.msra.mxu1 %v10821_v49 }
 0x19e   :  { %9554 = vmatprep.subr.bf16.mxu0 %v11656_v36  ;;  %9574 = vmatprep.subr.bf16.mxu1 %v11656_v36 }
 0x1a1   :  { %9555 = vmatpush3.bf16.msra.mxu0 %v10822_v54  ;;  %9575 = vmatpush3.bf16.msra.mxu1 %v10823_v57 }
 0x1a2   :  { %9556 = vmatprep.subr.bf16.mxu0 %v11656_v36  ;;  %9576 = vmatprep.subr.bf16.mxu1 %v11656_v36 }
 0x1a5   :  { %9557 = vmatpush3.bf16.msra.mxu0 %v10824_v58  ;;  %9577 = vmatpush3.bf16.msra.mxu1 %v10825_v61 }
 0x1a6   :  { %9558 = vmatprep.subr.bf16.mxu0 %v11656_v36  ;;  %9578 = vmatprep.subr.bf16.mxu1 %v11656_v36 }
 0x1a9   :  { %9559 = vmatpush3.bf16.msra.mxu0 %v10826_v62  ;;  %9579 = vmatpush3.bf16.msra.mxu1 %v10827_v2 }
 0x1aa   :  { %9584 = vmatprep.subr.bf16.mxu0 %v11656_v36  ;;  %9604 = vmatprep.subr.bf16.mxu1 %v11656_v36 }
 0x1ac   :  { %9561 = vmatmul.mubr.bf16.vlgmr.msra.gmra.mrb[28].mxu0 %v952_v23  ;;  %9581 = vmatmul.mubr.bf16.vlgmr.msra.gmra.mrb[28].mxu1 %v952_v23  ;;  %v10841_v23 = vld [vmem:[#allocation5 + $0xc0] ss:$16 sps:$4 sm:$0xff]  }
 0x1ad   :  { %9600 = vmatprep.mubr.msk.bf16.mxu0 %vm11657_vm0, %v11656_v36  ;;  %9620 = vmatprep.mubr.msk.bf16.mxu1 %vm11657_vm0, %v11656_v36 }
 0x1ae   :  { %9585 = vmatpush3.bf16.msra.mxu0 %v10828_v33  ;;  %9605 = vmatpush3.bf16.msra.mxu1 %v10829_v35 }
 0x1af   :  { %9586 = vmatprep.subr.bf16.mxu0 %v11656_v36  ;;  %9606 = vmatprep.subr.bf16.mxu1 %v11656_v36 }
 0x1b2   :  { %9587 = vmatpush3.bf16.msra.mxu0 %v10830_v38  ;;  %9607 = vmatpush3.bf16.msra.mxu1 %v10831_v40 }
 0x1b3   :  { %9588 = vmatprep.subr.bf16.mxu0 %v11656_v36  ;;  %9608 = vmatprep.subr.bf16.mxu1 %v11656_v36 }
 0x1b6   :  { %9589 = vmatpush3.bf16.msra.mxu0 %v10832_v3  ;;  %9609 = vmatpush3.bf16.msra.mxu1 %v10833_v6 }
 0x1b7   :  { %9590 = vmatprep.subr.bf16.mxu0 %v11656_v36  ;;  %9610 = vmatprep.subr.bf16.mxu1 %v11656_v36 }
 0x1ba   :  { %9591 = vmatpush3.bf16.msra.mxu0 %v10834_v7  ;;  %9611 = vmatpush3.bf16.msra.mxu1 %v10835_v11 }
 0x1bb   :  { %9592 = vmatprep.subr.bf16.mxu0 %v11656_v36  ;;  %9612 = vmatprep.subr.bf16.mxu1 %v11656_v36 }
 0x1be   :  { %9593 = vmatpush3.bf16.msra.mxu0 %v10836_v14  ;;  %9613 = vmatpush3.bf16.msra.mxu1 %v10837_v15 }
 0x1bf   :  { %9594 = vmatprep.subr.bf16.mxu0 %v11656_v36  ;;  %9614 = vmatprep.subr.bf16.mxu1 %v11656_v36 }
 0x1c2   :  { %9595 = vmatpush3.bf16.msra.mxu0 %v10838_v18  ;;  %9615 = vmatpush3.bf16.msra.mxu1 %v10839_v19 }
 0x1c3   :  { %9596 = vmatprep.subr.bf16.mxu0 %v11656_v36  ;;  %9616 = vmatprep.subr.bf16.mxu1 %v11656_v36 }
 0x1c6   :  { %9597 = vmatpush3.bf16.msra.mxu0 %v10840_v22  ;;  %9617 = vmatpush3.bf16.msra.mxu1 %v10841_v23 }
 0x1c7   :  { %9598 = vmatprep.subr.bf16.mxu0 %v11656_v36  ;;  %9618 = vmatprep.subr.bf16.mxu1 %v11656_v36 }
 0x1ca   :  { %9599 = vmatpush3.bf16.msra.mxu0 %v10842_v29  ;;  %9619 = vmatpush3.bf16.msra.mxu1 %v10843_v32 }
 0x1cb   :  { %9624 = vmatprep.subr.bf16.mxu0 %v11656_v36  ;;  %9644 = vmatprep.subr.bf16.mxu1 %v11656_v36 }
 0x25f   :  { %v1053_v34 = vpop.f32.mrb[24].mxu0  ;;  %v1166_v37 = vpop.f32.mrb[24].mxu1 }
 0x260   :  { %v1059_v39 = vadd.f32 %v1053_v34, %v11883_v47  ;;  %v1172_v41 = vadd.f32 %v1166_v37, %v11878_v43  ;;  %v9522_v46 = vpop.f32.mrb[25].mxu0  ;;  %v9542_v49 = vpop.f32.mrb[25].mxu1 }
 0x261   :  { %v1056_v54 = vpop.f32.mrb[26].mxu0  ;;  %v1169_v57 = vpop.f32.mrb[26].mxu1 }
 0x262   :  { %v9523_v58 = vpop.f32.mrb[27].mxu0  ;;  %v9543_v61 = vpop.f32.mrb[27].mxu1  ;;  %v8273_v62 = vmul.f32 -1.442695, %v1059_v39  ;;  %v8282_v2 = vmul.f32 -1.442695, %v1172_v41 }
 0x263   :  { %v10844_v54 = vld [vmem:[#allocation5 + $0x8] ss:$16 sps:$4 sm:$0xff]   ;;  %v10845_v57 = vld [vmem:[#allocation5 + $0xc] ss:$16 sps:$4 sm:$0xff]  }
 0x264   :  { %11340 = vpow2.f32 %v8273_v62  ;;  %v10847_v61 = vld [vmem:[#allocation5 + $0x2c] ss:$16 sps:$4 sm:$0xff]   ;;  %v10848_v62 = vld [vmem:[#allocation5 + $0x48] ss:$16 sps:$4 sm:$0xff]  }
 0x265   :  { %11342 = vpow2.f32 %v8282_v2  ;;  %v10849_v2 = vld [vmem:[#allocation5 + $0x4c] ss:$16 sps:$4 sm:$0xff]  }
 0x26e   :  { %v11341_v33 = vpop.eup %11340 }
 0x26f   :  { %v11343_v35 = vpop.eup %11342  ;;  %v1063_v38 = vadd.f32 1.0, %v11341_v33  ;;  %v10850_v33 = vld [vmem:[#allocation5 + $0x68] ss:$16 sps:$4 sm:$0xff]  }
 0x270   :  { %v1176_v40 = vadd.f32 1.0, %v11343_v35  ;;  %v10851_v35 = vld [vmem:[#allocation5 + $0x6c] ss:$16 sps:$4 sm:$0xff]  }
 0x271   :  { %11344 = vrcp.f32 %v1063_v38  ;;  %v10852_v38 = vld [vmem:[#allocation5 + $0x88] ss:$16 sps:$4 sm:$0xff]  }
 0x272   :  { %11346 = vrcp.f32 %v1176_v40  ;;  %v10853_v40 = vld [vmem:[#allocation5 + $0x8c] ss:$16 sps:$4 sm:$0xff]  }
 0x27b   :  { %v11345_v23 = vpop.eup %11344 }
 0x27c   :  { %v11347_v29 = vpop.eup %11346  ;;  %v1066_v34 = vmul.f32 %v11345_v23, %v11962_v10  ;;  %v10846_v10 = vld [vmem:[#allocation5 + $0x28] ss:$16 sps:$4 sm:$0xff]   ;;  %v10865_v23 = vld [vmem:[#allocation5 + $0x40] ss:$16 sps:$4 sm:$0xff]  }
 0x27f   :  { %v1278_v3 = vpop.f32.mrb[28].mxu0  ;;  %v1387_v6 = vpop.f32.mrb[28].mxu1 }
 0x280   :  { %v1284_v47 = vadd.f32 %v1278_v3, %v11881_v44  ;;  %v1393_v43 = vadd.f32 %v1387_v6, %v11886_v48  ;;  %v9562_v7 = vpop.f32.mrb[29].mxu0  ;;  %v9582_v11 = vpop.f32.mrb[29].mxu1  ;;  %v10854_v3 = vld [vmem:[#allocation5 + $0xa8] ss:$16 sps:$4 sm:$0xff]   ;;  %v10855_v6 = vld [vmem:[#allocation5 + $0xac] ss:$16 sps:$4 sm:$0xff]  }
 0x281   :  { %v1281_v14 = vpop.f32.mrb[30].mxu0  ;;  %v1390_v15 = vpop.f32.mrb[30].mxu1  ;;  %v10858_v7 = vld [vmem:[#allocation5 + $0xe8] ss:$16 sps:$4 sm:$0xff]   ;;  %v10859_v11 = vld [vmem:[#allocation5 + $0xec] ss:$16 sps:$4 sm:$0xff]  }
 0x282   :  { %11348 = vtanh.f32 %v1284_v47  ;;  %v8299_v18 = vmul.f32 -1.442695, %v1393_v43  ;;  %v9563_v19 = vpop.f32.mrb[31].mxu0  ;;  %v9583_v22 = vpop.f32.mrb[31].mxu1  ;;  %v10856_v47 = vld [vmem:[#allocation5 + $0xc8] ss:$16 sps:$4 sm:$0xff]  }
 0x283   :  { %v10857_v43 = vld [vmem:[#allocation5 + $0xcc] ss:$16 sps:$4 sm:$0xff]   ;;  %v10860_v14 = vld [vmem:[#allocation5 + $0x4] ss:$16 sps:$4 sm:$0xff]   ;;  %v10861_v15 = vld [vmem:[#allocation5] ss:$16 sps:$4 sm:$0xff]  }
 0x284   :  { %11350 = vpow2.f32 %v8299_v18  ;;  %v10862_v18 = vld [vmem:[#allocation5 + $0x24] ss:$16 sps:$4 sm:$0xff]   ;;  %v10863_v19 = vld [vmem:[#allocation5 + $0x20] ss:$16 sps:$4 sm:$0xff]  }
 0x285   :  { %v10864_v22 = vld [vmem:[#allocation5 + $0x44] ss:$16 sps:$4 sm:$0xff]  }
 0x28c   :  { %v11349_v32 = vpop.eup %11348 }
 0x28d   :  { %v1286_v37 = vmul.f32 %v11349_v32, %v11347_v29  ;;  %v10866_v29 = vld [vmem:[#allocation5 + $0x64] ss:$16 sps:$4 sm:$0xff]   ;;  %v10867_v32 = vld [vmem:[#allocation5 + $0x60] ss:$16 sps:$4 sm:$0xff]  }
 0x28e   :  { %v11351_v39 = vpop.eup %11350 }
 0x28f   :  { %v12013_v44 = vadd.f32 %v1286_v37, %v1066_v34  ;;  %v1397_v48 = vadd.f32 1.0, %v11351_v39  ;;  %v10868_v34 = vld [vmem:[#allocation5 + $0x84] ss:$16 sps:$4 sm:$0xff]   ;;  %v10869_v37 = vld [vmem:[#allocation5 + $0x80] ss:$16 sps:$4 sm:$0xff]  }
 0x290   :  { %v10870_v39 = vld [vmem:[#allocation5 + $0xa4] ss:$16 sps:$4 sm:$0xff]  }
 0x291   :  { %11352 = vtanh.f32 %v12013_v44 }
 0x292   :  { %11354 = vrcp.f32 %v1397_v48  ;;  %v10871_v48 = vld [vmem:[#allocation5 + $0xa0] ss:$16 sps:$4 sm:$0xff]  }
 0x29b   :  { %v11353_v41 = vpop.eup %11352 }
 0x29c   :  { %v11355_v46 = vpop.eup %11354 }
 0x29d   :  { %v1401_v49 = vmul.f32 %v11355_v46, %v11353_v41  ;;  %v10872_v41 = vld [vmem:[#allocation5 + $0xc4] ss:$16 sps:$4 sm:$0xff]   ;;  %v10873_v46 = vld [vmem:[#allocation5 + $0xc0] ss:$16 sps:$4 sm:$0xff]  }
 0x29f   :  { %8300 = vst [vmem:[%s12875_s8 + $0x8] sm:$0xff] %v1401_v49  ;;  %v1406_v58 = vpack.c.bf16 %v1401_v49, %v1401_v49  ;;  %v10874_v49 = vld [vmem:[#allocation5 + $0xe4] ss:$16 sps:$4 sm:$0xff]  }
 0x2a1   :  { %9601 = vmatmul.mubr.bf16.vlgmr.msra.gmra.mrb[32].mxu0 %v1406_v58  ;;  %9621 = vmatmul.mubr.bf16.vlgmr.msra.gmra.mrb[32].mxu1 %v1406_v58 }
 0x2a2   :  { %9625 = vmatpush3.bf16.msra.mxu0 %v10844_v54  ;;  %9645 = vmatpush3.bf16.msra.mxu1 %v10845_v57  ;;  %v10875_v54 = vld [vmem:[#allocation5 + $0xe0] ss:$16 sps:$4 sm:$0xff]  }
 0x2a3   :  { %9626 = vmatprep.subr.bf16.mxu0 %v11656_v36  ;;  %9646 = vmatprep.subr.bf16.mxu1 %v11656_v36 }
 0x2a4   :  { %9640 = vmatprep.mubr.msk.bf16.mxu0 %vm11657_vm0, %v11656_v36  ;;  %9660 = vmatprep.mubr.msk.bf16.mxu1 %vm11657_vm0, %v11656_v36 }
 0x2a6   :  { %9627 = vmatpush3.bf16.msra.mxu0 %v10846_v10  ;;  %9647 = vmatpush3.bf16.msra.mxu1 %v10847_v61 }
 0x2a7   :  { %9628 = vmatprep.subr.bf16.mxu0 %v11656_v36  ;;  %9648 = vmatprep.subr.bf16.mxu1 %v11656_v36 }
 0x2aa   :  { %9629 = vmatpush3.bf16.msra.mxu0 %v10848_v62  ;;  %9649 = vmatpush3.bf16.msra.mxu1 %v10849_v2 }
 0x2ab   :  { %9630 = vmatprep.subr.bf16.mxu0 %v11656_v36  ;;  %9650 = vmatprep.subr.bf16.mxu1 %v11656_v36 }
 0x2ae   :  { %9631 = vmatpush3.bf16.msra.mxu0 %v10850_v33  ;;  %9651 = vmatpush3.bf16.msra.mxu1 %v10851_v35 }
 0x2af   :  { %9632 = vmatprep.subr.bf16.mxu0 %v11656_v36  ;;  %9652 = vmatprep.subr.bf16.mxu1 %v11656_v36 }
 0x2b2   :  { %9633 = vmatpush3.bf16.msra.mxu0 %v10852_v38  ;;  %9653 = vmatpush3.bf16.msra.mxu1 %v10853_v40 }
 0x2b3   :  { %9634 = vmatprep.subr.bf16.mxu0 %v11656_v36  ;;  %9654 = vmatprep.subr.bf16.mxu1 %v11656_v36 }
 0x2b6   :  { %9635 = vmatpush3.bf16.msra.mxu0 %v10854_v3  ;;  %9655 = vmatpush3.bf16.msra.mxu1 %v10855_v6 }
 0x2b7   :  { %9636 = vmatprep.subr.bf16.mxu0 %v11656_v36  ;;  %9656 = vmatprep.subr.bf16.mxu1 %v11656_v36 }
 0x2ba   :  { %9637 = vmatpush3.bf16.msra.mxu0 %v10856_v47  ;;  %9657 = vmatpush3.bf16.msra.mxu1 %v10857_v43 }
 0x2bb   :  { %9638 = vmatprep.subr.bf16.mxu0 %v11656_v36  ;;  %9658 = vmatprep.subr.bf16.mxu1 %v11656_v36 }
 0x2be   :  { %9639 = vmatpush3.bf16.msra.mxu0 %v10858_v7  ;;  %9659 = vmatpush3.bf16.msra.mxu1 %v10859_v11 }
 0x2bf   :  { %9664 = vmatprep.subr.bf16.mxu0 %v11656_v36  ;;  %9684 = vmatprep.subr.bf16.mxu1 %v11656_v36 }
 0x2c1   :  { %9641 = vmatmul.mubr.bf16.vlgmr.msra.gmra.mrb[36].mxu0 %v1406_v58  ;;  %9661 = vmatmul.mubr.bf16.vlgmr.msra.gmra.mrb[36].mxu1 %v1406_v58 }
 0x2c2   :  { %9680 = vmatprep.mubr.msk.bf16.mxu0 %vm11657_vm0, %v11656_v36  ;;  %9700 = vmatprep.mubr.msk.bf16.mxu1 %vm11657_vm0, %v11656_v36 }
 0x2c3   :  { %9665 = vmatpush3.bf16.msra.mxu0 %v10860_v14  ;;  %9685 = vmatpush3.bf16.msra.mxu1 %v10861_v15 }
 0x2c4   :  { %9666 = vmatprep.subr.bf16.mxu0 %v11656_v36  ;;  %9686 = vmatprep.subr.bf16.mxu1 %v11656_v36 }
 0x2c7   :  { %9667 = vmatpush3.bf16.msra.mxu0 %v10862_v18  ;;  %9687 = vmatpush3.bf16.msra.mxu1 %v10863_v19 }
 0x2c8   :  { %9668 = vmatprep.subr.bf16.mxu0 %v11656_v36  ;;  %9688 = vmatprep.subr.bf16.mxu1 %v11656_v36 }
 0x2cb   :  { %9669 = vmatpush3.bf16.msra.mxu0 %v10864_v22  ;;  %9689 = vmatpush3.bf16.msra.mxu1 %v10865_v23 }
 0x2cc   :  { %9670 = vmatprep.subr.bf16.mxu0 %v11656_v36  ;;  %9690 = vmatprep.subr.bf16.mxu1 %v11656_v36 }
 0x2cf   :  { %9671 = vmatpush3.bf16.msra.mxu0 %v10866_v29  ;;  %9691 = vmatpush3.bf16.msra.mxu1 %v10867_v32 }
 0x2d0   :  { %9672 = vmatprep.subr.bf16.mxu0 %v11656_v36  ;;  %9692 = vmatprep.subr.bf16.mxu1 %v11656_v36 }
 0x2d3   :  { %9673 = vmatpush3.bf16.msra.mxu0 %v10868_v34  ;;  %9693 = vmatpush3.bf16.msra.mxu1 %v10869_v37 }
 0x2d4   :  { %9674 = vmatprep.subr.bf16.mxu0 %v11656_v36  ;;  %9694 = vmatprep.subr.bf16.mxu1 %v11656_v36 }
 0x2d7   :  { %9675 = vmatpush3.bf16.msra.mxu0 %v10870_v39  ;;  %9695 = vmatpush3.bf16.msra.mxu1 %v10871_v48 }
 0x2d8   :  { %9676 = vmatprep.subr.bf16.mxu0 %v11656_v36  ;;  %9696 = vmatprep.subr.bf16.mxu1 %v11656_v36 }
 0x2db   :  { %9677 = vmatpush3.bf16.msra.mxu0 %v10872_v41  ;;  %9697 = vmatpush3.bf16.msra.mxu1 %v10873_v46 }
 0x2dc   :  { %9678 = vmatprep.subr.bf16.mxu0 %v11656_v36  ;;  %9698 = vmatprep.subr.bf16.mxu1 %v11656_v36 }
 0x2df   :  { %9679 = vmatpush3.bf16.msra.mxu0 %v10874_v49  ;;  %9699 = vmatpush3.bf16.msra.mxu1 %v10875_v54 }
 0x2e0   :  { %9704 = vmatprep.subr.bf16.mxu0 %v11656_v36  ;;  %9724 = vmatprep.subr.bf16.mxu1 %v11656_v36 }
 0x374   :  { %v1507_v57 = vpop.f32.mrb[32].mxu0  ;;  %v1620_v58 = vpop.f32.mrb[32].mxu1 }
 0x375   :  { %v1513_v10 = vadd.f32 %v1507_v57, %v11894_v55  ;;  %v1626_v61 = vadd.f32 %v1620_v58, %v11889_v51  ;;  %v9602_v62 = vpop.f32.mrb[33].mxu0  ;;  %v9622_v2 = vpop.f32.mrb[33].mxu1 }
 0x376   :  { %v1510_v33 = vpop.f32.mrb[34].mxu0  ;;  %v1623_v35 = vpop.f32.mrb[34].mxu1  ;;  %v10879_v2 = vld [vmem:[#allocation5 + $0x2c] ss:$16 sps:$4 sm:$0xff]  }
 0x377   :  { %v9603_v38 = vpop.f32.mrb[35].mxu0  ;;  %v9623_v40 = vpop.f32.mrb[35].mxu1  ;;  %v8309_v3 = vmul.f32 -1.442695, %v1513_v10  ;;  %v8318_v6 = vmul.f32 -1.442695, %v1626_v61 }
 0x378   :  { %v10876_v10 = vld [vmem:[#allocation5 + $0x8] ss:$16 sps:$4 sm:$0xff]   ;;  %v10877_v61 = vld [vmem:[#allocation5 + $0xc] ss:$16 sps:$4 sm:$0xff]  }
 0x379   :  { %11356 = vpow2.f32 %v8309_v3  ;;  %v10880_v33 = vld [vmem:[#allocation5 + $0x48] ss:$16 sps:$4 sm:$0xff]   ;;  %v10881_v35 = vld [vmem:[#allocation5 + $0x4c] ss:$16 sps:$4 sm:$0xff]  }
 0x37a   :  { %11358 = vpow2.f32 %v8318_v6  ;;  %v10882_v38 = vld [vmem:[#allocation5 + $0x68] ss:$16 sps:$4 sm:$0xff]   ;;  %v10883_v40 = vld [vmem:[#allocation5 + $0x6c] ss:$16 sps:$4 sm:$0xff]  }
 0x37b   :  { %v10884_v3 = vld [vmem:[#allocation5 + $0x88] ss:$16 sps:$4 sm:$0xff]   ;;  %v10885_v6 = vld [vmem:[#allocation5 + $0x8c] ss:$16 sps:$4 sm:$0xff]  }
 0x383   :  { %v11357_v47 = vpop.eup %11356 }
 0x384   :  { %v11359_v43 = vpop.eup %11358  ;;  %v1517_v7 = vadd.f32 1.0, %v11357_v47  ;;  %v10886_v47 = vld [vmem:[#allocation5 + $0xa8] ss:$16 sps:$4 sm:$0xff]  }
 0x385   :  { %v1630_v11 = vadd.f32 1.0, %v11359_v43  ;;  %v10887_v43 = vld [vmem:[#allocation5 + $0xac] ss:$16 sps:$4 sm:$0xff]  }
 0x386   :  { %11360 = vrcp.f32 %v1517_v7  ;;  %v10888_v7 = vld [vmem:[#allocation5 + $0xc8] ss:$16 sps:$4 sm:$0xff]  }
 0x387   :  { %11362 = vrcp.f32 %v1630_v11  ;;  %v10889_v11 = vld [vmem:[#allocation5 + $0xcc] ss:$16 sps:$4 sm:$0xff]  }
 0x390   :  { %v11361_v37 = vpop.eup %11360 }
 0x391   :  { %v11363_v39 = vpop.eup %11362  ;;  %v1520_v41 = vmul.f32 %v11361_v37, %v12013_v44  ;;  %v10878_v44 = vld [vmem:[#allocation5 + $0x28] ss:$16 sps:$4 sm:$0xff]   ;;  %v10901_v37 = vld [vmem:[#allocation5 + $0x80] ss:$16 sps:$4 sm:$0xff]  }
 0x394   :  { %v1732_v14 = vpop.f32.mrb[36].mxu0  ;;  %v1841_v15 = vpop.f32.mrb[36].mxu1 }
 0x395   :  { %v1738_v55 = vadd.f32 %v1732_v14, %v11892_v52  ;;  %v1847_v51 = vadd.f32 %v1841_v15, %v11897_v56  ;;  %v9642_v18 = vpop.f32.mrb[37].mxu0  ;;  %v9662_v19 = vpop.f32.mrb[37].mxu1  ;;  %v10890_v14 = vld [vmem:[#allocation5 + $0xe8] ss:$16 sps:$4 sm:$0xff]   ;;  %v10891_v15 = vld [vmem:[#allocation5 + $0xec] ss:$16 sps:$4 sm:$0xff]  }
 0x396   :  { %v1735_v22 = vpop.f32.mrb[38].mxu0  ;;  %v1844_v23 = vpop.f32.mrb[38].mxu1  ;;  %v10894_v18 = vld [vmem:[#allocation5 + $0x24] ss:$16 sps:$4 sm:$0xff]   ;;  %v10895_v19 = vld [vmem:[#allocation5 + $0x20] ss:$16 sps:$4 sm:$0xff]  }
 0x397   :  { %11364 = vtanh.f32 %v1738_v55  ;;  %v8335_v29 = vmul.f32 -1.442695, %v1847_v51  ;;  %v9643_v32 = vpop.f32.mrb[39].mxu0  ;;  %v9663_v34 = vpop.f32.mrb[39].mxu1  ;;  %v10892_v55 = vld [vmem:[#allocation5 + $0x4] ss:$16 sps:$4 sm:$0xff]  }
 0x398   :  { %v10893_v51 = vld [vmem:[#allocation5] ss:$16 sps:$4 sm:$0xff]   ;;  %v10896_v22 = vld [vmem:[#allocation5 + $0x44] ss:$16 sps:$4 sm:$0xff]  }
 0x399   :  { %11366 = vpow2.f32 %v8335_v29  ;;  %v10897_v23 = vld [vmem:[#allocation5 + $0x40] ss:$16 sps:$4 sm:$0xff]   ;;  %v10898_v29 = vld [vmem:[#allocation5 + $0x64] ss:$16 sps:$4 sm:$0xff]  }
 0x39a   :  { %v10899_v32 = vld [vmem:[#allocation5 + $0x60] ss:$16 sps:$4 sm:$0xff]   ;;  %v10900_v34 = vld [vmem:[#allocation5 + $0x84] ss:$16 sps:$4 sm:$0xff]  }
 0x3a1   :  { %v11365_v48 = vpop.eup %11364 }
 0x3a2   :  { %v1740_v46 = vmul.f32 %v11365_v48, %v11363_v39  ;;  %v10902_v39 = vld [vmem:[#allocation5 + $0xa4] ss:$16 sps:$4 sm:$0xff]   ;;  %v10903_v48 = vld [vmem:[#allocation5 + $0xa0] ss:$16 sps:$4 sm:$0xff]  }
 0x3a3   :  { %v11367_v49 = vpop.eup %11366 }
 0x3a4   :  { %v12064_v52 = vadd.f32 %v1740_v46, %v1520_v41  ;;  %v1851_v56 = vadd.f32 1.0, %v11367_v49  ;;  %v10904_v41 = vld [vmem:[#allocation5 + $0xc4] ss:$16 sps:$4 sm:$0xff]   ;;  %v10905_v46 = vld [vmem:[#allocation5 + $0xc0] ss:$16 sps:$4 sm:$0xff]  }
 0x3a5   :  { %v10906_v49 = vld [vmem:[#allocation5 + $0xe4] ss:$16 sps:$4 sm:$0xff]  }
 0x3a6   :  { %11368 = vtanh.f32 %v12064_v52 }
 0x3a7   :  { %11370 = vrcp.f32 %v1851_v56  ;;  %v10907_v56 = vld [vmem:[#allocation5 + $0xe0] ss:$16 sps:$4 sm:$0xff]  }
 0x3b0   :  { %v11369_v54 = vpop.eup %11368 }
 0x3b1   :  { %v11371_v57 = vpop.eup %11370 }
 0x3b2   :  { %v1855_v58 = vmul.f32 %v11371_v57, %v11369_v54 }
 0x3b4   :  { %8336 = vst [vmem:[%s12875_s8 + $0x10] sm:$0xff] %v1855_v58  ;;  %v1860_v62 = vpack.c.bf16 %v1855_v58, %v1855_v58 }
 0x3b6   :  { %9681 = vmatmul.mubr.bf16.vlgmr.msra.gmra.mrb[40].mxu0 %v1860_v62  ;;  %9701 = vmatmul.mubr.bf16.vlgmr.msra.gmra.mrb[40].mxu1 %v1860_v62 }
 0x3b7   :  { %9705 = vmatpush3.bf16.msra.mxu0 %v10876_v10  ;;  %9725 = vmatpush3.bf16.msra.mxu1 %v10877_v61 }
 0x3b8   :  { %9706 = vmatprep.subr.bf16.mxu0 %v11656_v36  ;;  %9726 = vmatprep.subr.bf16.mxu1 %v11656_v36 }
 0x3b9   :  { %9720 = vmatprep.mubr.msk.bf16.mxu0 %vm11657_vm0, %v11656_v36  ;;  %9740 = vmatprep.mubr.msk.bf16.mxu1 %vm11657_vm0, %v11656_v36 }
 0x3bb   :  { %9707 = vmatpush3.bf16.msra.mxu0 %v10878_v44  ;;  %9727 = vmatpush3.bf16.msra.mxu1 %v10879_v2 }
 0x3bc   :  { %9708 = vmatprep.subr.bf16.mxu0 %v11656_v36  ;;  %9728 = vmatprep.subr.bf16.mxu1 %v11656_v36 }
 0x3bf   :  { %9709 = vmatpush3.bf16.msra.mxu0 %v10880_v33  ;;  %9729 = vmatpush3.bf16.msra.mxu1 %v10881_v35 }
 0x3c0   :  { %9710 = vmatprep.subr.bf16.mxu0 %v11656_v36  ;;  %9730 = vmatprep.subr.bf16.mxu1 %v11656_v36 }
 0x3c3   :  { %9711 = vmatpush3.bf16.msra.mxu0 %v10882_v38  ;;  %9731 = vmatpush3.bf16.msra.mxu1 %v10883_v40 }
 0x3c4   :  { %9712 = vmatprep.subr.bf16.mxu0 %v11656_v36  ;;  %9732 = vmatprep.subr.bf16.mxu1 %v11656_v36 }
 0x3c7   :  { %9713 = vmatpush3.bf16.msra.mxu0 %v10884_v3  ;;  %9733 = vmatpush3.bf16.msra.mxu1 %v10885_v6 }
 0x3c8   :  { %9714 = vmatprep.subr.bf16.mxu0 %v11656_v36  ;;  %9734 = vmatprep.subr.bf16.mxu1 %v11656_v36 }
 0x3cb   :  { %9715 = vmatpush3.bf16.msra.mxu0 %v10886_v47  ;;  %9735 = vmatpush3.bf16.msra.mxu1 %v10887_v43 }
 0x3cc   :  { %9716 = vmatprep.subr.bf16.mxu0 %v11656_v36  ;;  %9736 = vmatprep.subr.bf16.mxu1 %v11656_v36 }
 0x3cf   :  { %9717 = vmatpush3.bf16.msra.mxu0 %v10888_v7  ;;  %9737 = vmatpush3.bf16.msra.mxu1 %v10889_v11 }
 0x3d0   :  { %9718 = vmatprep.subr.bf16.mxu0 %v11656_v36  ;;  %9738 = vmatprep.subr.bf16.mxu1 %v11656_v36 }
 0x3d3   :  { %9719 = vmatpush3.bf16.msra.mxu0 %v10890_v14  ;;  %9739 = vmatpush3.bf16.msra.mxu1 %v10891_v15 }
 0x3d4   :  { %9744 = vmatprep.subr.bf16.mxu0 %v11656_v36  ;;  %9764 = vmatprep.subr.bf16.mxu1 %v11656_v36 }
 0x3d6   :  { %9721 = vmatmul.mubr.bf16.vlgmr.msra.gmra.mrb[44].mxu0 %v1860_v62  ;;  %9741 = vmatmul.mubr.bf16.vlgmr.msra.gmra.mrb[44].mxu1 %v1860_v62 }
 0x3d7   :  { %9760 = vmatprep.mubr.msk.bf16.mxu0 %vm11657_vm0, %v11656_v36  ;;  %9780 = vmatprep.mubr.msk.bf16.mxu1 %vm11657_vm0, %v11656_v36 }
 0x3d8   :  { %9745 = vmatpush3.bf16.msra.mxu0 %v10892_v55  ;;  %9765 = vmatpush3.bf16.msra.mxu1 %v10893_v51 }
 0x3d9   :  { %9746 = vmatprep.subr.bf16.mxu0 %v11656_v36  ;;  %9766 = vmatprep.subr.bf16.mxu1 %v11656_v36 }
 0x3dc   :  { %9747 = vmatpush3.bf16.msra.mxu0 %v10894_v18  ;;  %9767 = vmatpush3.bf16.msra.mxu1 %v10895_v19 }
 0x3dd   :  { %9748 = vmatprep.subr.bf16.mxu0 %v11656_v36  ;;  %9768 = vmatprep.subr.bf16.mxu1 %v11656_v36 }
 0x3e0   :  { %9749 = vmatpush3.bf16.msra.mxu0 %v10896_v22  ;;  %9769 = vmatpush3.bf16.msra.mxu1 %v10897_v23 }
 0x3e1   :  { %9750 = vmatprep.subr.bf16.mxu0 %v11656_v36  ;;  %9770 = vmatprep.subr.bf16.mxu1 %v11656_v36 }
 0x3e4   :  { %9751 = vmatpush3.bf16.msra.mxu0 %v10898_v29  ;;  %9771 = vmatpush3.bf16.msra.mxu1 %v10899_v32 }
 0x3e5   :  { %9752 = vmatprep.subr.bf16.mxu0 %v11656_v36  ;;  %9772 = vmatprep.subr.bf16.mxu1 %v11656_v36 }
 0x3e8   :  { %9753 = vmatpush3.bf16.msra.mxu0 %v10900_v34  ;;  %9773 = vmatpush3.bf16.msra.mxu1 %v10901_v37 }
 0x3e9   :  { %9754 = vmatprep.subr.bf16.mxu0 %v11656_v36  ;;  %9774 = vmatprep.subr.bf16.mxu1 %v11656_v36 }
 0x3ec   :  { %9755 = vmatpush3.bf16.msra.mxu0 %v10902_v39  ;;  %9775 = vmatpush3.bf16.msra.mxu1 %v10903_v48 }
 0x3ed   :  { %9756 = vmatprep.subr.bf16.mxu0 %v11656_v36  ;;  %9776 = vmatprep.subr.bf16.mxu1 %v11656_v36 }
 0x3f0   :  { %9757 = vmatpush3.bf16.msra.mxu0 %v10904_v41  ;;  %9777 = vmatpush3.bf16.msra.mxu1 %v10905_v46 }
 0x3f1   :  { %9758 = vmatprep.subr.bf16.mxu0 %v11656_v36  ;;  %9778 = vmatprep.subr.bf16.mxu1 %v11656_v36 }
 0x3f4   :  { %9759 = vmatpush3.bf16.msra.mxu0 %v10906_v49  ;;  %9779 = vmatpush3.bf16.msra.mxu1 %v10907_v56  ;;  %v10908_v49 = vld [vmem:[#allocation5 + $0x8] ss:$16 sps:$4 sm:$0xff]   ;;  %v10909_v56 = vld [vmem:[#allocation5 + $0xc] ss:$16 sps:$4 sm:$0xff]  }
 0x3f5   :  { %9784 = vmatprep.subr.bf16.mxu0 %v11656_v36  ;;  %9804 = vmatprep.subr.bf16.mxu1 %v11656_v36 }
 0x489   :  { %v1961_v54 = vpop.f32.mrb[40].mxu0  ;;  %v2074_v57 = vpop.f32.mrb[40].mxu1 }
 0x48a   :  { %v1967_v58 = vadd.f32 %v1961_v54, %v11905_v63  ;;  %v2080_v10 = vadd.f32 %v2074_v57, %v11900_v59  ;;  %v9682_v61 = vpop.f32.mrb[41].mxu0  ;;  %v9702_v62 = vpop.f32.mrb[41].mxu1  ;;  %v10911_v57 = vld [vmem:[#allocation5 + $0x2c] ss:$16 sps:$4 sm:$0xff]  }
 0x48b   :  { %v1964_v44 = vpop.f32.mrb[42].mxu0  ;;  %v2077_v2 = vpop.f32.mrb[42].mxu1  ;;  %v10914_v61 = vld [vmem:[#allocation5 + $0x68] ss:$16 sps:$4 sm:$0xff]   ;;  %v10915_v62 = vld [vmem:[#allocation5 + $0x6c] ss:$16 sps:$4 sm:$0xff]  }
 0x48c   :  { %v9683_v33 = vpop.f32.mrb[43].mxu0  ;;  %v9703_v35 = vpop.f32.mrb[43].mxu1  ;;  %v8345_v38 = vmul.f32 -1.442695, %v1967_v58  ;;  %v8354_v40 = vmul.f32 -1.442695, %v2080_v10 }
 0x48d   :  { %v10912_v58 = vld [vmem:[#allocation5 + $0x48] ss:$16 sps:$4 sm:$0xff]   ;;  %v10913_v10 = vld [vmem:[#allocation5 + $0x4c] ss:$16 sps:$4 sm:$0xff]  }
 0x48e   :  { %11372 = vpow2.f32 %v8345_v38  ;;  %v10916_v44 = vld [vmem:[#allocation5 + $0x88] ss:$16 sps:$4 sm:$0xff]   ;;  %v10917_v2 = vld [vmem:[#allocation5 + $0x8c] ss:$16 sps:$4 sm:$0xff]  }
 0x48f   :  { %11374 = vpow2.f32 %v8354_v40  ;;  %v10918_v33 = vld [vmem:[#allocation5 + $0xa8] ss:$16 sps:$4 sm:$0xff]   ;;  %v10919_v35 = vld [vmem:[#allocation5 + $0xac] ss:$16 sps:$4 sm:$0xff]  }
 0x490   :  { %v10920_v38 = vld [vmem:[#allocation5 + $0xc8] ss:$16 sps:$4 sm:$0xff]   ;;  %v10921_v40 = vld [vmem:[#allocation5 + $0xcc] ss:$16 sps:$4 sm:$0xff]  }
 0x498   :  { %v11373_v3 = vpop.eup %11372 }
 0x499   :  { %v11375_v6 = vpop.eup %11374  ;;  %v1971_v47 = vadd.f32 1.0, %v11373_v3  ;;  %v10922_v3 = vld [vmem:[#allocation5 + $0xe8] ss:$16 sps:$4 sm:$0xff]  }
 0x49a   :  { %v2084_v43 = vadd.f32 1.0, %v11375_v6  ;;  %v10923_v6 = vld [vmem:[#allocation5 + $0xec] ss:$16 sps:$4 sm:$0xff]  }
 0x49b   :  { %11376 = vrcp.f32 %v1971_v47  ;;  %v10924_v47 = vld [vmem:[#allocation5 + $0x4] ss:$16 sps:$4 sm:$0xff]  }
 0x49c   :  { %11378 = vrcp.f32 %v2084_v43  ;;  %v10925_v43 = vld [vmem:[#allocation5] ss:$16 sps:$4 sm:$0xff]  }
 0x4a5   :  { %v11377_v23 = vpop.eup %11376 }
 0x4a6   :  { %v11379_v29 = vpop.eup %11378  ;;  %v1974_v34 = vmul.f32 %v11377_v23, %v12064_v52  ;;  %v10910_v52 = vld [vmem:[#allocation5 + $0x28] ss:$16 sps:$4 sm:$0xff]   ;;  %v10937_v23 = vld [vmem:[#allocation5 + $0xc0] ss:$16 sps:$4 sm:$0xff]  }
 0x4a9   :  { %v2186_v7 = vpop.f32.mrb[44].mxu0  ;;  %v2295_v11 = vpop.f32.mrb[44].mxu1 }
 0x4aa   :  { %v2192_v63 = vadd.f32 %v2186_v7, %v11903_v60  ;;  %v2301_v59 = vadd.f32 %v2295_v11, %v11908_v1  ;;  %v9722_v14 = vpop.f32.mrb[45].mxu0  ;;  %v9742_v15 = vpop.f32.mrb[45].mxu1  ;;  %v10926_v7 = vld [vmem:[#allocation5 + $0x24] ss:$16 sps:$4 sm:$0xff]   ;;  %v10927_v11 = vld [vmem:[#allocation5 + $0x20] ss:$16 sps:$4 sm:$0xff]  }
 0x4ab   :  { %v2189_v55 = vpop.f32.mrb[46].mxu0  ;;  %v2298_v51 = vpop.f32.mrb[46].mxu1  ;;  %v10930_v14 = vld [vmem:[#allocation5 + $0x64] ss:$16 sps:$4 sm:$0xff]   ;;  %v10931_v15 = vld [vmem:[#allocation5 + $0x60] ss:$16 sps:$4 sm:$0xff]  }
 0x4ac   :  { %11380 = vtanh.f32 %v2192_v63  ;;  %v8371_v18 = vmul.f32 -1.442695, %v2301_v59  ;;  %v9723_v19 = vpop.f32.mrb[47].mxu0  ;;  %v9743_v22 = vpop.f32.mrb[47].mxu1  ;;  %v10928_v63 = vld [vmem:[#allocation5 + $0x44] ss:$16 sps:$4 sm:$0xff]  }
 0x4ad   :  { %v10929_v59 = vld [vmem:[#allocation5 + $0x40] ss:$16 sps:$4 sm:$0xff]   ;;  %v10932_v55 = vld [vmem:[#allocation5 + $0x84] ss:$16 sps:$4 sm:$0xff]  }
 0x4ae   :  { %11382 = vpow2.f32 %v8371_v18  ;;  %v10933_v51 = vld [vmem:[#allocation5 + $0x80] ss:$16 sps:$4 sm:$0xff]   ;;  %v10934_v18 = vld [vmem:[#allocation5 + $0xa4] ss:$16 sps:$4 sm:$0xff]  }
 0x4af   :  { %v10935_v19 = vld [vmem:[#allocation5 + $0xa0] ss:$16 sps:$4 sm:$0xff]   ;;  %v10936_v22 = vld [vmem:[#allocation5 + $0xc4] ss:$16 sps:$4 sm:$0xff]  }
 0x4b6   :  { %v11381_v32 = vpop.eup %11380 }
 0x4b7   :  { %v2194_v37 = vmul.f32 %v11381_v32, %v11379_v29  ;;  %v10938_v29 = vld [vmem:[#allocation5 + $0xe4] ss:$16 sps:$4 sm:$0xff]   ;;  %v10939_v32 = vld [vmem:[#allocation5 + $0xe0] ss:$16 sps:$4 sm:$0xff]  }
 0x4b8   :  { %v11383_v39 = vpop.eup %11382 }
 0x4b9   :  { %v12115_v60 = vadd.f32 %v2194_v37, %v1974_v34  ;;  %v2305_v1 = vadd.f32 1.0, %v11383_v39 }
 0x4bb   :  { %11384 = vtanh.f32 %v12115_v60 }
 0x4bc   :  { %11386 = vrcp.f32 %v2305_v1 }
 0x4c5   :  { %v11385_v48 = vpop.eup %11384 }
 0x4c6   :  { %v11387_v41 = vpop.eup %11386 }
 0x4c7   :  { %v2309_v46 = vmul.f32 %v11387_v41, %v11385_v48 }
 0x4c9   :  { %8372 = vst [vmem:[%s12875_s8 + $0x18] sm:$0xff] %v2309_v46  ;;  %v2314_v54 = vpack.c.bf16 %v2309_v46, %v2309_v46 }
 0x4cb   :  { %9761 = vmatmul.mubr.bf16.vlgmr.msra.gmra.mrb[48].mxu0 %v2314_v54  ;;  %9781 = vmatmul.mubr.bf16.vlgmr.msra.gmra.mrb[48].mxu1 %v2314_v54 }
 0x4cc   :  { %9785 = vmatpush3.bf16.msra.mxu0 %v10908_v49  ;;  %9805 = vmatpush3.bf16.msra.mxu1 %v10909_v56 }
 0x4cd   :  { %9786 = vmatprep.subr.bf16.mxu0 %v11656_v36  ;;  %9806 = vmatprep.subr.bf16.mxu1 %v11656_v36 }
 0x4ce   :  { %9800 = vmatprep.mubr.msk.bf16.mxu0 %vm11657_vm0, %v11656_v36  ;;  %9820 = vmatprep.mubr.msk.bf16.mxu1 %vm11657_vm0, %v11656_v36 }
 0x4d0   :  { %9787 = vmatpush3.bf16.msra.mxu0 %v10910_v52  ;;  %9807 = vmatpush3.bf16.msra.mxu1 %v10911_v57 }
 0x4d1   :  { %9788 = vmatprep.subr.bf16.mxu0 %v11656_v36  ;;  %9808 = vmatprep.subr.bf16.mxu1 %v11656_v36 }
 0x4d4   :  { %9789 = vmatpush3.bf16.msra.mxu0 %v10912_v58  ;;  %9809 = vmatpush3.bf16.msra.mxu1 %v10913_v10 }
 0x4d5   :  { %9790 = vmatprep.subr.bf16.mxu0 %v11656_v36  ;;  %9810 = vmatprep.subr.bf16.mxu1 %v11656_v36 }
 0x4d8   :  { %9791 = vmatpush3.bf16.msra.mxu0 %v10914_v61  ;;  %9811 = vmatpush3.bf16.msra.mxu1 %v10915_v62 }
 0x4d9   :  { %9792 = vmatprep.subr.bf16.mxu0 %v11656_v36  ;;  %9812 = vmatprep.subr.bf16.mxu1 %v11656_v36 }
 0x4dc   :  { %9793 = vmatpush3.bf16.msra.mxu0 %v10916_v44  ;;  %9813 = vmatpush3.bf16.msra.mxu1 %v10917_v2 }
 0x4dd   :  { %9794 = vmatprep.subr.bf16.mxu0 %v11656_v36  ;;  %9814 = vmatprep.subr.bf16.mxu1 %v11656_v36 }
 0x4e0   :  { %9795 = vmatpush3.bf16.msra.mxu0 %v10918_v33  ;;  %9815 = vmatpush3.bf16.msra.mxu1 %v10919_v35 }
 0x4e1   :  { %9796 = vmatprep.subr.bf16.mxu0 %v11656_v36  ;;  %9816 = vmatprep.subr.bf16.mxu1 %v11656_v36 }
 0x4e4   :  { %9797 = vmatpush3.bf16.msra.mxu0 %v10920_v38  ;;  %9817 = vmatpush3.bf16.msra.mxu1 %v10921_v40 }
 0x4e5   :  { %9798 = vmatprep.subr.bf16.mxu0 %v11656_v36  ;;  %9818 = vmatprep.subr.bf16.mxu1 %v11656_v36 }
 0x4e8   :  { %9799 = vmatpush3.bf16.msra.mxu0 %v10922_v3  ;;  %9819 = vmatpush3.bf16.msra.mxu1 %v10923_v6 }
 0x4e9   :  { %9824 = vmatprep.subr.bf16.mxu0 %v11656_v36  ;;  %9844 = vmatprep.subr.bf16.mxu1 %v11656_v36 }
 0x4eb   :  { %9801 = vmatmul.mubr.bf16.vlgmr.msra.gmra.mrb[52].mxu0 %v2314_v54  ;;  %9821 = vmatmul.mubr.bf16.vlgmr.msra.gmra.mrb[52].mxu1 %v2314_v54 }
 0x4ec   :  { %9840 = vmatprep.mubr.msk.bf16.mxu0 %vm11657_vm0, %v11656_v36  ;;  %9860 = vmatprep.mubr.msk.bf16.mxu1 %vm11657_vm0, %v11656_v36 }
 0x4ed   :  { %9825 = vmatpush3.bf16.msra.mxu0 %v10924_v47  ;;  %9845 = vmatpush3.bf16.msra.mxu1 %v10925_v43 }
 0x4ee   :  { %9826 = vmatprep.subr.bf16.mxu0 %v11656_v36  ;;  %9846 = vmatprep.subr.bf16.mxu1 %v11656_v36 }
 0x4f1   :  { %9827 = vmatpush3.bf16.msra.mxu0 %v10926_v7  ;;  %9847 = vmatpush3.bf16.msra.mxu1 %v10927_v11 }
 0x4f2   :  { %9828 = vmatprep.subr.bf16.mxu0 %v11656_v36  ;;  %9848 = vmatprep.subr.bf16.mxu1 %v11656_v36 }
 0x4f5   :  { %9829 = vmatpush3.bf16.msra.mxu0 %v10928_v63  ;;  %9849 = vmatpush3.bf16.msra.mxu1 %v10929_v59 }
 0x4f6   :  { %9830 = vmatprep.subr.bf16.mxu0 %v11656_v36  ;;  %9850 = vmatprep.subr.bf16.mxu1 %v11656_v36 }
 0x4f9   :  { %9831 = vmatpush3.bf16.msra.mxu0 %v10930_v14  ;;  %9851 = vmatpush3.bf16.msra.mxu1 %v10931_v15 }
 0x4fa   :  { %9832 = vmatprep.subr.bf16.mxu0 %v11656_v36  ;;  %9852 = vmatprep.subr.bf16.mxu1 %v11656_v36 }
 0x4fd   :  { %9833 = vmatpush3.bf16.msra.mxu0 %v10932_v55  ;;  %9853 = vmatpush3.bf16.msra.mxu1 %v10933_v51 }
 0x4fe   :  { %9834 = vmatprep.subr.bf16.mxu0 %v11656_v36  ;;  %9854 = vmatprep.subr.bf16.mxu1 %v11656_v36 }
 0x501   :  { %9835 = vmatpush3.bf16.msra.mxu0 %v10934_v18  ;;  %9855 = vmatpush3.bf16.msra.mxu1 %v10935_v19  ;;  %v10940_v18 = vld [vmem:[#allocation5 + $0x8] ss:$16 sps:$4 sm:$0xff]   ;;  %v10941_v19 = vld [vmem:[#allocation5 + $0xc] ss:$16 sps:$4 sm:$0xff]  }
 0x502   :  { %9836 = vmatprep.subr.bf16.mxu0 %v11656_v36  ;;  %9856 = vmatprep.subr.bf16.mxu1 %v11656_v36 }
 0x505   :  { %9837 = vmatpush3.bf16.msra.mxu0 %v10936_v22  ;;  %9857 = vmatpush3.bf16.msra.mxu1 %v10937_v23  ;;  %v10943_v23 = vld [vmem:[#allocation5 + $0x2c] ss:$16 sps:$4 sm:$0xff]  }
 0x506   :  { %9838 = vmatprep.subr.bf16.mxu0 %v11656_v36  ;;  %9858 = vmatprep.subr.bf16.mxu1 %v11656_v36 }
 0x509   :  { %9839 = vmatpush3.bf16.msra.mxu0 %v10938_v29  ;;  %9859 = vmatpush3.bf16.msra.mxu1 %v10939_v32  ;;  %v10944_v29 = vld [vmem:[#allocation5 + $0x48] ss:$16 sps:$4 sm:$0xff]   ;;  %v10945_v32 = vld [vmem:[#allocation5 + $0x4c] ss:$16 sps:$4 sm:$0xff]  }
 0x50a   :  { %9864 = vmatprep.subr.bf16.mxu0 %v11656_v36  ;;  %9884 = vmatprep.subr.bf16.mxu1 %v11656_v36 }
 0x59e   :  { %v2415_v34 = vpop.f32.mrb[48].mxu0  ;;  %v2528_v37 = vpop.f32.mrb[48].mxu1 }
 0x59f   :  { %v2421_v39 = vadd.f32 %v2415_v34, %v11916_v8  ;;  %v2534_v1 = vadd.f32 %v2528_v37, %v11911_v4  ;;  %v9762_v48 = vpop.f32.mrb[49].mxu0  ;;  %v9782_v41 = vpop.f32.mrb[49].mxu1  ;;  %v10946_v34 = vld [vmem:[#allocation5 + $0x68] ss:$16 sps:$4 sm:$0xff]   ;;  %v10947_v37 = vld [vmem:[#allocation5 + $0x6c] ss:$16 sps:$4 sm:$0xff]  }
 0x5a0   :  { %v2418_v46 = vpop.f32.mrb[50].mxu0  ;;  %v2531_v49 = vpop.f32.mrb[50].mxu1  ;;  %v10950_v48 = vld [vmem:[#allocation5 + $0xa8] ss:$16 sps:$4 sm:$0xff]   ;;  %v10951_v41 = vld [vmem:[#allocation5 + $0xac] ss:$16 sps:$4 sm:$0xff]  }
 0x5a1   :  { %v9763_v56 = vpop.f32.mrb[51].mxu0  ;;  %v9783_v54 = vpop.f32.mrb[51].mxu1  ;;  %v8381_v52 = vmul.f32 -1.442695, %v2421_v39  ;;  %v8390_v57 = vmul.f32 -1.442695, %v2534_v1 }
 0x5a2   :  { %v10948_v39 = vld [vmem:[#allocation5 + $0x88] ss:$16 sps:$4 sm:$0xff]   ;;  %v10949_v1 = vld [vmem:[#allocation5 + $0x8c] ss:$16 sps:$4 sm:$0xff]  }
 0x5a3   :  { %11388 = vpow2.f32 %v8381_v52  ;;  %v10952_v46 = vld [vmem:[#allocation5 + $0xc8] ss:$16 sps:$4 sm:$0xff]   ;;  %v10953_v49 = vld [vmem:[#allocation5 + $0xcc] ss:$16 sps:$4 sm:$0xff]   ;;  %v10956_v52 = vld [vmem:[#allocation5 + $0x4] ss:$16 sps:$4 sm:$0xff]  }
 0x5a4   :  { %11390 = vpow2.f32 %v8390_v57  ;;  %v10954_v56 = vld [vmem:[#allocation5 + $0xe8] ss:$16 sps:$4 sm:$0xff]   ;;  %v10955_v54 = vld [vmem:[#allocation5 + $0xec] ss:$16 sps:$4 sm:$0xff]   ;;  %v10957_v57 = vld [vmem:[#allocation5] ss:$16 sps:$4 sm:$0xff]  }
 0x5ad   :  { %v11389_v58 = vpop.eup %11388 }
 0x5ae   :  { %v11391_v10 = vpop.eup %11390  ;;  %v2425_v61 = vadd.f32 1.0, %v11389_v58  ;;  %v10958_v58 = vld [vmem:[#allocation5 + $0x24] ss:$16 sps:$4 sm:$0xff]  }
 0x5af   :  { %v2538_v62 = vadd.f32 1.0, %v11391_v10  ;;  %v10959_v10 = vld [vmem:[#allocation5 + $0x20] ss:$16 sps:$4 sm:$0xff]  }
 0x5b0   :  { %11392 = vrcp.f32 %v2425_v61  ;;  %v10960_v61 = vld [vmem:[#allocation5 + $0x44] ss:$16 sps:$4 sm:$0xff]  }
 0x5b1   :  { %11394 = vrcp.f32 %v2538_v62  ;;  %v10961_v62 = vld [vmem:[#allocation5 + $0x40] ss:$16 sps:$4 sm:$0xff]  }
 0x5ba   :  { %v11393_v43 = vpop.eup %11392 }
 0x5bb   :  { %v11395_v7 = vpop.eup %11394  ;;  %v2428_v63 = vmul.f32 %v11393_v43, %v12115_v60  ;;  %v10942_v60 = vld [vmem:[#allocation5 + $0x28] ss:$16 sps:$4 sm:$0xff]  }
 0x5be   :  { %v2640_v44 = vpop.f32.mrb[52].mxu0  ;;  %v2749_v2 = vpop.f32.mrb[52].mxu1 }
 0x5bf   :  { %v2646_v8 = vadd.f32 %v2640_v44, %v11914_v5  ;;  %v2755_v4 = vadd.f32 %v2749_v2, %v11919_v9  ;;  %v9802_v33 = vpop.f32.mrb[53].mxu0  ;;  %v9822_v35 = vpop.f32.mrb[53].mxu1  ;;  %v10962_v44 = vld [vmem:[#allocation5 + $0x64] ss:$16 sps:$4 sm:$0xff]   ;;  %v10963_v2 = vld [vmem:[#allocation5 + $0x60] ss:$16 sps:$4 sm:$0xff]  }
 0x5c0   :  { %v2643_v38 = vpop.f32.mrb[54].mxu0  ;;  %v2752_v40 = vpop.f32.mrb[54].mxu1  ;;  %v10966_v33 = vld [vmem:[#allocation5 + $0xa4] ss:$16 sps:$4 sm:$0xff]   ;;  %v10967_v35 = vld [vmem:[#allocation5 + $0xa0] ss:$16 sps:$4 sm:$0xff]  }
 0x5c1   :  { %11396 = vtanh.f32 %v2646_v8  ;;  %v8407_v3 = vmul.f32 -1.442695, %v2755_v4  ;;  %v9803_v6 = vpop.f32.mrb[55].mxu0  ;;  %v9823_v47 = vpop.f32.mrb[55].mxu1  ;;  %v10964_v8 = vld [vmem:[#allocation5 + $0x84] ss:$16 sps:$4 sm:$0xff]  }
 0x5c2   :  { %v10965_v4 = vld [vmem:[#allocation5 + $0x80] ss:$16 sps:$4 sm:$0xff]   ;;  %v10968_v38 = vld [vmem:[#allocation5 + $0xc4] ss:$16 sps:$4 sm:$0xff]  }
 0x5c3   :  { %11398 = vpow2.f32 %v8407_v3  ;;  %v10969_v40 = vld [vmem:[#allocation5 + $0xc0] ss:$16 sps:$4 sm:$0xff]   ;;  %v10970_v3 = vld [vmem:[#allocation5 + $0xe4] ss:$16 sps:$4 sm:$0xff]  }
 0x5c4   :  { %v10971_v6 = vld [vmem:[#allocation5 + $0xe0] ss:$16 sps:$4 sm:$0xff]  }
 0x5cb   :  { %v11397_v11 = vpop.eup %11396 }
 0x5cc   :  { %v2648_v59 = vmul.f32 %v11397_v11, %v11395_v7 }
 0x5cd   :  { %v11399_v14 = vpop.eup %11398 }
 0x5ce   :  { %v12166_v5 = vadd.f32 %v2648_v59, %v2428_v63  ;;  %v2759_v9 = vadd.f32 1.0, %v11399_v14 }
 0x5d0   :  { %11400 = vtanh.f32 %v12166_v5 }
 0x5d1   :  { %11402 = vrcp.f32 %v2759_v9 }
 0x5da   :  { %v11401_v15 = vpop.eup %11400 }
 0x5db   :  { %v11403_v55 = vpop.eup %11402 }
 0x5dc   :  { %v2763_v51 = vmul.f32 %v11403_v55, %v11401_v15 }
 0x5de   :  { %8408 = vst [vmem:[%s12875_s8 + $0x20] sm:$0xff] %v2763_v51  ;;  %v2768_v22 = vpack.c.bf16 %v2763_v51, %v2763_v51 }
 0x5e0   :  { %9841 = vmatmul.mubr.bf16.vlgmr.msra.gmra.mrb[56].mxu0 %v2768_v22  ;;  %9861 = vmatmul.mubr.bf16.vlgmr.msra.gmra.mrb[56].mxu1 %v2768_v22 }
 0x5e1   :  { %9865 = vmatpush3.bf16.msra.mxu0 %v10940_v18  ;;  %9885 = vmatpush3.bf16.msra.mxu1 %v10941_v19 }
 0x5e2   :  { %9866 = vmatprep.subr.bf16.mxu0 %v11656_v36  ;;  %9886 = vmatprep.subr.bf16.mxu1 %v11656_v36 }
 0x5e3   :  { %9880 = vmatprep.mubr.msk.bf16.mxu0 %vm11657_vm0, %v11656_v36  ;;  %9900 = vmatprep.mubr.msk.bf16.mxu1 %vm11657_vm0, %v11656_v36 }
 0x5e5   :  { %9867 = vmatpush3.bf16.msra.mxu0 %v10942_v60  ;;  %9887 = vmatpush3.bf16.msra.mxu1 %v10943_v23 }
 0x5e6   :  { %9868 = vmatprep.subr.bf16.mxu0 %v11656_v36  ;;  %9888 = vmatprep.subr.bf16.mxu1 %v11656_v36 }
 0x5e9   :  { %9869 = vmatpush3.bf16.msra.mxu0 %v10944_v29  ;;  %9889 = vmatpush3.bf16.msra.mxu1 %v10945_v32 }
 0x5ea   :  { %9870 = vmatprep.subr.bf16.mxu0 %v11656_v36  ;;  %9890 = vmatprep.subr.bf16.mxu1 %v11656_v36 }
 0x5ed   :  { %9871 = vmatpush3.bf16.msra.mxu0 %v10946_v34  ;;  %9891 = vmatpush3.bf16.msra.mxu1 %v10947_v37 }
 0x5ee   :  { %9872 = vmatprep.subr.bf16.mxu0 %v11656_v36  ;;  %9892 = vmatprep.subr.bf16.mxu1 %v11656_v36 }
 0x5f1   :  { %9873 = vmatpush3.bf16.msra.mxu0 %v10948_v39  ;;  %9893 = vmatpush3.bf16.msra.mxu1 %v10949_v1 }
 0x5f2   :  { %9874 = vmatprep.subr.bf16.mxu0 %v11656_v36  ;;  %9894 = vmatprep.subr.bf16.mxu1 %v11656_v36 }
 0x5f5   :  { %9875 = vmatpush3.bf16.msra.mxu0 %v10950_v48  ;;  %9895 = vmatpush3.bf16.msra.mxu1 %v10951_v41 }
 0x5f6   :  { %9876 = vmatprep.subr.bf16.mxu0 %v11656_v36  ;;  %9896 = vmatprep.subr.bf16.mxu1 %v11656_v36 }
 0x5f9   :  { %9877 = vmatpush3.bf16.msra.mxu0 %v10952_v46  ;;  %9897 = vmatpush3.bf16.msra.mxu1 %v10953_v49 }
 0x5fa   :  { %9878 = vmatprep.subr.bf16.mxu0 %v11656_v36  ;;  %9898 = vmatprep.subr.bf16.mxu1 %v11656_v36 }
 0x5fd   :  { %9879 = vmatpush3.bf16.msra.mxu0 %v10954_v56  ;;  %9899 = vmatpush3.bf16.msra.mxu1 %v10955_v54 }
 0x5fe   :  { %9904 = vmatprep.subr.bf16.mxu0 %v11656_v36  ;;  %9924 = vmatprep.subr.bf16.mxu1 %v11656_v36 }
 0x600   :  { %9881 = vmatmul.mubr.bf16.vlgmr.msra.gmra.mrb[60].mxu0 %v2768_v22  ;;  %9901 = vmatmul.mubr.bf16.vlgmr.msra.gmra.mrb[60].mxu1 %v2768_v22 }
 0x601   :  { %9920 = vmatprep.mubr.msk.bf16.mxu0 %vm11657_vm0, %v11656_v36  ;;  %9940 = vmatprep.mubr.msk.bf16.mxu1 %vm11657_vm0, %v11656_v36 }
 0x602   :  { %9905 = vmatpush3.bf16.msra.mxu0 %v10956_v52  ;;  %9925 = vmatpush3.bf16.msra.mxu1 %v10957_v57 }
 0x603   :  { %9906 = vmatprep.subr.bf16.mxu0 %v11656_v36  ;;  %9926 = vmatprep.subr.bf16.mxu1 %v11656_v36 }
 0x606   :  { %9907 = vmatpush3.bf16.msra.mxu0 %v10958_v58  ;;  %9927 = vmatpush3.bf16.msra.mxu1 %v10959_v10 }
 0x607   :  { %9908 = vmatprep.subr.bf16.mxu0 %v11656_v36  ;;  %9928 = vmatprep.subr.bf16.mxu1 %v11656_v36 }
 0x60a   :  { %9909 = vmatpush3.bf16.msra.mxu0 %v10960_v61  ;;  %9929 = vmatpush3.bf16.msra.mxu1 %v10961_v62 }
 0x60b   :  { %9910 = vmatprep.subr.bf16.mxu0 %v11656_v36  ;;  %9930 = vmatprep.subr.bf16.mxu1 %v11656_v36 }
 0x60e   :  { %9911 = vmatpush3.bf16.msra.mxu0 %v10962_v44  ;;  %9931 = vmatpush3.bf16.msra.mxu1 %v10963_v2  ;;  %v10972_v44 = vld [vmem:[#allocation5 + $0x8] ss:$16 sps:$4 sm:$0xff]   ;;  %v10973_v2 = vld [vmem:[#allocation5 + $0xc] ss:$16 sps:$4 sm:$0xff]  }
 0x60f   :  { %9912 = vmatprep.subr.bf16.mxu0 %v11656_v36  ;;  %9932 = vmatprep.subr.bf16.mxu1 %v11656_v36 }
 0x612   :  { %9913 = vmatpush3.bf16.msra.mxu0 %v10964_v8  ;;  %9933 = vmatpush3.bf16.msra.mxu1 %v10965_v4  ;;  %v10975_v4 = vld [vmem:[#allocation5 + $0x2c] ss:$16 sps:$4 sm:$0xff]  }
 0x613   :  { %9914 = vmatprep.subr.bf16.mxu0 %v11656_v36  ;;  %9934 = vmatprep.subr.bf16.mxu1 %v11656_v36 }
 0x616   :  { %9915 = vmatpush3.bf16.msra.mxu0 %v10966_v33  ;;  %9935 = vmatpush3.bf16.msra.mxu1 %v10967_v35  ;;  %v10976_v33 = vld [vmem:[#allocation5 + $0x48] ss:$16 sps:$4 sm:$0xff]   ;;  %v10977_v35 = vld [vmem:[#allocation5 + $0x4c] ss:$16 sps:$4 sm:$0xff]  }
 0x617   :  { %9916 = vmatprep.subr.bf16.mxu0 %v11656_v36  ;;  %9936 = vmatprep.subr.bf16.mxu1 %v11656_v36 }
 0x61a   :  { %9917 = vmatpush3.bf16.msra.mxu0 %v10968_v38  ;;  %9937 = vmatpush3.bf16.msra.mxu1 %v10969_v40  ;;  %v10978_v38 = vld [vmem:[#allocation5 + $0x68] ss:$16 sps:$4 sm:$0xff]   ;;  %v10979_v40 = vld [vmem:[#allocation5 + $0x6c] ss:$16 sps:$4 sm:$0xff]  }
 0x61b   :  { %9918 = vmatprep.subr.bf16.mxu0 %v11656_v36  ;;  %9938 = vmatprep.subr.bf16.mxu1 %v11656_v36 }
 0x61e   :  { %9919 = vmatpush3.bf16.msra.mxu0 %v10970_v3  ;;  %9939 = vmatpush3.bf16.msra.mxu1 %v10971_v6  ;;  %v10980_v3 = vld [vmem:[#allocation5 + $0x88] ss:$16 sps:$4 sm:$0xff]   ;;  %v10981_v6 = vld [vmem:[#allocation5 + $0x8c] ss:$16 sps:$4 sm:$0xff]  }
 0x61f   :  { %9944 = vmatprep.subr.bf16.mxu0 %v11656_v36  ;;  %9964 = vmatprep.subr.bf16.mxu1 %v11656_v36 }
 0x6b3   :  { %v2869_v47 = vpop.f32.mrb[56].mxu0  ;;  %v2982_v43 = vpop.f32.mrb[56].mxu1 }
 0x6b4   :  { %v2875_v7 = vadd.f32 %v2869_v47, %v11927_v16  ;;  %v2988_v11 = vadd.f32 %v2982_v43, %v11922_v12  ;;  %v9842_v63 = vpop.f32.mrb[57].mxu0  ;;  %v9862_v59 = vpop.f32.mrb[57].mxu1  ;;  %v10982_v47 = vld [vmem:[#allocation5 + $0xa8] ss:$16 sps:$4 sm:$0xff]   ;;  %v10983_v43 = vld [vmem:[#allocation5 + $0xac] ss:$16 sps:$4 sm:$0xff]  }
 0x6b5   :  { %v2872_v14 = vpop.f32.mrb[58].mxu0  ;;  %v2985_v9 = vpop.f32.mrb[58].mxu1  ;;  %v10986_v63 = vld [vmem:[#allocation5 + $0xe8] ss:$16 sps:$4 sm:$0xff]   ;;  %v10987_v59 = vld [vmem:[#allocation5 + $0xec] ss:$16 sps:$4 sm:$0xff]  }
 0x6b6   :  { %v9843_v15 = vpop.f32.mrb[59].mxu0  ;;  %v9863_v55 = vpop.f32.mrb[59].mxu1  ;;  %v8417_v51 = vmul.f32 -1.442695, %v2875_v7  ;;  %v8426_v18 = vmul.f32 -1.442695, %v2988_v11 }
 0x6b7   :  { %v10984_v7 = vld [vmem:[#allocation5 + $0xc8] ss:$16 sps:$4 sm:$0xff]   ;;  %v10985_v11 = vld [vmem:[#allocation5 + $0xcc] ss:$16 sps:$4 sm:$0xff]   ;;  %v10988_v14 = vld [vmem:[#allocation5 + $0x4] ss:$16 sps:$4 sm:$0xff]  }
 0x6b8   :  { %11404 = vpow2.f32 %v8417_v51  ;;  %v10989_v9 = vld [vmem:[#allocation5] ss:$16 sps:$4 sm:$0xff]   ;;  %v10990_v15 = vld [vmem:[#allocation5 + $0x24] ss:$16 sps:$4 sm:$0xff]  }
 0x6b9   :  { %11406 = vpow2.f32 %v8426_v18  ;;  %v10991_v55 = vld [vmem:[#allocation5 + $0x20] ss:$16 sps:$4 sm:$0xff]   ;;  %v10992_v51 = vld [vmem:[#allocation5 + $0x44] ss:$16 sps:$4 sm:$0xff]  }
 0x6ba   :  { %v10993_v18 = vld [vmem:[#allocation5 + $0x40] ss:$16 sps:$4 sm:$0xff]  }
 0x6c2   :  { %v11405_v19 = vpop.eup %11404 }
 0x6c3   :  { %v11407_v22 = vpop.eup %11406  ;;  %v2879_v60 = vadd.f32 1.0, %v11405_v19  ;;  %v10994_v19 = vld [vmem:[#allocation5 + $0x64] ss:$16 sps:$4 sm:$0xff]  }
 0x6c4   :  { %v2992_v23 = vadd.f32 1.0, %v11407_v22  ;;  %v10995_v22 = vld [vmem:[#allocation5 + $0x60] ss:$16 sps:$4 sm:$0xff]  }
 0x6c5   :  { %11408 = vrcp.f32 %v2879_v60  ;;  %v10996_v60 = vld [vmem:[#allocation5 + $0x84] ss:$16 sps:$4 sm:$0xff]  }
 0x6c6   :  { %11410 = vrcp.f32 %v2992_v23  ;;  %v10997_v23 = vld [vmem:[#allocation5 + $0x80] ss:$16 sps:$4 sm:$0xff]  }
 0x6cf   :  { %v11409_v49 = vpop.eup %11408 }
 0x6d0   :  { %v11411_v56 = vpop.eup %11410  ;;  %v2882_v52 = vmul.f32 %v11409_v49, %v12166_v5  ;;  %v10974_v5 = vld [vmem:[#allocation5 + $0x28] ss:$16 sps:$4 sm:$0xff]  }
 0x6d3   :  { %v3094_v29 = vpop.f32.mrb[60].mxu0  ;;  %v3203_v32 = vpop.f32.mrb[60].mxu1 }
 0x6d4   :  { %v3100_v16 = vadd.f32 %v3094_v29, %v11925_v13  ;;  %v3209_v12 = vadd.f32 %v3203_v32, %v11930_v17  ;;  %v9882_v34 = vpop.f32.mrb[61].mxu0  ;;  %v9902_v37 = vpop.f32.mrb[61].mxu1  ;;  %v10998_v29 = vld [vmem:[#allocation5 + $0xa4] ss:$16 sps:$4 sm:$0xff]   ;;  %v10999_v32 = vld [vmem:[#allocation5 + $0xa0] ss:$16 sps:$4 sm:$0xff]  }
 0x6d5   :  { %v3097_v39 = vpop.f32.mrb[62].mxu0  ;;  %v3206_v1 = vpop.f32.mrb[62].mxu1  ;;  %v11002_v34 = vld [vmem:[#allocation5 + $0xe4] ss:$16 sps:$4 sm:$0xff]   ;;  %v11003_v37 = vld [vmem:[#allocation5 + $0xe0] ss:$16 sps:$4 sm:$0xff]  }
 0x6d6   :  { %11412 = vtanh.f32 %v3100_v16  ;;  %v8443_v48 = vmul.f32 -1.442695, %v3209_v12  ;;  %v9883_v41 = vpop.f32.mrb[63].mxu0  ;;  %v9903_v46 = vpop.f32.mrb[63].mxu1  ;;  %v11000_v16 = vld [vmem:[#allocation5 + $0xc4] ss:$16 sps:$4 sm:$0xff]  }
 0x6d7   :  { %v11001_v12 = vld [vmem:[#allocation5 + $0xc0] ss:$16 sps:$4 sm:$0xff]  }
 0x6d8   :  { %11414 = vpow2.f32 %v8443_v48 }
 0x6e0   :  { %v11413_v54 = vpop.eup %11412 }
 0x6e1   :  { %v3102_v57 = vmul.f32 %v11413_v54, %v11411_v56 }
 0x6e2   :  { %v11415_v58 = vpop.eup %11414 }
 0x6e3   :  { %v12217_v13 = vadd.f32 %v3102_v57, %v2882_v52  ;;  %v3213_v17 = vadd.f32 1.0, %v11415_v58 }
 0x6e5   :  { %11416 = vtanh.f32 %v12217_v13 }
 0x6e6   :  { %11418 = vrcp.f32 %v3213_v17 }
 0x6ef   :  { %v11417_v10 = vpop.eup %11416 }
 0x6f0   :  { %v11419_v61 = vpop.eup %11418 }
 0x6f1   :  { %v12220_v62 = vmul.f32 %v11419_v61, %v11417_v10 }
 0x6f3   :  { %v3222_v8 = vpack.c.bf16 %v12220_v62, %v12220_v62 }
 0x6f5   :  { %9921 = vmatmul.mubr.bf16.vlgmr.msra.gmra.mrb[64].mxu0 %v3222_v8  ;;  %9941 = vmatmul.mubr.bf16.vlgmr.msra.gmra.mrb[64].mxu1 %v3222_v8 }
 0x6f6   :  { %9945 = vmatpush3.bf16.msra.mxu0 %v10972_v44  ;;  %9965 = vmatpush3.bf16.msra.mxu1 %v10973_v2 }
 0x6f7   :  { %9946 = vmatprep.subr.bf16.mxu0 %v11656_v36  ;;  %9966 = vmatprep.subr.bf16.mxu1 %v11656_v36 }
 0x6f8   :  { %9960 = vmatprep.mubr.msk.bf16.mxu0 %vm11657_vm0, %v11656_v36  ;;  %9980 = vmatprep.mubr.msk.bf16.mxu1 %vm11657_vm0, %v11656_v36 }
 0x6fa   :  { %9947 = vmatpush3.bf16.msra.mxu0 %v10974_v5  ;;  %9967 = vmatpush3.bf16.msra.mxu1 %v10975_v4 }
 0x6fb   :  { %9948 = vmatprep.subr.bf16.mxu0 %v11656_v36  ;;  %9968 = vmatprep.subr.bf16.mxu1 %v11656_v36 }
 0x6fe   :  { %9949 = vmatpush3.bf16.msra.mxu0 %v10976_v33  ;;  %9969 = vmatpush3.bf16.msra.mxu1 %v10977_v35 }
 0x6ff   :  { %9950 = vmatprep.subr.bf16.mxu0 %v11656_v36  ;;  %9970 = vmatprep.subr.bf16.mxu1 %v11656_v36 }
 0x702   :  { %9951 = vmatpush3.bf16.msra.mxu0 %v10978_v38  ;;  %9971 = vmatpush3.bf16.msra.mxu1 %v10979_v40 }
 0x703   :  { %9952 = vmatprep.subr.bf16.mxu0 %v11656_v36  ;;  %9972 = vmatprep.subr.bf16.mxu1 %v11656_v36 }
 0x706   :  { %9953 = vmatpush3.bf16.msra.mxu0 %v10980_v3  ;;  %9973 = vmatpush3.bf16.msra.mxu1 %v10981_v6 }
 0x707   :  { %9954 = vmatprep.subr.bf16.mxu0 %v11656_v36  ;;  %9974 = vmatprep.subr.bf16.mxu1 %v11656_v36 }
 0x70a   :  { %9955 = vmatpush3.bf16.msra.mxu0 %v10982_v47  ;;  %9975 = vmatpush3.bf16.msra.mxu1 %v10983_v43 }
 0x70b   :  { %9956 = vmatprep.subr.bf16.mxu0 %v11656_v36  ;;  %9976 = vmatprep.subr.bf16.mxu1 %v11656_v36 }
 0x70e   :  { %9957 = vmatpush3.bf16.msra.mxu0 %v10984_v7  ;;  %9977 = vmatpush3.bf16.msra.mxu1 %v10985_v11 }
 0x70f   :  { %9958 = vmatprep.subr.bf16.mxu0 %v11656_v36  ;;  %9978 = vmatprep.subr.bf16.mxu1 %v11656_v36 }
 0x712   :  { %9959 = vmatpush3.bf16.msra.mxu0 %v10986_v63  ;;  %9979 = vmatpush3.bf16.msra.mxu1 %v10987_v59 }
 0x713   :  { %9984 = vmatprep.subr.bf16.mxu0 %v11656_v36  ;;  %10004 = vmatprep.subr.bf16.mxu1 %v11656_v36 }
 0x715   :  { %9961 = vmatmul.mubr.bf16.vlgmr.msra.gmra.mrb[68].mxu0 %v3222_v8  ;;  %9981 = vmatmul.mubr.bf16.vlgmr.msra.gmra.mrb[68].mxu1 %v3222_v8 }
 0x716   :  { %10000 = vmatprep.mubr.msk.bf16.mxu0 %vm11657_vm0, %v11656_v36  ;;  %10020 = vmatprep.mubr.msk.bf16.mxu1 %vm11657_vm0, %v11656_v36 }
 0x717   :  { %9985 = vmatpush3.bf16.msra.mxu0 %v10988_v14  ;;  %10005 = vmatpush3.bf16.msra.mxu1 %v10989_v9 }
 0x718   :  { %9986 = vmatprep.subr.bf16.mxu0 %v11656_v36  ;;  %10006 = vmatprep.subr.bf16.mxu1 %v11656_v36 }
 0x71b   :  { %9987 = vmatpush3.bf16.msra.mxu0 %v10990_v15  ;;  %10007 = vmatpush3.bf16.msra.mxu1 %v10991_v55  ;;  %v11004_v55 = vld [vmem:[#allocation5 + $0x8] ss:$16 sps:$4 sm:$0xff]  }
 0x71c   :  { %9988 = vmatprep.subr.bf16.mxu0 %v11656_v36  ;;  %10008 = vmatprep.subr.bf16.mxu1 %v11656_v36 }
 0x71f   :  { %9989 = vmatpush3.bf16.msra.mxu0 %v10992_v51  ;;  %10009 = vmatpush3.bf16.msra.mxu1 %v10993_v18  ;;  %v11005_v51 = vld [vmem:[#allocation5 + $0xc] ss:$16 sps:$4 sm:$0xff]  }
 0x720   :  { %9990 = vmatprep.subr.bf16.mxu0 %v11656_v36  ;;  %10010 = vmatprep.subr.bf16.mxu1 %v11656_v36 }
 0x723   :  { %9991 = vmatpush3.bf16.msra.mxu0 %v10994_v19  ;;  %10011 = vmatpush3.bf16.msra.mxu1 %v10995_v22  ;;  %v11007_v19 = vld [vmem:[#allocation5 + $0x2c] ss:$16 sps:$4 sm:$0xff]   ;;  %v11008_v22 = vld [vmem:[#allocation5 + $0x48] ss:$16 sps:$4 sm:$0xff]  }
 0x724   :  { %9992 = vmatprep.subr.bf16.mxu0 %v11656_v36  ;;  %10012 = vmatprep.subr.bf16.mxu1 %v11656_v36 }
 0x727   :  { %9993 = vmatpush3.bf16.msra.mxu0 %v10996_v60  ;;  %10013 = vmatpush3.bf16.msra.mxu1 %v10997_v23  ;;  %v11009_v60 = vld [vmem:[#allocation5 + $0x4c] ss:$16 sps:$4 sm:$0xff]   ;;  %v11010_v23 = vld [vmem:[#allocation5 + $0x68] ss:$16 sps:$4 sm:$0xff]  }
 0x728   :  { %9994 = vmatprep.subr.bf16.mxu0 %v11656_v36  ;;  %10014 = vmatprep.subr.bf16.mxu1 %v11656_v36 }
 0x72b   :  { %9995 = vmatpush3.bf16.msra.mxu0 %v10998_v29  ;;  %10015 = vmatpush3.bf16.msra.mxu1 %v10999_v32  ;;  %v11011_v29 = vld [vmem:[#allocation5 + $0x6c] ss:$16 sps:$4 sm:$0xff]   ;;  %v11012_v32 = vld [vmem:[#allocation5 + $0x88] ss:$16 sps:$4 sm:$0xff]  }
 0x72c   :  { %9996 = vmatprep.subr.bf16.mxu0 %v11656_v36  ;;  %10016 = vmatprep.subr.bf16.mxu1 %v11656_v36 }
 0x72f   :  { %9997 = vmatpush3.bf16.msra.mxu0 %v11000_v16  ;;  %10017 = vmatpush3.bf16.msra.mxu1 %v11001_v12  ;;  %v11013_v16 = vld [vmem:[#allocation5 + $0x8c] ss:$16 sps:$4 sm:$0xff]   ;;  %v11014_v12 = vld [vmem:[#allocation5 + $0xa8] ss:$16 sps:$4 sm:$0xff]  }
 0x730   :  { %9998 = vmatprep.subr.bf16.mxu0 %v11656_v36  ;;  %10018 = vmatprep.subr.bf16.mxu1 %v11656_v36 }
 0x733   :  { %9999 = vmatpush3.bf16.msra.mxu0 %v11002_v34  ;;  %10019 = vmatpush3.bf16.msra.mxu1 %v11003_v37  ;;  %v11015_v34 = vld [vmem:[#allocation5 + $0xac] ss:$16 sps:$4 sm:$0xff]   ;;  %v11016_v37 = vld [vmem:[#allocation5 + $0xc8] ss:$16 sps:$4 sm:$0xff]  }
 0x734   :  { %10024 = vmatprep.subr.bf16.mxu0 %v11656_v36  ;;  %10044 = vmatprep.subr.bf16.mxu1 %v11656_v36 }
 0x7c8   :  { %v3323_v39 = vpop.f32.mrb[64].mxu0  ;;  %v3436_v1 = vpop.f32.mrb[64].mxu1 }
 0x7c9   :  { %v3329_v48 = vadd.f32 %v3323_v39, %v11938_v24  ;;  %v3442_v41 = vadd.f32 %v3436_v1, %v11933_v20  ;;  %v9922_v46 = vpop.f32.mrb[65].mxu0  ;;  %v9942_v49 = vpop.f32.mrb[65].mxu1  ;;  %v11017_v39 = vld [vmem:[#allocation5 + $0xcc] ss:$16 sps:$4 sm:$0xff]   ;;  %v11018_v1 = vld [vmem:[#allocation5 + $0xe8] ss:$16 sps:$4 sm:$0xff]  }
 0x7ca   :  { %v3326_v56 = vpop.f32.mrb[66].mxu0  ;;  %v3439_v54 = vpop.f32.mrb[66].mxu1  ;;  %v11025_v46 = vld [vmem:[#allocation7 + $0xc] ss:$16 sps:$4 sm:$0xff]   ;;  %v11020_v49 = vld [vmem:[#allocation7] ss:$16 sps:$4 sm:$0xff]  }
 0x7cb   :  { %v9923_v52 = vpop.f32.mrb[67].mxu0  ;;  %v9943_v57 = vpop.f32.mrb[67].mxu1  ;;  %v8453_v58 = vmul.f32 -1.442695, %v3329_v48  ;;  %v8462_v17 = vmul.f32 -1.442695, %v3442_v41 }
 0x7cc   :  { %v11019_v48 = vld [vmem:[#allocation5 + $0xec] ss:$16 sps:$4 sm:$0xff]   ;;  %v11022_v41 = vld [vmem:[#allocation7 + $0x4] ss:$16 sps:$4 sm:$0xff]   ;;  %v11023_v56 = vld [vmem:[#allocation7 + $0x8] ss:$16 sps:$4 sm:$0xff]  }
 0x7cd   :  { %11420 = vpow2.f32 %v8453_v58  ;;  %v11028_v54 = vld [vmem:[#allocation7 + $0x24] ss:$16 sps:$4 sm:$0xff]   ;;  %v11031_v52 = vld [vmem:[#allocation7 + $0x2c] ss:$16 sps:$4 sm:$0xff]   ;;  %v11026_v57 = vld [vmem:[#allocation7 + $0x20] ss:$16 sps:$4 sm:$0xff]  }
 0x7ce   :  { %11422 = vpow2.f32 %v8462_v17  ;;  %v11029_v58 = vld [vmem:[#allocation7 + $0x28] ss:$16 sps:$4 sm:$0xff]   ;;  %v11034_v17 = vld [vmem:[#allocation7 + $0x44] ss:$16 sps:$4 sm:$0xff]  }
 0x7d7   :  { %v11421_v10 = vpop.eup %11420 }
 0x7d8   :  { %v11423_v61 = vpop.eup %11422  ;;  %v3333_v44 = vadd.f32 1.0, %v11421_v10  ;;  %v11037_v10 = vld [vmem:[#allocation7 + $0x4c] ss:$16 sps:$4 sm:$0xff]  }
 0x7d9   :  { %v3446_v2 = vadd.f32 1.0, %v11423_v61  ;;  %v11032_v61 = vld [vmem:[#allocation7 + $0x40] ss:$16 sps:$4 sm:$0xff]  }
 0x7da   :  { %11424 = vrcp.f32 %v3333_v44  ;;  %v11035_v44 = vld [vmem:[#allocation7 + $0x48] ss:$16 sps:$4 sm:$0xff]  }
 0x7db   :  { %11426 = vrcp.f32 %v3446_v2  ;;  %v11040_v2 = vld [vmem:[#allocation7 + $0x64] ss:$16 sps:$4 sm:$0xff]  }
 0x7e4   :  { %v11425_v47 = vpop.eup %11424 }
 0x7e5   :  { %v11427_v43 = vpop.eup %11426  ;;  %v3336_v11 = vmul.f32 %v11425_v47, %v12217_v13  ;;  %v11006_v13 = vld [vmem:[#allocation5 + $0x28] ss:$16 sps:$4 sm:$0xff]   ;;  %v11058_v47 = vld [vmem:[#allocation7 + $0xc4] ss:$16 sps:$4 sm:$0xff]  }
 0x7e8   :  { %v3548_v8 = vpop.f32.mrb[68].mxu0  ;;  %v3657_v5 = vpop.f32.mrb[68].mxu1 }
 0x7e9   :  { %v3554_v24 = vadd.f32 %v3548_v8, %v11936_v21  ;;  %v3663_v20 = vadd.f32 %v3657_v5, %v11941_v25  ;;  %v9962_v4 = vpop.f32.mrb[69].mxu0  ;;  %v9982_v33 = vpop.f32.mrb[69].mxu1  ;;  %v11043_v8 = vld [vmem:[#allocation7 + $0x6c] ss:$16 sps:$4 sm:$0xff]   ;;  %v11038_v5 = vld [vmem:[#allocation7 + $0x60] ss:$16 sps:$4 sm:$0xff]  }
 0x7ea   :  { %v3551_v35 = vpop.f32.mrb[70].mxu0  ;;  %v3660_v38 = vpop.f32.mrb[70].mxu1  ;;  %v11049_v4 = vld [vmem:[#allocation7 + $0x8c] ss:$16 sps:$4 sm:$0xff]   ;;  %v11044_v33 = vld [vmem:[#allocation7 + $0x80] ss:$16 sps:$4 sm:$0xff]  }
 0x7eb   :  { %11428 = vtanh.f32 %v3554_v24  ;;  %v8479_v40 = vmul.f32 -1.442695, %v3663_v20  ;;  %v9963_v3 = vpop.f32.mrb[71].mxu0  ;;  %v9983_v6 = vpop.f32.mrb[71].mxu1  ;;  %v11041_v24 = vld [vmem:[#allocation7 + $0x68] ss:$16 sps:$4 sm:$0xff]  }
 0x7ec   :  { %v11046_v20 = vld [vmem:[#allocation7 + $0x84] ss:$16 sps:$4 sm:$0xff]   ;;  %v11047_v35 = vld [vmem:[#allocation7 + $0x88] ss:$16 sps:$4 sm:$0xff]   ;;  %v11050_v3 = vld [vmem:[#allocation7 + $0xa0] ss:$16 sps:$4 sm:$0xff]  }
 0x7ed   :  { %11430 = vpow2.f32 %v8479_v40  ;;  %v11052_v38 = vld [vmem:[#allocation7 + $0xa4] ss:$16 sps:$4 sm:$0xff]   ;;  %v11055_v40 = vld [vmem:[#allocation7 + $0xac] ss:$16 sps:$4 sm:$0xff]   ;;  %v11053_v6 = vld [vmem:[#allocation7 + $0xa8] ss:$16 sps:$4 sm:$0xff]  }
 0x7f5   :  { %v11429_v7 = vpop.eup %11428 }
 0x7f6   :  { %v3556_v63 = vmul.f32 %v11429_v7, %v11427_v43  ;;  %v11061_v43 = vld [vmem:[#allocation7 + $0xcc] ss:$16 sps:$4 sm:$0xff]   ;;  %v11056_v7 = vld [vmem:[#allocation7 + $0xc0] ss:$16 sps:$4 sm:$0xff]  }
 0x7f7   :  { %v11431_v59 = vpop.eup %11430 }
 0x7f8   :  { %v12269_v21 = vadd.f32 %v3556_v63, %v3336_v11  ;;  %v3667_v25 = vadd.f32 1.0, %v11431_v59  ;;  %v11059_v11 = vld [vmem:[#allocation7 + $0xc8] ss:$16 sps:$4 sm:$0xff]   ;;  %v11064_v63 = vld [vmem:[#allocation7 + $0xe4] ss:$16 sps:$4 sm:$0xff]  }
 0x7f9   :  { %v11067_v59 = vld [vmem:[#allocation7 + $0xec] ss:$16 sps:$4 sm:$0xff]  }
 0x7fa   :  { %11432 = vtanh.f32 %v12269_v21 }
 0x7fb   :  { %11434 = vrcp.f32 %v3667_v25  ;;  %v11062_v25 = vld [vmem:[#allocation7 + $0xe0] ss:$16 sps:$4 sm:$0xff]  }
 0x804   :  { %v11433_v14 = vpop.eup %11432 }
 0x805   :  { %v11435_v9 = vpop.eup %11434 }
 0x806   :  { %v12272_v15 = vmul.f32 %v11435_v9, %v11433_v14  ;;  %v11065_v14 = vld [vmem:[#allocation7 + $0xe8] ss:$16 sps:$4 sm:$0xff]  }
 0x807   :  { %v4137_v9 = vld [vmem:[%s12875_s8 + $0x8] sm:$0xff] }
 0x808   :  { %v3676_v18 = vpack.c.bf16 %v12272_v15, %v12272_v15 }
 0x80a   :  { %10001 = vmatmul.mubr.bf16.vlgmr.msra.gmra.mrb[72].mxu0 %v3676_v18  ;;  %10021 = vmatmul.mubr.bf16.vlgmr.msra.gmra.mrb[72].mxu1 %v3676_v18 }
 0x80b   :  { %10025 = vmatpush3.bf16.msra.mxu0 %v11004_v55  ;;  %10045 = vmatpush3.bf16.msra.mxu1 %v11005_v51  ;;  %v4136_v55 = vld [vmem:[%s12875_s8] sm:$0xff] }
 0x80c   :  { %10026 = vmatprep.subr.bf16.mxu0 %v11656_v36  ;;  %10046 = vmatprep.subr.bf16.mxu1 %v11656_v36  ;;  %v8844_v51 = vpack.c.bf16 %v4137_v9, %v4136_v55 }
 0x80d   :  { %10040 = vmatprep.mubr.msk.bf16.mxu0 %vm11657_vm0, %v11656_v36  ;;  %10060 = vmatprep.mubr.msk.bf16.mxu1 %vm11657_vm0, %v11656_v36 }
 0x80f   :  { %10027 = vmatpush3.bf16.msra.mxu0 %v11006_v13  ;;  %10047 = vmatpush3.bf16.msra.mxu1 %v11007_v19  ;;  %v4138_v13 = vld [vmem:[%s12875_s8 + $0x10] sm:$0xff] }
 0x810   :  { %10028 = vmatprep.subr.bf16.mxu0 %v11656_v36  ;;  %10048 = vmatprep.subr.bf16.mxu1 %v11656_v36 }
 0x813   :  { %10029 = vmatpush3.bf16.msra.mxu0 %v11008_v22  ;;  %10049 = vmatpush3.bf16.msra.mxu1 %v11009_v60  ;;  %v4140_v22 = vld [vmem:[%s12875_s8 + $0x20] sm:$0xff] }
 0x814   :  { %10030 = vmatprep.subr.bf16.mxu0 %v11656_v36  ;;  %10050 = vmatprep.subr.bf16.mxu1 %v11656_v36  ;;  %v8846_v60 = vpack.c.bf16 %v12220_v62, %v4140_v22  ;;  %v11072_v62 = vld [vmem:[#allocation5 + $0x144] ss:$16 sps:$4 sm:$0xff]  }
 0x817   :  { %10031 = vmatpush3.bf16.msra.mxu0 %v11010_v23  ;;  %10051 = vmatpush3.bf16.msra.mxu1 %v11011_v29  ;;  %v11068_v23 = vld [vmem:[#allocation5 + $0x104] ss:$16 sps:$4 sm:$0xff]   ;;  %v11069_v29 = vld [vmem:[#allocation5 + $0x100] ss:$16 sps:$4 sm:$0xff]  }
 0x818   :  { %10032 = vmatprep.subr.bf16.mxu0 %v11656_v36  ;;  %10052 = vmatprep.subr.bf16.mxu1 %v11656_v36 }
 0x81b   :  { %10033 = vmatpush3.bf16.msra.mxu0 %v11012_v32  ;;  %10053 = vmatpush3.bf16.msra.mxu1 %v11013_v16  ;;  %v11070_v32 = vld [vmem:[#allocation5 + $0x124] ss:$16 sps:$4 sm:$0xff]   ;;  %v11071_v16 = vld [vmem:[#allocation5 + $0x120] ss:$16 sps:$4 sm:$0xff]  }
 0x81c   :  { %10034 = vmatprep.subr.bf16.mxu0 %v11656_v36  ;;  %10054 = vmatprep.subr.bf16.mxu1 %v11656_v36 }
 0x81f   :  { %10035 = vmatpush3.bf16.msra.mxu0 %v11014_v12  ;;  %10055 = vmatpush3.bf16.msra.mxu1 %v11015_v34  ;;  %v11073_v12 = vld [vmem:[#allocation5 + $0x140] ss:$16 sps:$4 sm:$0xff]  }
 0x820   :  { %10036 = vmatprep.subr.bf16.mxu0 %v11656_v36  ;;  %10056 = vmatprep.subr.bf16.mxu1 %v11656_v36  ;;  %v11075_v34 = vld [vmem:[#allocation5 + $0x160] ss:$16 sps:$4 sm:$0xff]  }
 0x823   :  { %10037 = vmatpush3.bf16.msra.mxu0 %v11016_v37  ;;  %10057 = vmatpush3.bf16.msra.mxu1 %v11017_v39  ;;  %v11076_v37 = vld [vmem:[#allocation5 + $0x184] ss:$16 sps:$4 sm:$0xff]   ;;  %v11077_v39 = vld [vmem:[#allocation5 + $0x180] ss:$16 sps:$4 sm:$0xff]  }
 0x824   :  { %10038 = vmatprep.subr.bf16.mxu0 %v11656_v36  ;;  %10058 = vmatprep.subr.bf16.mxu1 %v11656_v36 }
 0x827   :  { %10039 = vmatpush3.bf16.msra.mxu0 %v11018_v1  ;;  %10059 = vmatpush3.bf16.msra.mxu1 %v11019_v48  ;;  %v11078_v1 = vld [vmem:[#allocation5 + $0x1a4] ss:$16 sps:$4 sm:$0xff]   ;;  %v11079_v48 = vld [vmem:[#allocation5 + $0x1a0] ss:$16 sps:$4 sm:$0xff]  }
 0x828   :  { %4390 = vmatprep.subr.bf16.mxu0 %v11022_v41  ;;  %4463 = vmatprep.subr.bf16.mxu1 %v11025_v46  ;;  %v11080_v41 = vld [vmem:[#allocation5 + $0x1c4] ss:$16 sps:$4 sm:$0xff]   ;;  %v11081_v46 = vld [vmem:[#allocation5 + $0x1c0] ss:$16 sps:$4 sm:$0xff]  }
 0x82a   :  { %10041 = vmatmul.mubr.bf16.vlgmr.msra.gmra.mrb[76].mxu0 %v3676_v18  ;;  %10061 = vmatmul.mubr.bf16.vlgmr.msra.gmra.mrb[76].mxu1 %v3676_v18  ;;  %v4139_v18 = vld [vmem:[%s12875_s8 + $0x18] sm:$0xff] }
 0x82b   :  { %4391 = vmatpush1.bf16.msra.mxu0 %v11020_v49  ;;  %4464 = vmatpush1.bf16.msra.mxu1 %v11023_v56  ;;  %v8845_v19 = vpack.c.bf16 %v4139_v18, %v4138_v13  ;;  %v11082_v49 = vld [vmem:[#allocation5 + $0x1e4] ss:$16 sps:$4 sm:$0xff]   ;;  %v11083_v56 = vld [vmem:[#allocation5 + $0x1e0] ss:$16 sps:$4 sm:$0xff]  }
 0x82c   :  { %4392 = vmatprep.subr.bf16.mxu0 %v11028_v54  ;;  %4465 = vmatprep.subr.bf16.mxu1 %v11031_v52 }
 0x82d   :  { %4422 = vmatprep.mubr.bf16.mxu0 %v11655_v0  ;;  %4495 = vmatprep.mubr.bf16.mxu1 %v11655_v0 }
 0x82f   :  { %4393 = vmatpush1.bf16.msra.mxu0 %v11026_v57  ;;  %4466 = vmatpush1.bf16.msra.mxu1 %v11029_v58 }
 0x830   :  { %4394 = vmatprep.subr.bf16.mxu0 %v11034_v17  ;;  %4467 = vmatprep.subr.bf16.mxu1 %v11037_v10 }
 0x833   :  { %4395 = vmatpush1.bf16.msra.mxu0 %v11032_v61  ;;  %4468 = vmatpush1.bf16.msra.mxu1 %v11035_v44 }
 0x834   :  { %4396 = vmatprep.subr.bf16.mxu0 %v11040_v2  ;;  %4469 = vmatprep.subr.bf16.mxu1 %v11043_v8 }
 0x837   :  { %4397 = vmatpush1.bf16.msra.mxu0 %v11038_v5  ;;  %4470 = vmatpush1.bf16.msra.mxu1 %v11041_v24 }
 0x838   :  { %4398 = vmatprep.subr.bf16.mxu0 %v11046_v20  ;;  %4471 = vmatprep.subr.bf16.mxu1 %v11049_v4 }
 0x83b   :  { %4399 = vmatpush1.bf16.msra.mxu0 %v11044_v33  ;;  %4472 = vmatpush1.bf16.msra.mxu1 %v11047_v35 }
 0x83c   :  { %4400 = vmatprep.subr.bf16.mxu0 %v11052_v38  ;;  %4473 = vmatprep.subr.bf16.mxu1 %v11055_v40 }
 0x83f   :  { %4401 = vmatpush1.bf16.msra.mxu0 %v11050_v3  ;;  %4474 = vmatpush1.bf16.msra.mxu1 %v11053_v6 }
 0x840   :  { %4402 = vmatprep.subr.bf16.mxu0 %v11058_v47  ;;  %4475 = vmatprep.subr.bf16.mxu1 %v11061_v43 }
 0x843   :  { %4403 = vmatpush1.bf16.msra.mxu0 %v11056_v7  ;;  %4476 = vmatpush1.bf16.msra.mxu1 %v11059_v11 }
 0x844   :  { %4404 = vmatprep.subr.bf16.mxu0 %v11064_v63  ;;  %4477 = vmatprep.subr.bf16.mxu1 %v11067_v59 }
 0x847   :  { %4405 = vmatpush1.bf16.msra.mxu0 %v11062_v25  ;;  %4478 = vmatpush1.bf16.msra.mxu1 %v11065_v14 }
 0x848   :  { %10064 = vmatprep.subr.bf16.mxu0 %v11656_v36  ;;  %10084 = vmatprep.subr.bf16.mxu1 %v11656_v36 }
 0x84a   :  { %4423 = vmatmul.mubr.bf16.vlgmr.msra.gmra.mrb[80].mxu0 %v8844_v51  ;;  %4496 = vmatmul.mubr.bf16.vlgmr.msra.gmra.mrb[80].mxu1 %v8844_v51 }
 0x84b   :  { %4432 = vmatprep.mubr.bf16.mxu0 %v11655_v0  ;;  %4505 = vmatprep.mubr.bf16.mxu1 %v11655_v0 }
 0x84c   :  { %10065 = vmatpush3.bf16.msra.mxu0 %v11068_v23  ;;  %10085 = vmatpush3.bf16.msra.mxu1 %v11069_v29 }
 0x84d   :  { %10066 = vmatprep.subr.bf16.mxu0 %v11656_v36  ;;  %10086 = vmatprep.subr.bf16.mxu1 %v11656_v36 }
 0x850   :  { %10067 = vmatpush3.bf16.msra.mxu0 %v11070_v32  ;;  %10087 = vmatpush3.bf16.msra.mxu1 %v11071_v16 }
 0x851   :  { %10068 = vmatprep.subr.bf16.mxu0 %v11656_v36  ;;  %10088 = vmatprep.subr.bf16.mxu1 %v11656_v36 }
 0x852   :  { %4433 = vmatmul.mubr.bf16.gmra.mrb[84].mxu0 %v8845_v19  ;;  %4506 = vmatmul.mubr.bf16.gmra.mrb[84].mxu1 %v8845_v19 }
 0x853   :  { %4442 = vmatprep.mubr.bf16.mxu0 %v11655_v0  ;;  %4515 = vmatprep.mubr.bf16.mxu1 %v11655_v0 }
 0x854   :  { %10069 = vmatpush3.bf16.msra.mxu0 %v11072_v62  ;;  %10089 = vmatpush3.bf16.msra.mxu1 %v11073_v12 }
 0x855   :  { %10070 = vmatprep.subr.bf16.mxu0 %v11656_v36  ;;  %10090 = vmatprep.subr.bf16.mxu1 %v11656_v36 }
 0x858   :  { %10091 = vmatpush3.bf16.msra.mxu1 %v11075_v34  ;;  %v11084_v34 = vld [vmem:[#allocation5 + $0x108] ss:$16 sps:$4 sm:$0xff]  }
 0x859   :  { %10092 = vmatprep.subr.bf16.mxu1 %v11656_v36 }
 0x85a   :  { %4443 = vmatmul.mubr.bf16.gmra.mrb[88].mxu0 %v8846_v60  ;;  %4516 = vmatmul.mubr.bf16.gmra.mrb[88].mxu1 %v8846_v60 }
 0x85b   :  { %4452 = vmatprep.mubr.bf16.mxu0 %v11655_v0  ;;  %4525 = vmatprep.mubr.bf16.mxu1 %v11655_v0  ;;  %v11074_v0 = vld [vmem:[#allocation5 + $0x164] ss:$16 sps:$4 sm:$0xff]  }
 0x85c   :  { %10071 = vmatpush3.bf16.msra.mxu0 %v11074_v0  ;;  %10093 = vmatpush3.bf16.msra.mxu1 %v11077_v39 }
 0x85d   :  { %10072 = vmatprep.subr.bf16.mxu0 %v11656_v36  ;;  %10094 = vmatprep.subr.bf16.mxu1 %v11656_v36 }
 0x860   :  { %10073 = vmatpush3.bf16.msra.mxu0 %v11076_v37  ;;  %10095 = vmatpush3.bf16.msra.mxu1 %v11079_v48  ;;  %v11085_v37 = vld [vmem:[#allocation5 + $0x10c] ss:$16 sps:$4 sm:$0xff]  }
 0x861   :  { %10074 = vmatprep.subr.bf16.mxu0 %v11656_v36  ;;  %10096 = vmatprep.subr.bf16.mxu1 %v11656_v36 }
 0x864   :  { %10075 = vmatpush3.bf16.msra.mxu0 %v11078_v1  ;;  %10097 = vmatpush3.bf16.msra.mxu1 %v11081_v46 }
 0x865   :  { %10076 = vmatprep.subr.bf16.mxu0 %v11656_v36  ;;  %10098 = vmatprep.subr.bf16.mxu1 %v11656_v36 }
 0x868   :  { %10077 = vmatpush3.bf16.msra.mxu0 %v11080_v41  ;;  %10099 = vmatpush3.bf16.msra.mxu1 %v11083_v56 }
 0x869   :  { %10078 = vmatprep.subr.bf16.mxu0 %v11656_v36  ;;  %10124 = vmatprep.subr.bf16.mxu1 %v11656_v36 }
 0x86c   :  { %10079 = vmatpush3.bf16.msra.mxu0 %v11082_v49 }
 0x86d   :  { %10104 = vmatprep.subr.bf16.mxu0 %v11656_v36 }
 0x8dd   :  { %v3777_v54 = vpop.f32.mrb[72].mxu0  ;;  %v3890_v52 = vpop.f32.mrb[72].mxu1 }
 0x8de   :  { %v3783_v57 = vadd.f32 %v3777_v54, %v11949_v50  ;;  %v3896_v58 = vadd.f32 %v3890_v52, %v11944_v42  ;;  %v10002_v17 = vpop.f32.mrb[73].mxu0  ;;  %v10022_v10 = vpop.f32.mrb[73].mxu1  ;;  %v11086_v52 = vld [vmem:[#allocation5 + $0x128] ss:$16 sps:$4 sm:$0xff]  }
 0x8df   :  { %v3780_v61 = vpop.f32.mrb[74].mxu0  ;;  %v3893_v44 = vpop.f32.mrb[74].mxu1  ;;  %v11089_v17 = vld [vmem:[#allocation5 + $0x14c] ss:$16 sps:$4 sm:$0xff]  }
 0x8e0   :  { %v10003_v2 = vpop.f32.mrb[75].mxu0  ;;  %v10023_v8 = vpop.f32.mrb[75].mxu1  ;;  %v8489_v5 = vmul.f32 -1.442695, %v3783_v57  ;;  %v8498_v24 = vmul.f32 -1.442695, %v3896_v58 }
 0x8e1   :  { %v11087_v57 = vld [vmem:[#allocation5 + $0x12c] ss:$16 sps:$4 sm:$0xff]   ;;  %v11088_v58 = vld [vmem:[#allocation5 + $0x148] ss:$16 sps:$4 sm:$0xff]  }
 0x8e2   :  { %11436 = vpow2.f32 %v8489_v5 }
 0x8e3   :  { %11438 = vpow2.f32 %v8498_v24 }
 0x8ec   :  { %v11437_v20 = vpop.eup %11436 }
 0x8ed   :  { %v11439_v4 = vpop.eup %11438  ;;  %v3787_v33 = vadd.f32 1.0, %v11437_v20 }
 0x8ee   :  { %v3900_v35 = vadd.f32 1.0, %v11439_v4  ;;  %v11090_v4 = vld [vmem:[#allocation5 + $0x168] ss:$16 sps:$4 sm:$0xff]  }
 0x8ef   :  { %11440 = vrcp.f32 %v3787_v33  ;;  %v11091_v33 = vld [vmem:[#allocation5 + $0x16c] ss:$16 sps:$4 sm:$0xff]  }
 0x8f0   :  { %11442 = vrcp.f32 %v3900_v35  ;;  %v11092_v35 = vld [vmem:[#allocation5 + $0x188] ss:$16 sps:$4 sm:$0xff]  }
 0x8f9   :  { %v11441_v59 = vpop.eup %11440 }
 0x8fa   :  { %v11443_v25 = vpop.eup %11442  ;;  %v3790_v9 = vmul.f32 %v11441_v59, %v12269_v21  ;;  %v11104_v59 = vld [vmem:[#allocation5 + $0x144] ss:$16 sps:$4 sm:$0xff]  }
 0x8fd   :  { %v4002_v38 = vpop.f32.mrb[76].mxu0  ;;  %v4111_v40 = vpop.f32.mrb[76].mxu1 }
 0x8fe   :  { %v4008_v50 = vadd.f32 %v4002_v38, %v11947_v45  ;;  %v4117_v42 = vadd.f32 %v4111_v40, %v11952_v53  ;;  %v10042_v3 = vpop.f32.mrb[77].mxu0  ;;  %v10062_v6 = vpop.f32.mrb[77].mxu1  ;;  %v11093_v38 = vld [vmem:[#allocation5 + $0x18c] ss:$16 sps:$4 sm:$0xff]   ;;  %v11094_v40 = vld [vmem:[#allocation5 + $0x1a8] ss:$16 sps:$4 sm:$0xff]  }
 0x8ff   :  { %v4005_v47 = vpop.f32.mrb[78].mxu0  ;;  %v4114_v43 = vpop.f32.mrb[78].mxu1  ;;  %v11097_v3 = vld [vmem:[#allocation5 + $0x1cc] ss:$16 sps:$4 sm:$0xff]   ;;  %v11098_v6 = vld [vmem:[#allocation5 + $0x1e8] ss:$16 sps:$4 sm:$0xff]  }
 0x900   :  { %11444 = vtanh.f32 %v4008_v50  ;;  %v8515_v7 = vmul.f32 -1.442695, %v4117_v42  ;;  %v10043_v11 = vpop.f32.mrb[79].mxu0  ;;  %v10063_v63 = vpop.f32.mrb[79].mxu1  ;;  %v11095_v50 = vld [vmem:[#allocation5 + $0x1ac] ss:$16 sps:$4 sm:$0xff]  }
 0x901   :  { %v11096_v42 = vld [vmem:[#allocation5 + $0x1c8] ss:$16 sps:$4 sm:$0xff]   ;;  %v11099_v47 = vld [vmem:[#allocation5 + $0x1ec] ss:$16 sps:$4 sm:$0xff]   ;;  %v11100_v43 = vld [vmem:[#allocation5 + $0x104] ss:$16 sps:$4 sm:$0xff]  }
 0x902   :  { %11446 = vpow2.f32 %v8515_v7  ;;  %v11101_v7 = vld [vmem:[#allocation5 + $0x100] ss:$16 sps:$4 sm:$0xff]   ;;  %v11102_v11 = vld [vmem:[#allocation5 + $0x124] ss:$16 sps:$4 sm:$0xff]  }
 0x903   :  { %v11103_v63 = vld [vmem:[#allocation5 + $0x120] ss:$16 sps:$4 sm:$0xff]  }
 0x90a   :  { %v11445_v14 = vpop.eup %11444 }
 0x90b   :  { %v4010_v55 = vmul.f32 %v11445_v14, %v11443_v25  ;;  %v11105_v25 = vld [vmem:[#allocation5 + $0x140] ss:$16 sps:$4 sm:$0xff]   ;;  %v11106_v14 = vld [vmem:[#allocation5 + $0x164] ss:$16 sps:$4 sm:$0xff]  }
 0x90c   :  { %v11447_v51 = vpop.eup %11446 }
 0x90d   :  { %v4011_v45 = vadd.f32 %v4010_v55, %v3790_v9  ;;  %v4121_v18 = vadd.f32 1.0, %v11447_v51  ;;  %v11107_v9 = vld [vmem:[#allocation5 + $0x160] ss:$16 sps:$4 sm:$0xff]   ;;  %v11108_v55 = vld [vmem:[#allocation5 + $0x184] ss:$16 sps:$4 sm:$0xff]  }
 0x90e   :  { %v11109_v51 = vld [vmem:[#allocation5 + $0x180] ss:$16 sps:$4 sm:$0xff]  }
 0x90f   :  { %11448 = vtanh.f32 %v4011_v45  ;;  %4131 = vst [vmem:[%s12877_s10] sm:$0xff] %v4011_v45  ;;  %v11110_v45 = vld [vmem:[#allocation5 + $0x1a4] ss:$16 sps:$4 sm:$0xff]  }
 0x910   :  { %11450 = vrcp.f32 %v4121_v18  ;;  %v11111_v18 = vld [vmem:[#allocation5 + $0x1a0] ss:$16 sps:$4 sm:$0xff]  }
 0x919   :  { %v11449_v53 = vpop.eup %11448 }
 0x91a   :  { %v11451_v13 = vpop.eup %11450 }
 0x91b   :  { %v4125_v19 = vmul.f32 %v11451_v13, %v11449_v53  ;;  %v11112_v53 = vld [vmem:[#allocation5 + $0x1c4] ss:$16 sps:$4 sm:$0xff]   ;;  %v11113_v13 = vld [vmem:[#allocation5 + $0x1c0] ss:$16 sps:$4 sm:$0xff]  }
 0x91d   :  { %4130 = vst [vmem:[%s12876_s9] sm:$0xff] %v4125_v19  ;;  %v12347_v22 = vpop.f32.mrb[80].mxu0  ;;  %v12349_v21 = vpop.f32.mrb[80].mxu1  ;;  %v8847_v60 = vpack.c.bf16 %v4125_v19, %v12272_v15  ;;  %v8517_v15 = vld [vmem:[%s12873_s6 + $0x8] sm:$0xff]  ;;  %v11114_v19 = vld [vmem:[#allocation5 + $0x1e4] ss:$16 sps:$4 sm:$0xff]  }
 0x91e   :  { %v12352_v23 = vpop.f32.mrb[81].mxu0  ;;  %v12354_v29 = vpop.f32.mrb[81].mxu1  ;;  %v12371_v0 = vpack.c.bf16 %v8517_v15, %v8517_v15  ;;  %v4184_v15 = vld [vmem:[%s12872_s5] sm:$0xf] }
 0x91f   :  { %v12356_v32 = vpop.f32.mrb[82].mxu0  ;;  %v12358_v16 = vpop.f32.mrb[82].mxu1  ;;  %4453 = vmatmul.mubr.bf16.gmra.mrb[92].mxu0 %v8847_v60  ;;  %4526 = vmatmul.mubr.bf16.gmra.mrb[92].mxu1 %v8847_v60  ;;  %v11115_v60 = vld [vmem:[#allocation5 + $0x1e0] ss:$16 sps:$4 sm:$0xff]  }
 0x920   :  { %v12360_v62 = vpop.f32.mrb[83].mxu0  ;;  %v12362_v12 = vpop.f32.mrb[83].mxu1  ;;  %10080 = vmatprep.mubr.msk.bf16.mxu0 %vm11657_vm0, %v11656_v36  ;;  %10100 = vmatprep.mubr.msk.bf16.mxu1 %vm11657_vm0, %v11656_v36 }
 0x925   :  { %v12373_v39 = vpop.f32.mrb[84].mxu0  ;;  %v12375_v1 = vpop.f32.mrb[84].mxu1 }
 0x926   :  { %v12377_v48 = vpop.f32.mrb[85].mxu0  ;;  %v12379_v41 = vpop.f32.mrb[85].mxu1 }
 0x927   :  { %v12381_v46 = vpop.f32.mrb[86].mxu0  ;;  %v12383_v49 = vpop.f32.mrb[86].mxu1  ;;  %10081 = vmatmul.mubr.bf16.vlgmr.msra.gmra.mrb[96].mxu0 %v12371_v0  ;;  %10101 = vmatmul.mubr.bf16.vlgmr.msra.gmra.mrb[96].mxu1 %v12371_v0 }
 0x928   :  { %v12387_v56 = vpop.f32.mrb[87].mxu0  ;;  %v12389_v54 = vpop.f32.mrb[87].mxu1  ;;  %10105 = vmatpush3.bf16.msra.mxu0 %v11084_v34  ;;  %10125 = vmatpush3.bf16.msra.mxu1 %v11085_v37 }
 0x929   :  { %10106 = vmatprep.subr.bf16.mxu0 %v11656_v36  ;;  %10126 = vmatprep.subr.bf16.mxu1 %v11656_v36 }
 0x92a   :  { %10120 = vmatprep.mubr.msk.bf16.mxu0 %vm11657_vm0, %v11656_v36  ;;  %10140 = vmatprep.mubr.msk.bf16.mxu1 %vm11657_vm0, %v11656_v36 }
 0x92c   :  { %10107 = vmatpush3.bf16.msra.mxu0 %v11086_v52  ;;  %10127 = vmatpush3.bf16.msra.mxu1 %v11087_v57 }
 0x92d   :  { %v12397_v10 = vpop.f32.mrb[88].mxu0  ;;  %v12399_v61 = vpop.f32.mrb[88].mxu1  ;;  %10108 = vmatprep.subr.bf16.mxu0 %v11656_v36  ;;  %10128 = vmatprep.subr.bf16.mxu1 %v11656_v36 }
 0x92e   :  { %v12403_v44 = vpop.f32.mrb[89].mxu0  ;;  %v12405_v2 = vpop.f32.mrb[89].mxu1 }
 0x92f   :  { %v12407_v8 = vpop.f32.mrb[90].mxu0  ;;  %v12409_v5 = vpop.f32.mrb[90].mxu1 }
 0x930   :  { %v12411_v24 = vpop.f32.mrb[91].mxu0  ;;  %v12413_v20 = vpop.f32.mrb[91].mxu1  ;;  %10109 = vmatpush3.bf16.msra.mxu0 %v11088_v58  ;;  %10129 = vmatpush3.bf16.msra.mxu1 %v11089_v17  ;;  %v12466_v17 = vrot.slane %v4184_v15, %v120_v27 }
 0x931   :  { %10110 = vmatprep.subr.bf16.mxu0 %v11656_v36  ;;  %10130 = vmatprep.subr.bf16.mxu1 %v11656_v36 }
 0x934   :  { %10111 = vmatpush3.bf16.msra.mxu0 %v11090_v4  ;;  %10131 = vmatpush3.bf16.msra.mxu1 %v11091_v33  ;;  %v12470_v4 = vrot.slane %v4184_v15, %v124_v30 }
 0x935   :  { %10112 = vmatprep.subr.bf16.mxu0 %v11656_v36  ;;  %10132 = vmatprep.subr.bf16.mxu1 %v11656_v36 }
 0x938   :  { %10113 = vmatpush3.bf16.msra.mxu0 %v11092_v35  ;;  %10133 = vmatpush3.bf16.msra.mxu1 %v11093_v38  ;;  %v4425_v38 = vadd.f32 %v12347_v22, %v12466_v17  ;;  %v12482_v22 = vrot.slane %v4184_v15, %v128_v28 }
 0x939   :  { %10114 = vmatprep.subr.bf16.mxu0 %v11656_v36  ;;  %10134 = vmatprep.subr.bf16.mxu1 %v11656_v36 }
 0x93c   :  { %10115 = vmatpush3.bf16.msra.mxu0 %v11094_v40  ;;  %10135 = vmatpush3.bf16.msra.mxu1 %v11095_v50  ;;  %v4427_v40 = vadd.f32 %v12352_v23, %v12470_v4  ;;  %v12486_v23 = vrot.slane %v4184_v15, %v132_v31 }
 0x93d   :  { %10116 = vmatprep.subr.bf16.mxu0 %v11656_v36  ;;  %10136 = vmatprep.subr.bf16.mxu1 %v11656_v36 }
 0x940   :  { %10117 = vmatpush3.bf16.msra.mxu0 %v11096_v42  ;;  %10137 = vmatpush3.bf16.msra.mxu1 %v11097_v3 }
 0x941   :  { %10118 = vmatprep.subr.bf16.mxu0 %v11656_v36  ;;  %10138 = vmatprep.subr.bf16.mxu1 %v11656_v36 }
 0x944   :  { %10119 = vmatpush3.bf16.msra.mxu0 %v11098_v6  ;;  %10139 = vmatpush3.bf16.msra.mxu1 %v11099_v47 }
 0x945   :  { %10144 = vmatprep.subr.bf16.mxu0 %v11656_v36  ;;  %10164 = vmatprep.subr.bf16.mxu1 %v11656_v36 }
 0x947   :  { %10121 = vmatmul.mubr.bf16.vlgmr.msra.gmra.mrb[100].mxu0 %v12371_v0  ;;  %10141 = vmatmul.mubr.bf16.vlgmr.msra.gmra.mrb[100].mxu1 %v12371_v0 }
 0x948   :  { %10160 = vmatprep.mubr.msk.bf16.mxu0 %vm11657_vm0, %v11656_v36  ;;  %10180 = vmatprep.mubr.msk.bf16.mxu1 %vm11657_vm0, %v11656_v36 }
 0x949   :  { %10145 = vmatpush3.bf16.msra.mxu0 %v11100_v43  ;;  %10165 = vmatpush3.bf16.msra.mxu1 %v11101_v7 }
 0x94a   :  { %10146 = vmatprep.subr.bf16.mxu0 %v11656_v36  ;;  %10166 = vmatprep.subr.bf16.mxu1 %v11656_v36 }
 0x94d   :  { %10147 = vmatpush3.bf16.msra.mxu0 %v11102_v11  ;;  %10167 = vmatpush3.bf16.msra.mxu1 %v11103_v63 }
 0x94e   :  { %10148 = vmatprep.subr.bf16.mxu0 %v11656_v36  ;;  %10168 = vmatprep.subr.bf16.mxu1 %v11656_v36 }
 0x951   :  { %10149 = vmatpush3.bf16.msra.mxu0 %v11104_v59  ;;  %10169 = vmatpush3.bf16.msra.mxu1 %v11105_v25 }
 0x952   :  { %10150 = vmatprep.subr.bf16.mxu0 %v11656_v36  ;;  %10170 = vmatprep.subr.bf16.mxu1 %v11656_v36 }
 0x955   :  { %10151 = vmatpush3.bf16.msra.mxu0 %v11106_v14  ;;  %10171 = vmatpush3.bf16.msra.mxu1 %v11107_v9 }
 0x956   :  { %10152 = vmatprep.subr.bf16.mxu0 %v11656_v36  ;;  %10172 = vmatprep.subr.bf16.mxu1 %v11656_v36 }
 0x959   :  { %10153 = vmatpush3.bf16.msra.mxu0 %v11108_v55  ;;  %10173 = vmatpush3.bf16.msra.mxu1 %v11109_v51  ;;  %v4498_v51 = vadd.f32 %v12349_v21, %v12482_v22  ;;  %v8518_v21 = vld [vmem:[%s12874_s7 + $0x8] sm:$0xff] }
 0x95a   :  { %10154 = vmatprep.subr.bf16.mxu0 %v11656_v36  ;;  %10174 = vmatprep.subr.bf16.mxu1 %v11656_v36 }
 0x95d   :  { %10155 = vmatpush3.bf16.msra.mxu0 %v11110_v45  ;;  %10175 = vmatpush3.bf16.msra.mxu1 %v11111_v18  ;;  %v4500_v45 = vadd.f32 %v12354_v29, %v12486_v23 }
 0x95e   :  { %10156 = vmatprep.subr.bf16.mxu0 %v11656_v36  ;;  %10176 = vmatprep.subr.bf16.mxu1 %v11656_v36 }
 0x961   :  { %10157 = vmatpush3.bf16.msra.mxu0 %v11112_v53  ;;  %10177 = vmatpush3.bf16.msra.mxu1 %v11113_v13 }
 0x962   :  { %10158 = vmatprep.subr.bf16.mxu0 %v11656_v36  ;;  %10178 = vmatprep.subr.bf16.mxu1 %v11656_v36 }
 0x965   :  { %10159 = vmatpush3.bf16.msra.mxu0 %v11114_v19  ;;  %10179 = vmatpush3.bf16.msra.mxu1 %v11115_v60 }
 0x966   :  { %10184 = vmatprep.subr.bf16.mxu0 %v11656_v36  ;;  %10204 = vmatprep.subr.bf16.mxu1 %v11656_v36 }
 0x9f2   :  { %v12452_v0 = vpop.f32.mrb[92].mxu0  ;;  %v12454_v34 = vpop.f32.mrb[92].mxu1 }
 0x9f3   :  { %v12456_v37 = vpop.f32.mrb[93].mxu0  ;;  %v12458_v52 = vpop.f32.mrb[93].mxu1 }
 0x9f4   :  { %v12460_v57 = vpop.f32.mrb[94].mxu0  ;;  %v12462_v58 = vpop.f32.mrb[94].mxu1 }
 0x9f5   :  { %v12472_v33 = vpop.f32.mrb[95].mxu0  ;;  %v12474_v35 = vpop.f32.mrb[95].mxu1 }
 0x9fa   :  { %v4669_v50 = vpop.f32.mrb[96].mxu0  ;;  %v4782_v42 = vpop.f32.mrb[96].mxu1 }
 0x9fb   :  { %v4675_v3 = vadd.f32 %v4669_v50, %v4427_v40  ;;  %v4788_v6 = vadd.f32 %v4782_v42, %v4425_v38  ;;  %v10082_v27 = vpop.f32.mrb[97].mxu0  ;;  %v10102_v47 = vpop.f32.mrb[97].mxu1 }
 0x9fc   :  { %v4672_v43 = vpop.f32.mrb[98].mxu0  ;;  %v4785_v7 = vpop.f32.mrb[98].mxu1 }
 0x9fd   :  { %v10083_v30 = vpop.f32.mrb[99].mxu0  ;;  %v10103_v11 = vpop.f32.mrb[99].mxu1  ;;  %v8563_v63 = vmul.f32 -1.442695, %v4675_v3  ;;  %v8572_v59 = vmul.f32 -1.442695, %v4788_v6 }
 0x9ff   :  { %11452 = vpow2.f32 %v8563_v63  ;;  %v11116_v63 = vld [vmem:[#allocation5 + $0x108] ss:$16 sps:$4 sm:$0xff]  }
 0xa00   :  { %11454 = vpow2.f32 %v8572_v59  ;;  %v11117_v59 = vld [vmem:[#allocation5 + $0x10c] ss:$16 sps:$4 sm:$0xff]  }
 0xa09   :  { %v11453_v25 = vpop.eup %11452 }
 0xa0a   :  { %v11455_v14 = vpop.eup %11454  ;;  %v4679_v9 = vadd.f32 1.0, %v11453_v25 }
 0xa0b   :  { %v4792_v55 = vadd.f32 1.0, %v11455_v14  ;;  %v11118_v14 = vld [vmem:[#allocation5 + $0x128] ss:$16 sps:$4 sm:$0xff]  }
 0xa0c   :  { %11456 = vrcp.f32 %v4679_v9  ;;  %v11119_v9 = vld [vmem:[#allocation5 + $0x12c] ss:$16 sps:$4 sm:$0xff]  }
 0xa0d   :  { %11458 = vrcp.f32 %v4792_v55  ;;  %v11120_v55 = vld [vmem:[#allocation5 + $0x148] ss:$16 sps:$4 sm:$0xff]  }
 0xa16   :  { %v11457_v50 = vpop.eup %11456 }
 0xa17   :  { %v11459_v29 = vpop.eup %11458  ;;  %v4682_v3 = vmul.f32 %v11457_v50, %v8518_v21  ;;  %v11134_v50 = vld [vmem:[#allocation5 + $0x124] ss:$16 sps:$4 sm:$0xff]   ;;  %v11135_v21 = vld [vmem:[#allocation5 + $0x120] ss:$16 sps:$4 sm:$0xff]  }
 0xa1a   :  { %v4894_v18 = vpop.f32.mrb[100].mxu0  ;;  %v5003_v53 = vpop.f32.mrb[100].mxu1 }
 0xa1b   :  { %v4900_v13 = vadd.f32 %v4894_v18, %v4498_v51  ;;  %v5009_v19 = vadd.f32 %v5003_v53, %v4500_v45  ;;  %v10122_v60 = vpop.f32.mrb[101].mxu0  ;;  %v10142_v28 = vpop.f32.mrb[101].mxu1  ;;  %v11121_v51 = vld [vmem:[#allocation5 + $0x14c] ss:$16 sps:$4 sm:$0xff]   ;;  %v11122_v45 = vld [vmem:[#allocation5 + $0x168] ss:$16 sps:$4 sm:$0xff]  }
 0xa1c   :  { %v4897_v38 = vpop.f32.mrb[102].mxu0  ;;  %v5006_v26 = vpop.f32.mrb[102].mxu1  ;;  %v11123_v18 = vld [vmem:[#allocation5 + $0x16c] ss:$16 sps:$4 sm:$0xff]   ;;  %v11124_v53 = vld [vmem:[#allocation5 + $0x188] ss:$16 sps:$4 sm:$0xff]  }
 0xa1d   :  { %11460 = vtanh.f32 %v4900_v13  ;;  %v8589_v31 = vmul.f32 -1.442695, %v5009_v19  ;;  %v10123_v15 = vpop.f32.mrb[103].mxu0  ;;  %v10143_v40 = vpop.f32.mrb[103].mxu1  ;;  %v11125_v13 = vld [vmem:[#allocation5 + $0x18c] ss:$16 sps:$4 sm:$0xff]  }
 0xa1e   :  { %v11126_v19 = vld [vmem:[#allocation5 + $0x1a8] ss:$16 sps:$4 sm:$0xff]   ;;  %v11127_v60 = vld [vmem:[#allocation5 + $0x1ac] ss:$16 sps:$4 sm:$0xff]   ;;  %v11132_v15 = vld [vmem:[#allocation5 + $0x104] ss:$16 sps:$4 sm:$0xff]  }
 0xa1f   :  { %11462 = vpow2.f32 %v8589_v31  ;;  %v11128_v28 = vld [vmem:[#allocation5 + $0x1c8] ss:$16 sps:$4 sm:$0xff]   ;;  %v11129_v38 = vld [vmem:[#allocation5 + $0x1cc] ss:$16 sps:$4 sm:$0xff]   ;;  %v11133_v40 = vld [vmem:[#allocation5 + $0x100] ss:$16 sps:$4 sm:$0xff]  }
 0xa20   :  { %v11130_v26 = vld [vmem:[#allocation5 + $0x1e8] ss:$16 sps:$4 sm:$0xff]   ;;  %v11131_v31 = vld [vmem:[#allocation5 + $0x1ec] ss:$16 sps:$4 sm:$0xff]  }
 0xa27   :  { %v11461_v42 = vpop.eup %11460 }
 0xa28   :  { %v4902_v6 = vmul.f32 %v11461_v42, %v11459_v29  ;;  %v11136_v29 = vld [vmem:[#allocation5 + $0x144] ss:$16 sps:$4 sm:$0xff]   ;;  %v11137_v42 = vld [vmem:[#allocation5 + $0x140] ss:$16 sps:$4 sm:$0xff]  }
 0xa29   :  { %v11463_v27 = vpop.eup %11462 }
 0xa2a   :  { %v12495_v47 = vadd.f32 %v4902_v6, %v4682_v3  ;;  %v5013_v43 = vadd.f32 1.0, %v11463_v27  ;;  %v11138_v3 = vld [vmem:[#allocation5 + $0x164] ss:$16 sps:$4 sm:$0xff]   ;;  %v11139_v6 = vld [vmem:[#allocation5 + $0x160] ss:$16 sps:$4 sm:$0xff]  }
 0xa2b   :  { %v11140_v27 = vld [vmem:[#allocation5 + $0x184] ss:$16 sps:$4 sm:$0xff]  }
 0xa2c   :  { %11464 = vtanh.f32 %v12495_v47 }
 0xa2d   :  { %11466 = vrcp.f32 %v5013_v43  ;;  %v11141_v43 = vld [vmem:[#allocation5 + $0x180] ss:$16 sps:$4 sm:$0xff]  }
 0xa36   :  { %v11465_v7 = vpop.eup %11464 }
 0xa37   :  { %v11467_v30 = vpop.eup %11466 }
 0xa38   :  { %v5017_v11 = vmul.f32 %v11467_v30, %v11465_v7  ;;  %v11142_v7 = vld [vmem:[#allocation5 + $0x1a4] ss:$16 sps:$4 sm:$0xff]   ;;  %v11143_v30 = vld [vmem:[#allocation5 + $0x1a0] ss:$16 sps:$4 sm:$0xff]  }
 0xa3a   :  { %5018 = vst [vmem:[%s12875_s8] sm:$0xff] %v5017_v11  ;;  %v5019_v25 = vpack.c.bf16 %v5017_v11, %v5017_v11  ;;  %v11144_v11 = vld [vmem:[#allocation5 + $0x1c4] ss:$16 sps:$4 sm:$0xff]  }
 0xa3c   :  { %10161 = vmatmul.mubr.bf16.vlgmr.msra.gmra.mrb[104].mxu0 %v5019_v25  ;;  %10181 = vmatmul.mubr.bf16.vlgmr.msra.gmra.mrb[104].mxu1 %v5019_v25 }
 0xa3d   :  { %10185 = vmatpush3.bf16.msra.mxu0 %v11116_v63  ;;  %10205 = vmatpush3.bf16.msra.mxu1 %v11117_v59  ;;  %v11145_v63 = vld [vmem:[#allocation5 + $0x1c0] ss:$16 sps:$4 sm:$0xff]   ;;  %v11146_v59 = vld [vmem:[#allocation5 + $0x1e4] ss:$16 sps:$4 sm:$0xff]  }
 0xa3e   :  { %10186 = vmatprep.subr.bf16.mxu0 %v11656_v36  ;;  %10206 = vmatprep.subr.bf16.mxu1 %v11656_v36 }
 0xa3f   :  { %10200 = vmatprep.mubr.msk.bf16.mxu0 %vm11657_vm0, %v11656_v36  ;;  %10220 = vmatprep.mubr.msk.bf16.mxu1 %vm11657_vm0, %v11656_v36 }
 0xa41   :  { %10187 = vmatpush3.bf16.msra.mxu0 %v11118_v14  ;;  %10207 = vmatpush3.bf16.msra.mxu1 %v11119_v9  ;;  %v4429_v14 = vadd.f32 %v12356_v32, %v12466_v17  ;;  %v4431_v9 = vadd.f32 %v12360_v62, %v12470_v4  ;;  %v4502_v62 = vadd.f32 %v12358_v16, %v12482_v22 }
 0xa42   :  { %10188 = vmatprep.subr.bf16.mxu0 %v11656_v36  ;;  %10208 = vmatprep.subr.bf16.mxu1 %v11656_v36 }
 0xa45   :  { %10189 = vmatpush3.bf16.msra.mxu0 %v11120_v55  ;;  %10209 = vmatpush3.bf16.msra.mxu1 %v11121_v51 }
 0xa46   :  { %10190 = vmatprep.subr.bf16.mxu0 %v11656_v36  ;;  %10210 = vmatprep.subr.bf16.mxu1 %v11656_v36 }
 0xa49   :  { %10191 = vmatpush3.bf16.msra.mxu0 %v11122_v45  ;;  %10211 = vmatpush3.bf16.msra.mxu1 %v11123_v18 }
 0xa4a   :  { %10192 = vmatprep.subr.bf16.mxu0 %v11656_v36  ;;  %10212 = vmatprep.subr.bf16.mxu1 %v11656_v36 }
 0xa4d   :  { %10193 = vmatpush3.bf16.msra.mxu0 %v11124_v53  ;;  %10213 = vmatpush3.bf16.msra.mxu1 %v11125_v13 }
 0xa4e   :  { %10194 = vmatprep.subr.bf16.mxu0 %v11656_v36  ;;  %10214 = vmatprep.subr.bf16.mxu1 %v11656_v36 }
 0xa51   :  { %10195 = vmatpush3.bf16.msra.mxu0 %v11126_v19  ;;  %10215 = vmatpush3.bf16.msra.mxu1 %v11127_v60 }
 0xa52   :  { %10196 = vmatprep.subr.bf16.mxu0 %v11656_v36  ;;  %10216 = vmatprep.subr.bf16.mxu1 %v11656_v36 }
 0xa55   :  { %10197 = vmatpush3.bf16.msra.mxu0 %v11128_v28  ;;  %10217 = vmatpush3.bf16.msra.mxu1 %v11129_v38 }
 0xa56   :  { %10198 = vmatprep.subr.bf16.mxu0 %v11656_v36  ;;  %10218 = vmatprep.subr.bf16.mxu1 %v11656_v36 }
 0xa59   :  { %10199 = vmatpush3.bf16.msra.mxu0 %v11130_v26  ;;  %10219 = vmatpush3.bf16.msra.mxu1 %v11131_v31 }
 0xa5a   :  { %10224 = vmatprep.subr.bf16.mxu0 %v11656_v36  ;;  %10244 = vmatprep.subr.bf16.mxu1 %v11656_v36 }
 0xa5c   :  { %10201 = vmatmul.mubr.bf16.vlgmr.msra.gmra.mrb[108].mxu0 %v5019_v25  ;;  %10221 = vmatmul.mubr.bf16.vlgmr.msra.gmra.mrb[108].mxu1 %v5019_v25  ;;  %v11147_v25 = vld [vmem:[#allocation5 + $0x1e0] ss:$16 sps:$4 sm:$0xff]  }
 0xa5d   :  { %10240 = vmatprep.mubr.msk.bf16.mxu0 %vm11657_vm0, %v11656_v36  ;;  %10260 = vmatprep.mubr.msk.bf16.mxu1 %vm11657_vm0, %v11656_v36 }
 0xa5e   :  { %10225 = vmatpush3.bf16.msra.mxu0 %v11132_v15  ;;  %10245 = vmatpush3.bf16.msra.mxu1 %v11133_v40 }
 0xa5f   :  { %10226 = vmatprep.subr.bf16.mxu0 %v11656_v36  ;;  %10246 = vmatprep.subr.bf16.mxu1 %v11656_v36 }
 0xa62   :  { %10227 = vmatpush3.bf16.msra.mxu0 %v11134_v50  ;;  %10247 = vmatpush3.bf16.msra.mxu1 %v11135_v21  ;;  %v4504_v21 = vadd.f32 %v12362_v12, %v12486_v23 }
 0xa63   :  { %10228 = vmatprep.subr.bf16.mxu0 %v11656_v36  ;;  %10248 = vmatprep.subr.bf16.mxu1 %v11656_v36 }
 0xa66   :  { %10229 = vmatpush3.bf16.msra.mxu0 %v11136_v29  ;;  %10249 = vmatpush3.bf16.msra.mxu1 %v11137_v42 }
 0xa67   :  { %10230 = vmatprep.subr.bf16.mxu0 %v11656_v36  ;;  %10250 = vmatprep.subr.bf16.mxu1 %v11656_v36 }
 0xa6a   :  { %10231 = vmatpush3.bf16.msra.mxu0 %v11138_v3  ;;  %10251 = vmatpush3.bf16.msra.mxu1 %v11139_v6 }
 0xa6b   :  { %10232 = vmatprep.subr.bf16.mxu0 %v11656_v36  ;;  %10252 = vmatprep.subr.bf16.mxu1 %v11656_v36 }
 0xa6e   :  { %10233 = vmatpush3.bf16.msra.mxu0 %v11140_v27  ;;  %10253 = vmatpush3.bf16.msra.mxu1 %v11141_v43 }
 0xa6f   :  { %10234 = vmatprep.subr.bf16.mxu0 %v11656_v36  ;;  %10254 = vmatprep.subr.bf16.mxu1 %v11656_v36 }
 0xa72   :  { %10235 = vmatpush3.bf16.msra.mxu0 %v11142_v7  ;;  %10255 = vmatpush3.bf16.msra.mxu1 %v11143_v30 }
 0xa73   :  { %10236 = vmatprep.subr.bf16.mxu0 %v11656_v36  ;;  %10256 = vmatprep.subr.bf16.mxu1 %v11656_v36 }
 0xa76   :  { %10237 = vmatpush3.bf16.msra.mxu0 %v11144_v11  ;;  %10257 = vmatpush3.bf16.msra.mxu1 %v11145_v63 }
 0xa77   :  { %10238 = vmatprep.subr.bf16.mxu0 %v11656_v36  ;;  %10258 = vmatprep.subr.bf16.mxu1 %v11656_v36 }
 0xa7a   :  { %10239 = vmatpush3.bf16.msra.mxu0 %v11146_v59  ;;  %10259 = vmatpush3.bf16.msra.mxu1 %v11147_v25 }
 0xa7b   :  { %10264 = vmatprep.subr.bf16.mxu0 %v11656_v36  ;;  %10284 = vmatprep.subr.bf16.mxu1 %v11656_v36 }
 0xb0f   :  { %v5119_v55 = vpop.f32.mrb[104].mxu0  ;;  %v5232_v51 = vpop.f32.mrb[104].mxu1 }
 0xb10   :  { %v5125_v45 = vadd.f32 %v5119_v55, %v4431_v9  ;;  %v5238_v18 = vadd.f32 %v5232_v51, %v4429_v14  ;;  %v10162_v53 = vpop.f32.mrb[105].mxu0  ;;  %v10182_v13 = vpop.f32.mrb[105].mxu1 }
 0xb11   :  { %v5122_v19 = vpop.f32.mrb[106].mxu0  ;;  %v5235_v60 = vpop.f32.mrb[106].mxu1 }
 0xb12   :  { %v10163_v28 = vpop.f32.mrb[107].mxu0  ;;  %v10183_v38 = vpop.f32.mrb[107].mxu1  ;;  %v8598_v26 = vmul.f32 -1.442695, %v5125_v45  ;;  %v8607_v31 = vmul.f32 -1.442695, %v5238_v18 }
 0xb13   :  { %v11148_v19 = vld [vmem:[#allocation5 + $0x108] ss:$16 sps:$4 sm:$0xff]   ;;  %v11149_v60 = vld [vmem:[#allocation5 + $0x10c] ss:$16 sps:$4 sm:$0xff]  }
 0xb14   :  { %11468 = vpow2.f32 %v8598_v26  ;;  %v11151_v38 = vld [vmem:[#allocation5 + $0x12c] ss:$16 sps:$4 sm:$0xff]   ;;  %v11152_v26 = vld [vmem:[#allocation5 + $0x148] ss:$16 sps:$4 sm:$0xff]  }
 0xb15   :  { %11470 = vpow2.f32 %v8607_v31  ;;  %v11153_v31 = vld [vmem:[#allocation5 + $0x14c] ss:$16 sps:$4 sm:$0xff]  }
 0xb1e   :  { %v11469_v15 = vpop.eup %11468 }
 0xb1f   :  { %v11471_v40 = vpop.eup %11470  ;;  %v5129_v32 = vadd.f32 1.0, %v11469_v15  ;;  %v11154_v15 = vld [vmem:[#allocation5 + $0x168] ss:$16 sps:$4 sm:$0xff]  }
 0xb20   :  { %v5242_v50 = vadd.f32 1.0, %v11471_v40  ;;  %v11155_v40 = vld [vmem:[#allocation5 + $0x16c] ss:$16 sps:$4 sm:$0xff]  }
 0xb21   :  { %11472 = vrcp.f32 %v5129_v32  ;;  %v11156_v32 = vld [vmem:[#allocation5 + $0x188] ss:$16 sps:$4 sm:$0xff]  }
 0xb22   :  { %11474 = vrcp.f32 %v5242_v50  ;;  %v11157_v50 = vld [vmem:[#allocation5 + $0x18c] ss:$16 sps:$4 sm:$0xff]  }
 0xb2b   :  { %v11473_v25 = vpop.eup %11472 }
 0xb2c   :  { %v11475_v16 = vpop.eup %11474  ;;  %v5132_v12 = vmul.f32 %v11473_v25, %v12495_v47  ;;  %v11150_v47 = vld [vmem:[#allocation5 + $0x128] ss:$16 sps:$4 sm:$0xff]   ;;  %v11171_v25 = vld [vmem:[#allocation5 + $0x160] ss:$16 sps:$4 sm:$0xff]  }
 0xb2f   :  { %v5344_v29 = vpop.f32.mrb[108].mxu0  ;;  %v5453_v42 = vpop.f32.mrb[108].mxu1 }
 0xb30   :  { %v5350_v3 = vadd.f32 %v5344_v29, %v4502_v62  ;;  %v5459_v6 = vadd.f32 %v5453_v42, %v4504_v21  ;;  %v10202_v27 = vpop.f32.mrb[109].mxu0  ;;  %v10222_v43 = vpop.f32.mrb[109].mxu1  ;;  %v11158_v62 = vld [vmem:[#allocation5 + $0x1a8] ss:$16 sps:$4 sm:$0xff]   ;;  %v11159_v21 = vld [vmem:[#allocation5 + $0x1ac] ss:$16 sps:$4 sm:$0xff]  }
 0xb31   :  { %v5347_v7 = vpop.f32.mrb[110].mxu0  ;;  %v5456_v30 = vpop.f32.mrb[110].mxu1  ;;  %v11160_v29 = vld [vmem:[#allocation5 + $0x1c8] ss:$16 sps:$4 sm:$0xff]   ;;  %v11161_v42 = vld [vmem:[#allocation5 + $0x1cc] ss:$16 sps:$4 sm:$0xff]  }
 0xb32   :  { %11476 = vtanh.f32 %v5350_v3  ;;  %v8624_v11 = vmul.f32 -1.442695, %v5459_v6  ;;  %v10203_v63 = vpop.f32.mrb[111].mxu0  ;;  %v10223_v59 = vpop.f32.mrb[111].mxu1  ;;  %v11162_v3 = vld [vmem:[#allocation5 + $0x1e8] ss:$16 sps:$4 sm:$0xff]  }
 0xb33   :  { %v11163_v6 = vld [vmem:[#allocation5 + $0x1ec] ss:$16 sps:$4 sm:$0xff]   ;;  %v11164_v27 = vld [vmem:[#allocation5 + $0x104] ss:$16 sps:$4 sm:$0xff]   ;;  %v11165_v43 = vld [vmem:[#allocation5 + $0x100] ss:$16 sps:$4 sm:$0xff]  }
 0xb34   :  { %11478 = vpow2.f32 %v8624_v11  ;;  %v11166_v7 = vld [vmem:[#allocation5 + $0x124] ss:$16 sps:$4 sm:$0xff]   ;;  %v11167_v30 = vld [vmem:[#allocation5 + $0x120] ss:$16 sps:$4 sm:$0xff]  }
 0xb35   :  { %v11168_v11 = vld [vmem:[#allocation5 + $0x144] ss:$16 sps:$4 sm:$0xff]   ;;  %v11169_v63 = vld [vmem:[#allocation5 + $0x140] ss:$16 sps:$4 sm:$0xff]  }
 0xb36   :  { %v11170_v59 = vld [vmem:[#allocation5 + $0x164] ss:$16 sps:$4 sm:$0xff]  }
 0xb3c   :  { %v11477_v14 = vpop.eup %11476 }
 0xb3d   :  { %v5352_v9 = vmul.f32 %v11477_v14, %v11475_v16  ;;  %v11172_v16 = vld [vmem:[#allocation5 + $0x184] ss:$16 sps:$4 sm:$0xff]   ;;  %v11173_v14 = vld [vmem:[#allocation5 + $0x180] ss:$16 sps:$4 sm:$0xff]  }
 0xb3e   :  { %v11479_v55 = vpop.eup %11478 }
 0xb3f   :  { %v12550_v51 = vadd.f32 %v5352_v9, %v5132_v12  ;;  %v5463_v45 = vadd.f32 1.0, %v11479_v55  ;;  %v11174_v12 = vld [vmem:[#allocation5 + $0x1a4] ss:$16 sps:$4 sm:$0xff]   ;;  %v11175_v9 = vld [vmem:[#allocation5 + $0x1a0] ss:$16 sps:$4 sm:$0xff]  }
 0xb40   :  { %v11176_v55 = vld [vmem:[#allocation5 + $0x1c4] ss:$16 sps:$4 sm:$0xff]  }
 0xb41   :  { %11480 = vtanh.f32 %v12550_v51 }
 0xb42   :  { %11482 = vrcp.f32 %v5463_v45  ;;  %v11177_v45 = vld [vmem:[#allocation5 + $0x1c0] ss:$16 sps:$4 sm:$0xff]  }
 0xb4b   :  { %v11481_v18 = vpop.eup %11480 }
 0xb4c   :  { %v11483_v53 = vpop.eup %11482 }
 0xb4d   :  { %v5467_v13 = vmul.f32 %v11483_v53, %v11481_v18  ;;  %v11178_v18 = vld [vmem:[#allocation5 + $0x1e4] ss:$16 sps:$4 sm:$0xff]   ;;  %v11179_v53 = vld [vmem:[#allocation5 + $0x1e0] ss:$16 sps:$4 sm:$0xff]  }
 0xb4f   :  { %8625 = vst [vmem:[%s12875_s8 + $0x8] sm:$0xff] %v5467_v13  ;;  %v5469_v28 = vpack.c.bf16 %v5467_v13, %v5467_v13  ;;  %v4435_v13 = vadd.f32 %v12373_v39, %v12466_v17 }
 0xb51   :  { %10241 = vmatmul.mubr.bf16.vlgmr.msra.gmra.mrb[112].mxu0 %v5469_v28  ;;  %10261 = vmatmul.mubr.bf16.vlgmr.msra.gmra.mrb[112].mxu1 %v5469_v28 }
 0xb52   :  { %10265 = vmatpush3.bf16.msra.mxu0 %v11148_v19  ;;  %10285 = vmatpush3.bf16.msra.mxu1 %v11149_v60  ;;  %v4437_v19 = vadd.f32 %v12377_v48, %v12470_v4  ;;  %v4508_v48 = vadd.f32 %v12375_v1, %v12482_v22 }
 0xb53   :  { %10266 = vmatprep.subr.bf16.mxu0 %v11656_v36  ;;  %10286 = vmatprep.subr.bf16.mxu1 %v11656_v36 }
 0xb54   :  { %10280 = vmatprep.mubr.msk.bf16.mxu0 %vm11657_vm0, %v11656_v36  ;;  %10300 = vmatprep.mubr.msk.bf16.mxu1 %vm11657_vm0, %v11656_v36 }
 0xb56   :  { %10267 = vmatpush3.bf16.msra.mxu0 %v11150_v47  ;;  %10287 = vmatpush3.bf16.msra.mxu1 %v11151_v38 }
 0xb57   :  { %10268 = vmatprep.subr.bf16.mxu0 %v11656_v36  ;;  %10288 = vmatprep.subr.bf16.mxu1 %v11656_v36 }
 0xb5a   :  { %10269 = vmatpush3.bf16.msra.mxu0 %v11152_v26  ;;  %10289 = vmatpush3.bf16.msra.mxu1 %v11153_v31 }
 0xb5b   :  { %10270 = vmatprep.subr.bf16.mxu0 %v11656_v36  ;;  %10290 = vmatprep.subr.bf16.mxu1 %v11656_v36 }
 0xb5e   :  { %10271 = vmatpush3.bf16.msra.mxu0 %v11154_v15  ;;  %10291 = vmatpush3.bf16.msra.mxu1 %v11155_v40 }
 0xb5f   :  { %10272 = vmatprep.subr.bf16.mxu0 %v11656_v36  ;;  %10292 = vmatprep.subr.bf16.mxu1 %v11656_v36 }
 0xb62   :  { %10273 = vmatpush3.bf16.msra.mxu0 %v11156_v32  ;;  %10293 = vmatpush3.bf16.msra.mxu1 %v11157_v50 }
 0xb63   :  { %10274 = vmatprep.subr.bf16.mxu0 %v11656_v36  ;;  %10294 = vmatprep.subr.bf16.mxu1 %v11656_v36 }
 0xb66   :  { %10275 = vmatpush3.bf16.msra.mxu0 %v11158_v62  ;;  %10295 = vmatpush3.bf16.msra.mxu1 %v11159_v21 }
 0xb67   :  { %10276 = vmatprep.subr.bf16.mxu0 %v11656_v36  ;;  %10296 = vmatprep.subr.bf16.mxu1 %v11656_v36 }
 0xb6a   :  { %10277 = vmatpush3.bf16.msra.mxu0 %v11160_v29  ;;  %10297 = vmatpush3.bf16.msra.mxu1 %v11161_v42 }
 0xb6b   :  { %10278 = vmatprep.subr.bf16.mxu0 %v11656_v36  ;;  %10298 = vmatprep.subr.bf16.mxu1 %v11656_v36 }
 0xb6e   :  { %10279 = vmatpush3.bf16.msra.mxu0 %v11162_v3  ;;  %10299 = vmatpush3.bf16.msra.mxu1 %v11163_v6  ;;  %v4510_v6 = vadd.f32 %v12379_v41, %v12486_v23 }
 0xb6f   :  { %10304 = vmatprep.subr.bf16.mxu0 %v11656_v36  ;;  %10324 = vmatprep.subr.bf16.mxu1 %v11656_v36 }
 0xb71   :  { %10281 = vmatmul.mubr.bf16.vlgmr.msra.gmra.mrb[116].mxu0 %v5469_v28  ;;  %10301 = vmatmul.mubr.bf16.vlgmr.msra.gmra.mrb[116].mxu1 %v5469_v28 }
 0xb72   :  { %10320 = vmatprep.mubr.msk.bf16.mxu0 %vm11657_vm0, %v11656_v36  ;;  %10340 = vmatprep.mubr.msk.bf16.mxu1 %vm11657_vm0, %v11656_v36 }
 0xb73   :  { %10305 = vmatpush3.bf16.msra.mxu0 %v11164_v27  ;;  %10325 = vmatpush3.bf16.msra.mxu1 %v11165_v43 }
 0xb74   :  { %10306 = vmatprep.subr.bf16.mxu0 %v11656_v36  ;;  %10326 = vmatprep.subr.bf16.mxu1 %v11656_v36 }
 0xb77   :  { %10307 = vmatpush3.bf16.msra.mxu0 %v11166_v7  ;;  %10327 = vmatpush3.bf16.msra.mxu1 %v11167_v30 }
 0xb78   :  { %10308 = vmatprep.subr.bf16.mxu0 %v11656_v36  ;;  %10328 = vmatprep.subr.bf16.mxu1 %v11656_v36 }
 0xb7b   :  { %10309 = vmatpush3.bf16.msra.mxu0 %v11168_v11  ;;  %10329 = vmatpush3.bf16.msra.mxu1 %v11169_v63 }
 0xb7c   :  { %10310 = vmatprep.subr.bf16.mxu0 %v11656_v36  ;;  %10330 = vmatprep.subr.bf16.mxu1 %v11656_v36 }
 0xb7f   :  { %10311 = vmatpush3.bf16.msra.mxu0 %v11170_v59  ;;  %10331 = vmatpush3.bf16.msra.mxu1 %v11171_v25 }
 0xb80   :  { %10312 = vmatprep.subr.bf16.mxu0 %v11656_v36  ;;  %10332 = vmatprep.subr.bf16.mxu1 %v11656_v36 }
 0xb83   :  { %10313 = vmatpush3.bf16.msra.mxu0 %v11172_v16  ;;  %10333 = vmatpush3.bf16.msra.mxu1 %v11173_v14 }
 0xb84   :  { %10314 = vmatprep.subr.bf16.mxu0 %v11656_v36  ;;  %10334 = vmatprep.subr.bf16.mxu1 %v11656_v36 }
 0xb87   :  { %10315 = vmatpush3.bf16.msra.mxu0 %v11174_v12  ;;  %10335 = vmatpush3.bf16.msra.mxu1 %v11175_v9 }
 0xb88   :  { %10316 = vmatprep.subr.bf16.mxu0 %v11656_v36  ;;  %10336 = vmatprep.subr.bf16.mxu1 %v11656_v36 }
 0xb8b   :  { %10317 = vmatpush3.bf16.msra.mxu0 %v11176_v55  ;;  %10337 = vmatpush3.bf16.msra.mxu1 %v11177_v45 }
 0xb8c   :  { %10318 = vmatprep.subr.bf16.mxu0 %v11656_v36  ;;  %10338 = vmatprep.subr.bf16.mxu1 %v11656_v36 }
 0xb8f   :  { %10319 = vmatpush3.bf16.msra.mxu0 %v11178_v18  ;;  %10339 = vmatpush3.bf16.msra.mxu1 %v11179_v53 }
 0xb90   :  { %10344 = vmatprep.subr.bf16.mxu0 %v11656_v36  ;;  %10364 = vmatprep.subr.bf16.mxu1 %v11656_v36 }
 0xc24   :  { %v5569_v60 = vpop.f32.mrb[112].mxu0  ;;  %v5682_v28 = vpop.f32.mrb[112].mxu1 }
 0xc25   :  { %v5575_v47 = vadd.f32 %v5569_v60, %v4437_v19  ;;  %v5688_v38 = vadd.f32 %v5682_v28, %v4435_v13  ;;  %v10242_v26 = vpop.f32.mrb[113].mxu0  ;;  %v10262_v31 = vpop.f32.mrb[113].mxu1 }
 0xc26   :  { %v5572_v15 = vpop.f32.mrb[114].mxu0  ;;  %v5685_v40 = vpop.f32.mrb[114].mxu1  ;;  %v11183_v31 = vld [vmem:[#allocation5 + $0x12c] ss:$16 sps:$4 sm:$0xff]  }
 0xc27   :  { %v10243_v32 = vpop.f32.mrb[115].mxu0  ;;  %v10263_v50 = vpop.f32.mrb[115].mxu1  ;;  %v8634_v62 = vmul.f32 -1.442695, %v5575_v47  ;;  %v8643_v21 = vmul.f32 -1.442695, %v5688_v38 }
 0xc28   :  { %v11180_v47 = vld [vmem:[#allocation5 + $0x108] ss:$16 sps:$4 sm:$0xff]   ;;  %v11181_v38 = vld [vmem:[#allocation5 + $0x10c] ss:$16 sps:$4 sm:$0xff]  }
 0xc29   :  { %11484 = vpow2.f32 %v8634_v62  ;;  %v11184_v15 = vld [vmem:[#allocation5 + $0x148] ss:$16 sps:$4 sm:$0xff]   ;;  %v11185_v40 = vld [vmem:[#allocation5 + $0x14c] ss:$16 sps:$4 sm:$0xff]  }
 0xc2a   :  { %11486 = vpow2.f32 %v8643_v21  ;;  %v11186_v32 = vld [vmem:[#allocation5 + $0x168] ss:$16 sps:$4 sm:$0xff]   ;;  %v11187_v50 = vld [vmem:[#allocation5 + $0x16c] ss:$16 sps:$4 sm:$0xff]  }
 0xc2b   :  { %v11188_v62 = vld [vmem:[#allocation5 + $0x188] ss:$16 sps:$4 sm:$0xff]   ;;  %v11189_v21 = vld [vmem:[#allocation5 + $0x18c] ss:$16 sps:$4 sm:$0xff]  }
 0xc33   :  { %v11485_v29 = vpop.eup %11484 }
 0xc34   :  { %v11487_v42 = vpop.eup %11486  ;;  %v5579_v39 = vadd.f32 1.0, %v11485_v29  ;;  %v11190_v29 = vld [vmem:[#allocation5 + $0x1a8] ss:$16 sps:$4 sm:$0xff]  }
 0xc35   :  { %v5692_v3 = vadd.f32 1.0, %v11487_v42  ;;  %v11191_v42 = vld [vmem:[#allocation5 + $0x1ac] ss:$16 sps:$4 sm:$0xff]  }
 0xc36   :  { %11488 = vrcp.f32 %v5579_v39  ;;  %v11192_v39 = vld [vmem:[#allocation5 + $0x1c8] ss:$16 sps:$4 sm:$0xff]  }
 0xc37   :  { %11490 = vrcp.f32 %v5692_v3  ;;  %v11193_v3 = vld [vmem:[#allocation5 + $0x1cc] ss:$16 sps:$4 sm:$0xff]  }
 0xc40   :  { %v11489_v9 = vpop.eup %11488 }
 0xc41   :  { %v11491_v1 = vpop.eup %11490  ;;  %v5582_v41 = vmul.f32 %v11489_v9, %v12550_v51  ;;  %v11182_v51 = vld [vmem:[#allocation5 + $0x128] ss:$16 sps:$4 sm:$0xff]   ;;  %v11207_v9 = vld [vmem:[#allocation5 + $0x1a0] ss:$16 sps:$4 sm:$0xff]  }
 0xc44   :  { %v5794_v27 = vpop.f32.mrb[116].mxu0  ;;  %v5903_v43 = vpop.f32.mrb[116].mxu1 }
 0xc45   :  { %v5800_v7 = vadd.f32 %v5794_v27, %v4508_v48  ;;  %v5909_v30 = vadd.f32 %v5903_v43, %v4510_v6  ;;  %v10282_v11 = vpop.f32.mrb[117].mxu0  ;;  %v10302_v63 = vpop.f32.mrb[117].mxu1  ;;  %v11194_v48 = vld [vmem:[#allocation5 + $0x1e8] ss:$16 sps:$4 sm:$0xff]   ;;  %v11195_v6 = vld [vmem:[#allocation5 + $0x1ec] ss:$16 sps:$4 sm:$0xff]  }
 0xc46   :  { %v5797_v59 = vpop.f32.mrb[118].mxu0  ;;  %v5906_v25 = vpop.f32.mrb[118].mxu1  ;;  %v11196_v27 = vld [vmem:[#allocation5 + $0x104] ss:$16 sps:$4 sm:$0xff]   ;;  %v11197_v43 = vld [vmem:[#allocation5 + $0x100] ss:$16 sps:$4 sm:$0xff]  }
 0xc47   :  { %11492 = vtanh.f32 %v5800_v7  ;;  %v8660_v16 = vmul.f32 -1.442695, %v5909_v30  ;;  %v10283_v14 = vpop.f32.mrb[119].mxu0  ;;  %v10303_v12 = vpop.f32.mrb[119].mxu1  ;;  %v11198_v7 = vld [vmem:[#allocation5 + $0x124] ss:$16 sps:$4 sm:$0xff]  }
 0xc48   :  { %v11199_v30 = vld [vmem:[#allocation5 + $0x120] ss:$16 sps:$4 sm:$0xff]   ;;  %v11200_v11 = vld [vmem:[#allocation5 + $0x144] ss:$16 sps:$4 sm:$0xff]  }
 0xc49   :  { %11494 = vpow2.f32 %v8660_v16  ;;  %v11201_v63 = vld [vmem:[#allocation5 + $0x140] ss:$16 sps:$4 sm:$0xff]   ;;  %v11202_v59 = vld [vmem:[#allocation5 + $0x164] ss:$16 sps:$4 sm:$0xff]  }
 0xc4a   :  { %v11203_v25 = vld [vmem:[#allocation5 + $0x160] ss:$16 sps:$4 sm:$0xff]   ;;  %v11204_v16 = vld [vmem:[#allocation5 + $0x184] ss:$16 sps:$4 sm:$0xff]  }
 0xc4b   :  { %v11205_v14 = vld [vmem:[#allocation5 + $0x180] ss:$16 sps:$4 sm:$0xff]   ;;  %v11206_v12 = vld [vmem:[#allocation5 + $0x1a4] ss:$16 sps:$4 sm:$0xff]  }
 0xc51   :  { %v11493_v55 = vpop.eup %11492 }
 0xc52   :  { %v5802_v45 = vmul.f32 %v11493_v55, %v11491_v1  ;;  %v11208_v1 = vld [vmem:[#allocation5 + $0x1c4] ss:$16 sps:$4 sm:$0xff]   ;;  %v11209_v55 = vld [vmem:[#allocation5 + $0x1c0] ss:$16 sps:$4 sm:$0xff]  }
 0xc53   :  { %v11495_v18 = vpop.eup %11494 }
 0xc54   :  { %v12605_v53 = vadd.f32 %v5802_v45, %v5582_v41  ;;  %v5913_v13 = vadd.f32 1.0, %v11495_v18  ;;  %v11210_v41 = vld [vmem:[#allocation5 + $0x1e4] ss:$16 sps:$4 sm:$0xff]   ;;  %v11211_v45 = vld [vmem:[#allocation5 + $0x1e0] ss:$16 sps:$4 sm:$0xff]   ;;  %v4439_v18 = vadd.f32 %v12381_v46, %v12466_v17 }
 0xc56   :  { %11496 = vtanh.f32 %v12605_v53 }
 0xc57   :  { %11498 = vrcp.f32 %v5913_v13  ;;  %v4441_v13 = vadd.f32 %v12387_v56, %v12470_v4  ;;  %v4512_v56 = vadd.f32 %v12383_v49, %v12482_v22 }
 0xc60   :  { %v11497_v19 = vpop.eup %11496 }
 0xc61   :  { %v11499_v60 = vpop.eup %11498 }
 0xc62   :  { %v5917_v28 = vmul.f32 %v11499_v60, %v11497_v19 }
 0xc64   :  { %8661 = vst [vmem:[%s12875_s8 + $0x10] sm:$0xff] %v5917_v28  ;;  %v5919_v26 = vpack.c.bf16 %v5917_v28, %v5917_v28 }
 0xc66   :  { %10321 = vmatmul.mubr.bf16.vlgmr.msra.gmra.mrb[120].mxu0 %v5919_v26  ;;  %10341 = vmatmul.mubr.bf16.vlgmr.msra.gmra.mrb[120].mxu1 %v5919_v26 }
 0xc67   :  { %10345 = vmatpush3.bf16.msra.mxu0 %v11180_v47  ;;  %10365 = vmatpush3.bf16.msra.mxu1 %v11181_v38 }
 0xc68   :  { %10346 = vmatprep.subr.bf16.mxu0 %v11656_v36  ;;  %10366 = vmatprep.subr.bf16.mxu1 %v11656_v36 }
 0xc69   :  { %10360 = vmatprep.mubr.msk.bf16.mxu0 %vm11657_vm0, %v11656_v36  ;;  %10380 = vmatprep.mubr.msk.bf16.mxu1 %vm11657_vm0, %v11656_v36 }
 0xc6b   :  { %10347 = vmatpush3.bf16.msra.mxu0 %v11182_v51  ;;  %10367 = vmatpush3.bf16.msra.mxu1 %v11183_v31 }
 0xc6c   :  { %10348 = vmatprep.subr.bf16.mxu0 %v11656_v36  ;;  %10368 = vmatprep.subr.bf16.mxu1 %v11656_v36 }
 0xc6f   :  { %10349 = vmatpush3.bf16.msra.mxu0 %v11184_v15  ;;  %10369 = vmatpush3.bf16.msra.mxu1 %v11185_v40 }
 0xc70   :  { %10350 = vmatprep.subr.bf16.mxu0 %v11656_v36  ;;  %10370 = vmatprep.subr.bf16.mxu1 %v11656_v36 }
 0xc73   :  { %10351 = vmatpush3.bf16.msra.mxu0 %v11186_v32  ;;  %10371 = vmatpush3.bf16.msra.mxu1 %v11187_v50 }
 0xc74   :  { %10352 = vmatprep.subr.bf16.mxu0 %v11656_v36  ;;  %10372 = vmatprep.subr.bf16.mxu1 %v11656_v36 }
 0xc77   :  { %10353 = vmatpush3.bf16.msra.mxu0 %v11188_v62  ;;  %10373 = vmatpush3.bf16.msra.mxu1 %v11189_v21 }
 0xc78   :  { %10354 = vmatprep.subr.bf16.mxu0 %v11656_v36  ;;  %10374 = vmatprep.subr.bf16.mxu1 %v11656_v36 }
 0xc7b   :  { %10355 = vmatpush3.bf16.msra.mxu0 %v11190_v29  ;;  %10375 = vmatpush3.bf16.msra.mxu1 %v11191_v42  ;;  %v4514_v42 = vadd.f32 %v12389_v54, %v12486_v23 }
 0xc7c   :  { %10356 = vmatprep.subr.bf16.mxu0 %v11656_v36  ;;  %10376 = vmatprep.subr.bf16.mxu1 %v11656_v36 }
 0xc7f   :  { %10357 = vmatpush3.bf16.msra.mxu0 %v11192_v39  ;;  %10377 = vmatpush3.bf16.msra.mxu1 %v11193_v3 }
 0xc80   :  { %10358 = vmatprep.subr.bf16.mxu0 %v11656_v36  ;;  %10378 = vmatprep.subr.bf16.mxu1 %v11656_v36 }
 0xc83   :  { %10359 = vmatpush3.bf16.msra.mxu0 %v11194_v48  ;;  %10379 = vmatpush3.bf16.msra.mxu1 %v11195_v6 }
 0xc84   :  { %10384 = vmatprep.subr.bf16.mxu0 %v11656_v36  ;;  %10404 = vmatprep.subr.bf16.mxu1 %v11656_v36 }
 0xc86   :  { %10361 = vmatmul.mubr.bf16.vlgmr.msra.gmra.mrb[124].mxu0 %v5919_v26  ;;  %10381 = vmatmul.mubr.bf16.vlgmr.msra.gmra.mrb[124].mxu1 %v5919_v26 }
 0xc87   :  { %10400 = vmatprep.mubr.msk.bf16.mxu0 %vm11657_vm0, %v11656_v36  ;;  %10420 = vmatprep.mubr.msk.bf16.mxu1 %vm11657_vm0, %v11656_v36 }
 0xc88   :  { %10385 = vmatpush3.bf16.msra.mxu0 %v11196_v27  ;;  %10405 = vmatpush3.bf16.msra.mxu1 %v11197_v43 }
 0xc89   :  { %10386 = vmatprep.subr.bf16.mxu0 %v11656_v36  ;;  %10406 = vmatprep.subr.bf16.mxu1 %v11656_v36 }
 0xc8c   :  { %10387 = vmatpush3.bf16.msra.mxu0 %v11198_v7  ;;  %10407 = vmatpush3.bf16.msra.mxu1 %v11199_v30 }
 0xc8d   :  { %10388 = vmatprep.subr.bf16.mxu0 %v11656_v36  ;;  %10408 = vmatprep.subr.bf16.mxu1 %v11656_v36 }
 0xc90   :  { %10389 = vmatpush3.bf16.msra.mxu0 %v11200_v11  ;;  %10409 = vmatpush3.bf16.msra.mxu1 %v11201_v63 }
 0xc91   :  { %10390 = vmatprep.subr.bf16.mxu0 %v11656_v36  ;;  %10410 = vmatprep.subr.bf16.mxu1 %v11656_v36 }
 0xc94   :  { %10391 = vmatpush3.bf16.msra.mxu0 %v11202_v59  ;;  %10411 = vmatpush3.bf16.msra.mxu1 %v11203_v25 }
 0xc95   :  { %10392 = vmatprep.subr.bf16.mxu0 %v11656_v36  ;;  %10412 = vmatprep.subr.bf16.mxu1 %v11656_v36 }
 0xc98   :  { %10393 = vmatpush3.bf16.msra.mxu0 %v11204_v16  ;;  %10413 = vmatpush3.bf16.msra.mxu1 %v11205_v14 }
 0xc99   :  { %10394 = vmatprep.subr.bf16.mxu0 %v11656_v36  ;;  %10414 = vmatprep.subr.bf16.mxu1 %v11656_v36 }
 0xc9c   :  { %10395 = vmatpush3.bf16.msra.mxu0 %v11206_v12  ;;  %10415 = vmatpush3.bf16.msra.mxu1 %v11207_v9 }
 0xc9d   :  { %10396 = vmatprep.subr.bf16.mxu0 %v11656_v36  ;;  %10416 = vmatprep.subr.bf16.mxu1 %v11656_v36 }
 0xca0   :  { %10397 = vmatpush3.bf16.msra.mxu0 %v11208_v1  ;;  %10417 = vmatpush3.bf16.msra.mxu1 %v11209_v55 }
 0xca1   :  { %10398 = vmatprep.subr.bf16.mxu0 %v11656_v36  ;;  %10418 = vmatprep.subr.bf16.mxu1 %v11656_v36 }
 0xca4   :  { %10399 = vmatpush3.bf16.msra.mxu0 %v11210_v41  ;;  %10419 = vmatpush3.bf16.msra.mxu1 %v11211_v45 }
 0xca5   :  { %10424 = vmatprep.subr.bf16.mxu0 %v11656_v36  ;;  %10444 = vmatprep.subr.bf16.mxu1 %v11656_v36 }
 0xd39   :  { %v6019_v19 = vpop.f32.mrb[120].mxu0  ;;  %v6132_v60 = vpop.f32.mrb[120].mxu1 }
 0xd3a   :  { %v6025_v28 = vadd.f32 %v6019_v19, %v4441_v13  ;;  %v6138_v47 = vadd.f32 %v6132_v60, %v4439_v18  ;;  %v10322_v38 = vpop.f32.mrb[121].mxu0  ;;  %v10342_v26 = vpop.f32.mrb[121].mxu1  ;;  %v11212_v18 = vld [vmem:[#allocation5 + $0x108] ss:$16 sps:$4 sm:$0xff]   ;;  %v11213_v13 = vld [vmem:[#allocation5 + $0x10c] ss:$16 sps:$4 sm:$0xff]  }
 0xd3b   :  { %v6022_v51 = vpop.f32.mrb[122].mxu0  ;;  %v6135_v31 = vpop.f32.mrb[122].mxu1  ;;  %v11215_v60 = vld [vmem:[#allocation5 + $0x12c] ss:$16 sps:$4 sm:$0xff]   ;;  %v11218_v38 = vld [vmem:[#allocation5 + $0x168] ss:$16 sps:$4 sm:$0xff]  }
 0xd3c   :  { %v10323_v15 = vpop.f32.mrb[123].mxu0  ;;  %v10343_v40 = vpop.f32.mrb[123].mxu1  ;;  %v8670_v32 = vmul.f32 -1.442695, %v6025_v28  ;;  %v8679_v50 = vmul.f32 -1.442695, %v6138_v47 }
 0xd3d   :  { %v11216_v28 = vld [vmem:[#allocation5 + $0x148] ss:$16 sps:$4 sm:$0xff]   ;;  %v11217_v47 = vld [vmem:[#allocation5 + $0x14c] ss:$16 sps:$4 sm:$0xff]  }
 0xd3e   :  { %11500 = vpow2.f32 %v8670_v32  ;;  %v11219_v26 = vld [vmem:[#allocation5 + $0x16c] ss:$16 sps:$4 sm:$0xff]   ;;  %v11220_v51 = vld [vmem:[#allocation5 + $0x188] ss:$16 sps:$4 sm:$0xff]  }
 0xd3f   :  { %11502 = vpow2.f32 %v8679_v50  ;;  %v11221_v31 = vld [vmem:[#allocation5 + $0x18c] ss:$16 sps:$4 sm:$0xff]   ;;  %v11222_v15 = vld [vmem:[#allocation5 + $0x1a8] ss:$16 sps:$4 sm:$0xff]  }
 0xd40   :  { %v11223_v40 = vld [vmem:[#allocation5 + $0x1ac] ss:$16 sps:$4 sm:$0xff]   ;;  %v11224_v32 = vld [vmem:[#allocation5 + $0x1c8] ss:$16 sps:$4 sm:$0xff]  }
 0xd41   :  { %v11225_v50 = vld [vmem:[#allocation5 + $0x1cc] ss:$16 sps:$4 sm:$0xff]  }
 0xd48   :  { %v11501_v62 = vpop.eup %11500 }
 0xd49   :  { %v11503_v21 = vpop.eup %11502  ;;  %v6029_v46 = vadd.f32 1.0, %v11501_v62  ;;  %v11226_v62 = vld [vmem:[#allocation5 + $0x1e8] ss:$16 sps:$4 sm:$0xff]  }
 0xd4a   :  { %v6142_v29 = vadd.f32 1.0, %v11503_v21  ;;  %v11227_v21 = vld [vmem:[#allocation5 + $0x1ec] ss:$16 sps:$4 sm:$0xff]  }
 0xd4b   :  { %11504 = vrcp.f32 %v6029_v46  ;;  %v11228_v46 = vld [vmem:[#allocation5 + $0x104] ss:$16 sps:$4 sm:$0xff]  }
 0xd4c   :  { %11506 = vrcp.f32 %v6142_v29  ;;  %v11229_v29 = vld [vmem:[#allocation5 + $0x100] ss:$16 sps:$4 sm:$0xff]  }
 0xd55   :  { %v11505_v25 = vpop.eup %11504 }
 0xd56   :  { %v11507_v49 = vpop.eup %11506  ;;  %v6032_v54 = vmul.f32 %v11505_v25, %v12605_v53  ;;  %v11214_v53 = vld [vmem:[#allocation5 + $0x128] ss:$16 sps:$4 sm:$0xff]   ;;  %v11243_v25 = vld [vmem:[#allocation5 + $0x1e0] ss:$16 sps:$4 sm:$0xff]  }
 0xd59   :  { %v6244_v39 = vpop.f32.mrb[124].mxu0  ;;  %v6353_v3 = vpop.f32.mrb[124].mxu1 }
 0xd5a   :  { %v6250_v48 = vadd.f32 %v6244_v39, %v4512_v56  ;;  %v6359_v6 = vadd.f32 %v6353_v3, %v4514_v42  ;;  %v10362_v27 = vpop.f32.mrb[125].mxu0  ;;  %v10382_v43 = vpop.f32.mrb[125].mxu1  ;;  %v11230_v56 = vld [vmem:[#allocation5 + $0x124] ss:$16 sps:$4 sm:$0xff]   ;;  %v11231_v42 = vld [vmem:[#allocation5 + $0x120] ss:$16 sps:$4 sm:$0xff]  }
 0xd5b   :  { %v6247_v7 = vpop.f32.mrb[126].mxu0  ;;  %v6356_v30 = vpop.f32.mrb[126].mxu1  ;;  %v11232_v39 = vld [vmem:[#allocation5 + $0x144] ss:$16 sps:$4 sm:$0xff]   ;;  %v11233_v3 = vld [vmem:[#allocation5 + $0x140] ss:$16 sps:$4 sm:$0xff]  }
 0xd5c   :  { %11508 = vtanh.f32 %v6250_v48  ;;  %v8696_v11 = vmul.f32 -1.442695, %v6359_v6  ;;  %v10363_v63 = vpop.f32.mrb[127].mxu0  ;;  %v10383_v59 = vpop.f32.mrb[127].mxu1  ;;  %v11234_v48 = vld [vmem:[#allocation5 + $0x164] ss:$16 sps:$4 sm:$0xff]  }
 0xd5d   :  { %v11235_v6 = vld [vmem:[#allocation5 + $0x160] ss:$16 sps:$4 sm:$0xff]   ;;  %v11236_v27 = vld [vmem:[#allocation5 + $0x184] ss:$16 sps:$4 sm:$0xff]  }
 0xd5e   :  { %11510 = vpow2.f32 %v8696_v11  ;;  %v11237_v43 = vld [vmem:[#allocation5 + $0x180] ss:$16 sps:$4 sm:$0xff]   ;;  %v11238_v7 = vld [vmem:[#allocation5 + $0x1a4] ss:$16 sps:$4 sm:$0xff]  }
 0xd5f   :  { %v11239_v30 = vld [vmem:[#allocation5 + $0x1a0] ss:$16 sps:$4 sm:$0xff]   ;;  %v11240_v11 = vld [vmem:[#allocation5 + $0x1c4] ss:$16 sps:$4 sm:$0xff]  }
 0xd60   :  { %v11241_v63 = vld [vmem:[#allocation5 + $0x1c0] ss:$16 sps:$4 sm:$0xff]   ;;  %v11242_v59 = vld [vmem:[#allocation5 + $0x1e4] ss:$16 sps:$4 sm:$0xff]  }
 0xd66   :  { %v11509_v16 = vpop.eup %11508 }
 0xd67   :  { %v6252_v14 = vmul.f32 %v11509_v16, %v11507_v49  ;;  %v4445_v49 = vadd.f32 %v12397_v10, %v12466_v17  ;;  %v4447_v16 = vadd.f32 %v12403_v44, %v12470_v4  ;;  %v4518_v44 = vadd.f32 %v12399_v61, %v12482_v22 }
 0xd68   :  { %v11511_v12 = vpop.eup %11510 }
 0xd69   :  { %v12660_v9 = vadd.f32 %v6252_v14, %v6032_v54  ;;  %v6363_v1 = vadd.f32 1.0, %v11511_v12 }
 0xd6b   :  { %11512 = vtanh.f32 %v12660_v9 }
 0xd6c   :  { %11514 = vrcp.f32 %v6363_v1 }
 0xd75   :  { %v11513_v55 = vpop.eup %11512 }
 0xd76   :  { %v11515_v41 = vpop.eup %11514 }
 0xd77   :  { %v6367_v45 = vmul.f32 %v11515_v41, %v11513_v55 }
 0xd79   :  { %8697 = vst [vmem:[%s12875_s8 + $0x18] sm:$0xff] %v6367_v45  ;;  %v6369_v19 = vpack.c.bf16 %v6367_v45, %v6367_v45 }
 0xd7b   :  { %10401 = vmatmul.mubr.bf16.vlgmr.msra.gmra.mrb[128].mxu0 %v6369_v19  ;;  %10421 = vmatmul.mubr.bf16.vlgmr.msra.gmra.mrb[128].mxu1 %v6369_v19 }
 0xd7c   :  { %10425 = vmatpush3.bf16.msra.mxu0 %v11212_v18  ;;  %10445 = vmatpush3.bf16.msra.mxu1 %v11213_v13 }
 0xd7d   :  { %10426 = vmatprep.subr.bf16.mxu0 %v11656_v36  ;;  %10446 = vmatprep.subr.bf16.mxu1 %v11656_v36 }
 0xd7e   :  { %10440 = vmatprep.mubr.msk.bf16.mxu0 %vm11657_vm0, %v11656_v36  ;;  %10460 = vmatprep.mubr.msk.bf16.mxu1 %vm11657_vm0, %v11656_v36 }
 0xd80   :  { %10427 = vmatpush3.bf16.msra.mxu0 %v11214_v53  ;;  %10447 = vmatpush3.bf16.msra.mxu1 %v11215_v60 }
 0xd81   :  { %10428 = vmatprep.subr.bf16.mxu0 %v11656_v36  ;;  %10448 = vmatprep.subr.bf16.mxu1 %v11656_v36 }
 0xd84   :  { %10429 = vmatpush3.bf16.msra.mxu0 %v11216_v28  ;;  %10449 = vmatpush3.bf16.msra.mxu1 %v11217_v47 }
 0xd85   :  { %10430 = vmatprep.subr.bf16.mxu0 %v11656_v36  ;;  %10450 = vmatprep.subr.bf16.mxu1 %v11656_v36 }
 0xd88   :  { %10431 = vmatpush3.bf16.msra.mxu0 %v11218_v38  ;;  %10451 = vmatpush3.bf16.msra.mxu1 %v11219_v26  ;;  %v4520_v26 = vadd.f32 %v12405_v2, %v12486_v23 }
 0xd89   :  { %10432 = vmatprep.subr.bf16.mxu0 %v11656_v36  ;;  %10452 = vmatprep.subr.bf16.mxu1 %v11656_v36 }
 0xd8c   :  { %10433 = vmatpush3.bf16.msra.mxu0 %v11220_v51  ;;  %10453 = vmatpush3.bf16.msra.mxu1 %v11221_v31 }
 0xd8d   :  { %10434 = vmatprep.subr.bf16.mxu0 %v11656_v36  ;;  %10454 = vmatprep.subr.bf16.mxu1 %v11656_v36 }
 0xd90   :  { %10435 = vmatpush3.bf16.msra.mxu0 %v11222_v15  ;;  %10455 = vmatpush3.bf16.msra.mxu1 %v11223_v40 }
 0xd91   :  { %10436 = vmatprep.subr.bf16.mxu0 %v11656_v36  ;;  %10456 = vmatprep.subr.bf16.mxu1 %v11656_v36 }
 0xd94   :  { %10437 = vmatpush3.bf16.msra.mxu0 %v11224_v32  ;;  %10457 = vmatpush3.bf16.msra.mxu1 %v11225_v50 }
 0xd95   :  { %10438 = vmatprep.subr.bf16.mxu0 %v11656_v36  ;;  %10458 = vmatprep.subr.bf16.mxu1 %v11656_v36 }
 0xd98   :  { %10439 = vmatpush3.bf16.msra.mxu0 %v11226_v62  ;;  %10459 = vmatpush3.bf16.msra.mxu1 %v11227_v21 }
 0xd99   :  { %10464 = vmatprep.subr.bf16.mxu0 %v11656_v36  ;;  %10484 = vmatprep.subr.bf16.mxu1 %v11656_v36 }
 0xd9b   :  { %10441 = vmatmul.mubr.bf16.vlgmr.msra.gmra.mrb[132].mxu0 %v6369_v19  ;;  %10461 = vmatmul.mubr.bf16.vlgmr.msra.gmra.mrb[132].mxu1 %v6369_v19 }
 0xd9c   :  { %10480 = vmatprep.mubr.msk.bf16.mxu0 %vm11657_vm0, %v11656_v36  ;;  %10500 = vmatprep.mubr.msk.bf16.mxu1 %vm11657_vm0, %v11656_v36 }
 0xd9d   :  { %10465 = vmatpush3.bf16.msra.mxu0 %v11228_v46  ;;  %10485 = vmatpush3.bf16.msra.mxu1 %v11229_v29 }
 0xd9e   :  { %10466 = vmatprep.subr.bf16.mxu0 %v11656_v36  ;;  %10486 = vmatprep.subr.bf16.mxu1 %v11656_v36 }
 0xda1   :  { %10467 = vmatpush3.bf16.msra.mxu0 %v11230_v56  ;;  %10487 = vmatpush3.bf16.msra.mxu1 %v11231_v42 }
 0xda2   :  { %10468 = vmatprep.subr.bf16.mxu0 %v11656_v36  ;;  %10488 = vmatprep.subr.bf16.mxu1 %v11656_v36 }
 0xda5   :  { %10469 = vmatpush3.bf16.msra.mxu0 %v11232_v39  ;;  %10489 = vmatpush3.bf16.msra.mxu1 %v11233_v3 }
 0xda6   :  { %10470 = vmatprep.subr.bf16.mxu0 %v11656_v36  ;;  %10490 = vmatprep.subr.bf16.mxu1 %v11656_v36 }
 0xda9   :  { %10471 = vmatpush3.bf16.msra.mxu0 %v11234_v48  ;;  %10491 = vmatpush3.bf16.msra.mxu1 %v11235_v6 }
 0xdaa   :  { %10472 = vmatprep.subr.bf16.mxu0 %v11656_v36  ;;  %10492 = vmatprep.subr.bf16.mxu1 %v11656_v36 }
 0xdad   :  { %10473 = vmatpush3.bf16.msra.mxu0 %v11236_v27  ;;  %10493 = vmatpush3.bf16.msra.mxu1 %v11237_v43 }
 0xdae   :  { %10474 = vmatprep.subr.bf16.mxu0 %v11656_v36  ;;  %10494 = vmatprep.subr.bf16.mxu1 %v11656_v36 }
 0xdb1   :  { %10475 = vmatpush3.bf16.msra.mxu0 %v11238_v7  ;;  %10495 = vmatpush3.bf16.msra.mxu1 %v11239_v30 }
 0xdb2   :  { %10476 = vmatprep.subr.bf16.mxu0 %v11656_v36  ;;  %10496 = vmatprep.subr.bf16.mxu1 %v11656_v36 }
 0xdb5   :  { %10477 = vmatpush3.bf16.msra.mxu0 %v11240_v11  ;;  %10497 = vmatpush3.bf16.msra.mxu1 %v11241_v63  ;;  %v11244_v11 = vld [vmem:[#allocation5 + $0x108] ss:$16 sps:$4 sm:$0xff]   ;;  %v11245_v63 = vld [vmem:[#allocation5 + $0x10c] ss:$16 sps:$4 sm:$0xff]  }
 0xdb6   :  { %10478 = vmatprep.subr.bf16.mxu0 %v11656_v36  ;;  %10498 = vmatprep.subr.bf16.mxu1 %v11656_v36 }
 0xdb9   :  { %10479 = vmatpush3.bf16.msra.mxu0 %v11242_v59  ;;  %10499 = vmatpush3.bf16.msra.mxu1 %v11243_v25  ;;  %v11247_v25 = vld [vmem:[#allocation5 + $0x12c] ss:$16 sps:$4 sm:$0xff]  }
 0xdba   :  { %10504 = vmatprep.subr.bf16.mxu0 %v11656_v36  ;;  %10524 = vmatprep.subr.bf16.mxu1 %v11656_v36 }
 0xe4e   :  { %v6469_v54 = vpop.f32.mrb[128].mxu0  ;;  %v6582_v14 = vpop.f32.mrb[128].mxu1 }
 0xe4f   :  { %v6475_v12 = vadd.f32 %v6469_v54, %v4447_v16  ;;  %v6588_v1 = vadd.f32 %v6582_v14, %v4445_v49  ;;  %v10402_v55 = vpop.f32.mrb[129].mxu0  ;;  %v10422_v41 = vpop.f32.mrb[129].mxu1  ;;  %v11248_v49 = vld [vmem:[#allocation5 + $0x148] ss:$16 sps:$4 sm:$0xff]   ;;  %v11249_v16 = vld [vmem:[#allocation5 + $0x14c] ss:$16 sps:$4 sm:$0xff]  }
 0xe50   :  { %v6472_v45 = vpop.f32.mrb[130].mxu0  ;;  %v6585_v18 = vpop.f32.mrb[130].mxu1  ;;  %v11250_v54 = vld [vmem:[#allocation5 + $0x168] ss:$16 sps:$4 sm:$0xff]   ;;  %v11251_v14 = vld [vmem:[#allocation5 + $0x16c] ss:$16 sps:$4 sm:$0xff]  }
 0xe51   :  { %v10403_v13 = vpop.f32.mrb[131].mxu0  ;;  %v10423_v19 = vpop.f32.mrb[131].mxu1  ;;  %v8706_v53 = vmul.f32 -1.442695, %v6475_v12  ;;  %v8715_v60 = vmul.f32 -1.442695, %v6588_v1 }
 0xe52   :  { %v11252_v12 = vld [vmem:[#allocation5 + $0x188] ss:$16 sps:$4 sm:$0xff]   ;;  %v11253_v1 = vld [vmem:[#allocation5 + $0x18c] ss:$16 sps:$4 sm:$0xff]  }
 0xe53   :  { %11516 = vpow2.f32 %v8706_v53  ;;  %v11254_v55 = vld [vmem:[#allocation5 + $0x1a8] ss:$16 sps:$4 sm:$0xff]   ;;  %v11255_v41 = vld [vmem:[#allocation5 + $0x1ac] ss:$16 sps:$4 sm:$0xff]   ;;  %v11260_v53 = vld [vmem:[#allocation5 + $0x104] ss:$16 sps:$4 sm:$0xff]  }
 0xe54   :  { %11518 = vpow2.f32 %v8715_v60  ;;  %v11256_v45 = vld [vmem:[#allocation5 + $0x1c8] ss:$16 sps:$4 sm:$0xff]   ;;  %v11257_v18 = vld [vmem:[#allocation5 + $0x1cc] ss:$16 sps:$4 sm:$0xff]   ;;  %v11261_v60 = vld [vmem:[#allocation5 + $0x100] ss:$16 sps:$4 sm:$0xff]  }
 0xe55   :  { %v11258_v13 = vld [vmem:[#allocation5 + $0x1e8] ss:$16 sps:$4 sm:$0xff]   ;;  %v11259_v19 = vld [vmem:[#allocation5 + $0x1ec] ss:$16 sps:$4 sm:$0xff]  }
 0xe5d   :  { %v11517_v28 = vpop.eup %11516 }
 0xe5e   :  { %v11519_v47 = vpop.eup %11518  ;;  %v6479_v10 = vadd.f32 1.0, %v11517_v28  ;;  %v11262_v28 = vld [vmem:[#allocation5 + $0x124] ss:$16 sps:$4 sm:$0xff]  }
 0xe5f   :  { %v6592_v38 = vadd.f32 1.0, %v11519_v47  ;;  %v11263_v47 = vld [vmem:[#allocation5 + $0x120] ss:$16 sps:$4 sm:$0xff]  }
 0xe60   :  { %11520 = vrcp.f32 %v6479_v10  ;;  %v11264_v10 = vld [vmem:[#allocation5 + $0x144] ss:$16 sps:$4 sm:$0xff]  }
 0xe61   :  { %11522 = vrcp.f32 %v6592_v38  ;;  %v11265_v38 = vld [vmem:[#allocation5 + $0x140] ss:$16 sps:$4 sm:$0xff]  }
 0xe6a   :  { %v11521_v42 = vpop.eup %11520 }
 0xe6b   :  { %v11523_v61 = vpop.eup %11522  ;;  %v6482_v2 = vmul.f32 %v11521_v42, %v12660_v9  ;;  %v11246_v9 = vld [vmem:[#allocation5 + $0x128] ss:$16 sps:$4 sm:$0xff]  }
 0xe6e   :  { %v6694_v51 = vpop.f32.mrb[132].mxu0  ;;  %v6803_v31 = vpop.f32.mrb[132].mxu1 }
 0xe6f   :  { %v6700_v15 = vadd.f32 %v6694_v51, %v4518_v44  ;;  %v6809_v40 = vadd.f32 %v6803_v31, %v4520_v26  ;;  %v10442_v32 = vpop.f32.mrb[133].mxu0  ;;  %v10462_v50 = vpop.f32.mrb[133].mxu1  ;;  %v11266_v44 = vld [vmem:[#allocation5 + $0x164] ss:$16 sps:$4 sm:$0xff]   ;;  %v11267_v26 = vld [vmem:[#allocation5 + $0x160] ss:$16 sps:$4 sm:$0xff]  }
 0xe70   :  { %v6697_v62 = vpop.f32.mrb[134].mxu0  ;;  %v6806_v21 = vpop.f32.mrb[134].mxu1  ;;  %v11268_v51 = vld [vmem:[#allocation5 + $0x184] ss:$16 sps:$4 sm:$0xff]   ;;  %v11269_v31 = vld [vmem:[#allocation5 + $0x180] ss:$16 sps:$4 sm:$0xff]  }
 0xe71   :  { %11524 = vtanh.f32 %v6700_v15  ;;  %v8732_v46 = vmul.f32 -1.442695, %v6809_v40  ;;  %v10443_v29 = vpop.f32.mrb[135].mxu0  ;;  %v10463_v56 = vpop.f32.mrb[135].mxu1  ;;  %v11270_v15 = vld [vmem:[#allocation5 + $0x1a4] ss:$16 sps:$4 sm:$0xff]  }
 0xe72   :  { %v11271_v40 = vld [vmem:[#allocation5 + $0x1a0] ss:$16 sps:$4 sm:$0xff]   ;;  %v11272_v32 = vld [vmem:[#allocation5 + $0x1c4] ss:$16 sps:$4 sm:$0xff]   ;;  %v4451_v29 = vadd.f32 %v12411_v24, %v12470_v4  ;;  %v4522_v24 = vadd.f32 %v12409_v5, %v12482_v22 }
 0xe73   :  { %11526 = vpow2.f32 %v8732_v46  ;;  %v11273_v50 = vld [vmem:[#allocation5 + $0x1c0] ss:$16 sps:$4 sm:$0xff]   ;;  %v11274_v62 = vld [vmem:[#allocation5 + $0x1e4] ss:$16 sps:$4 sm:$0xff]   ;;  %v4449_v46 = vadd.f32 %v12407_v8, %v12466_v17 }
 0xe74   :  { %v11275_v21 = vld [vmem:[#allocation5 + $0x1e0] ss:$16 sps:$4 sm:$0xff]  }
 0xe7b   :  { %v11525_v39 = vpop.eup %11524 }
 0xe7c   :  { %v6702_v3 = vmul.f32 %v11525_v39, %v11523_v61 }
 0xe7d   :  { %v11527_v48 = vpop.eup %11526 }
 0xe7e   :  { %v12715_v6 = vadd.f32 %v6702_v3, %v6482_v2  ;;  %v6813_v27 = vadd.f32 1.0, %v11527_v48 }
 0xe80   :  { %11528 = vtanh.f32 %v12715_v6 }
 0xe81   :  { %11530 = vrcp.f32 %v6813_v27 }
 0xe8a   :  { %v11529_v43 = vpop.eup %11528 }
 0xe8b   :  { %v11531_v7 = vpop.eup %11530 }
 0xe8c   :  { %v6817_v30 = vmul.f32 %v11531_v7, %v11529_v43 }
 0xe8e   :  { %8733 = vst [vmem:[%s12875_s8 + $0x20] sm:$0xff] %v6817_v30  ;;  %v6819_v59 = vpack.c.bf16 %v6817_v30, %v6817_v30 }
 0xe90   :  { %10481 = vmatmul.mubr.bf16.vlgmr.msra.gmra.mrb[136].mxu0 %v6819_v59  ;;  %10501 = vmatmul.mubr.bf16.vlgmr.msra.gmra.mrb[136].mxu1 %v6819_v59 }
 0xe91   :  { %10505 = vmatpush3.bf16.msra.mxu0 %v11244_v11  ;;  %10525 = vmatpush3.bf16.msra.mxu1 %v11245_v63 }
 0xe92   :  { %10506 = vmatprep.subr.bf16.mxu0 %v11656_v36  ;;  %10526 = vmatprep.subr.bf16.mxu1 %v11656_v36 }
 0xe93   :  { %10520 = vmatprep.mubr.msk.bf16.mxu0 %vm11657_vm0, %v11656_v36  ;;  %10540 = vmatprep.mubr.msk.bf16.mxu1 %vm11657_vm0, %v11656_v36 }
 0xe95   :  { %10507 = vmatpush3.bf16.msra.mxu0 %v11246_v9  ;;  %10527 = vmatpush3.bf16.msra.mxu1 %v11247_v25  ;;  %v4524_v25 = vadd.f32 %v12413_v20, %v12486_v23 }
 0xe96   :  { %10508 = vmatprep.subr.bf16.mxu0 %v11656_v36  ;;  %10528 = vmatprep.subr.bf16.mxu1 %v11656_v36 }
 0xe99   :  { %10509 = vmatpush3.bf16.msra.mxu0 %v11248_v49  ;;  %10529 = vmatpush3.bf16.msra.mxu1 %v11249_v16 }
 0xe9a   :  { %10510 = vmatprep.subr.bf16.mxu0 %v11656_v36  ;;  %10530 = vmatprep.subr.bf16.mxu1 %v11656_v36 }
 0xe9d   :  { %10511 = vmatpush3.bf16.msra.mxu0 %v11250_v54  ;;  %10531 = vmatpush3.bf16.msra.mxu1 %v11251_v14 }
 0xe9e   :  { %10512 = vmatprep.subr.bf16.mxu0 %v11656_v36  ;;  %10532 = vmatprep.subr.bf16.mxu1 %v11656_v36 }
 0xea1   :  { %10513 = vmatpush3.bf16.msra.mxu0 %v11252_v12  ;;  %10533 = vmatpush3.bf16.msra.mxu1 %v11253_v1 }
 0xea2   :  { %10514 = vmatprep.subr.bf16.mxu0 %v11656_v36  ;;  %10534 = vmatprep.subr.bf16.mxu1 %v11656_v36 }
 0xea5   :  { %10515 = vmatpush3.bf16.msra.mxu0 %v11254_v55  ;;  %10535 = vmatpush3.bf16.msra.mxu1 %v11255_v41 }
 0xea6   :  { %10516 = vmatprep.subr.bf16.mxu0 %v11656_v36  ;;  %10536 = vmatprep.subr.bf16.mxu1 %v11656_v36 }
 0xea9   :  { %10517 = vmatpush3.bf16.msra.mxu0 %v11256_v45  ;;  %10537 = vmatpush3.bf16.msra.mxu1 %v11257_v18 }
 0xeaa   :  { %10518 = vmatprep.subr.bf16.mxu0 %v11656_v36  ;;  %10538 = vmatprep.subr.bf16.mxu1 %v11656_v36 }
 0xead   :  { %10519 = vmatpush3.bf16.msra.mxu0 %v11258_v13  ;;  %10539 = vmatpush3.bf16.msra.mxu1 %v11259_v19 }
 0xeae   :  { %10544 = vmatprep.subr.bf16.mxu0 %v11656_v36  ;;  %10564 = vmatprep.subr.bf16.mxu1 %v11656_v36 }
 0xeb0   :  { %10521 = vmatmul.mubr.bf16.vlgmr.msra.gmra.mrb[140].mxu0 %v6819_v59  ;;  %10541 = vmatmul.mubr.bf16.vlgmr.msra.gmra.mrb[140].mxu1 %v6819_v59 }
 0xeb1   :  { %10560 = vmatprep.mubr.msk.bf16.mxu0 %vm11657_vm0, %v11656_v36  ;;  %10580 = vmatprep.mubr.msk.bf16.mxu1 %vm11657_vm0, %v11656_v36 }
 0xeb2   :  { %10545 = vmatpush3.bf16.msra.mxu0 %v11260_v53  ;;  %10565 = vmatpush3.bf16.msra.mxu1 %v11261_v60 }
 0xeb3   :  { %10546 = vmatprep.subr.bf16.mxu0 %v11656_v36  ;;  %10566 = vmatprep.subr.bf16.mxu1 %v11656_v36 }
 0xeb6   :  { %10547 = vmatpush3.bf16.msra.mxu0 %v11262_v28  ;;  %10567 = vmatpush3.bf16.msra.mxu1 %v11263_v47 }
 0xeb7   :  { %10548 = vmatprep.subr.bf16.mxu0 %v11656_v36  ;;  %10568 = vmatprep.subr.bf16.mxu1 %v11656_v36 }
 0xeba   :  { %10549 = vmatpush3.bf16.msra.mxu0 %v11264_v10  ;;  %10569 = vmatpush3.bf16.msra.mxu1 %v11265_v38 }
 0xebb   :  { %10550 = vmatprep.subr.bf16.mxu0 %v11656_v36  ;;  %10570 = vmatprep.subr.bf16.mxu1 %v11656_v36 }
 0xebe   :  { %10551 = vmatpush3.bf16.msra.mxu0 %v11266_v44  ;;  %10571 = vmatpush3.bf16.msra.mxu1 %v11267_v26 }
 0xebf   :  { %10552 = vmatprep.subr.bf16.mxu0 %v11656_v36  ;;  %10572 = vmatprep.subr.bf16.mxu1 %v11656_v36 }
 0xec2   :  { %10553 = vmatpush3.bf16.msra.mxu0 %v11268_v51  ;;  %10573 = vmatpush3.bf16.msra.mxu1 %v11269_v31  ;;  %v11276_v51 = vld [vmem:[#allocation5 + $0x108] ss:$16 sps:$4 sm:$0xff]   ;;  %v11277_v31 = vld [vmem:[#allocation5 + $0x10c] ss:$16 sps:$4 sm:$0xff]  }
 0xec3   :  { %10554 = vmatprep.subr.bf16.mxu0 %v11656_v36  ;;  %10574 = vmatprep.subr.bf16.mxu1 %v11656_v36 }
 0xec6   :  { %10555 = vmatpush3.bf16.msra.mxu0 %v11270_v15  ;;  %10575 = vmatpush3.bf16.msra.mxu1 %v11271_v40  ;;  %v11279_v40 = vld [vmem:[#allocation5 + $0x12c] ss:$16 sps:$4 sm:$0xff]  }
 0xec7   :  { %10556 = vmatprep.subr.bf16.mxu0 %v11656_v36  ;;  %10576 = vmatprep.subr.bf16.mxu1 %v11656_v36 }
 0xeca   :  { %10557 = vmatpush3.bf16.msra.mxu0 %v11272_v32  ;;  %10577 = vmatpush3.bf16.msra.mxu1 %v11273_v50  ;;  %v11280_v32 = vld [vmem:[#allocation5 + $0x148] ss:$16 sps:$4 sm:$0xff]   ;;  %v11281_v50 = vld [vmem:[#allocation5 + $0x14c] ss:$16 sps:$4 sm:$0xff]  }
 0xecb   :  { %10558 = vmatprep.subr.bf16.mxu0 %v11656_v36  ;;  %10578 = vmatprep.subr.bf16.mxu1 %v11656_v36 }
 0xece   :  { %10559 = vmatpush3.bf16.msra.mxu0 %v11274_v62  ;;  %10579 = vmatpush3.bf16.msra.mxu1 %v11275_v21  ;;  %v11282_v62 = vld [vmem:[#allocation5 + $0x168] ss:$16 sps:$4 sm:$0xff]   ;;  %v11283_v21 = vld [vmem:[#allocation5 + $0x16c] ss:$16 sps:$4 sm:$0xff]  }
 0xecf   :  { %10584 = vmatprep.subr.bf16.mxu0 %v11656_v36  ;;  %10604 = vmatprep.subr.bf16.mxu1 %v11656_v36 }
 0xf63   :  { %v6919_v56 = vpop.f32.mrb[136].mxu0  ;;  %v7032_v42 = vpop.f32.mrb[136].mxu1 }
 0xf64   :  { %v6925_v61 = vadd.f32 %v6919_v56, %v4451_v29  ;;  %v7038_v39 = vadd.f32 %v7032_v42, %v4449_v46  ;;  %v10482_v2 = vpop.f32.mrb[137].mxu0  ;;  %v10502_v3 = vpop.f32.mrb[137].mxu1  ;;  %v11284_v46 = vld [vmem:[#allocation5 + $0x188] ss:$16 sps:$4 sm:$0xff]   ;;  %v11285_v29 = vld [vmem:[#allocation5 + $0x18c] ss:$16 sps:$4 sm:$0xff]  }
 0xf65   :  { %v6922_v48 = vpop.f32.mrb[138].mxu0  ;;  %v7035_v27 = vpop.f32.mrb[138].mxu1  ;;  %v11286_v56 = vld [vmem:[#allocation5 + $0x1a8] ss:$16 sps:$4 sm:$0xff]   ;;  %v11287_v42 = vld [vmem:[#allocation5 + $0x1ac] ss:$16 sps:$4 sm:$0xff]  }
 0xf66   :  { %v10483_v43 = vpop.f32.mrb[139].mxu0  ;;  %v10503_v7 = vpop.f32.mrb[139].mxu1  ;;  %v8742_v30 = vmul.f32 -1.442695, %v6925_v61  ;;  %v8751_v11 = vmul.f32 -1.442695, %v7038_v39 }
 0xf67   :  { %v11288_v61 = vld [vmem:[#allocation5 + $0x1c8] ss:$16 sps:$4 sm:$0xff]   ;;  %v11289_v39 = vld [vmem:[#allocation5 + $0x1cc] ss:$16 sps:$4 sm:$0xff]   ;;  %v11292_v48 = vld [vmem:[#allocation5 + $0x104] ss:$16 sps:$4 sm:$0xff]  }
 0xf68   :  { %11532 = vpow2.f32 %v8742_v30  ;;  %v11290_v2 = vld [vmem:[#allocation5 + $0x1e8] ss:$16 sps:$4 sm:$0xff]   ;;  %v11291_v3 = vld [vmem:[#allocation5 + $0x1ec] ss:$16 sps:$4 sm:$0xff]   ;;  %v11293_v27 = vld [vmem:[#allocation5 + $0x100] ss:$16 sps:$4 sm:$0xff]  }
 0xf69   :  { %11534 = vpow2.f32 %v8751_v11  ;;  %v11294_v43 = vld [vmem:[#allocation5 + $0x124] ss:$16 sps:$4 sm:$0xff]   ;;  %v11295_v7 = vld [vmem:[#allocation5 + $0x120] ss:$16 sps:$4 sm:$0xff]  }
 0xf6a   :  { %v11296_v30 = vld [vmem:[#allocation5 + $0x144] ss:$16 sps:$4 sm:$0xff]   ;;  %v11297_v11 = vld [vmem:[#allocation5 + $0x140] ss:$16 sps:$4 sm:$0xff]  }
 0xf72   :  { %v11533_v63 = vpop.eup %11532 }
 0xf73   :  { %v11535_v59 = vpop.eup %11534  ;;  %v6929_v8 = vadd.f32 1.0, %v11533_v63  ;;  %v11298_v63 = vld [vmem:[#allocation5 + $0x164] ss:$16 sps:$4 sm:$0xff]  }
 0xf74   :  { %v7042_v9 = vadd.f32 1.0, %v11535_v59  ;;  %v11299_v59 = vld [vmem:[#allocation5 + $0x160] ss:$16 sps:$4 sm:$0xff]  }
 0xf75   :  { %11536 = vrcp.f32 %v6929_v8  ;;  %v11300_v8 = vld [vmem:[#allocation5 + $0x184] ss:$16 sps:$4 sm:$0xff]  }
 0xf76   :  { %11538 = vrcp.f32 %v7042_v9  ;;  %v11301_v9 = vld [vmem:[#allocation5 + $0x180] ss:$16 sps:$4 sm:$0xff]  }
 0xf7f   :  { %v11537_v19 = vpop.eup %11536 }
 0xf80   :  { %v11539_v5 = vpop.eup %11538  ;;  %v6932_v20 = vmul.f32 %v11537_v19, %v12715_v6  ;;  %v11278_v6 = vld [vmem:[#allocation5 + $0x128] ss:$16 sps:$4 sm:$0xff]  }
 0xf83   :  { %v7144_v49 = vpop.f32.mrb[140].mxu0  ;;  %v7253_v16 = vpop.f32.mrb[140].mxu1 }
 0xf84   :  { %v7150_v54 = vadd.f32 %v7144_v49, %v4522_v24  ;;  %v7259_v14 = vadd.f32 %v7253_v16, %v4524_v25  ;;  %v10522_v12 = vpop.f32.mrb[141].mxu0  ;;  %v10542_v1 = vpop.f32.mrb[141].mxu1  ;;  %v11302_v24 = vld [vmem:[#allocation5 + $0x1a4] ss:$16 sps:$4 sm:$0xff]   ;;  %v11303_v25 = vld [vmem:[#allocation5 + $0x1a0] ss:$16 sps:$4 sm:$0xff]  }
 0xf85   :  { %v7147_v55 = vpop.f32.mrb[142].mxu0  ;;  %v7256_v41 = vpop.f32.mrb[142].mxu1  ;;  %v11304_v49 = vld [vmem:[#allocation5 + $0x1c4] ss:$16 sps:$4 sm:$0xff]   ;;  %v11305_v16 = vld [vmem:[#allocation5 + $0x1c0] ss:$16 sps:$4 sm:$0xff]   ;;  %v4455_v12 = vadd.f32 %v12452_v0, %v12466_v17  ;;  %v4457_v1 = vadd.f32 %v12456_v37, %v12470_v4  ;;  %v4528_v37 = vadd.f32 %v12454_v34, %v12482_v22 }
 0xf86   :  { %11540 = vtanh.f32 %v7150_v54  ;;  %v8768_v45 = vmul.f32 -1.442695, %v7259_v14  ;;  %v10523_v18 = vpop.f32.mrb[143].mxu0  ;;  %v10543_v13 = vpop.f32.mrb[143].mxu1  ;;  %v11306_v54 = vld [vmem:[#allocation5 + $0x1e4] ss:$16 sps:$4 sm:$0xff]  }
 0xf87   :  { %v11307_v14 = vld [vmem:[#allocation5 + $0x1e0] ss:$16 sps:$4 sm:$0xff]  }
 0xf88   :  { %11542 = vpow2.f32 %v8768_v45 }
 0xf90   :  { %v11541_v53 = vpop.eup %11540 }
 0xf91   :  { %v7152_v60 = vmul.f32 %v11541_v53, %v11539_v5 }
 0xf92   :  { %v11543_v28 = vpop.eup %11542 }
 0xf93   :  { %v12770_v47 = vadd.f32 %v7152_v60, %v6932_v20  ;;  %v7263_v10 = vadd.f32 1.0, %v11543_v28 }
 0xf95   :  { %11544 = vtanh.f32 %v12770_v47 }
 0xf96   :  { %11546 = vrcp.f32 %v7263_v10 }
 0xf9f   :  { %v11545_v38 = vpop.eup %11544 }
 0xfa0   :  { %v11547_v44 = vpop.eup %11546 }
 0xfa1   :  { %v7267_v26 = vmul.f32 %v11547_v44, %v11545_v38 }
 0xfa3   :  { %8769 = vst [vmem:[%s12875_s8 + $0x28] sm:$0xff] %v7267_v26  ;;  %v7269_v15 = vpack.c.bf16 %v7267_v26, %v7267_v26 }
 0xfa5   :  { %10561 = vmatmul.mubr.bf16.vlgmr.msra.gmra.mrb[144].mxu0 %v7269_v15  ;;  %10581 = vmatmul.mubr.bf16.vlgmr.msra.gmra.mrb[144].mxu1 %v7269_v15 }
 0xfa6   :  { %10585 = vmatpush3.bf16.msra.mxu0 %v11276_v51  ;;  %10605 = vmatpush3.bf16.msra.mxu1 %v11277_v31  ;;  %v4530_v51 = vadd.f32 %v12458_v52, %v12486_v23 }
 0xfa7   :  { %10586 = vmatprep.subr.bf16.mxu0 %v11656_v36  ;;  %10606 = vmatprep.subr.bf16.mxu1 %v11656_v36 }
 0xfa8   :  { %10600 = vmatprep.mubr.msk.bf16.mxu0 %vm11657_vm0, %v11656_v36  ;;  %10620 = vmatprep.mubr.msk.bf16.mxu1 %vm11657_vm0, %v11656_v36 }
 0xfaa   :  { %10587 = vmatpush3.bf16.msra.mxu0 %v11278_v6  ;;  %10607 = vmatpush3.bf16.msra.mxu1 %v11279_v40 }
 0xfab   :  { %10588 = vmatprep.subr.bf16.mxu0 %v11656_v36  ;;  %10608 = vmatprep.subr.bf16.mxu1 %v11656_v36 }
 0xfae   :  { %10589 = vmatpush3.bf16.msra.mxu0 %v11280_v32  ;;  %10609 = vmatpush3.bf16.msra.mxu1 %v11281_v50 }
 0xfaf   :  { %10590 = vmatprep.subr.bf16.mxu0 %v11656_v36  ;;  %10610 = vmatprep.subr.bf16.mxu1 %v11656_v36 }
 0xfb2   :  { %10591 = vmatpush3.bf16.msra.mxu0 %v11282_v62  ;;  %10611 = vmatpush3.bf16.msra.mxu1 %v11283_v21 }
 0xfb3   :  { %10592 = vmatprep.subr.bf16.mxu0 %v11656_v36  ;;  %10612 = vmatprep.subr.bf16.mxu1 %v11656_v36 }
 0xfb6   :  { %10593 = vmatpush3.bf16.msra.mxu0 %v11284_v46  ;;  %10613 = vmatpush3.bf16.msra.mxu1 %v11285_v29 }
 0xfb7   :  { %10594 = vmatprep.subr.bf16.mxu0 %v11656_v36  ;;  %10614 = vmatprep.subr.bf16.mxu1 %v11656_v36 }
 0xfba   :  { %10595 = vmatpush3.bf16.msra.mxu0 %v11286_v56  ;;  %10615 = vmatpush3.bf16.msra.mxu1 %v11287_v42 }
 0xfbb   :  { %10596 = vmatprep.subr.bf16.mxu0 %v11656_v36  ;;  %10616 = vmatprep.subr.bf16.mxu1 %v11656_v36 }
 0xfbe   :  { %10597 = vmatpush3.bf16.msra.mxu0 %v11288_v61  ;;  %10617 = vmatpush3.bf16.msra.mxu1 %v11289_v39 }
 0xfbf   :  { %10598 = vmatprep.subr.bf16.mxu0 %v11656_v36  ;;  %10618 = vmatprep.subr.bf16.mxu1 %v11656_v36 }
 0xfc2   :  { %10599 = vmatpush3.bf16.msra.mxu0 %v11290_v2  ;;  %10619 = vmatpush3.bf16.msra.mxu1 %v11291_v3 }
 0xfc3   :  { %10624 = vmatprep.subr.bf16.mxu0 %v11656_v36  ;;  %10644 = vmatprep.subr.bf16.mxu1 %v11656_v36 }
 0xfc5   :  { %10601 = vmatmul.mubr.bf16.vlgmr.msra.gmra.mrb[148].mxu0 %v7269_v15  ;;  %10621 = vmatmul.mubr.bf16.vlgmr.msra.gmra.mrb[148].mxu1 %v7269_v15 }
 0xfc6   :  { %10640 = vmatprep.mubr.msk.bf16.mxu0 %vm11657_vm0, %v11656_v36  ;;  %10660 = vmatprep.mubr.msk.bf16.mxu1 %vm11657_vm0, %v11656_v36 }
 0xfc7   :  { %10625 = vmatpush3.bf16.msra.mxu0 %v11292_v48  ;;  %10645 = vmatpush3.bf16.msra.mxu1 %v11293_v27 }
 0xfc8   :  { %10626 = vmatprep.subr.bf16.mxu0 %v11656_v36  ;;  %10646 = vmatprep.subr.bf16.mxu1 %v11656_v36 }
 0xfcb   :  { %10627 = vmatpush3.bf16.msra.mxu0 %v11294_v43  ;;  %10647 = vmatpush3.bf16.msra.mxu1 %v11295_v7 }
 0xfcc   :  { %10628 = vmatprep.subr.bf16.mxu0 %v11656_v36  ;;  %10648 = vmatprep.subr.bf16.mxu1 %v11656_v36 }
 0xfcf   :  { %10629 = vmatpush3.bf16.msra.mxu0 %v11296_v30  ;;  %10649 = vmatpush3.bf16.msra.mxu1 %v11297_v11  ;;  %v11308_v30 = vld [vmem:[#allocation5 + $0x108] ss:$16 sps:$4 sm:$0xff]   ;;  %v11309_v11 = vld [vmem:[#allocation5 + $0x10c] ss:$16 sps:$4 sm:$0xff]  }
 0xfd0   :  { %10630 = vmatprep.subr.bf16.mxu0 %v11656_v36  ;;  %10650 = vmatprep.subr.bf16.mxu1 %v11656_v36 }
 0xfd3   :  { %10631 = vmatpush3.bf16.msra.mxu0 %v11298_v63  ;;  %10651 = vmatpush3.bf16.msra.mxu1 %v11299_v59  ;;  %v11311_v59 = vld [vmem:[#allocation5 + $0x12c] ss:$16 sps:$4 sm:$0xff]  }
 0xfd4   :  { %10632 = vmatprep.subr.bf16.mxu0 %v11656_v36  ;;  %10652 = vmatprep.subr.bf16.mxu1 %v11656_v36 }
 0xfd7   :  { %10633 = vmatpush3.bf16.msra.mxu0 %v11300_v8  ;;  %10653 = vmatpush3.bf16.msra.mxu1 %v11301_v9  ;;  %v11312_v8 = vld [vmem:[#allocation5 + $0x148] ss:$16 sps:$4 sm:$0xff]   ;;  %v11313_v9 = vld [vmem:[#allocation5 + $0x14c] ss:$16 sps:$4 sm:$0xff]  }
 0xfd8   :  { %10634 = vmatprep.subr.bf16.mxu0 %v11656_v36  ;;  %10654 = vmatprep.subr.bf16.mxu1 %v11656_v36 }
 0xfdb   :  { %10635 = vmatpush3.bf16.msra.mxu0 %v11302_v24  ;;  %10655 = vmatpush3.bf16.msra.mxu1 %v11303_v25  ;;  %v11314_v24 = vld [vmem:[#allocation5 + $0x168] ss:$16 sps:$4 sm:$0xff]   ;;  %v11315_v25 = vld [vmem:[#allocation5 + $0x16c] ss:$16 sps:$4 sm:$0xff]  }
 0xfdc   :  { %10636 = vmatprep.subr.bf16.mxu0 %v11656_v36  ;;  %10656 = vmatprep.subr.bf16.mxu1 %v11656_v36 }
 0xfdf   :  { %10637 = vmatpush3.bf16.msra.mxu0 %v11304_v49  ;;  %10657 = vmatpush3.bf16.msra.mxu1 %v11305_v16  ;;  %v11316_v49 = vld [vmem:[#allocation5 + $0x188] ss:$16 sps:$4 sm:$0xff]   ;;  %v11317_v16 = vld [vmem:[#allocation5 + $0x18c] ss:$16 sps:$4 sm:$0xff]  }
 0xfe0   :  { %10638 = vmatprep.subr.bf16.mxu0 %v11656_v36  ;;  %10658 = vmatprep.subr.bf16.mxu1 %v11656_v36 }
 0xfe3   :  { %10639 = vmatpush3.bf16.msra.mxu0 %v11306_v54  ;;  %10659 = vmatpush3.bf16.msra.mxu1 %v11307_v14  ;;  %v11318_v54 = vld [vmem:[#allocation5 + $0x1a8] ss:$16 sps:$4 sm:$0xff]   ;;  %v11319_v14 = vld [vmem:[#allocation5 + $0x1ac] ss:$16 sps:$4 sm:$0xff]  }
 0xfe4   :  { %10664 = vmatprep.subr.bf16.mxu0 %v11656_v36  ;;  %10684 = vmatprep.subr.bf16.mxu1 %v11656_v36 }
0x1078   :  { %v7369_v55 = vpop.f32.mrb[144].mxu0  ;;  %v7482_v41 = vpop.f32.mrb[144].mxu1 }
0x1079   :  { %v7375_v45 = vadd.f32 %v7369_v55, %v4457_v1  ;;  %v7488_v18 = vadd.f32 %v7482_v41, %v4455_v12  ;;  %v10562_v13 = vpop.f32.mrb[145].mxu0  ;;  %v10582_v19 = vpop.f32.mrb[145].mxu1  ;;  %v11320_v12 = vld [vmem:[#allocation5 + $0x1c8] ss:$16 sps:$4 sm:$0xff]   ;;  %v11321_v1 = vld [vmem:[#allocation5 + $0x1cc] ss:$16 sps:$4 sm:$0xff]  }
0x107a   :  { %v7372_v5 = vpop.f32.mrb[146].mxu0  ;;  %v7485_v53 = vpop.f32.mrb[146].mxu1  ;;  %v11322_v55 = vld [vmem:[#allocation5 + $0x1e8] ss:$16 sps:$4 sm:$0xff]   ;;  %v11323_v41 = vld [vmem:[#allocation5 + $0x1ec] ss:$16 sps:$4 sm:$0xff]  }
0x107b   :  { %v10563_v20 = vpop.f32.mrb[147].mxu0  ;;  %v10583_v60 = vpop.f32.mrb[147].mxu1  ;;  %v8778_v28 = vmul.f32 -1.442695, %v7375_v45  ;;  %v8787_v10 = vmul.f32 -1.442695, %v7488_v18  ;;  %v4459_v45 = vadd.f32 %v12460_v57, %v12466_v17  ;;  %v4461_v18 = vadd.f32 %v12472_v33, %v12470_v4 }
0x107c   :  { %v4532_v4 = vadd.f32 %v12462_v58, %v12482_v22  ;;  %v4534_v33 = vadd.f32 %v12474_v35, %v12486_v23 }
0x107d   :  { %11548 = vpow2.f32 %v8778_v28 }
0x107e   :  { %11550 = vpow2.f32 %v8787_v10 }
0x1087   :  { %v11549_v38 = vpop.eup %11548 }
0x1088   :  { %v11551_v44 = vpop.eup %11550  ;;  %v7379_v0 = vadd.f32 1.0, %v11549_v38 }
0x1089   :  { %v7492_v26 = vadd.f32 1.0, %v11551_v44 }
0x108a   :  { %11552 = vrcp.f32 %v7379_v0 }
0x108b   :  { %11554 = vrcp.f32 %v7492_v26 }
0x1094   :  { %v11553_v42 = vpop.eup %11552 }
0x1095   :  { %v11555_v34 = vpop.eup %11554  ;;  %v7382_v52 = vmul.f32 %v11553_v42, %v12770_v47  ;;  %v11310_v47 = vld [vmem:[#allocation5 + $0x128] ss:$16 sps:$4 sm:$0xff]  }
0x1098   :  { %v7594_v31 = vpop.f32.mrb[148].mxu0  ;;  %v7703_v15 = vpop.f32.mrb[148].mxu1 }
0x1099   :  { %v7600_v6 = vadd.f32 %v7594_v31, %v4528_v37  ;;  %v7709_v40 = vadd.f32 %v7703_v15, %v4530_v51  ;;  %v10602_v32 = vpop.f32.mrb[149].mxu0  ;;  %v10622_v50 = vpop.f32.mrb[149].mxu1 }
0x109a   :  { %v7597_v62 = vpop.f32.mrb[150].mxu0  ;;  %v7706_v21 = vpop.f32.mrb[150].mxu1 }
0x109b   :  { %11556 = vtanh.f32 %v7600_v6  ;;  %v8804_v46 = vmul.f32 -1.442695, %v7709_v40  ;;  %v10603_v29 = vpop.f32.mrb[151].mxu0  ;;  %v10623_v56 = vpop.f32.mrb[151].mxu1 }
0x109d   :  { %11558 = vpow2.f32 %v8804_v46 }
0x10a5   :  { %v11557_v61 = vpop.eup %11556 }
0x10a6   :  { %v7602_v39 = vmul.f32 %v11557_v61, %v11555_v34 }
0x10a7   :  { %v11559_v2 = vpop.eup %11558 }
0x10a8   :  { %v12825_v3 = vadd.f32 %v7602_v39, %v7382_v52  ;;  %v7713_v48 = vadd.f32 1.0, %v11559_v2 }
0x10aa   :  { %11560 = vtanh.f32 %v12825_v3 }
0x10ab   :  { %11562 = vrcp.f32 %v7713_v48 }
0x10b4   :  { %v11561_v27 = vpop.eup %11560 }
0x10b5   :  { %v11563_v43 = vpop.eup %11562 }
0x10b6   :  { %v7717_v7 = vmul.f32 %v11563_v43, %v11561_v27 }
0x10b8   :  { %8805 = vst [vmem:[%s12875_s8 + $0x30] sm:$0xff] %v7717_v7  ;;  %v7719_v63 = vpack.c.bf16 %v7717_v7, %v7717_v7 }
0x10ba   :  { %10641 = vmatmul.mubr.bf16.vlgmr.msra.gmra.mrb[152].mxu0 %v7719_v63  ;;  %10661 = vmatmul.mubr.bf16.vlgmr.msra.gmra.mrb[152].mxu1 %v7719_v63 }
0x10bb   :  { %10665 = vmatpush3.bf16.msra.mxu0 %v11308_v30  ;;  %10685 = vmatpush3.bf16.msra.mxu1 %v11309_v11 }
0x10bc   :  { %10666 = vmatprep.subr.bf16.mxu0 %v11656_v36  ;;  %10686 = vmatprep.subr.bf16.mxu1 %v11656_v36 }
0x10bd   :  { %10680 = vmatprep.mubr.msk.bf16.mxu0 %vm11657_vm0, %v11656_v36  ;;  %10700 = vmatprep.mubr.msk.bf16.mxu1 %vm11657_vm0, %v11656_v36 }
0x10bf   :  { %10667 = vmatpush3.bf16.msra.mxu0 %v11310_v47  ;;  %10687 = vmatpush3.bf16.msra.mxu1 %v11311_v59 }
0x10c0   :  { %10668 = vmatprep.subr.bf16.mxu0 %v11656_v36  ;;  %10688 = vmatprep.subr.bf16.mxu1 %v11656_v36 }
0x10c3   :  { %10669 = vmatpush3.bf16.msra.mxu0 %v11312_v8  ;;  %10689 = vmatpush3.bf16.msra.mxu1 %v11313_v9 }
0x10c4   :  { %10670 = vmatprep.subr.bf16.mxu0 %v11656_v36  ;;  %10690 = vmatprep.subr.bf16.mxu1 %v11656_v36 }
0x10c7   :  { %10671 = vmatpush3.bf16.msra.mxu0 %v11314_v24  ;;  %10691 = vmatpush3.bf16.msra.mxu1 %v11315_v25 }
0x10c8   :  { %10672 = vmatprep.subr.bf16.mxu0 %v11656_v36  ;;  %10692 = vmatprep.subr.bf16.mxu1 %v11656_v36 }
0x10cb   :  { %10673 = vmatpush3.bf16.msra.mxu0 %v11316_v49  ;;  %10693 = vmatpush3.bf16.msra.mxu1 %v11317_v16 }
0x10cc   :  { %10674 = vmatprep.subr.bf16.mxu0 %v11656_v36  ;;  %10694 = vmatprep.subr.bf16.mxu1 %v11656_v36 }
0x10cf   :  { %10675 = vmatpush3.bf16.msra.mxu0 %v11318_v54  ;;  %10695 = vmatpush3.bf16.msra.mxu1 %v11319_v14 }
0x10d0   :  { %10676 = vmatprep.subr.bf16.mxu0 %v11656_v36  ;;  %10696 = vmatprep.subr.bf16.mxu1 %v11656_v36 }
0x10d3   :  { %10677 = vmatpush3.bf16.msra.mxu0 %v11320_v12  ;;  %10697 = vmatpush3.bf16.msra.mxu1 %v11321_v1 }
0x10d4   :  { %10678 = vmatprep.subr.bf16.mxu0 %v11656_v36  ;;  %10698 = vmatprep.subr.bf16.mxu1 %v11656_v36 }
0x10d7   :  { %10679 = vmatpush3.bf16.msra.mxu0 %v11322_v55  ;;  %10699 = vmatpush3.bf16.msra.mxu1 %v11323_v41 }
0x10da   :  { %10681 = vmatmul.mubr.bf16.vlgmr.msra.gmra.mrb[156].mxu0 %v7719_v63  ;;  %10701 = vmatmul.mubr.bf16.vlgmr.msra.gmra.mrb[156].mxu1 %v7719_v63 }
0x118d   :  { %v7819_v13 = vpop.f32.mrb[152].mxu0  ;;  %v7932_v19 = vpop.f32.mrb[152].mxu1 }
0x118e   :  { %v7825_v5 = vadd.f32 %v7819_v13, %v4461_v18  ;;  %v7938_v53 = vadd.f32 %v7932_v19, %v4459_v45  ;;  %v10642_v20 = vpop.f32.mrb[153].mxu0  ;;  %v10662_v60 = vpop.f32.mrb[153].mxu1 }
0x118f   :  { %v7822_v28 = vpop.f32.mrb[154].mxu0  ;;  %v7935_v10 = vpop.f32.mrb[154].mxu1 }
0x1190   :  { %v10643_v38 = vpop.f32.mrb[155].mxu0  ;;  %v10663_v36 = vpop.f32.mrb[155].mxu1  ;;  %v8814_v44 = vmul.f32 -1.442695, %v7825_v5  ;;  %v8823_v0 = vmul.f32 -1.442695, %v7938_v53 }
0x1192   :  { %11564 = vpow2.f32 %v8814_v44 }
0x1193   :  { %11566 = vpow2.f32 %v8823_v0 }
0x119c   :  { %v11565_v26 = vpop.eup %11564 }
0x119d   :  { %v11567_v37 = vpop.eup %11566  ;;  %v7829_v57 = vadd.f32 1.0, %v11565_v26 }
0x119e   :  { %v7942_v17 = vadd.f32 1.0, %v11567_v37 }
0x119f   :  { %11568 = vrcp.f32 %v7829_v57 }
0x11a0   :  { %11570 = vrcp.f32 %v7942_v17 }
0x11a9   :  { %v11569_v56 = vpop.eup %11568 }
0x11aa   :  { %v11571_v58 = vpop.eup %11570  ;;  %v7832_v35 = vmul.f32 %v11569_v56, %v12825_v3 }
0x11ad   :  { %v8044_v51 = vpop.f32.mrb[156].mxu0  ;;  %v8153_v31 = vpop.f32.mrb[156].mxu1 }
0x11ae   :  { %v8050_v15 = vadd.f32 %v8044_v51, %v4532_v4  ;;  %v8159_v6 = vadd.f32 %v8153_v31, %v4534_v33  ;;  %v10682_v40 = vpop.f32.mrb[157].mxu0  ;;  %v10702_v32 = vpop.f32.mrb[157].mxu1 }
0x11af   :  { %v8047_v50 = vpop.f32.mrb[158].mxu0  ;;  %v8156_v62 = vpop.f32.mrb[158].mxu1 }
0x11b0   :  { %11572 = vtanh.f32 %v8050_v15  ;;  %v8840_v21 = vmul.f32 -1.442695, %v8159_v6  ;;  %v10683_v46 = vpop.f32.mrb[159].mxu0  ;;  %v10703_v29 = vpop.f32.mrb[159].mxu1 }
0x11b2   :  { %11574 = vpow2.f32 %v8840_v21 }
0x11ba   :  { %v11573_v22 = vpop.eup %11572 }
0x11bb   :  { %v8052_v23 = vmul.f32 %v11573_v22, %v11571_v58 }
0x11bc   :  { %v11575_v42 = vpop.eup %11574 }
0x11bd   :  { %v8053_v34 = vadd.f32 %v8052_v23, %v7832_v35  ;;  %v8163_v61 = vadd.f32 1.0, %v11575_v42 }
0x11bf   :  { %11576 = vtanh.f32 %v8053_v34  ;;  %8843 = vst [vmem:[%s12877_s10 + $0x8] sm:$0xff] %v8053_v34 }
0x11c0   :  { %11578 = vrcp.f32 %v8163_v61 }
0x11c9   :  { %v11577_v52 = vpop.eup %11576 }
0x11ca   :  { %v11579_v39 = vpop.eup %11578 }
0x11cb   :  { %v8167_v2 = vmul.f32 %v11579_v39, %v11577_v52 }
0x11cd   :  { %8841 = vst [vmem:[%s12875_s8 + $0x38] sm:$0xff] %v8167_v2  ;;  %8842 = vst [vmem:[%s12876_s9 + $0x8] sm:$0xff] %v8167_v2 }
0x11ce   :  { %8185 = vsyncpa [#allocation4], 1 }
0x11cf   :  { %8186 = vsyncpa [#allocation6], 1 }

</bundles_post_ra>
